<compile_context>
chip_gen: v7x
topology: tpu7x:2x2x1
jax: 0.10.0
libtpu: 0.0.40
codegen_flags: <defaults>
</compile_context>

<pallas_src>
import math
import numpy as np

import jax
import jax.numpy as jnp
from jax import lax
from jax.experimental import pallas as pl
from jax.experimental.pallas import tpu as pltpu

EPS = 1e-5


def _round_up(x, m):
    return ((x + m - 1) // m) * m


def _cdiv(a, b):
    return (a + b - 1) // b


# ----------------------------------------------------------------------------
# Kernel 1: conv1 -> Res2Net branch chain -> conv3, plus SE partial sums.
# ----------------------------------------------------------------------------
def _make_main_kernel(*, T, TT, TW, H, width, nums, ksz, dil, pad,
                      mx_dtype, fuse_taps):
    def kernel(xw_ref,                                    # (1, 1, TW, C)
               w1_ref, b1_ref, s1_ref, t1_ref,            # conv1 + folded bn1
               wc_ref, bc_ref, sc_ref, tc_ref,            # dilated convs + bns
               w3_ref, b3_ref, s3_ref, t3_ref,            # conv3 + folded bn3
               pre_ref,                                    # (1, TT, planes)
               sums_ref,                                   # (1, 1, 1, planes)
               spall_ref):                                 # VMEM scratch (TW, WS)
        tstart = pl.program_id(1) * TT        # first global row of this tile

        # ---- conv1 (1x1): one (TW, C) @ (C, WS) MXU matmul; elementwise f32 --
        h = jnp.dot(xw_ref[0, 0], w1_ref[...],
                    preferred_element_type=jnp.float32)    # (TW, WS)
        h = jnp.maximum(h + b1_ref[...], 0.0)
        spall_ref[...] = (h * s1_ref[...] + t1_ref[...]).astype(spall_ref.dtype)

        # (TW, 1) row iota; tap masks are recomputed at the where-site (cheap
        # VPU compares, co-issued under the MXU) with GLOBAL row indices so the
        # dilated conv's zero padding applies at the true sequence boundaries.
        rows = lax.broadcasted_iota(jnp.int32, (TW, 1), 0)

        def tap(sp, j):
            s0 = pad - j * dil                 # tap_j[t] = sp[t - s0]
            if (s0 % TW) == 0:
                rolled = sp
            else:
                rolled = pltpu.roll(sp, shift=s0 % TW, axis=0)      # XLU
            lo = H + s0 - tstart               # validity window in local rows
            m = (rows >= lo) & (rows < lo + T)
            return jnp.where(m, rolled, 0.0).astype(mx_dtype)

        # ---- Res2Net branch chain (serial) -----------------------------------
        sp = None
        for i in range(nums):
            chunk = spall_ref[:, i * width:(i + 1) * width].astype(jnp.float32)
            sp = chunk if i == 0 else sp + chunk
            if fuse_taps:
                # cast-before-concat: lane concat of mx taps, single fused dot
                tcat = jnp.concatenate([tap(sp, j) for j in range(ksz)], axis=1)
                y = jnp.dot(tcat, wc_ref[i], preferred_element_type=jnp.float32)
            else:
                y = None
                for j in range(ksz):
                    d = jnp.dot(tap(sp, j), wc_ref[i * ksz + j],
                                preferred_element_type=jnp.float32)
                    y = d if y is None else y + d
            y = jnp.maximum(y + bc_ref[i], 0.0)
            sp = y * sc_ref[i] + tc_ref[i]                          # (TW, width)
            spall_ref[:, i * width:(i + 1) * width] = sp.astype(spall_ref.dtype)

        # ---- conv3 (1x1) over the inner TT rows only --------------------------
        feat = spall_ref[H:H + TT, :].astype(mx_dtype)              # (TT, WS)
        out = jnp.dot(feat, w3_ref[...], preferred_element_type=jnp.float32)
        out = jnp.maximum(out + b3_ref[...], 0.0)
        out = out * s3_ref[...] + t3_ref[...]                       # (TT, planes)
        pre_ref[0] = out.astype(pre_ref.dtype)

        # ---- SE partial sum over the globally-valid rows of this tile ---------
        r = lax.broadcasted_iota(jnp.int32, (TT, 1), 0)
        valid = r < (T - tstart)
        sums_ref[0, 0] = jnp.sum(jnp.where(valid, out, 0.0),
                                 axis=0, keepdims=True)

    return kernel


# ----------------------------------------------------------------------------
# Kernel 2: gate + residual + store sweep (element-wise).
# ----------------------------------------------------------------------------
def _gate_residual_kernel(pre_ref, gate_ref, x_ref, o_ref):
    o_ref[0] = (pre_ref[0] * gate_ref[0] + x_ref[0]).astype(o_ref.dtype)


def _bn_fold(g, b, m, v):
    s = g / jnp.sqrt(v + EPS)
    return s, b - m * s


def _pick_vmem_limit():
    # ~75% of physical VMEM: ~48 MiB on v7x (64 MiB), ~96 MiB on v5e/v6e (128).
    try:
        cap = int(pltpu.get_tpu_info().vmem_capacity_bytes)
    except Exception:
        cap = 64 * 1024 * 1024   # conservative fallback, safe on every chip
    return min((cap * 3) // 4, 112 * 1024 * 1024)


# ----------------------------------------------------------------------------
# Wrapper: param repacking + two pallas_calls + tiny SE-gate glue.
# ----------------------------------------------------------------------------
def bottle2neck_pallas(x_ncl, P, *, kernel_size, dilation, scale,
                       compute_dtype=jnp.bfloat16, t_tile=512,
                       out_dtype=jnp.float32, single_buffer_weights=True,
                       vmem_limit_bytes=None):
    B, C, T = x_ncl.shape
    planes = P["conv3_w"].shape[0]
    width = int(math.floor(planes / scale))
    WS = width * scale
    nums = scale - 1
    ksz, dil = kernel_size, dilation
    pad = math.floor(ksz / 2) * dil
    assert planes == C, "residual add requires inplanes == planes"

    mx = compute_dtype
    fuse_taps = (width % 128 == 0)
    # bf16 scratch only for lane-aligned widths (production ECAPA); tiny-width
    # test configs keep an f32 scratch (sub-128-lane bf16 slices not worth it).
    scratch_dtype = mx if fuse_taps else jnp.float32

    # ---- T tiling --------------------------------------------------------------
    TT = min(int(t_tile), _round_up(T, 8))
    TT = max(8, (TT // 8) * 8)
    nT = _cdiv(T, TT)
    T_pad = nT * TT
    H = _round_up(nums * pad, 16)         # halo = receptive field of branch chain
    TW = TT + 2 * H

    if vmem_limit_bytes is None:
        vmem_limit_bytes = _pick_vmem_limit()

    # ---- activations: (B, T, C) layout + halo'd overlapping windows ------------
    x_btc = jnp.transpose(x_ncl, (0, 2, 1)).astype(jnp.float32)       # (B, T, C)
    x_halo = jnp.pad(x_btc, ((0, 0), (H, T_pad - T + H), (0, 0)))
    xw = jnp.stack([x_halo[:, t * TT:t * TT + TW, :] for t in range(nT)],
                   axis=1).astype(mx)                                 # (B,nT,TW,C)

    # ---- fold params ------------------------------------------------------------
    w1 = P["conv1_w"][:, :, 0].T.astype(mx)                           # (C, WS)
    b1 = P["conv1_b"][None, :]
    s1f, t1f = _bn_fold(*P["bn1"]); s1, t1 = s1f[None, :], t1f[None, :]

    wc = jnp.transpose(P["convs_w"], (0, 3, 2, 1))                    # (nums,k,ci,co)
    if fuse_taps:
        wc = wc.reshape(nums, ksz * width, width).astype(mx)
    else:
        wc = wc.reshape(nums * ksz, width, width).astype(mx)
    bc = P["convs_b"][:, None, :]                                     # (nums,1,width)
    scf, tcf = _bn_fold(*P["bns"]); sc, tc = scf[:, None, :], tcf[:, None, :]

    w3 = P["conv3_w"][:, :, 0].T.astype(mx)                           # (WS, planes)
    b3 = P["conv3_b"][None, :]
    s3f, t3f = _bn_fold(*P["bn3"]); s3, t3 = s3f[None, :], t3f[None, :]

    kernel1 = _make_main_kernel(T=T, TT=TT, TW=TW, H=H, width=width, nums=nums,
                                ksz=ksz, dil=dil, pad=pad, mx_dtype=mx,
                                fuse_taps=fuse_taps)

    inputs = (xw, w1, b1, s1, t1, wc, bc, sc, tc, w3, b3, s3, t3)

    cparams = pltpu.CompilerParams(
        dimension_semantics=("parallel", "parallel"),   # batch and T tiles indep.
        vmem_limit_bytes=int(vmem_limit_bytes))

    def _call_main(single_buffer):
        def const_spec(a):
            n = a.ndim
            idx = lambda b, t, _n=n: (0,) * _n
            if single_buffer:
                return pl.BlockSpec(a.shape, idx, pipeline_mode=pl.Buffered(1))
            return pl.BlockSpec(a.shape, idx)

        in_specs = [pl.BlockSpec((1, 1, TW, C), lambda b, t: (b, t, 0, 0))]
        in_specs += [const_spec(a) for a in inputs[1:]]
        out_specs = [pl.BlockSpec((1, TT, planes), lambda b, t: (b, t, 0)),
                     pl.BlockSpec((1, 1, 1, planes), lambda b, t: (b, t, 0, 0))]
        return pl.pallas_call(
            kernel1,
            out_shape=(jax.ShapeDtypeStruct((B, T_pad, planes), jnp.float32),
                       jax.ShapeDtypeStruct((B, nT, 1, planes), jnp.float32)),
            grid_spec=pltpu.PrefetchScalarGridSpec(
                num_scalar_prefetch=0,
                grid=(B, nT),
                in_specs=in_specs,
                out_specs=out_specs,
                scratch_shapes=[pltpu.VMEM((TW, WS), scratch_dtype)]),
            compiler_params=cparams,
        )(*inputs)

    if single_buffer_weights:
        try:
            pre, sums = _call_main(True)
        except Exception:
            # TODO(synk): this JAX/Mosaic build rejects pl.Buffered(1) on
            # pallas_call BlockSpecs; fall back to default double buffering.
            pre, sums = _call_main(False)
    else:
        pre, sums = _call_main(False)

    # ---- SE gate: tiny per-batch matmuls, plain JAX glue -------------------------
    mean = jnp.sum(sums[:, :, 0, :], axis=1) / jnp.float32(T)          # (B, planes)
    hh = jnp.maximum(mean @ P["se1_w"][:, :, 0].T + P["se1_b"][None, :], 0.0)
    gate = jax.nn.sigmoid(hh @ P["se2_w"][:, :, 0].T + P["se2_b"][None, :])
    gate = gate[:, None, :]                                            # (B,1,planes)

    # ---- gate + residual + store sweep --------------------------------------------
    x_res = jnp.pad(x_btc, ((0, 0), (0, T_pad - T), (0, 0)))           # (B,T_pad,C)
    out_btc = pl.pallas_call(
        _gate_residual_kernel,
        out_shape=jax.ShapeDtypeStruct((B, T_pad, planes), out_dtype),
        grid_spec=pltpu.PrefetchScalarGridSpec(
            num_scalar_prefetch=0,
            grid=(B, nT),
            in_specs=[pl.BlockSpec((1, TT, planes), lambda b, t: (b, t, 0)),
                      pl.BlockSpec((1, 1, planes), lambda b, t: (b, 0, 0)),
                      pl.BlockSpec((1, TT, planes), lambda b, t: (b, t, 0))],
            out_specs=pl.BlockSpec((1, TT, planes), lambda b, t: (b, t, 0))),
        compiler_params=cparams,
    )(pre, gate, x_res)

    return jnp.transpose(out_btc[:, :T, :], (0, 2, 1))                 # back to NCL


# ----------------------------------------------------------------------------
# Pure-JAX reference (mirrors the PyTorch forward, NCL layout).
# ----------------------------------------------------------------------------
def _conv1d(x, w, b, dilation=1, padding=0):
    y = lax.conv_general_dilated(x, w, window_strides=(1,),
                                 padding=[(padding, padding)],
                                 rhs_dilation=(dilation,),
                                 dimension_numbers=("NCH", "OIH", "NCH"))
    return y + b[None, :, None]


def _bn(x, g, b, m, v):
    return (x - m[None, :, None]) * (g / jnp.sqrt(v + EPS))[None, :, None] \
        + b[None, :, None]


def bottle2neck_ref(x, P, *, kernel_size, dilation, scale):
    planes = P["conv3_w"].shape[0]
    width = int(math.floor(planes / scale))
    nums = scale - 1
    pad = math.floor(kernel_size / 2) * dilation

    residual = x
    out = _conv1d(x, P["conv1_w"], P["conv1_b"])
    out = jax.nn.relu(out)
    out = _bn(out, *P["bn1"])
    spx = [out[:, i * width:(i + 1) * width, :] for i in range(scale)]
    outs = []
    sp = None
    for i in range(nums):
        sp = spx[i] if i == 0 else sp + spx[i]
        sp = _conv1d(sp, P["convs_w"][i], P["convs_b"][i],
                     dilation=dilation, padding=pad)
        sp = jax.nn.relu(sp)
        g, b, m, v = (P["bns"][j][i] for j in range(4))
        sp = _bn(sp, g, b, m, v)
        outs.append(sp)
    outs.append(spx[nums])
    out = jnp.concatenate(outs, axis=1)
    out = _conv1d(out, P["conv3_w"], P["conv3_b"])
    out = jax.nn.relu(out)
    out = _bn(out, *P["bn3"])
    s = jnp.mean(out, axis=2, keepdims=True)
    h = jax.nn.relu(_conv1d(s, P["se1_w"], P["se1_b"]))
    gate = jax.nn.sigmoid(_conv1d(h, P["se2_w"], P["se2_b"]))
    out = out * gate
    return out + residual


# ----------------------------------------------------------------------------
def _make_params(key, inplanes, planes, scale, kernel_size, bneck=128):
    width = planes // scale
    WS = width * scale
    nums = scale - 1
    ks = list(jax.random.split(key, 22))

    def nrm(k, shape, s=0.1):
        return s * jax.random.normal(k, shape, jnp.float32)

    return {
        "conv1_w": nrm(ks[0], (WS, inplanes, 1)),
        "conv1_b": nrm(ks[1], (WS,)),
        "bn1": (1.0 + nrm(ks[2], (WS,)), nrm(ks[3], (WS,)), nrm(ks[4], (WS,)),
                jax.random.uniform(ks[5], (WS,), jnp.float32, 0.5, 1.5)),
        "convs_w": nrm(ks[6], (nums, width, width, kernel_size), 0.2),
        "convs_b": nrm(ks[7], (nums, width)),
        "bns": (1.0 + nrm(ks[8], (nums, width)), nrm(ks[9], (nums, width)),
                nrm(ks[10], (nums, width)),
                jax.random.uniform(ks[11], (nums, width), jnp.float32, 0.5, 1.5)),
        "conv3_w": nrm(ks[12], (planes, WS, 1)),
        "conv3_b": nrm(ks[13], (planes,)),
        "bn3": (1.0 + nrm(ks[14], (planes,)), nrm(ks[15], (planes,)),
                nrm(ks[16], (planes,)),
                jax.random.uniform(ks[17], (planes,), jnp.float32, 0.5, 1.5)),
        "se1_w": nrm(ks[18], (bneck, planes, 1)),
        "se1_b": nrm(ks[19], (bneck,)),
        "se2_w": nrm(ks[20], (planes, bneck, 1)),
        "se2_b": nrm(ks[21], (planes,)),
    }


if __name__ == "__main__":
    key = jax.random.PRNGKey(0)
    k_a, k_b, k_xa, k_xb = jax.random.split(key, 4)

    # --- config A: small channels (non-fused tap path), T not divisible by the
    #     T tile (exercises partial-tile masking and the halo logic, nT=3).
    B, C, T = 2, 64, 40
    scale, ksz, dil = 8, 3, 2                     # width = 8
    P_a = _make_params(k_a, C, C, scale, ksz)
    x_a = jax.random.normal(k_xa, (B, C, T), jnp.float32)
    ref_a = bottle2neck_ref(x_a, P_a, kernel_size=ksz, dilation=dil, scale=scale)

    out_f32 = bottle2neck_pallas(x_a, P_a, kernel_size=ksz, dilation=dil,
                                 scale=scale, compute_dtype=jnp.float32,
                                 t_tile=16)
    out_f32 = jax.block_until_ready(out_f32)
    np.testing.assert_allclose(np.asarray(out_f32), np.asarray(ref_a),
                               rtol=1e-4, atol=1e-4)

    out_bf16 = bottle2neck_pallas(x_a, P_a, kernel_size=ksz, dilation=dil,
                                  scale=scale, compute_dtype=jnp.bfloat16,
                                  t_tile=16)
    out_bf16 = jax.block_until_ready(out_bf16)
    np.testing.assert_allclose(np.asarray(out_bf16), np.asarray(ref_a),
                               rtol=1e-1, atol=1e-1)

    # --- config B: width = 128 -> fused-tap single-matmul branch path and the
    #     mx-dtype spall scratch (production-like code path at toy sizes).
    B2, C2, T2 = 1, 256, 40
    scale2, ksz2, dil2 = 2, 3, 2                  # width = 128
    P_b = _make_params(k_b, C2, C2, scale2, ksz2)
    x_b = jax.random.normal(k_xb, (B2, C2, T2), jnp.float32)
    ref_b = bottle2neck_ref(x_b, P_b, kernel_size=ksz2, dilation=dil2,
                            scale=scale2)

    out_b32 = bottle2neck_pallas(x_b, P_b, kernel_size=ksz2, dilation=dil2,
                                 scale=scale2, compute_dtype=jnp.float32,
                                 t_tile=16)
    out_b32 = jax.block_until_ready(out_b32)
    np.testing.assert_allclose(np.asarray(out_b32), np.asarray(ref_b),
                               rtol=2e-4, atol=2e-4)

    out_b16 = bottle2neck_pallas(x_b, P_b, kernel_size=ksz2, dilation=dil2,
                                 scale=scale2, compute_dtype=jnp.bfloat16,
                                 t_tile=16)
    out_b16 = jax.block_until_ready(out_b16)
    np.testing.assert_allclose(np.asarray(out_b16), np.asarray(ref_b),
                               rtol=1e-1, atol=1e-1)

    print("KERNEL_OK")
</pallas_src>

<mosaic_0001>
module attributes {stable_mosaic.version = 11 : i64} {
  func.func @kernel(%arg0: i32, %arg1: i32, %arg2: memref<1x1x48x64xf32, #tpu.memory_space<vmem>>, %arg3: memref<64x64xf32, #tpu.memory_space<vmem>>, %arg4: memref<1x64xf32, #tpu.memory_space<vmem>>, %arg5: memref<1x64xf32, #tpu.memory_space<vmem>>, %arg6: memref<1x64xf32, #tpu.memory_space<vmem>>, %arg7: memref<21x8x8xf32, #tpu.memory_space<vmem>>, %arg8: memref<7x1x8xf32, #tpu.memory_space<vmem>>, %arg9: memref<7x1x8xf32, #tpu.memory_space<vmem>>, %arg10: memref<7x1x8xf32, #tpu.memory_space<vmem>>, %arg11: memref<64x64xf32, #tpu.memory_space<vmem>>, %arg12: memref<1x64xf32, #tpu.memory_space<vmem>>, %arg13: memref<1x64xf32, #tpu.memory_space<vmem>>, %arg14: memref<1x64xf32, #tpu.memory_space<vmem>>, %arg15: memref<1x16x64xf32, #tpu.memory_space<vmem>>, %arg16: memref<1x1x1x64xf32, #tpu.memory_space<vmem>>, %arg17: memref<48x64xf32, #tpu.memory_space<vmem>>) attributes {dimension_semantics = [#tpu.dimension_semantics<parallel>, #tpu.dimension_semantics<parallel>], iteration_bounds = array<i64: 2, 3>, scalar_prefetch = 0 : i64, scratch_operands = 1 : i64, tpu.core_type = #tpu.core_type<tc>, window_params = [{transform_indices = @transform_0, window_bounds = array<i64: 1, 1, 48, 64>}, {pipeline_mode = #tpu.pipeline_mode<synchronous>, transform_indices = @transform_1, window_bounds = array<i64: 64, 64>}, {pipeline_mode = #tpu.pipeline_mode<synchronous>, transform_indices = @transform_2, window_bounds = array<i64: 1, 64>}, {pipeline_mode = #tpu.pipeline_mode<synchronous>, transform_indices = @transform_3, window_bounds = array<i64: 1, 64>}, {pipeline_mode = #tpu.pipeline_mode<synchronous>, transform_indices = @transform_4, window_bounds = array<i64: 1, 64>}, {pipeline_mode = #tpu.pipeline_mode<synchronous>, transform_indices = @transform_5, window_bounds = array<i64: 21, 8, 8>}, {pipeline_mode = #tpu.pipeline_mode<synchronous>, transform_indices = @transform_6, window_bounds = array<i64: 7, 1, 8>}, {pipeline_mode = #tpu.pipeline_mode<synchronous>, transform_indices = @transform_7, window_bounds = array<i64: 7, 1, 8>}, {pipeline_mode = #tpu.pipeline_mode<synchronous>, transform_indices = @transform_8, window_bounds = array<i64: 7, 1, 8>}, {pipeline_mode = #tpu.pipeline_mode<synchronous>, transform_indices = @transform_9, window_bounds = array<i64: 64, 64>}, {pipeline_mode = #tpu.pipeline_mode<synchronous>, transform_indices = @transform_10, window_bounds = array<i64: 1, 64>}, {pipeline_mode = #tpu.pipeline_mode<synchronous>, transform_indices = @transform_11, window_bounds = array<i64: 1, 64>}, {pipeline_mode = #tpu.pipeline_mode<synchronous>, transform_indices = @transform_12, window_bounds = array<i64: 1, 64>}, {transform_indices = @transform_13, window_bounds = array<i64: 1, 16, 64>}, {transform_indices = @transform_14, window_bounds = array<i64: 1, 1, 1, 64>}]} {
    %c16_i32 = arith.constant 16 : i32
    %0 = arith.muli %arg1, %c16_i32 : i32
    %c0 = arith.constant 0 : index
    %c0_0 = arith.constant 0 : index
    %c0_1 = arith.constant 0 : index
    %c0_2 = arith.constant 0 : index
    %1 = vector.load %arg2[%c0, %c0_0, %c0_1, %c0_2] : memref<1x1x48x64xf32, #tpu.memory_space<vmem>>, vector<1x1x48x64xf32>
    %2 = vector.shape_cast %1 : vector<1x1x48x64xf32> to vector<48x64xf32>
    %c0_3 = arith.constant 0 : index
    %c0_4 = arith.constant 0 : index
    %3 = vector.load %arg3[%c0_3, %c0_4] : memref<64x64xf32, #tpu.memory_space<vmem>>, vector<64x64xf32>
    %cst = arith.constant dense<0.000000e+00> : vector<48x64xf32>
    %4 = tpu.matmul %2, %3, %cst {dimension_numbers = #tpu.dot_dimension_numbers<[1], [0], [0], [1], [0, 0, 1, 1], [], []>} : vector<48x64xf32>, vector<64x64xf32>, vector<48x64xf32> -> vector<48x64xf32>
    %c0_5 = arith.constant 0 : index
    %c0_6 = arith.constant 0 : index
    %5 = vector.load %arg4[%c0_5, %c0_6] : memref<1x64xf32, #tpu.memory_space<vmem>>, vector<1x64xf32>
    %6 = vector.broadcast %5 : vector<1x64xf32> to vector<48x64xf32>
    %7 = arith.addf %4, %6 : vector<48x64xf32>
    %cst_7 = arith.constant 0.000000e+00 : f32
    %8 = vector.broadcast %cst_7 : f32 to vector<48x64xf32>
    %9 = arith.maximumf %7, %8 : vector<48x64xf32>
    %c0_8 = arith.constant 0 : index
    %c0_9 = arith.constant 0 : index
    %10 = vector.load %arg5[%c0_8, %c0_9] : memref<1x64xf32, #tpu.memory_space<vmem>>, vector<1x64xf32>
    %11 = vector.broadcast %10 : vector<1x64xf32> to vector<48x64xf32>
    %12 = arith.mulf %9, %11 : vector<48x64xf32>
    %c0_10 = arith.constant 0 : index
    %c0_11 = arith.constant 0 : index
    %13 = vector.load %arg6[%c0_10, %c0_11] : memref<1x64xf32, #tpu.memory_space<vmem>>, vector<1x64xf32>
    %14 = vector.broadcast %13 : vector<1x64xf32> to vector<48x64xf32>
    %15 = arith.addf %12, %14 : vector<48x64xf32>
    %c0_12 = arith.constant 0 : index
    %c0_13 = arith.constant 0 : index
    %16 = vector.load %arg17[%c0_12, %c0_13] : memref<48x64xf32, #tpu.memory_space<vmem>>, vector<48x64xf32>
    tpu.vector_store %arg17[%c0_12, %c0_13], %15 {strides = array<i32>} : memref<48x64xf32, #tpu.memory_space<vmem>>, vector<48x64xf32>,
    %17 = tpu.iota {dimensions = array<i32: 0>} : vector<48x1xi32>
    %c0_14 = arith.constant 0 : index
    %c0_15 = arith.constant 0 : index
    %18 = vector.load %arg17[%c0_14, %c0_15] : memref<48x64xf32, #tpu.memory_space<vmem>>, vector<48x8xf32>
    %c2_i32 = arith.constant 2 : i32
    %19 = tpu.dynamic_rotate %18 by %c2_i32 dim 0 : vector<48x8xf32>, i32 -> vector<48x8xf32>
    %c18_i32 = arith.constant 18 : i32
    %20 = arith.subi %c18_i32, %0 : i32
    %21 = vector.broadcast %20 : i32 to vector<48x1xi32>
    %22 = arith.cmpi sge, %17, %21 : vector<48x1xi32>
    %c40_i32 = arith.constant 40 : i32
    %23 = arith.addi %20, %c40_i32 : i32
    %24 = vector.broadcast %23 : i32 to vector<48x1xi32>
    %25 = arith.cmpi slt, %17, %24 : vector<48x1xi32>
    %26 = arith.andi %22, %25 : vector<48x1xi1>
    %cst_16 = arith.constant 0.000000e+00 : f32
    %27 = vector.shape_cast %26 : vector<48x1xi1> to vector<48x1xi1>
    %28 = vector.broadcast %27 : vector<48x1xi1> to vector<48x8xi1>
    %29 = vector.broadcast %cst_16 : f32 to vector<48x8xf32>
    %30 = arith.select %28, %19, %29 : vector<48x8xi1>, vector<48x8xf32>
    %c0_17 = arith.constant 0 : index
    %c0_18 = arith.constant 0 : index
    %c0_19 = arith.constant 0 : index
    %31 = vector.load %arg7[%c0_17, %c0_18, %c0_19] : memref<21x8x8xf32, #tpu.memory_space<vmem>>, vector<1x8x8xf32>
    %32 = vector.shape_cast %31 : vector<1x8x8xf32> to vector<8x8xf32>
    %cst_20 = arith.constant dense<0.000000e+00> : vector<48x8xf32>
    %33 = tpu.matmul %30, %32, %cst_20 {dimension_numbers = #tpu.dot_dimension_numbers<[1], [0], [0], [1], [0, 0, 1, 1], [], []>} : vector<48x8xf32>, vector<8x8xf32>, vector<48x8xf32> -> vector<48x8xf32>
    %c16_i32_21 = arith.constant 16 : i32
    %34 = arith.subi %c16_i32_21, %0 : i32
    %35 = vector.broadcast %34 : i32 to vector<48x1xi32>
    %36 = arith.cmpi sge, %17, %35 : vector<48x1xi32>
    %c40_i32_22 = arith.constant 40 : i32
    %37 = arith.addi %34, %c40_i32_22 : i32
    %38 = vector.broadcast %37 : i32 to vector<48x1xi32>
    %39 = arith.cmpi slt, %17, %38 : vector<48x1xi32>
    %40 = arith.andi %36, %39 : vector<48x1xi1>
    %cst_23 = arith.constant 0.000000e+00 : f32
    %41 = vector.shape_cast %40 : vector<48x1xi1> to vector<48x1xi1>
    %42 = vector.broadcast %41 : vector<48x1xi1> to vector<48x8xi1>
    %43 = vector.broadcast %cst_23 : f32 to vector<48x8xf32>
    %44 = arith.select %42, %18, %43 : vector<48x8xi1>, vector<48x8xf32>
    %c1 = arith.constant 1 : index
    %c0_24 = arith.constant 0 : index
    %c0_25 = arith.constant 0 : index
    %45 = vector.load %arg7[%c1, %c0_24, %c0_25] : memref<21x8x8xf32, #tpu.memory_space<vmem>>, vector<1x8x8xf32>
    %46 = vector.shape_cast %45 : vector<1x8x8xf32> to vector<8x8xf32>
    %cst_26 = arith.constant dense<0.000000e+00> : vector<48x8xf32>
    %47 = tpu.matmul %44, %46, %cst_26 {dimension_numbers = #tpu.dot_dimension_numbers<[1], [0], [0], [1], [0, 0, 1, 1], [], []>} : vector<48x8xf32>, vector<8x8xf32>, vector<48x8xf32> -> vector<48x8xf32>
    %48 = arith.addf %33, %47 : vector<48x8xf32>
    %c46_i32 = arith.constant 46 : i32
    %49 = tpu.dynamic_rotate %18 by %c46_i32 dim 0 : vector<48x8xf32>, i32 -> vector<48x8xf32>
    %c14_i32 = arith.constant 14 : i32
    %50 = arith.subi %c14_i32, %0 : i32
    %51 = vector.broadcast %50 : i32 to vector<48x1xi32>
    %52 = arith.cmpi sge, %17, %51 : vector<48x1xi32>
    %c40_i32_27 = arith.constant 40 : i32
    %53 = arith.addi %50, %c40_i32_27 : i32
    %54 = vector.broadcast %53 : i32 to vector<48x1xi32>
    %55 = arith.cmpi slt, %17, %54 : vector<48x1xi32>
    %56 = arith.andi %52, %55 : vector<48x1xi1>
    %cst_28 = arith.constant 0.000000e+00 : f32
    %57 = vector.shape_cast %56 : vector<48x1xi1> to vector<48x1xi1>
    %58 = vector.broadcast %57 : vector<48x1xi1> to vector<48x8xi1>
    %59 = vector.broadcast %cst_28 : f32 to vector<48x8xf32>
    %60 = arith.select %58, %49, %59 : vector<48x8xi1>, vector<48x8xf32>
    %c2 = arith.constant 2 : index
    %c0_29 = arith.constant 0 : index
    %c0_30 = arith.constant 0 : index
    %61 = vector.load %arg7[%c2, %c0_29, %c0_30] : memref<21x8x8xf32, #tpu.memory_space<vmem>>, vector<1x8x8xf32>
    %62 = vector.shape_cast %61 : vector<1x8x8xf32> to vector<8x8xf32>
    %cst_31 = arith.constant dense<0.000000e+00> : vector<48x8xf32>
    %63 = tpu.matmul %60, %62, %cst_31 {dimension_numbers = #tpu.dot_dimension_numbers<[1], [0], [0], [1], [0, 0, 1, 1], [], []>} : vector<48x8xf32>, vector<8x8xf32>, vector<48x8xf32> -> vector<48x8xf32>
    %64 = arith.addf %48, %63 : vector<48x8xf32>
    %c0_32 = arith.constant 0 : index
    %c0_33 = arith.constant 0 : index
    %c0_34 = arith.constant 0 : index
    %65 = vector.load %arg8[%c0_32, %c0_33, %c0_34] : memref<7x1x8xf32, #tpu.memory_space<vmem>>, vector<1x1x8xf32>
    %66 = vector.shape_cast %65 : vector<1x1x8xf32> to vector<1x8xf32>
    %67 = vector.broadcast %66 : vector<1x8xf32> to vector<48x8xf32>
    %68 = arith.addf %64, %67 : vector<48x8xf32>
    %cst_35 = arith.constant 0.000000e+00 : f32
    %69 = vector.broadcast %cst_35 : f32 to vector<48x8xf32>
    %70 = arith.maximumf %68, %69 : vector<48x8xf32>
    %c0_36 = arith.constant 0 : index
    %c0_37 = arith.constant 0 : index
    %c0_38 = arith.constant 0 : index
    %71 = vector.load %arg9[%c0_36, %c0_37, %c0_38] : memref<7x1x8xf32, #tpu.memory_space<vmem>>, vector<1x1x8xf32>
    %72 = vector.shape_cast %71 : vector<1x1x8xf32> to vector<1x8xf32>
    %73 = vector.broadcast %72 : vector<1x8xf32> to vector<48x8xf32>
    %74 = arith.mulf %70, %73 : vector<48x8xf32>
    %c0_39 = arith.constant 0 : index
    %c0_40 = arith.constant 0 : index
    %c0_41 = arith.constant 0 : index
    %75 = vector.load %arg10[%c0_39, %c0_40, %c0_41] : memref<7x1x8xf32, #tpu.memory_space<vmem>>, vector<1x1x8xf32>
    %76 = vector.shape_cast %75 : vector<1x1x8xf32> to vector<1x8xf32>
    %77 = vector.broadcast %76 : vector<1x8xf32> to vector<48x8xf32>
    %78 = arith.addf %74, %77 : vector<48x8xf32>
    %c0_42 = arith.constant 0 : index
    %c0_43 = arith.constant 0 : index
    %79 = vector.load %arg17[%c0_42, %c0_43] : memref<48x64xf32, #tpu.memory_space<vmem>>, vector<48x8xf32>
    tpu.vector_store %arg17[%c0_42, %c0_43], %78 {strides = array<i32>} : memref<48x64xf32, #tpu.memory_space<vmem>>, vector<48x8xf32>,
    %c0_44 = arith.constant 0 : index
    %c8 = arith.constant 8 : index
    %80 = vector.load %arg17[%c0_44, %c8] : memref<48x64xf32, #tpu.memory_space<vmem>>, vector<48x8xf32>
    %81 = arith.addf %78, %80 : vector<48x8xf32>
    %c2_i32_45 = arith.constant 2 : i32
    %82 = tpu.dynamic_rotate %81 by %c2_i32_45 dim 0 : vector<48x8xf32>, i32 -> vector<48x8xf32>
    %c18_i32_46 = arith.constant 18 : i32
    %83 = arith.subi %c18_i32_46, %0 : i32
    %84 = vector.broadcast %83 : i32 to vector<48x1xi32>
    %85 = arith.cmpi sge, %17, %84 : vector<48x1xi32>
    %c40_i32_47 = arith.constant 40 : i32
    %86 = arith.addi %83, %c40_i32_47 : i32
    %87 = vector.broadcast %86 : i32 to vector<48x1xi32>
    %88 = arith.cmpi slt, %17, %87 : vector<48x1xi32>
    %89 = arith.andi %85, %88 : vector<48x1xi1>
    %cst_48 = arith.constant 0.000000e+00 : f32
    %90 = vector.shape_cast %89 : vector<48x1xi1> to vector<48x1xi1>
    %91 = vector.broadcast %90 : vector<48x1xi1> to vector<48x8xi1>
    %92 = vector.broadcast %cst_48 : f32 to vector<48x8xf32>
    %93 = arith.select %91, %82, %92 : vector<48x8xi1>, vector<48x8xf32>
    %c3 = arith.constant 3 : index
    %c0_49 = arith.constant 0 : index
    %c0_50 = arith.constant 0 : index
    %94 = vector.load %arg7[%c3, %c0_49, %c0_50] : memref<21x8x8xf32, #tpu.memory_space<vmem>>, vector<1x8x8xf32>
    %95 = vector.shape_cast %94 : vector<1x8x8xf32> to vector<8x8xf32>
    %cst_51 = arith.constant dense<0.000000e+00> : vector<48x8xf32>
    %96 = tpu.matmul %93, %95, %cst_51 {dimension_numbers = #tpu.dot_dimension_numbers<[1], [0], [0], [1], [0, 0, 1, 1], [], []>} : vector<48x8xf32>, vector<8x8xf32>, vector<48x8xf32> -> vector<48x8xf32>
    %c16_i32_52 = arith.constant 16 : i32
    %97 = arith.subi %c16_i32_52, %0 : i32
    %98 = vector.broadcast %97 : i32 to vector<48x1xi32>
    %99 = arith.cmpi sge, %17, %98 : vector<48x1xi32>
    %c40_i32_53 = arith.constant 40 : i32
    %100 = arith.addi %97, %c40_i32_53 : i32
    %101 = vector.broadcast %100 : i32 to vector<48x1xi32>
    %102 = arith.cmpi slt, %17, %101 : vector<48x1xi32>
    %103 = arith.andi %99, %102 : vector<48x1xi1>
    %cst_54 = arith.constant 0.000000e+00 : f32
    %104 = vector.shape_cast %103 : vector<48x1xi1> to vector<48x1xi1>
    %105 = vector.broadcast %104 : vector<48x1xi1> to vector<48x8xi1>
    %106 = vector.broadcast %cst_54 : f32 to vector<48x8xf32>
    %107 = arith.select %105, %81, %106 : vector<48x8xi1>, vector<48x8xf32>
    %c4 = arith.constant 4 : index
    %c0_55 = arith.constant 0 : index
    %c0_56 = arith.constant 0 : index
    %108 = vector.load %arg7[%c4, %c0_55, %c0_56] : memref<21x8x8xf32, #tpu.memory_space<vmem>>, vector<1x8x8xf32>
    %109 = vector.shape_cast %108 : vector<1x8x8xf32> to vector<8x8xf32>
    %cst_57 = arith.constant dense<0.000000e+00> : vector<48x8xf32>
    %110 = tpu.matmul %107, %109, %cst_57 {dimension_numbers = #tpu.dot_dimension_numbers<[1], [0], [0], [1], [0, 0, 1, 1], [], []>} : vector<48x8xf32>, vector<8x8xf32>, vector<48x8xf32> -> vector<48x8xf32>
    %111 = arith.addf %96, %110 : vector<48x8xf32>
    %c46_i32_58 = arith.constant 46 : i32
    %112 = tpu.dynamic_rotate %81 by %c46_i32_58 dim 0 : vector<48x8xf32>, i32 -> vector<48x8xf32>
    %c14_i32_59 = arith.constant 14 : i32
    %113 = arith.subi %c14_i32_59, %0 : i32
    %114 = vector.broadcast %113 : i32 to vector<48x1xi32>
    %115 = arith.cmpi sge, %17, %114 : vector<48x1xi32>
    %c40_i32_60 = arith.constant 40 : i32
    %116 = arith.addi %113, %c40_i32_60 : i32
    %117 = vector.broadcast %116 : i32 to vector<48x1xi32>
    %118 = arith.cmpi slt, %17, %117 : vector<48x1xi32>
    %119 = arith.andi %115, %118 : vector<48x1xi1>
    %cst_61 = arith.constant 0.000000e+00 : f32
    %120 = vector.shape_cast %119 : vector<48x1xi1> to vector<48x1xi1>
    %121 = vector.broadcast %120 : vector<48x1xi1> to vector<48x8xi1>
    %122 = vector.broadcast %cst_61 : f32 to vector<48x8xf32>
    %123 = arith.select %121, %112, %122 : vector<48x8xi1>, vector<48x8xf32>
    %c5 = arith.constant 5 : index
    %c0_62 = arith.constant 0 : index
    %c0_63 = arith.constant 0 : index
    %124 = vector.load %arg7[%c5, %c0_62, %c0_63] : memref<21x8x8xf32, #tpu.memory_space<vmem>>, vector<1x8x8xf32>
    %125 = vector.shape_cast %124 : vector<1x8x8xf32> to vector<8x8xf32>
    %cst_64 = arith.constant dense<0.000000e+00> : vector<48x8xf32>
    %126 = tpu.matmul %123, %125, %cst_64 {dimension_numbers = #tpu.dot_dimension_numbers<[1], [0], [0], [1], [0, 0, 1, 1], [], []>} : vector<48x8xf32>, vector<8x8xf32>, vector<48x8xf32> -> vector<48x8xf32>
    %127 = arith.addf %111, %126 : vector<48x8xf32>
    %c1_65 = arith.constant 1 : index
    %c0_66 = arith.constant 0 : index
    %c0_67 = arith.constant 0 : index
    %128 = vector.load %arg8[%c1_65, %c0_66, %c0_67] : memref<7x1x8xf32, #tpu.memory_space<vmem>>, vector<1x1x8xf32>
    %129 = vector.shape_cast %128 : vector<1x1x8xf32> to vector<1x8xf32>
    %130 = vector.broadcast %129 : vector<1x8xf32> to vector<48x8xf32>
    %131 = arith.addf %127, %130 : vector<48x8xf32>
    %cst_68 = arith.constant 0.000000e+00 : f32
    %132 = vector.broadcast %cst_68 : f32 to vector<48x8xf32>
    %133 = arith.maximumf %131, %132 : vector<48x8xf32>
    %c1_69 = arith.constant 1 : index
    %c0_70 = arith.constant 0 : index
    %c0_71 = arith.constant 0 : index
    %134 = vector.load %arg9[%c1_69, %c0_70, %c0_71] : memref<7x1x8xf32, #tpu.memory_space<vmem>>, vector<1x1x8xf32>
    %135 = vector.shape_cast %134 : vector<1x1x8xf32> to vector<1x8xf32>
    %136 = vector.broadcast %135 : vector<1x8xf32> to vector<48x8xf32>
    %137 = arith.mulf %133, %136 : vector<48x8xf32>
    %c1_72 = arith.constant 1 : index
    %c0_73 = arith.constant 0 : index
    %c0_74 = arith.constant 0 : index
    %138 = vector.load %arg10[%c1_72, %c0_73, %c0_74] : memref<7x1x8xf32, #tpu.memory_space<vmem>>, vector<1x1x8xf32>
    %139 = vector.shape_cast %138 : vector<1x1x8xf32> to vector<1x8xf32>
    %140 = vector.broadcast %139 : vector<1x8xf32> to vector<48x8xf32>
    %141 = arith.addf %137, %140 : vector<48x8xf32>
    %c0_75 = arith.constant 0 : index
    %c8_76 = arith.constant 8 : index
    %142 = vector.load %arg17[%c0_75, %c8_76] : memref<48x64xf32, #tpu.memory_space<vmem>>, vector<48x8xf32>
    tpu.vector_store %arg17[%c0_75, %c8_76], %141 {strides = array<i32>} : memref<48x64xf32, #tpu.memory_space<vmem>>, vector<48x8xf32>,
    %c0_77 = arith.constant 0 : index
    %c16 = arith.constant 16 : index
    %143 = vector.load %arg17[%c0_77, %c16] : memref<48x64xf32, #tpu.memory_space<vmem>>, vector<48x8xf32>
    %144 = arith.addf %141, %143 : vector<48x8xf32>
    %c2_i32_78 = arith.constant 2 : i32
    %145 = tpu.dynamic_rotate %144 by %c2_i32_78 dim 0 : vector<48x8xf32>, i32 -> vector<48x8xf32>
    %c18_i32_79 = arith.constant 18 : i32
    %146 = arith.subi %c18_i32_79, %0 : i32
    %147 = vector.broadcast %146 : i32 to vector<48x1xi32>
    %148 = arith.cmpi sge, %17, %147 : vector<48x1xi32>
    %c40_i32_80 = arith.constant 40 : i32
    %149 = arith.addi %146, %c40_i32_80 : i32
    %150 = vector.broadcast %149 : i32 to vector<48x1xi32>
    %151 = arith.cmpi slt, %17, %150 : vector<48x1xi32>
    %152 = arith.andi %148, %151 : vector<48x1xi1>
    %cst_81 = arith.constant 0.000000e+00 : f32
    %153 = vector.shape_cast %152 : vector<48x1xi1> to vector<48x1xi1>
    %154 = vector.broadcast %153 : vector<48x1xi1> to vector<48x8xi1>
    %155 = vector.broadcast %cst_81 : f32 to vector<48x8xf32>
    %156 = arith.select %154, %145, %155 : vector<48x8xi1>, vector<48x8xf32>
    %c6 = arith.constant 6 : index
    %c0_82 = arith.constant 0 : index
    %c0_83 = arith.constant 0 : index
    %157 = vector.load %arg7[%c6, %c0_82, %c0_83] : memref<21x8x8xf32, #tpu.memory_space<vmem>>, vector<1x8x8xf32>
    %158 = vector.shape_cast %157 : vector<1x8x8xf32> to vector<8x8xf32>
    %cst_84 = arith.constant dense<0.000000e+00> : vector<48x8xf32>
    %159 = tpu.matmul %156, %158, %cst_84 {dimension_numbers = #tpu.dot_dimension_numbers<[1], [0], [0], [1], [0, 0, 1, 1], [], []>} : vector<48x8xf32>, vector<8x8xf32>, vector<48x8xf32> -> vector<48x8xf32>
    %c16_i32_85 = arith.constant 16 : i32
    %160 = arith.subi %c16_i32_85, %0 : i32
    %161 = vector.broadcast %160 : i32 to vector<48x1xi32>
    %162 = arith.cmpi sge, %17, %161 : vector<48x1xi32>
    %c40_i32_86 = arith.constant 40 : i32
    %163 = arith.addi %160, %c40_i32_86 : i32
    %164 = vector.broadcast %163 : i32 to vector<48x1xi32>
    %165 = arith.cmpi slt, %17, %164 : vector<48x1xi32>
    %166 = arith.andi %162, %165 : vector<48x1xi1>
    %cst_87 = arith.constant 0.000000e+00 : f32
    %167 = vector.shape_cast %166 : vector<48x1xi1> to vector<48x1xi1>
    %168 = vector.broadcast %167 : vector<48x1xi1> to vector<48x8xi1>
    %169 = vector.broadcast %cst_87 : f32 to vector<48x8xf32>
    %170 = arith.select %168, %144, %169 : vector<48x8xi1>, vector<48x8xf32>
    %c7 = arith.constant 7 : index
    %c0_88 = arith.constant 0 : index
    %c0_89 = arith.constant 0 : index
    %171 = vector.load %arg7[%c7, %c0_88, %c0_89] : memref<21x8x8xf32, #tpu.memory_space<vmem>>, vector<1x8x8xf32>
    %172 = vector.shape_cast %171 : vector<1x8x8xf32> to vector<8x8xf32>
    %cst_90 = arith.constant dense<0.000000e+00> : vector<48x8xf32>
    %173 = tpu.matmul %170, %172, %cst_90 {dimension_numbers = #tpu.dot_dimension_numbers<[1], [0], [0], [1], [0, 0, 1, 1], [], []>} : vector<48x8xf32>, vector<8x8xf32>, vector<48x8xf32> -> vector<48x8xf32>
    %174 = arith.addf %159, %173 : vector<48x8xf32>
    %c46_i32_91 = arith.constant 46 : i32
    %175 = tpu.dynamic_rotate %144 by %c46_i32_91 dim 0 : vector<48x8xf32>, i32 -> vector<48x8xf32>
    %c14_i32_92 = arith.constant 14 : i32
    %176 = arith.subi %c14_i32_92, %0 : i32
    %177 = vector.broadcast %176 : i32 to vector<48x1xi32>
    %178 = arith.cmpi sge, %17, %177 : vector<48x1xi32>
    %c40_i32_93 = arith.constant 40 : i32
    %179 = arith.addi %176, %c40_i32_93 : i32
    %180 = vector.broadcast %179 : i32 to vector<48x1xi32>
    %181 = arith.cmpi slt, %17, %180 : vector<48x1xi32>
    %182 = arith.andi %178, %181 : vector<48x1xi1>
    %cst_94 = arith.constant 0.000000e+00 : f32
    %183 = vector.shape_cast %182 : vector<48x1xi1> to vector<48x1xi1>
    %184 = vector.broadcast %183 : vector<48x1xi1> to vector<48x8xi1>
    %185 = vector.broadcast %cst_94 : f32 to vector<48x8xf32>
    %186 = arith.select %184, %175, %185 : vector<48x8xi1>, vector<48x8xf32>
    %c8_95 = arith.constant 8 : index
    %c0_96 = arith.constant 0 : index
    %c0_97 = arith.constant 0 : index
    %187 = vector.load %arg7[%c8_95, %c0_96, %c0_97] : memref<21x8x8xf32, #tpu.memory_space<vmem>>, vector<1x8x8xf32>
    %188 = vector.shape_cast %187 : vector<1x8x8xf32> to vector<8x8xf32>
    %cst_98 = arith.constant dense<0.000000e+00> : vector<48x8xf32>
    %189 = tpu.matmul %186, %188, %cst_98 {dimension_numbers = #tpu.dot_dimension_numbers<[1], [0], [0], [1], [0, 0, 1, 1], [], []>} : vector<48x8xf32>, vector<8x8xf32>, vector<48x8xf32> -> vector<48x8xf32>
    %190 = arith.addf %174, %189 : vector<48x8xf32>
    %c2_99 = arith.constant 2 : index
    %c0_100 = arith.constant 0 : index
    %c0_101 = arith.constant 0 : index
    %191 = vector.load %arg8[%c2_99, %c0_100, %c0_101] : memref<7x1x8xf32, #tpu.memory_space<vmem>>, vector<1x1x8xf32>
    %192 = vector.shape_cast %191 : vector<1x1x8xf32> to vector<1x8xf32>
    %193 = vector.broadcast %192 : vector<1x8xf32> to vector<48x8xf32>
    %194 = arith.addf %190, %193 : vector<48x8xf32>
    %cst_102 = arith.constant 0.000000e+00 : f32
    %195 = vector.broadcast %cst_102 : f32 to vector<48x8xf32>
    %196 = arith.maximumf %194, %195 : vector<48x8xf32>
    %c2_103 = arith.constant 2 : index
    %c0_104 = arith.constant 0 : index
    %c0_105 = arith.constant 0 : index
    %197 = vector.load %arg9[%c2_103, %c0_104, %c0_105] : memref<7x1x8xf32, #tpu.memory_space<vmem>>, vector<1x1x8xf32>
    %198 = vector.shape_cast %197 : vector<1x1x8xf32> to vector<1x8xf32>
    %199 = vector.broadcast %198 : vector<1x8xf32> to vector<48x8xf32>
    %200 = arith.mulf %196, %199 : vector<48x8xf32>
    %c2_106 = arith.constant 2 : index
    %c0_107 = arith.constant 0 : index
    %c0_108 = arith.constant 0 : index
    %201 = vector.load %arg10[%c2_106, %c0_107, %c0_108] : memref<7x1x8xf32, #tpu.memory_space<vmem>>, vector<1x1x8xf32>
    %202 = vector.shape_cast %201 : vector<1x1x8xf32> to vector<1x8xf32>
    %203 = vector.broadcast %202 : vector<1x8xf32> to vector<48x8xf32>
    %204 = arith.addf %200, %203 : vector<48x8xf32>
    %c0_109 = arith.constant 0 : index
    %c16_110 = arith.constant 16 : index
    %205 = vector.load %arg17[%c0_109, %c16_110] : memref<48x64xf32, #tpu.memory_space<vmem>>, vector<48x8xf32>
    tpu.vector_store %arg17[%c0_109, %c16_110], %204 {strides = array<i32>} : memref<48x64xf32, #tpu.memory_space<vmem>>, vector<48x8xf32>,
    %c0_111 = arith.constant 0 : index
    %c24 = arith.constant 24 : index
    %206 = vector.load %arg17[%c0_111, %c24] : memref<48x64xf32, #tpu.memory_space<vmem>>, vector<48x8xf32>
    %207 = arith.addf %204, %206 : vector<48x8xf32>
    %c2_i32_112 = arith.constant 2 : i32
    %208 = tpu.dynamic_rotate %207 by %c2_i32_112 dim 0 : vector<48x8xf32>, i32 -> vector<48x8xf32>
    %c18_i32_113 = arith.constant 18 : i32
    %209 = arith.subi %c18_i32_113, %0 : i32
    %210 = vector.broadcast %209 : i32 to vector<48x1xi32>
    %211 = arith.cmpi sge, %17, %210 : vector<48x1xi32>
    %c40_i32_114 = arith.constant 40 : i32
    %212 = arith.addi %209, %c40_i32_114 : i32
    %213 = vector.broadcast %212 : i32 to vector<48x1xi32>
    %214 = arith.cmpi slt, %17, %213 : vector<48x1xi32>
    %215 = arith.andi %211, %214 : vector<48x1xi1>
    %cst_115 = arith.constant 0.000000e+00 : f32
    %216 = vector.shape_cast %215 : vector<48x1xi1> to vector<48x1xi1>
    %217 = vector.broadcast %216 : vector<48x1xi1> to vector<48x8xi1>
    %218 = vector.broadcast %cst_115 : f32 to vector<48x8xf32>
    %219 = arith.select %217, %208, %218 : vector<48x8xi1>, vector<48x8xf32>
    %c9 = arith.constant 9 : index
    %c0_116 = arith.constant 0 : index
    %c0_117 = arith.constant 0 : index
    %220 = vector.load %arg7[%c9, %c0_116, %c0_117] : memref<21x8x8xf32, #tpu.memory_space<vmem>>, vector<1x8x8xf32>
    %221 = vector.shape_cast %220 : vector<1x8x8xf32> to vector<8x8xf32>
    %cst_118 = arith.constant dense<0.000000e+00> : vector<48x8xf32>
    %222 = tpu.matmul %219, %221, %cst_118 {dimension_numbers = #tpu.dot_dimension_numbers<[1], [0], [0], [1], [0, 0, 1, 1], [], []>} : vector<48x8xf32>, vector<8x8xf32>, vector<48x8xf32> -> vector<48x8xf32>
    %c16_i32_119 = arith.constant 16 : i32
    %223 = arith.subi %c16_i32_119, %0 : i32
    %224 = vector.broadcast %223 : i32 to vector<48x1xi32>
    %225 = arith.cmpi sge, %17, %224 : vector<48x1xi32>
    %c40_i32_120 = arith.constant 40 : i32
    %226 = arith.addi %223, %c40_i32_120 : i32
    %227 = vector.broadcast %226 : i32 to vector<48x1xi32>
    %228 = arith.cmpi slt, %17, %227 : vector<48x1xi32>
    %229 = arith.andi %225, %228 : vector<48x1xi1>
    %cst_121 = arith.constant 0.000000e+00 : f32
    %230 = vector.shape_cast %229 : vector<48x1xi1> to vector<48x1xi1>
    %231 = vector.broadcast %230 : vector<48x1xi1> to vector<48x8xi1>
    %232 = vector.broadcast %cst_121 : f32 to vector<48x8xf32>
    %233 = arith.select %231, %207, %232 : vector<48x8xi1>, vector<48x8xf32>
    %c10 = arith.constant 10 : index
    %c0_122 = arith.constant 0 : index
    %c0_123 = arith.constant 0 : index
    %234 = vector.load %arg7[%c10, %c0_122, %c0_123] : memref<21x8x8xf32, #tpu.memory_space<vmem>>, vector<1x8x8xf32>
    %235 = vector.shape_cast %234 : vector<1x8x8xf32> to vector<8x8xf32>
    %cst_124 = arith.constant dense<0.000000e+00> : vector<48x8xf32>
    %236 = tpu.matmul %233, %235, %cst_124 {dimension_numbers = #tpu.dot_dimension_numbers<[1], [0], [0], [1], [0, 0, 1, 1], [], []>} : vector<48x8xf32>, vector<8x8xf32>, vector<48x8xf32> -> vector<48x8xf32>
    %237 = arith.addf %222, %236 : vector<48x8xf32>
    %c46_i32_125 = arith.constant 46 : i32
    %238 = tpu.dynamic_rotate %207 by %c46_i32_125 dim 0 : vector<48x8xf32>, i32 -> vector<48x8xf32>
    %c14_i32_126 = arith.constant 14 : i32
    %239 = arith.subi %c14_i32_126, %0 : i32
    %240 = vector.broadcast %239 : i32 to vector<48x1xi32>
    %241 = arith.cmpi sge, %17, %240 : vector<48x1xi32>
    %c40_i32_127 = arith.constant 40 : i32
    %242 = arith.addi %239, %c40_i32_127 : i32
    %243 = vector.broadcast %242 : i32 to vector<48x1xi32>
    %244 = arith.cmpi slt, %17, %243 : vector<48x1xi32>
    %245 = arith.andi %241, %244 : vector<48x1xi1>
    %cst_128 = arith.constant 0.000000e+00 : f32
    %246 = vector.shape_cast %245 : vector<48x1xi1> to vector<48x1xi1>
    %247 = vector.broadcast %246 : vector<48x1xi1> to vector<48x8xi1>
    %248 = vector.broadcast %cst_128 : f32 to vector<48x8xf32>
    %249 = arith.select %247, %238, %248 : vector<48x8xi1>, vector<48x8xf32>
    %c11 = arith.constant 11 : index
    %c0_129 = arith.constant 0 : index
    %c0_130 = arith.constant 0 : index
    %250 = vector.load %arg7[%c11, %c0_129, %c0_130] : memref<21x8x8xf32, #tpu.memory_space<vmem>>, vector<1x8x8xf32>
    %251 = vector.shape_cast %250 : vector<1x8x8xf32> to vector<8x8xf32>
    %cst_131 = arith.constant dense<0.000000e+00> : vector<48x8xf32>
    %252 = tpu.matmul %249, %251, %cst_131 {dimension_numbers = #tpu.dot_dimension_numbers<[1], [0], [0], [1], [0, 0, 1, 1], [], []>} : vector<48x8xf32>, vector<8x8xf32>, vector<48x8xf32> -> vector<48x8xf32>
    %253 = arith.addf %237, %252 : vector<48x8xf32>
    %c3_132 = arith.constant 3 : index
    %c0_133 = arith.constant 0 : index
    %c0_134 = arith.constant 0 : index
    %254 = vector.load %arg8[%c3_132, %c0_133, %c0_134] : memref<7x1x8xf32, #tpu.memory_space<vmem>>, vector<1x1x8xf32>
    %255 = vector.shape_cast %254 : vector<1x1x8xf32> to vector<1x8xf32>
    %256 = vector.broadcast %255 : vector<1x8xf32> to vector<48x8xf32>
    %257 = arith.addf %253, %256 : vector<48x8xf32>
    %cst_135 = arith.constant 0.000000e+00 : f32
    %258 = vector.broadcast %cst_135 : f32 to vector<48x8xf32>
    %259 = arith.maximumf %257, %258 : vector<48x8xf32>
    %c3_136 = arith.constant 3 : index
    %c0_137 = arith.constant 0 : index
    %c0_138 = arith.constant 0 : index
    %260 = vector.load %arg9[%c3_136, %c0_137, %c0_138] : memref<7x1x8xf32, #tpu.memory_space<vmem>>, vector<1x1x8xf32>
    %261 = vector.shape_cast %260 : vector<1x1x8xf32> to vector<1x8xf32>
    %262 = vector.broadcast %261 : vector<1x8xf32> to vector<48x8xf32>
    %263 = arith.mulf %259, %262 : vector<48x8xf32>
    %c3_139 = arith.constant 3 : index
    %c0_140 = arith.constant 0 : index
    %c0_141 = arith.constant 0 : index
    %264 = vector.load %arg10[%c3_139, %c0_140, %c0_141] : memref<7x1x8xf32, #tpu.memory_space<vmem>>, vector<1x1x8xf32>
    %265 = vector.shape_cast %264 : vector<1x1x8xf32> to vector<1x8xf32>
    %266 = vector.broadcast %265 : vector<1x8xf32> to vector<48x8xf32>
    %267 = arith.addf %263, %266 : vector<48x8xf32>
    %c0_142 = arith.constant 0 : index
    %c24_143 = arith.constant 24 : index
    %268 = vector.load %arg17[%c0_142, %c24_143] : memref<48x64xf32, #tpu.memory_space<vmem>>, vector<48x8xf32>
    tpu.vector_store %arg17[%c0_142, %c24_143], %267 {strides = array<i32>} : memref<48x64xf32, #tpu.memory_space<vmem>>, vector<48x8xf32>,
    %c0_144 = arith.constant 0 : index
    %c32 = arith.constant 32 : index
    %269 = vector.load %arg17[%c0_144, %c32] : memref<48x64xf32, #tpu.memory_space<vmem>>, vector<48x8xf32>
    %270 = arith.addf %267, %269 : vector<48x8xf32>
    %c2_i32_145 = arith.constant 2 : i32
    %271 = tpu.dynamic_rotate %270 by %c2_i32_145 dim 0 : vector<48x8xf32>, i32 -> vector<48x8xf32>
    %c18_i32_146 = arith.constant 18 : i32
    %272 = arith.subi %c18_i32_146, %0 : i32
    %273 = vector.broadcast %272 : i32 to vector<48x1xi32>
    %274 = arith.cmpi sge, %17, %273 : vector<48x1xi32>
    %c40_i32_147 = arith.constant 40 : i32
    %275 = arith.addi %272, %c40_i32_147 : i32
    %276 = vector.broadcast %275 : i32 to vector<48x1xi32>
    %277 = arith.cmpi slt, %17, %276 : vector<48x1xi32>
    %278 = arith.andi %274, %277 : vector<48x1xi1>
    %cst_148 = arith.constant 0.000000e+00 : f32
    %279 = vector.shape_cast %278 : vector<48x1xi1> to vector<48x1xi1>
    %280 = vector.broadcast %279 : vector<48x1xi1> to vector<48x8xi1>
    %281 = vector.broadcast %cst_148 : f32 to vector<48x8xf32>
    %282 = arith.select %280, %271, %281 : vector<48x8xi1>, vector<48x8xf32>
    %c12 = arith.constant 12 : index
    %c0_149 = arith.constant 0 : index
    %c0_150 = arith.constant 0 : index
    %283 = vector.load %arg7[%c12, %c0_149, %c0_150] : memref<21x8x8xf32, #tpu.memory_space<vmem>>, vector<1x8x8xf32>
    %284 = vector.shape_cast %283 : vector<1x8x8xf32> to vector<8x8xf32>
    %cst_151 = arith.constant dense<0.000000e+00> : vector<48x8xf32>
    %285 = tpu.matmul %282, %284, %cst_151 {dimension_numbers = #tpu.dot_dimension_numbers<[1], [0], [0], [1], [0, 0, 1, 1], [], []>} : vector<48x8xf32>, vector<8x8xf32>, vector<48x8xf32> -> vector<48x8xf32>
    %c16_i32_152 = arith.constant 16 : i32
    %286 = arith.subi %c16_i32_152, %0 : i32
    %287 = vector.broadcast %286 : i32 to vector<48x1xi32>
    %288 = arith.cmpi sge, %17, %287 : vector<48x1xi32>
    %c40_i32_153 = arith.constant 40 : i32
    %289 = arith.addi %286, %c40_i32_153 : i32
    %290 = vector.broadcast %289 : i32 to vector<48x1xi32>
    %291 = arith.cmpi slt, %17, %290 : vector<48x1xi32>
    %292 = arith.andi %288, %291 : vector<48x1xi1>
    %cst_154 = arith.constant 0.000000e+00 : f32
    %293 = vector.shape_cast %292 : vector<48x1xi1> to vector<48x1xi1>
    %294 = vector.broadcast %293 : vector<48x1xi1> to vector<48x8xi1>
    %295 = vector.broadcast %cst_154 : f32 to vector<48x8xf32>
    %296 = arith.select %294, %270, %295 : vector<48x8xi1>, vector<48x8xf32>
    %c13 = arith.constant 13 : index
    %c0_155 = arith.constant 0 : index
    %c0_156 = arith.constant 0 : index
    %297 = vector.load %arg7[%c13, %c0_155, %c0_156] : memref<21x8x8xf32, #tpu.memory_space<vmem>>, vector<1x8x8xf32>
    %298 = vector.shape_cast %297 : vector<1x8x8xf32> to vector<8x8xf32>
    %cst_157 = arith.constant dense<0.000000e+00> : vector<48x8xf32>
    %299 = tpu.matmul %296, %298, %cst_157 {dimension_numbers = #tpu.dot_dimension_numbers<[1], [0], [0], [1], [0, 0, 1, 1], [], []>} : vector<48x8xf32>, vector<8x8xf32>, vector<48x8xf32> -> vector<48x8xf32>
    %300 = arith.addf %285, %299 : vector<48x8xf32>
    %c46_i32_158 = arith.constant 46 : i32
    %301 = tpu.dynamic_rotate %270 by %c46_i32_158 dim 0 : vector<48x8xf32>, i32 -> vector<48x8xf32>
    %c14_i32_159 = arith.constant 14 : i32
    %302 = arith.subi %c14_i32_159, %0 : i32
    %303 = vector.broadcast %302 : i32 to vector<48x1xi32>
    %304 = arith.cmpi sge, %17, %303 : vector<48x1xi32>
    %c40_i32_160 = arith.constant 40 : i32
    %305 = arith.addi %302, %c40_i32_160 : i32
    %306 = vector.broadcast %305 : i32 to vector<48x1xi32>
    %307 = arith.cmpi slt, %17, %306 : vector<48x1xi32>
    %308 = arith.andi %304, %307 : vector<48x1xi1>
    %cst_161 = arith.constant 0.000000e+00 : f32
    %309 = vector.shape_cast %308 : vector<48x1xi1> to vector<48x1xi1>
    %310 = vector.broadcast %309 : vector<48x1xi1> to vector<48x8xi1>
    %311 = vector.broadcast %cst_161 : f32 to vector<48x8xf32>
    %312 = arith.select %310, %301, %311 : vector<48x8xi1>, vector<48x8xf32>
    %c14 = arith.constant 14 : index
    %c0_162 = arith.constant 0 : index
    %c0_163 = arith.constant 0 : index
    %313 = vector.load %arg7[%c14, %c0_162, %c0_163] : memref<21x8x8xf32, #tpu.memory_space<vmem>>, vector<1x8x8xf32>
    %314 = vector.shape_cast %313 : vector<1x8x8xf32> to vector<8x8xf32>
    %cst_164 = arith.constant dense<0.000000e+00> : vector<48x8xf32>
    %315 = tpu.matmul %312, %314, %cst_164 {dimension_numbers = #tpu.dot_dimension_numbers<[1], [0], [0], [1], [0, 0, 1, 1], [], []>} : vector<48x8xf32>, vector<8x8xf32>, vector<48x8xf32> -> vector<48x8xf32>
    %316 = arith.addf %300, %315 : vector<48x8xf32>
    %c4_165 = arith.constant 4 : index
    %c0_166 = arith.constant 0 : index
    %c0_167 = arith.constant 0 : index
    %317 = vector.load %arg8[%c4_165, %c0_166, %c0_167] : memref<7x1x8xf32, #tpu.memory_space<vmem>>, vector<1x1x8xf32>
    %318 = vector.shape_cast %317 : vector<1x1x8xf32> to vector<1x8xf32>
    %319 = vector.broadcast %318 : vector<1x8xf32> to vector<48x8xf32>
    %320 = arith.addf %316, %319 : vector<48x8xf32>
    %cst_168 = arith.constant 0.000000e+00 : f32
    %321 = vector.broadcast %cst_168 : f32 to vector<48x8xf32>
    %322 = arith.maximumf %320, %321 : vector<48x8xf32>
    %c4_169 = arith.constant 4 : index
    %c0_170 = arith.constant 0 : index
    %c0_171 = arith.constant 0 : index
    %323 = vector.load %arg9[%c4_169, %c0_170, %c0_171] : memref<7x1x8xf32, #tpu.memory_space<vmem>>, vector<1x1x8xf32>
    %324 = vector.shape_cast %323 : vector<1x1x8xf32> to vector<1x8xf32>
    %325 = vector.broadcast %324 : vector<1x8xf32> to vector<48x8xf32>
    %326 = arith.mulf %322, %325 : vector<48x8xf32>
    %c4_172 = arith.constant 4 : index
    %c0_173 = arith.constant 0 : index
    %c0_174 = arith.constant 0 : index
    %327 = vector.load %arg10[%c4_172, %c0_173, %c0_174] : memref<7x1x8xf32, #tpu.memory_space<vmem>>, vector<1x1x8xf32>
    %328 = vector.shape_cast %327 : vector<1x1x8xf32> to vector<1x8xf32>
    %329 = vector.broadcast %328 : vector<1x8xf32> to vector<48x8xf32>
    %330 = arith.addf %326, %329 : vector<48x8xf32>
    %c0_175 = arith.constant 0 : index
    %c32_176 = arith.constant 32 : index
    %331 = vector.load %arg17[%c0_175, %c32_176] : memref<48x64xf32, #tpu.memory_space<vmem>>, vector<48x8xf32>
    tpu.vector_store %arg17[%c0_175, %c32_176], %330 {strides = array<i32>} : memref<48x64xf32, #tpu.memory_space<vmem>>, vector<48x8xf32>,
    %c0_177 = arith.constant 0 : index
    %c40 = arith.constant 40 : index
    %332 = vector.load %arg17[%c0_177, %c40] : memref<48x64xf32, #tpu.memory_space<vmem>>, vector<48x8xf32>
    %333 = arith.addf %330, %332 : vector<48x8xf32>
    %c2_i32_178 = arith.constant 2 : i32
    %334 = tpu.dynamic_rotate %333 by %c2_i32_178 dim 0 : vector<48x8xf32>, i32 -> vector<48x8xf32>
    %c18_i32_179 = arith.constant 18 : i32
    %335 = arith.subi %c18_i32_179, %0 : i32
    %336 = vector.broadcast %335 : i32 to vector<48x1xi32>
    %337 = arith.cmpi sge, %17, %336 : vector<48x1xi32>
    %c40_i32_180 = arith.constant 40 : i32
    %338 = arith.addi %335, %c40_i32_180 : i32
    %339 = vector.broadcast %338 : i32 to vector<48x1xi32>
    %340 = arith.cmpi slt, %17, %339 : vector<48x1xi32>
    %341 = arith.andi %337, %340 : vector<48x1xi1>
    %cst_181 = arith.constant 0.000000e+00 : f32
    %342 = vector.shape_cast %341 : vector<48x1xi1> to vector<48x1xi1>
    %343 = vector.broadcast %342 : vector<48x1xi1> to vector<48x8xi1>
    %344 = vector.broadcast %cst_181 : f32 to vector<48x8xf32>
    %345 = arith.select %343, %334, %344 : vector<48x8xi1>, vector<48x8xf32>
    %c15 = arith.constant 15 : index
    %c0_182 = arith.constant 0 : index
    %c0_183 = arith.constant 0 : index
    %346 = vector.load %arg7[%c15, %c0_182, %c0_183] : memref<21x8x8xf32, #tpu.memory_space<vmem>>, vector<1x8x8xf32>
    %347 = vector.shape_cast %346 : vector<1x8x8xf32> to vector<8x8xf32>
    %cst_184 = arith.constant dense<0.000000e+00> : vector<48x8xf32>
    %348 = tpu.matmul %345, %347, %cst_184 {dimension_numbers = #tpu.dot_dimension_numbers<[1], [0], [0], [1], [0, 0, 1, 1], [], []>} : vector<48x8xf32>, vector<8x8xf32>, vector<48x8xf32> -> vector<48x8xf32>
    %c16_i32_185 = arith.constant 16 : i32
    %349 = arith.subi %c16_i32_185, %0 : i32
    %350 = vector.broadcast %349 : i32 to vector<48x1xi32>
    %351 = arith.cmpi sge, %17, %350 : vector<48x1xi32>
    %c40_i32_186 = arith.constant 40 : i32
    %352 = arith.addi %349, %c40_i32_186 : i32
    %353 = vector.broadcast %352 : i32 to vector<48x1xi32>
    %354 = arith.cmpi slt, %17, %353 : vector<48x1xi32>
    %355 = arith.andi %351, %354 : vector<48x1xi1>
    %cst_187 = arith.constant 0.000000e+00 : f32
    %356 = vector.shape_cast %355 : vector<48x1xi1> to vector<48x1xi1>
    %357 = vector.broadcast %356 : vector<48x1xi1> to vector<48x8xi1>
    %358 = vector.broadcast %cst_187 : f32 to vector<48x8xf32>
    %359 = arith.select %357, %333, %358 : vector<48x8xi1>, vector<48x8xf32>
    %c16_188 = arith.constant 16 : index
    %c0_189 = arith.constant 0 : index
    %c0_190 = arith.constant 0 : index
    %360 = vector.load %arg7[%c16_188, %c0_189, %c0_190] : memref<21x8x8xf32, #tpu.memory_space<vmem>>, vector<1x8x8xf32>
    %361 = vector.shape_cast %360 : vector<1x8x8xf32> to vector<8x8xf32>
    %cst_191 = arith.constant dense<0.000000e+00> : vector<48x8xf32>
    %362 = tpu.matmul %359, %361, %cst_191 {dimension_numbers = #tpu.dot_dimension_numbers<[1], [0], [0], [1], [0, 0, 1, 1], [], []>} : vector<48x8xf32>, vector<8x8xf32>, vector<48x8xf32> -> vector<48x8xf32>
    %363 = arith.addf %348, %362 : vector<48x8xf32>
    %c46_i32_192 = arith.constant 46 : i32
    %364 = tpu.dynamic_rotate %333 by %c46_i32_192 dim 0 : vector<48x8xf32>, i32 -> vector<48x8xf32>
    %c14_i32_193 = arith.constant 14 : i32
    %365 = arith.subi %c14_i32_193, %0 : i32
    %366 = vector.broadcast %365 : i32 to vector<48x1xi32>
    %367 = arith.cmpi sge, %17, %366 : vector<48x1xi32>
    %c40_i32_194 = arith.constant 40 : i32
    %368 = arith.addi %365, %c40_i32_194 : i32
    %369 = vector.broadcast %368 : i32 to vector<48x1xi32>
    %370 = arith.cmpi slt, %17, %369 : vector<48x1xi32>
    %371 = arith.andi %367, %370 : vector<48x1xi1>
    %cst_195 = arith.constant 0.000000e+00 : f32
    %372 = vector.shape_cast %371 : vector<48x1xi1> to vector<48x1xi1>
    %373 = vector.broadcast %372 : vector<48x1xi1> to vector<48x8xi1>
    %374 = vector.broadcast %cst_195 : f32 to vector<48x8xf32>
    %375 = arith.select %373, %364, %374 : vector<48x8xi1>, vector<48x8xf32>
    %c17 = arith.constant 17 : index
    %c0_196 = arith.constant 0 : index
    %c0_197 = arith.constant 0 : index
    %376 = vector.load %arg7[%c17, %c0_196, %c0_197] : memref<21x8x8xf32, #tpu.memory_space<vmem>>, vector<1x8x8xf32>
    %377 = vector.shape_cast %376 : vector<1x8x8xf32> to vector<8x8xf32>
    %cst_198 = arith.constant dense<0.000000e+00> : vector<48x8xf32>
    %378 = tpu.matmul %375, %377, %cst_198 {dimension_numbers = #tpu.dot_dimension_numbers<[1], [0], [0], [1], [0, 0, 1, 1], [], []>} : vector<48x8xf32>, vector<8x8xf32>, vector<48x8xf32> -> vector<48x8xf32>
    %379 = arith.addf %363, %378 : vector<48x8xf32>
    %c5_199 = arith.constant 5 : index
    %c0_200 = arith.constant 0 : index
    %c0_201 = arith.constant 0 : index
    %380 = vector.load %arg8[%c5_199, %c0_200, %c0_201] : memref<7x1x8xf32, #tpu.memory_space<vmem>>, vector<1x1x8xf32>
    %381 = vector.shape_cast %380 : vector<1x1x8xf32> to vector<1x8xf32>
    %382 = vector.broadcast %381 : vector<1x8xf32> to vector<48x8xf32>
    %383 = arith.addf %379, %382 : vector<48x8xf32>
    %cst_202 = arith.constant 0.000000e+00 : f32
    %384 = vector.broadcast %cst_202 : f32 to vector<48x8xf32>
    %385 = arith.maximumf %383, %384 : vector<48x8xf32>
    %c5_203 = arith.constant 5 : index
    %c0_204 = arith.constant 0 : index
    %c0_205 = arith.constant 0 : index
    %386 = vector.load %arg9[%c5_203, %c0_204, %c0_205] : memref<7x1x8xf32, #tpu.memory_space<vmem>>, vector<1x1x8xf32>
    %387 = vector.shape_cast %386 : vector<1x1x8xf32> to vector<1x8xf32>
    %388 = vector.broadcast %387 : vector<1x8xf32> to vector<48x8xf32>
    %389 = arith.mulf %385, %388 : vector<48x8xf32>
    %c5_206 = arith.constant 5 : index
    %c0_207 = arith.constant 0 : index
    %c0_208 = arith.constant 0 : index
    %390 = vector.load %arg10[%c5_206, %c0_207, %c0_208] : memref<7x1x8xf32, #tpu.memory_space<vmem>>, vector<1x1x8xf32>
    %391 = vector.shape_cast %390 : vector<1x1x8xf32> to vector<1x8xf32>
    %392 = vector.broadcast %391 : vector<1x8xf32> to vector<48x8xf32>
    %393 = arith.addf %389, %392 : vector<48x8xf32>
    %c0_209 = arith.constant 0 : index
    %c40_210 = arith.constant 40 : index
    %394 = vector.load %arg17[%c0_209, %c40_210] : memref<48x64xf32, #tpu.memory_space<vmem>>, vector<48x8xf32>
    tpu.vector_store %arg17[%c0_209, %c40_210], %393 {strides = array<i32>} : memref<48x64xf32, #tpu.memory_space<vmem>>, vector<48x8xf32>,
    %c0_211 = arith.constant 0 : index
    %c48 = arith.constant 48 : index
    %395 = vector.load %arg17[%c0_211, %c48] : memref<48x64xf32, #tpu.memory_space<vmem>>, vector<48x8xf32>
    %396 = arith.addf %393, %395 : vector<48x8xf32>
    %c2_i32_212 = arith.constant 2 : i32
    %397 = tpu.dynamic_rotate %396 by %c2_i32_212 dim 0 : vector<48x8xf32>, i32 -> vector<48x8xf32>
    %c18_i32_213 = arith.constant 18 : i32
    %398 = arith.subi %c18_i32_213, %0 : i32
    %399 = vector.broadcast %398 : i32 to vector<48x1xi32>
    %400 = arith.cmpi sge, %17, %399 : vector<48x1xi32>
    %c40_i32_214 = arith.constant 40 : i32
    %401 = arith.addi %398, %c40_i32_214 : i32
    %402 = vector.broadcast %401 : i32 to vector<48x1xi32>
    %403 = arith.cmpi slt, %17, %402 : vector<48x1xi32>
    %404 = arith.andi %400, %403 : vector<48x1xi1>
    %cst_215 = arith.constant 0.000000e+00 : f32
    %405 = vector.shape_cast %404 : vector<48x1xi1> to vector<48x1xi1>
    %406 = vector.broadcast %405 : vector<48x1xi1> to vector<48x8xi1>
    %407 = vector.broadcast %cst_215 : f32 to vector<48x8xf32>
    %408 = arith.select %406, %397, %407 : vector<48x8xi1>, vector<48x8xf32>
    %c18 = arith.constant 18 : index
    %c0_216 = arith.constant 0 : index
    %c0_217 = arith.constant 0 : index
    %409 = vector.load %arg7[%c18, %c0_216, %c0_217] : memref<21x8x8xf32, #tpu.memory_space<vmem>>, vector<1x8x8xf32>
    %410 = vector.shape_cast %409 : vector<1x8x8xf32> to vector<8x8xf32>
    %cst_218 = arith.constant dense<0.000000e+00> : vector<48x8xf32>
    %411 = tpu.matmul %408, %410, %cst_218 {dimension_numbers = #tpu.dot_dimension_numbers<[1], [0], [0], [1], [0, 0, 1, 1], [], []>} : vector<48x8xf32>, vector<8x8xf32>, vector<48x8xf32> -> vector<48x8xf32>
    %c16_i32_219 = arith.constant 16 : i32
    %412 = arith.subi %c16_i32_219, %0 : i32
    %413 = vector.broadcast %412 : i32 to vector<48x1xi32>
    %414 = arith.cmpi sge, %17, %413 : vector<48x1xi32>
    %c40_i32_220 = arith.constant 40 : i32
    %415 = arith.addi %412, %c40_i32_220 : i32
    %416 = vector.broadcast %415 : i32 to vector<48x1xi32>
    %417 = arith.cmpi slt, %17, %416 : vector<48x1xi32>
    %418 = arith.andi %414, %417 : vector<48x1xi1>
    %cst_221 = arith.constant 0.000000e+00 : f32
    %419 = vector.shape_cast %418 : vector<48x1xi1> to vector<48x1xi1>
    %420 = vector.broadcast %419 : vector<48x1xi1> to vector<48x8xi1>
    %421 = vector.broadcast %cst_221 : f32 to vector<48x8xf32>
    %422 = arith.select %420, %396, %421 : vector<48x8xi1>, vector<48x8xf32>
    %c19 = arith.constant 19 : index
    %c0_222 = arith.constant 0 : index
    %c0_223 = arith.constant 0 : index
    %423 = vector.load %arg7[%c19, %c0_222, %c0_223] : memref<21x8x8xf32, #tpu.memory_space<vmem>>, vector<1x8x8xf32>
    %424 = vector.shape_cast %423 : vector<1x8x8xf32> to vector<8x8xf32>
    %cst_224 = arith.constant dense<0.000000e+00> : vector<48x8xf32>
    %425 = tpu.matmul %422, %424, %cst_224 {dimension_numbers = #tpu.dot_dimension_numbers<[1], [0], [0], [1], [0, 0, 1, 1], [], []>} : vector<48x8xf32>, vector<8x8xf32>, vector<48x8xf32> -> vector<48x8xf32>
    %426 = arith.addf %411, %425 : vector<48x8xf32>
    %c46_i32_225 = arith.constant 46 : i32
    %427 = tpu.dynamic_rotate %396 by %c46_i32_225 dim 0 : vector<48x8xf32>, i32 -> vector<48x8xf32>
    %c14_i32_226 = arith.constant 14 : i32
    %428 = arith.subi %c14_i32_226, %0 : i32
    %429 = vector.broadcast %428 : i32 to vector<48x1xi32>
    %430 = arith.cmpi sge, %17, %429 : vector<48x1xi32>
    %c40_i32_227 = arith.constant 40 : i32
    %431 = arith.addi %428, %c40_i32_227 : i32
    %432 = vector.broadcast %431 : i32 to vector<48x1xi32>
    %433 = arith.cmpi slt, %17, %432 : vector<48x1xi32>
    %434 = arith.andi %430, %433 : vector<48x1xi1>
    %cst_228 = arith.constant 0.000000e+00 : f32
    %435 = vector.shape_cast %434 : vector<48x1xi1> to vector<48x1xi1>
    %436 = vector.broadcast %435 : vector<48x1xi1> to vector<48x8xi1>
    %437 = vector.broadcast %cst_228 : f32 to vector<48x8xf32>
    %438 = arith.select %436, %427, %437 : vector<48x8xi1>, vector<48x8xf32>
    %c20 = arith.constant 20 : index
    %c0_229 = arith.constant 0 : index
    %c0_230 = arith.constant 0 : index
    %439 = vector.load %arg7[%c20, %c0_229, %c0_230] : memref<21x8x8xf32, #tpu.memory_space<vmem>>, vector<1x8x8xf32>
    %440 = vector.shape_cast %439 : vector<1x8x8xf32> to vector<8x8xf32>
    %cst_231 = arith.constant dense<0.000000e+00> : vector<48x8xf32>
    %441 = tpu.matmul %438, %440, %cst_231 {dimension_numbers = #tpu.dot_dimension_numbers<[1], [0], [0], [1], [0, 0, 1, 1], [], []>} : vector<48x8xf32>, vector<8x8xf32>, vector<48x8xf32> -> vector<48x8xf32>
    %442 = arith.addf %426, %441 : vector<48x8xf32>
    %c6_232 = arith.constant 6 : index
    %c0_233 = arith.constant 0 : index
    %c0_234 = arith.constant 0 : index
    %443 = vector.load %arg8[%c6_232, %c0_233, %c0_234] : memref<7x1x8xf32, #tpu.memory_space<vmem>>, vector<1x1x8xf32>
    %444 = vector.shape_cast %443 : vector<1x1x8xf32> to vector<1x8xf32>
    %445 = vector.broadcast %444 : vector<1x8xf32> to vector<48x8xf32>
    %446 = arith.addf %442, %445 : vector<48x8xf32>
    %cst_235 = arith.constant 0.000000e+00 : f32
    %447 = vector.broadcast %cst_235 : f32 to vector<48x8xf32>
    %448 = arith.maximumf %446, %447 : vector<48x8xf32>
    %c6_236 = arith.constant 6 : index
    %c0_237 = arith.constant 0 : index
    %c0_238 = arith.constant 0 : index
    %449 = vector.load %arg9[%c6_236, %c0_237, %c0_238] : memref<7x1x8xf32, #tpu.memory_space<vmem>>, vector<1x1x8xf32>
    %450 = vector.shape_cast %449 : vector<1x1x8xf32> to vector<1x8xf32>
    %451 = vector.broadcast %450 : vector<1x8xf32> to vector<48x8xf32>
    %452 = arith.mulf %448, %451 : vector<48x8xf32>
    %c6_239 = arith.constant 6 : index
    %c0_240 = arith.constant 0 : index
    %c0_241 = arith.constant 0 : index
    %453 = vector.load %arg10[%c6_239, %c0_240, %c0_241] : memref<7x1x8xf32, #tpu.memory_space<vmem>>, vector<1x1x8xf32>
    %454 = vector.shape_cast %453 : vector<1x1x8xf32> to vector<1x8xf32>
    %455 = vector.broadcast %454 : vector<1x8xf32> to vector<48x8xf32>
    %456 = arith.addf %452, %455 : vector<48x8xf32>
    %c0_242 = arith.constant 0 : index
    %c48_243 = arith.constant 48 : index
    %457 = vector.load %arg17[%c0_242, %c48_243] : memref<48x64xf32, #tpu.memory_space<vmem>>, vector<48x8xf32>
    tpu.vector_store %arg17[%c0_242, %c48_243], %456 {strides = array<i32>} : memref<48x64xf32, #tpu.memory_space<vmem>>, vector<48x8xf32>,
    %c16_244 = arith.constant 16 : index
    %c0_245 = arith.constant 0 : index
    %458 = vector.load %arg17[%c16_244, %c0_245] : memref<48x64xf32, #tpu.memory_space<vmem>>, vector<16x64xf32>
    %c0_246 = arith.constant 0 : index
    %c0_247 = arith.constant 0 : index
    %459 = vector.load %arg11[%c0_246, %c0_247] : memref<64x64xf32, #tpu.memory_space<vmem>>, vector<64x64xf32>
    %cst_248 = arith.constant dense<0.000000e+00> : vector<16x64xf32>
    %460 = tpu.matmul %458, %459, %cst_248 {dimension_numbers = #tpu.dot_dimension_numbers<[1], [0], [0], [1], [0, 0, 1, 1], [], []>} : vector<16x64xf32>, vector<64x64xf32>, vector<16x64xf32> -> vector<16x64xf32>
    %c0_249 = arith.constant 0 : index
    %c0_250 = arith.constant 0 : index
    %461 = vector.load %arg12[%c0_249, %c0_250] : memref<1x64xf32, #tpu.memory_space<vmem>>, vector<1x64xf32>
    %462 = vector.broadcast %461 : vector<1x64xf32> to vector<16x64xf32>
    %463 = arith.addf %460, %462 : vector<16x64xf32>
    %cst_251 = arith.constant 0.000000e+00 : f32
    %464 = vector.broadcast %cst_251 : f32 to vector<16x64xf32>
    %465 = arith.maximumf %463, %464 : vector<16x64xf32>
    %c0_252 = arith.constant 0 : index
    %c0_253 = arith.constant 0 : index
    %466 = vector.load %arg13[%c0_252, %c0_253] : memref<1x64xf32, #tpu.memory_space<vmem>>, vector<1x64xf32>
    %467 = vector.broadcast %466 : vector<1x64xf32> to vector<16x64xf32>
    %468 = arith.mulf %465, %467 : vector<16x64xf32>
    %c0_254 = arith.constant 0 : index
    %c0_255 = arith.constant 0 : index
    %469 = vector.load %arg14[%c0_254, %c0_255] : memref<1x64xf32, #tpu.memory_space<vmem>>, vector<1x64xf32>
    %470 = vector.broadcast %469 : vector<1x64xf32> to vector<16x64xf32>
    %471 = arith.addf %468, %470 : vector<16x64xf32>
    %c0_256 = arith.constant 0 : index
    %c0_257 = arith.constant 0 : index
    %c0_258 = arith.constant 0 : index
    %472 = vector.load %arg15[%c0_256, %c0_257, %c0_258] : memref<1x16x64xf32, #tpu.memory_space<vmem>>, vector<1x16x64xf32>
    %473 = vector.shape_cast %472 : vector<1x16x64xf32> to vector<16x64xf32>
    %474 = vector.shape_cast %471 : vector<16x64xf32> to vector<1x16x64xf32>
    tpu.vector_store %arg15[%c0_256, %c0_257, %c0_258], %474 {strides = array<i32>} : memref<1x16x64xf32, #tpu.memory_space<vmem>>, vector<1x16x64xf32>,
    %475 = tpu.iota {dimensions = array<i32: 0>} : vector<16x1xi32>
    %c40_i32_259 = arith.constant 40 : i32
    %476 = arith.subi %c40_i32_259, %0 : i32
    %477 = vector.broadcast %476 : i32 to vector<16x1xi32>
    %478 = arith.cmpi slt, %475, %477 : vector<16x1xi32>
    %cst_260 = arith.constant 0.000000e+00 : f32
    %479 = vector.shape_cast %478 : vector<16x1xi1> to vector<16x1xi1>
    %480 = vector.broadcast %479 : vector<16x1xi1> to vector<16x64xi1>
    %481 = vector.broadcast %cst_260 : f32 to vector<16x64xf32>
    %482 = arith.select %480, %471, %481 : vector<16x64xi1>, vector<16x64xf32>
    %cst_261 = arith.constant dense<0.000000e+00> : vector<64xf32>
    %483 = vector.multi_reduction <add>, %482, %cst_261 [0] : vector<16x64xf32> to vector<64xf32>
    %484 = vector.shape_cast %483 : vector<64xf32> to vector<1x64xf32>
    %c0_262 = arith.constant 0 : index
    %c0_263 = arith.constant 0 : index
    %c0_264 = arith.constant 0 : index
    %c0_265 = arith.constant 0 : index
    %485 = vector.load %arg16[%c0_262, %c0_263, %c0_264, %c0_265] : memref<1x1x1x64xf32, #tpu.memory_space<vmem>>, vector<1x1x1x64xf32>
    %486 = vector.shape_cast %485 : vector<1x1x1x64xf32> to vector<1x64xf32>
    %487 = vector.shape_cast %484 : vector<1x64xf32> to vector<1x1x1x64xf32>
    tpu.vector_store %arg16[%c0_262, %c0_263, %c0_264, %c0_265], %487 {strides = array<i32>} : memref<1x1x1x64xf32, #tpu.memory_space<vmem>>, vector<1x1x1x64xf32>,
    return
  }
  func.func @transform_0(%arg0: i32, %arg1: i32) -> (i32, i32, i32, i32) {
    %c0_i32 = arith.constant 0 : i32
    %c0_i32_0 = arith.constant 0 : i32
    %c0_i32_1 = arith.constant 0 : i32
    return %arg0, %arg1, %c0_i32, %c0_i32_0 : i32, i32, i32, i32
  }
  func.func @transform_1(%arg0: i32, %arg1: i32) -> (i32, i32) {
    %c0_i32 = arith.constant 0 : i32
    %c0_i32_0 = arith.constant 0 : i32
    %c0_i32_1 = arith.constant 0 : i32
    return %c0_i32, %c0_i32_0 : i32, i32
  }
  func.func @transform_2(%arg0: i32, %arg1: i32) -> (i32, i32) {
    %c0_i32 = arith.constant 0 : i32
    %c0_i32_0 = arith.constant 0 : i32
    %c0_i32_1 = arith.constant 0 : i32
    return %c0_i32, %c0_i32_0 : i32, i32
  }
  func.func @transform_3(%arg0: i32, %arg1: i32) -> (i32, i32) {
    %c0_i32 = arith.constant 0 : i32
    %c0_i32_0 = arith.constant 0 : i32
    %c0_i32_1 = arith.constant 0 : i32
    return %c0_i32, %c0_i32_0 : i32, i32
  }
  func.func @transform_4(%arg0: i32, %arg1: i32) -> (i32, i32) {
    %c0_i32 = arith.constant 0 : i32
    %c0_i32_0 = arith.constant 0 : i32
    %c0_i32_1 = arith.constant 0 : i32
    return %c0_i32, %c0_i32_0 : i32, i32
  }
  func.func @transform_5(%arg0: i32, %arg1: i32) -> (i32, i32, i32) {
    %c0_i32 = arith.constant 0 : i32
    %c0_i32_0 = arith.constant 0 : i32
    %c0_i32_1 = arith.constant 0 : i32
    %c0_i32_2 = arith.constant 0 : i32
    return %c0_i32, %c0_i32_0, %c0_i32_1 : i32, i32, i32
  }
  func.func @transform_6(%arg0: i32, %arg1: i32) -> (i32, i32, i32) {
    %c0_i32 = arith.constant 0 : i32
    %c0_i32_0 = arith.constant 0 : i32
    %c0_i32_1 = arith.constant 0 : i32
    %c0_i32_2 = arith.constant 0 : i32
    return %c0_i32, %c0_i32_0, %c0_i32_1 : i32, i32, i32
  }
  func.func @transform_7(%arg0: i32, %arg1: i32) -> (i32, i32, i32) {
    %c0_i32 = arith.constant 0 : i32
    %c0_i32_0 = arith.constant 0 : i32
    %c0_i32_1 = arith.constant 0 : i32
    %c0_i32_2 = arith.constant 0 : i32
    return %c0_i32, %c0_i32_0, %c0_i32_1 : i32, i32, i32
  }
  func.func @transform_8(%arg0: i32, %arg1: i32) -> (i32, i32, i32) {
    %c0_i32 = arith.constant 0 : i32
    %c0_i32_0 = arith.constant 0 : i32
    %c0_i32_1 = arith.constant 0 : i32
    %c0_i32_2 = arith.constant 0 : i32
    return %c0_i32, %c0_i32_0, %c0_i32_1 : i32, i32, i32
  }
  func.func @transform_9(%arg0: i32, %arg1: i32) -> (i32, i32) {
    %c0_i32 = arith.constant 0 : i32
    %c0_i32_0 = arith.constant 0 : i32
    %c0_i32_1 = arith.constant 0 : i32
    return %c0_i32, %c0_i32_0 : i32, i32
  }
  func.func @transform_10(%arg0: i32, %arg1: i32) -> (i32, i32) {
    %c0_i32 = arith.constant 0 : i32
    %c0_i32_0 = arith.constant 0 : i32
    %c0_i32_1 = arith.constant 0 : i32
    return %c0_i32, %c0_i32_0 : i32, i32
  }
  func.func @transform_11(%arg0: i32, %arg1: i32) -> (i32, i32) {
    %c0_i32 = arith.constant 0 : i32
    %c0_i32_0 = arith.constant 0 : i32
    %c0_i32_1 = arith.constant 0 : i32
    return %c0_i32, %c0_i32_0 : i32, i32
  }
  func.func @transform_12(%arg0: i32, %arg1: i32) -> (i32, i32) {
    %c0_i32 = arith.constant 0 : i32
    %c0_i32_0 = arith.constant 0 : i32
    %c0_i32_1 = arith.constant 0 : i32
    return %c0_i32, %c0_i32_0 : i32, i32
  }
  func.func @transform_13(%arg0: i32, %arg1: i32) -> (i32, i32, i32) {
    %c0_i32 = arith.constant 0 : i32
    %c0_i32_0 = arith.constant 0 : i32
    return %arg0, %arg1, %c0_i32 : i32, i32, i32
  }
  func.func @transform_14(%arg0: i32, %arg1: i32) -> (i32, i32, i32, i32) {
    %c0_i32 = arith.constant 0 : i32
    %c0_i32_0 = arith.constant 0 : i32
    %c0_i32_1 = arith.constant 0 : i32
    return %arg0, %arg1, %c0_i32, %c0_i32_0 : i32, i32, i32, i32
  }
}

module attributes {stable_mosaic.version = 11 : i64} {
  func.func @kernel(%arg0: i32, %arg1: i32, %arg2: memref<1x1x48x64xf32, #tpu.memory_space<vmem>>, %arg3: memref<64x64xf32, #tpu.memory_space<vmem>>, %arg4: memref<1x64xf32, #tpu.memory_space<vmem>>, %arg5: memref<1x64xf32, #tpu.memory_space<vmem>>, %arg6: memref<1x64xf32, #tpu.memory_space<vmem>>, %arg7: memref<21x8x8xf32, #tpu.memory_space<vmem>>, %arg8: memref<7x1x8xf32, #tpu.memory_space<vmem>>, %arg9: memref<7x1x8xf32, #tpu.memory_space<vmem>>, %arg10: memref<7x1x8xf32, #tpu.memory_space<vmem>>, %arg11: memref<64x64xf32, #tpu.memory_space<vmem>>, %arg12: memref<1x64xf32, #tpu.memory_space<vmem>>, %arg13: memref<1x64xf32, #tpu.memory_space<vmem>>, %arg14: memref<1x64xf32, #tpu.memory_space<vmem>>, %arg15: memref<1x16x64xf32, #tpu.memory_space<vmem>>, %arg16: memref<1x1x1x64xf32, #tpu.memory_space<vmem>>, %arg17: memref<48x64xf32, #tpu.memory_space<vmem>>) attributes {dimension_semantics = [#tpu.dimension_semantics<parallel>, #tpu.dimension_semantics<parallel>], iteration_bounds = array<i64: 2, 3>, scalar_prefetch = 0 : i64, scratch_operands = 1 : i64, tpu.core_type = #tpu.core_type<tc>, window_params = [{transform_indices = @transform_0, window_bounds = array<i64: 1, 1, 48, 64>}, {pipeline_mode = #tpu.pipeline_mode<synchronous>, transform_indices = @transform_1, window_bounds = array<i64: 64, 64>}, {pipeline_mode = #tpu.pipeline_mode<synchronous>, transform_indices = @transform_2, window_bounds = array<i64: 1, 64>}, {pipeline_mode = #tpu.pipeline_mode<synchronous>, transform_indices = @transform_3, window_bounds = array<i64: 1, 64>}, {pipeline_mode = #tpu.pipeline_mode<synchronous>, transform_indices = @transform_4, window_bounds = array<i64: 1, 64>}, {pipeline_mode = #tpu.pipeline_mode<synchronous>, transform_indices = @transform_5, window_bounds = array<i64: 21, 8, 8>}, {pipeline_mode = #tpu.pipeline_mode<synchronous>, transform_indices = @transform_6, window_bounds = array<i64: 7, 1, 8>}, {pipeline_mode = #tpu.pipeline_mode<synchronous>, transform_indices = @transform_7, window_bounds = array<i64: 7, 1, 8>}, {pipeline_mode = #tpu.pipeline_mode<synchronous>, transform_indices = @transform_8, window_bounds = array<i64: 7, 1, 8>}, {pipeline_mode = #tpu.pipeline_mode<synchronous>, transform_indices = @transform_9, window_bounds = array<i64: 64, 64>}, {pipeline_mode = #tpu.pipeline_mode<synchronous>, transform_indices = @transform_10, window_bounds = array<i64: 1, 64>}, {pipeline_mode = #tpu.pipeline_mode<synchronous>, transform_indices = @transform_11, window_bounds = array<i64: 1, 64>}, {pipeline_mode = #tpu.pipeline_mode<synchronous>, transform_indices = @transform_12, window_bounds = array<i64: 1, 64>}, {transform_indices = @transform_13, window_bounds = array<i64: 1, 16, 64>}, {transform_indices = @transform_14, window_bounds = array<i64: 1, 1, 1, 64>}]} {
    %c16_i32 = arith.constant 16 : i32
    %0 = arith.muli %arg1, %c16_i32 : i32
    %c0 = arith.constant 0 : index
    %c0_0 = arith.constant 0 : index
    %c0_1 = arith.constant 0 : index
    %c0_2 = arith.constant 0 : index
    %1 = vector.load %arg2[%c0, %c0_0, %c0_1, %c0_2] : memref<1x1x48x64xf32, #tpu.memory_space<vmem>>, vector<1x1x48x64xf32>
    %2 = vector.shape_cast %1 : vector<1x1x48x64xf32> to vector<48x64xf32>
    %c0_3 = arith.constant 0 : index
    %c0_4 = arith.constant 0 : index
    %3 = vector.load %arg3[%c0_3, %c0_4] : memref<64x64xf32, #tpu.memory_space<vmem>>, vector<64x64xf32>
    %cst = arith.constant dense<0.000000e+00> : vector<48x64xf32>
    %4 = tpu.matmul %2, %3, %cst {dimension_numbers = #tpu.dot_dimension_numbers<[1], [0], [0], [1], [0, 0, 1, 1], [], []>} : vector<48x64xf32>, vector<64x64xf32>, vector<48x64xf32> -> vector<48x64xf32>
    %c0_5 = arith.constant 0 : index
    %c0_6 = arith.constant 0 : index
    %5 = vector.load %arg4[%c0_5, %c0_6] : memref<1x64xf32, #tpu.memory_space<vmem>>, vector<1x64xf32>
    %6 = vector.broadcast %5 : vector<1x64xf32> to vector<48x64xf32>
    %7 = arith.addf %4, %6 : vector<48x64xf32>
    %cst_7 = arith.constant 0.000000e+00 : f32
    %8 = vector.broadcast %cst_7 : f32 to vector<48x64xf32>
    %9 = arith.maximumf %7, %8 : vector<48x64xf32>
    %c0_8 = arith.constant 0 : index
    %c0_9 = arith.constant 0 : index
    %10 = vector.load %arg5[%c0_8, %c0_9] : memref<1x64xf32, #tpu.memory_space<vmem>>, vector<1x64xf32>
    %11 = vector.broadcast %10 : vector<1x64xf32> to vector<48x64xf32>
    %12 = arith.mulf %9, %11 : vector<48x64xf32>
    %c0_10 = arith.constant 0 : index
    %c0_11 = arith.constant 0 : index
    %13 = vector.load %arg6[%c0_10, %c0_11] : memref<1x64xf32, #tpu.memory_space<vmem>>, vector<1x64xf32>
    %14 = vector.broadcast %13 : vector<1x64xf32> to vector<48x64xf32>
    %15 = arith.addf %12, %14 : vector<48x64xf32>
    %c0_12 = arith.constant 0 : index
    %c0_13 = arith.constant 0 : index
    %16 = vector.load %arg17[%c0_12, %c0_13] : memref<48x64xf32, #tpu.memory_space<vmem>>, vector<48x64xf32>
    tpu.vector_store %arg17[%c0_12, %c0_13], %15 {strides = array<i32>} : memref<48x64xf32, #tpu.memory_space<vmem>>, vector<48x64xf32>,
    %17 = tpu.iota {dimensions = array<i32: 0>} : vector<48x1xi32>
    %c0_14 = arith.constant 0 : index
    %c0_15 = arith.constant 0 : index
    %18 = vector.load %arg17[%c0_14, %c0_15] : memref<48x64xf32, #tpu.memory_space<vmem>>, vector<48x8xf32>
    %c2_i32 = arith.constant 2 : i32
    %19 = tpu.dynamic_rotate %18 by %c2_i32 dim 0 : vector<48x8xf32>, i32 -> vector<48x8xf32>
    %c18_i32 = arith.constant 18 : i32
    %20 = arith.subi %c18_i32, %0 : i32
    %21 = vector.broadcast %20 : i32 to vector<48x1xi32>
    %22 = arith.cmpi sge, %17, %21 : vector<48x1xi32>
    %c40_i32 = arith.constant 40 : i32
    %23 = arith.addi %20, %c40_i32 : i32
    %24 = vector.broadcast %23 : i32 to vector<48x1xi32>
    %25 = arith.cmpi slt, %17, %24 : vector<48x1xi32>
    %26 = arith.andi %22, %25 : vector<48x1xi1>
    %cst_16 = arith.constant 0.000000e+00 : f32
    %27 = vector.shape_cast %26 : vector<48x1xi1> to vector<48x1xi1>
    %28 = vector.broadcast %27 : vector<48x1xi1> to vector<48x8xi1>
    %29 = vector.broadcast %cst_16 : f32 to vector<48x8xf32>
    %30 = arith.select %28, %19, %29 : vector<48x8xi1>, vector<48x8xf32>
    %c0_17 = arith.constant 0 : index
    %c0_18 = arith.constant 0 : index
    %c0_19 = arith.constant 0 : index
    %31 = vector.load %arg7[%c0_17, %c0_18, %c0_19] : memref<21x8x8xf32, #tpu.memory_space<vmem>>, vector<1x8x8xf32>
    %32 = vector.shape_cast %31 : vector<1x8x8xf32> to vector<8x8xf32>
    %cst_20 = arith.constant dense<0.000000e+00> : vector<48x8xf32>
    %33 = tpu.matmul %30, %32, %cst_20 {dimension_numbers = #tpu.dot_dimension_numbers<[1], [0], [0], [1], [0, 0, 1, 1], [], []>} : vector<48x8xf32>, vector<8x8xf32>, vector<48x8xf32> -> vector<48x8xf32>
    %c16_i32_21 = arith.constant 16 : i32
    %34 = arith.subi %c16_i32_21, %0 : i32
    %35 = vector.broadcast %34 : i32 to vector<48x1xi32>
    %36 = arith.cmpi sge, %17, %35 : vector<48x1xi32>
    %c40_i32_22 = arith.constant 40 : i32
    %37 = arith.addi %34, %c40_i32_22 : i32
    %38 = vector.broadcast %37 : i32 to vector<48x1xi32>
    %39 = arith.cmpi slt, %17, %38 : vector<48x1xi32>
    %40 = arith.andi %36, %39 : vector<48x1xi1>
    %cst_23 = arith.constant 0.000000e+00 : f32
    %41 = vector.shape_cast %40 : vector<48x1xi1> to vector<48x1xi1>
    %42 = vector.broadcast %41 : vector<48x1xi1> to vector<48x8xi1>
    %43 = vector.broadcast %cst_23 : f32 to vector<48x8xf32>
    %44 = arith.select %42, %18, %43 : vector<48x8xi1>, vector<48x8xf32>
    %c1 = arith.constant 1 : index
    %c0_24 = arith.constant 0 : index
    %c0_25 = arith.constant 0 : index
    %45 = vector.load %arg7[%c1, %c0_24, %c0_25] : memref<21x8x8xf32, #tpu.memory_space<vmem>>, vector<1x8x8xf32>
    %46 = vector.shape_cast %45 : vector<1x8x8xf32> to vector<8x8xf32>
    %cst_26 = arith.constant dense<0.000000e+00> : vector<48x8xf32>
    %47 = tpu.matmul %44, %46, %cst_26 {dimension_numbers = #tpu.dot_dimension_numbers<[1], [0], [0], [1], [0, 0, 1, 1], [], []>} : vector<48x8xf32>, vector<8x8xf32>, vector<48x8xf32> -> vector<48x8xf32>
    %48 = arith.addf %33, %47 : vector<48x8xf32>
    %c46_i32 = arith.constant 46 : i32
    %49 = tpu.dynamic_rotate %18 by %c46_i32 dim 0 : vector<48x8xf32>, i32 -> vector<48x8xf32>
    %c14_i32 = arith.constant 14 : i32
    %50 = arith.subi %c14_i32, %0 : i32
    %51 = vector.broadcast %50 : i32 to vector<48x1xi32>
    %52 = arith.cmpi sge, %17, %51 : vector<48x1xi32>
    %c40_i32_27 = arith.constant 40 : i32
    %53 = arith.addi %50, %c40_i32_27 : i32
    %54 = vector.broadcast %53 : i32 to vector<48x1xi32>
    %55 = arith.cmpi slt, %17, %54 : vector<48x1xi32>
    %56 = arith.andi %52, %55 : vector<48x1xi1>
    %cst_28 = arith.constant 0.000000e+00 : f32
    %57 = vector.shape_cast %56 : vector<48x1xi1> to vector<48x1xi1>
    %58 = vector.broadcast %57 : vector<48x1xi1> to vector<48x8xi1>
    %59 = vector.broadcast %cst_28 : f32 to vector<48x8xf32>
    %60 = arith.select %58, %49, %59 : vector<48x8xi1>, vector<48x8xf32>
    %c2 = arith.constant 2 : index
    %c0_29 = arith.constant 0 : index
    %c0_30 = arith.constant 0 : index
    %61 = vector.load %arg7[%c2, %c0_29, %c0_30] : memref<21x8x8xf32, #tpu.memory_space<vmem>>, vector<1x8x8xf32>
    %62 = vector.shape_cast %61 : vector<1x8x8xf32> to vector<8x8xf32>
    %cst_31 = arith.constant dense<0.000000e+00> : vector<48x8xf32>
    %63 = tpu.matmul %60, %62, %cst_31 {dimension_numbers = #tpu.dot_dimension_numbers<[1], [0], [0], [1], [0, 0, 1, 1], [], []>} : vector<48x8xf32>, vector<8x8xf32>, vector<48x8xf32> -> vector<48x8xf32>
    %64 = arith.addf %48, %63 : vector<48x8xf32>
    %c0_32 = arith.constant 0 : index
    %c0_33 = arith.constant 0 : index
    %c0_34 = arith.constant 0 : index
    %65 = vector.load %arg8[%c0_32, %c0_33, %c0_34] : memref<7x1x8xf32, #tpu.memory_space<vmem>>, vector<1x1x8xf32>
    %66 = vector.shape_cast %65 : vector<1x1x8xf32> to vector<1x8xf32>
    %67 = vector.broadcast %66 : vector<1x8xf32> to vector<48x8xf32>
    %68 = arith.addf %64, %67 : vector<48x8xf32>
    %cst_35 = arith.constant 0.000000e+00 : f32
    %69 = vector.broadcast %cst_35 : f32 to vector<48x8xf32>
    %70 = arith.maximumf %68, %69 : vector<48x8xf32>
    %c0_36 = arith.constant 0 : index
    %c0_37 = arith.constant 0 : index
    %c0_38 = arith.constant 0 : index
    %71 = vector.load %arg9[%c0_36, %c0_37, %c0_38] : memref<7x1x8xf32, #tpu.memory_space<vmem>>, vector<1x1x8xf32>
    %72 = vector.shape_cast %71 : vector<1x1x8xf32> to vector<1x8xf32>
    %73 = vector.broadcast %72 : vector<1x8xf32> to vector<48x8xf32>
    %74 = arith.mulf %70, %73 : vector<48x8xf32>
    %c0_39 = arith.constant 0 : index
    %c0_40 = arith.constant 0 : index
    %c0_41 = arith.constant 0 : index
    %75 = vector.load %arg10[%c0_39, %c0_40, %c0_41] : memref<7x1x8xf32, #tpu.memory_space<vmem>>, vector<1x1x8xf32>
    %76 = vector.shape_cast %75 : vector<1x1x8xf32> to vector<1x8xf32>
    %77 = vector.broadcast %76 : vector<1x8xf32> to vector<48x8xf32>
    %78 = arith.addf %74, %77 : vector<48x8xf32>
    %c0_42 = arith.constant 0 : index
    %c0_43 = arith.constant 0 : index
    %79 = vector.load %arg17[%c0_42, %c0_43] : memref<48x64xf32, #tpu.memory_space<vmem>>, vector<48x8xf32>
    tpu.vector_store %arg17[%c0_42, %c0_43], %78 {strides = array<i32>} : memref<48x64xf32, #tpu.memory_space<vmem>>, vector<48x8xf32>,
    %c0_44 = arith.constant 0 : index
    %c8 = arith.constant 8 : index
    %80 = vector.load %arg17[%c0_44, %c8] : memref<48x64xf32, #tpu.memory_space<vmem>>, vector<48x8xf32>
    %81 = arith.addf %78, %80 : vector<48x8xf32>
    %c2_i32_45 = arith.constant 2 : i32
    %82 = tpu.dynamic_rotate %81 by %c2_i32_45 dim 0 : vector<48x8xf32>, i32 -> vector<48x8xf32>
    %c18_i32_46 = arith.constant 18 : i32
    %83 = arith.subi %c18_i32_46, %0 : i32
    %84 = vector.broadcast %83 : i32 to vector<48x1xi32>
    %85 = arith.cmpi sge, %17, %84 : vector<48x1xi32>
    %c40_i32_47 = arith.constant 40 : i32
    %86 = arith.addi %83, %c40_i32_47 : i32
    %87 = vector.broadcast %86 : i32 to vector<48x1xi32>
    %88 = arith.cmpi slt, %17, %87 : vector<48x1xi32>
    %89 = arith.andi %85, %88 : vector<48x1xi1>
    %cst_48 = arith.constant 0.000000e+00 : f32
    %90 = vector.shape_cast %89 : vector<48x1xi1> to vector<48x1xi1>
    %91 = vector.broadcast %90 : vector<48x1xi1> to vector<48x8xi1>
    %92 = vector.broadcast %cst_48 : f32 to vector<48x8xf32>
    %93 = arith.select %91, %82, %92 : vector<48x8xi1>, vector<48x8xf32>
    %c3 = arith.constant 3 : index
    %c0_49 = arith.constant 0 : index
    %c0_50 = arith.constant 0 : index
    %94 = vector.load %arg7[%c3, %c0_49, %c0_50] : memref<21x8x8xf32, #tpu.memory_space<vmem>>, vector<1x8x8xf32>
    %95 = vector.shape_cast %94 : vector<1x8x8xf32> to vector<8x8xf32>
    %cst_51 = arith.constant dense<0.000000e+00> : vector<48x8xf32>
    %96 = tpu.matmul %93, %95, %cst_51 {dimension_numbers = #tpu.dot_dimension_numbers<[1], [0], [0], [1], [0, 0, 1, 1], [], []>} : vector<48x8xf32>, vector<8x8xf32>, vector<48x8xf32> -> vector<48x8xf32>
    %c16_i32_52 = arith.constant 16 : i32
    %97 = arith.subi %c16_i32_52, %0 : i32
    %98 = vector.broadcast %97 : i32 to vector<48x1xi32>
    %99 = arith.cmpi sge, %17, %98 : vector<48x1xi32>
    %c40_i32_53 = arith.constant 40 : i32
    %100 = arith.addi %97, %c40_i32_53 : i32
    %101 = vector.broadcast %100 : i32 to vector<48x1xi32>
    %102 = arith.cmpi slt, %17, %101 : vector<48x1xi32>
    %103 = arith.andi %99, %102 : vector<48x1xi1>
    %cst_54 = arith.constant 0.000000e+00 : f32
    %104 = vector.shape_cast %103 : vector<48x1xi1> to vector<48x1xi1>
    %105 = vector.broadcast %104 : vector<48x1xi1> to vector<48x8xi1>
    %106 = vector.broadcast %cst_54 : f32 to vector<48x8xf32>
    %107 = arith.select %105, %81, %106 : vector<48x8xi1>, vector<48x8xf32>
    %c4 = arith.constant 4 : index
    %c0_55 = arith.constant 0 : index
    %c0_56 = arith.constant 0 : index
    %108 = vector.load %arg7[%c4, %c0_55, %c0_56] : memref<21x8x8xf32, #tpu.memory_space<vmem>>, vector<1x8x8xf32>
    %109 = vector.shape_cast %108 : vector<1x8x8xf32> to vector<8x8xf32>
    %cst_57 = arith.constant dense<0.000000e+00> : vector<48x8xf32>
    %110 = tpu.matmul %107, %109, %cst_57 {dimension_numbers = #tpu.dot_dimension_numbers<[1], [0], [0], [1], [0, 0, 1, 1], [], []>} : vector<48x8xf32>, vector<8x8xf32>, vector<48x8xf32> -> vector<48x8xf32>
    %111 = arith.addf %96, %110 : vector<48x8xf32>
    %c46_i32_58 = arith.constant 46 : i32
    %112 = tpu.dynamic_rotate %81 by %c46_i32_58 dim 0 : vector<48x8xf32>, i32 -> vector<48x8xf32>
    %c14_i32_59 = arith.constant 14 : i32
    %113 = arith.subi %c14_i32_59, %0 : i32
    %114 = vector.broadcast %113 : i32 to vector<48x1xi32>
    %115 = arith.cmpi sge, %17, %114 : vector<48x1xi32>
    %c40_i32_60 = arith.constant 40 : i32
    %116 = arith.addi %113, %c40_i32_60 : i32
    %117 = vector.broadcast %116 : i32 to vector<48x1xi32>
    %118 = arith.cmpi slt, %17, %117 : vector<48x1xi32>
    %119 = arith.andi %115, %118 : vector<48x1xi1>
    %cst_61 = arith.constant 0.000000e+00 : f32
    %120 = vector.shape_cast %119 : vector<48x1xi1> to vector<48x1xi1>
    %121 = vector.broadcast %120 : vector<48x1xi1> to vector<48x8xi1>
    %122 = vector.broadcast %cst_61 : f32 to vector<48x8xf32>
    %123 = arith.select %121, %112, %122 : vector<48x8xi1>, vector<48x8xf32>
    %c5 = arith.constant 5 : index
    %c0_62 = arith.constant 0 : index
    %c0_63 = arith.constant 0 : index
    %124 = vector.load %arg7[%c5, %c0_62, %c0_63] : memref<21x8x8xf32, #tpu.memory_space<vmem>>, vector<1x8x8xf32>
    %125 = vector.shape_cast %124 : vector<1x8x8xf32> to vector<8x8xf32>
    %cst_64 = arith.constant dense<0.000000e+00> : vector<48x8xf32>
    %126 = tpu.matmul %123, %125, %cst_64 {dimension_numbers = #tpu.dot_dimension_numbers<[1], [0], [0], [1], [0, 0, 1, 1], [], []>} : vector<48x8xf32>, vector<8x8xf32>, vector<48x8xf32> -> vector<48x8xf32>
    %127 = arith.addf %111, %126 : vector<48x8xf32>
    %c1_65 = arith.constant 1 : index
    %c0_66 = arith.constant 0 : index
    %c0_67 = arith.constant 0 : index
    %128 = vector.load %arg8[%c1_65, %c0_66, %c0_67] : memref<7x1x8xf32, #tpu.memory_space<vmem>>, vector<1x1x8xf32>
    %129 = vector.shape_cast %128 : vector<1x1x8xf32> to vector<1x8xf32>
    %130 = vector.broadcast %129 : vector<1x8xf32> to vector<48x8xf32>
    %131 = arith.addf %127, %130 : vector<48x8xf32>
    %cst_68 = arith.constant 0.000000e+00 : f32
    %132 = vector.broadcast %cst_68 : f32 to vector<48x8xf32>
    %133 = arith.maximumf %131, %132 : vector<48x8xf32>
    %c1_69 = arith.constant 1 : index
    %c0_70 = arith.constant 0 : index
    %c0_71 = arith.constant 0 : index
    %134 = vector.load %arg9[%c1_69, %c0_70, %c0_71] : memref<7x1x8xf32, #tpu.memory_space<vmem>>, vector<1x1x8xf32>
    %135 = vector.shape_cast %134 : vector<1x1x8xf32> to vector<1x8xf32>
    %136 = vector.broadcast %135 : vector<1x8xf32> to vector<48x8xf32>
    %137 = arith.mulf %133, %136 : vector<48x8xf32>
    %c1_72 = arith.constant 1 : index
    %c0_73 = arith.constant 0 : index
    %c0_74 = arith.constant 0 : index
    %138 = vector.load %arg10[%c1_72, %c0_73, %c0_74] : memref<7x1x8xf32, #tpu.memory_space<vmem>>, vector<1x1x8xf32>
    %139 = vector.shape_cast %138 : vector<1x1x8xf32> to vector<1x8xf32>
    %140 = vector.broadcast %139 : vector<1x8xf32> to vector<48x8xf32>
    %141 = arith.addf %137, %140 : vector<48x8xf32>
    %c0_75 = arith.constant 0 : index
    %c8_76 = arith.constant 8 : index
    %142 = vector.load %arg17[%c0_75, %c8_76] : memref<48x64xf32, #tpu.memory_space<vmem>>, vector<48x8xf32>
    tpu.vector_store %arg17[%c0_75, %c8_76], %141 {strides = array<i32>} : memref<48x64xf32, #tpu.memory_space<vmem>>, vector<48x8xf32>,
    %c0_77 = arith.constant 0 : index
    %c16 = arith.constant 16 : index
    %143 = vector.load %arg17[%c0_77, %c16] : memref<48x64xf32, #tpu.memory_space<vmem>>, vector<48x8xf32>
    %144 = arith.addf %141, %143 : vector<48x8xf32>
    %c2_i32_78 = arith.constant 2 : i32
    %145 = tpu.dynamic_rotate %144 by %c2_i32_78 dim 0 : vector<48x8xf32>, i32 -> vector<48x8xf32>
    %c18_i32_79 = arith.constant 18 : i32
    %146 = arith.subi %c18_i32_79, %0 : i32
    %147 = vector.broadcast %146 : i32 to vector<48x1xi32>
    %148 = arith.cmpi sge, %17, %147 : vector<48x1xi32>
    %c40_i32_80 = arith.constant 40 : i32
    %149 = arith.addi %146, %c40_i32_80 : i32
    %150 = vector.broadcast %149 : i32 to vector<48x1xi32>
    %151 = arith.cmpi slt, %17, %150 : vector<48x1xi32>
    %152 = arith.andi %148, %151 : vector<48x1xi1>
    %cst_81 = arith.constant 0.000000e+00 : f32
    %153 = vector.shape_cast %152 : vector<48x1xi1> to vector<48x1xi1>
    %154 = vector.broadcast %153 : vector<48x1xi1> to vector<48x8xi1>
    %155 = vector.broadcast %cst_81 : f32 to vector<48x8xf32>
    %156 = arith.select %154, %145, %155 : vector<48x8xi1>, vector<48x8xf32>
    %c6 = arith.constant 6 : index
    %c0_82 = arith.constant 0 : index
    %c0_83 = arith.constant 0 : index
    %157 = vector.load %arg7[%c6, %c0_82, %c0_83] : memref<21x8x8xf32, #tpu.memory_space<vmem>>, vector<1x8x8xf32>
    %158 = vector.shape_cast %157 : vector<1x8x8xf32> to vector<8x8xf32>
    %cst_84 = arith.constant dense<0.000000e+00> : vector<48x8xf32>
    %159 = tpu.matmul %156, %158, %cst_84 {dimension_numbers = #tpu.dot_dimension_numbers<[1], [0], [0], [1], [0, 0, 1, 1], [], []>} : vector<48x8xf32>, vector<8x8xf32>, vector<48x8xf32> -> vector<48x8xf32>
    %c16_i32_85 = arith.constant 16 : i32
    %160 = arith.subi %c16_i32_85, %0 : i32
    %161 = vector.broadcast %160 : i32 to vector<48x1xi32>
    %162 = arith.cmpi sge, %17, %161 : vector<48x1xi32>
    %c40_i32_86 = arith.constant 40 : i32
    %163 = arith.addi %160, %c40_i32_86 : i32
    %164 = vector.broadcast %163 : i32 to vector<48x1xi32>
    %165 = arith.cmpi slt, %17, %164 : vector<48x1xi32>
    %166 = arith.andi %162, %165 : vector<48x1xi1>
    %cst_87 = arith.constant 0.000000e+00 : f32
    %167 = vector.shape_cast %166 : vector<48x1xi1> to vector<48x1xi1>
    %168 = vector.broadcast %167 : vector<48x1xi1> to vector<48x8xi1>
    %169 = vector.broadcast %cst_87 : f32 to vector<48x8xf32>
    %170 = arith.select %168, %144, %169 : vector<48x8xi1>, vector<48x8xf32>
    %c7 = arith.constant 7 : index
    %c0_88 = arith.constant 0 : index
    %c0_89 = arith.constant 0 : index
    %171 = vector.load %arg7[%c7, %c0_88, %c0_89] : memref<21x8x8xf32, #tpu.memory_space<vmem>>, vector<1x8x8xf32>
    %172 = vector.shape_cast %171 : vector<1x8x8xf32> to vector<8x8xf32>
    %cst_90 = arith.constant dense<0.000000e+00> : vector<48x8xf32>
    %173 = tpu.matmul %170, %172, %cst_90 {dimension_numbers = #tpu.dot_dimension_numbers<[1], [0], [0], [1], [0, 0, 1, 1], [], []>} : vector<48x8xf32>, vector<8x8xf32>, vector<48x8xf32> -> vector<48x8xf32>
    %174 = arith.addf %159, %173 : vector<48x8xf32>
    %c46_i32_91 = arith.constant 46 : i32
    %175 = tpu.dynamic_rotate %144 by %c46_i32_91 dim 0 : vector<48x8xf32>, i32 -> vector<48x8xf32>
    %c14_i32_92 = arith.constant 14 : i32
    %176 = arith.subi %c14_i32_92, %0 : i32
    %177 = vector.broadcast %176 : i32 to vector<48x1xi32>
    %178 = arith.cmpi sge, %17, %177 : vector<48x1xi32>
    %c40_i32_93 = arith.constant 40 : i32
    %179 = arith.addi %176, %c40_i32_93 : i32
    %180 = vector.broadcast %179 : i32 to vector<48x1xi32>
    %181 = arith.cmpi slt, %17, %180 : vector<48x1xi32>
    %182 = arith.andi %178, %181 : vector<48x1xi1>
    %cst_94 = arith.constant 0.000000e+00 : f32
    %183 = vector.shape_cast %182 : vector<48x1xi1> to vector<48x1xi1>
    %184 = vector.broadcast %183 : vector<48x1xi1> to vector<48x8xi1>
    %185 = vector.broadcast %cst_94 : f32 to vector<48x8xf32>
    %186 = arith.select %184, %175, %185 : vector<48x8xi1>, vector<48x8xf32>
    %c8_95 = arith.constant 8 : index
    %c0_96 = arith.constant 0 : index
    %c0_97 = arith.constant 0 : index
    %187 = vector.load %arg7[%c8_95, %c0_96, %c0_97] : memref<21x8x8xf32, #tpu.memory_space<vmem>>, vector<1x8x8xf32>
    %188 = vector.shape_cast %187 : vector<1x8x8xf32> to vector<8x8xf32>
    %cst_98 = arith.constant dense<0.000000e+00> : vector<48x8xf32>
    %189 = tpu.matmul %186, %188, %cst_98 {dimension_numbers = #tpu.dot_dimension_numbers<[1], [0], [0], [1], [0, 0, 1, 1], [], []>} : vector<48x8xf32>, vector<8x8xf32>, vector<48x8xf32> -> vector<48x8xf32>
    %190 = arith.addf %174, %189 : vector<48x8xf32>
    %c2_99 = arith.constant 2 : index
    %c0_100 = arith.constant 0 : index
    %c0_101 = arith.constant 0 : index
    %191 = vector.load %arg8[%c2_99, %c0_100, %c0_101] : memref<7x1x8xf32, #tpu.memory_space<vmem>>, vector<1x1x8xf32>
    %192 = vector.shape_cast %191 : vector<1x1x8xf32> to vector<1x8xf32>
    %193 = vector.broadcast %192 : vector<1x8xf32> to vector<48x8xf32>
    %194 = arith.addf %190, %193 : vector<48x8xf32>
    %cst_102 = arith.constant 0.000000e+00 : f32
    %195 = vector.broadcast %cst_102 : f32 to vector<48x8xf32>
    %196 = arith.maximumf %194, %195 : vector<48x8xf32>
    %c2_103 = arith.constant 2 : index
    %c0_104 = arith.constant 0 : index
    %c0_105 = arith.constant 0 : index
    %197 = vector.load %arg9[%c2_103, %c0_104, %c0_105] : memref<7x1x8xf32, #tpu.memory_space<vmem>>, vector<1x1x8xf32>
    %198 = vector.shape_cast %197 : vector<1x1x8xf32> to vector<1x8xf32>
    %199 = vector.broadcast %198 : vector<1x8xf32> to vector<48x8xf32>
    %200 = arith.mulf %196, %199 : vector<48x8xf32>
    %c2_106 = arith.constant 2 : index
    %c0_107 = arith.constant 0 : index
    %c0_108 = arith.constant 0 : index
    %201 = vector.load %arg10[%c2_106, %c0_107, %c0_108] : memref<7x1x8xf32, #tpu.memory_space<vmem>>, vector<1x1x8xf32>
    %202 = vector.shape_cast %201 : vector<1x1x8xf32> to vector<1x8xf32>
    %203 = vector.broadcast %202 : vector<1x8xf32> to vector<48x8xf32>
    %204 = arith.addf %200, %203 : vector<48x8xf32>
    %c0_109 = arith.constant 0 : index
    %c16_110 = arith.constant 16 : index
    %205 = vector.load %arg17[%c0_109, %c16_110] : memref<48x64xf32, #tpu.memory_space<vmem>>, vector<48x8xf32>
    tpu.vector_store %arg17[%c0_109, %c16_110], %204 {strides = array<i32>} : memref<48x64xf32, #tpu.memory_space<vmem>>, vector<48x8xf32>,
    %c0_111 = arith.constant 0 : index
    %c24 = arith.constant 24 : index
    %206 = vector.load %arg17[%c0_111, %c24] : memref<48x64xf32, #tpu.memory_space<vmem>>, vector<48x8xf32>
    %207 = arith.addf %204, %206 : vector<48x8xf32>
    %c2_i32_112 = arith.constant 2 : i32
    %208 = tpu.dynamic_rotate %207 by %c2_i32_112 dim 0 : vector<48x8xf32>, i32 -> vector<48x8xf32>
    %c18_i32_113 = arith.constant 18 : i32
    %209 = arith.subi %c18_i32_113, %0 : i32
    %210 = vector.broadcast %209 : i32 to vector<48x1xi32>
    %211 = arith.cmpi sge, %17, %210 : vector<48x1xi32>
    %c40_i32_114 = arith.constant 40 : i32
    %212 = arith.addi %209, %c40_i32_114 : i32
    %213 = vector.broadcast %212 : i32 to vector<48x1xi32>
    %214 = arith.cmpi slt, %17, %213 : vector<48x1xi32>
    %215 = arith.andi %211, %214 : vector<48x1xi1>
    %cst_115 = arith.constant 0.000000e+00 : f32
    %216 = vector.shape_cast %215 : vector<48x1xi1> to vector<48x1xi1>
    %217 = vector.broadcast %216 : vector<48x1xi1> to vector<48x8xi1>
    %218 = vector.broadcast %cst_115 : f32 to vector<48x8xf32>
    %219 = arith.select %217, %208, %218 : vector<48x8xi1>, vector<48x8xf32>
    %c9 = arith.constant 9 : index
    %c0_116 = arith.constant 0 : index
    %c0_117 = arith.constant 0 : index
    %220 = vector.load %arg7[%c9, %c0_116, %c0_117] : memref<21x8x8xf32, #tpu.memory_space<vmem>>, vector<1x8x8xf32>
    %221 = vector.shape_cast %220 : vector<1x8x8xf32> to vector<8x8xf32>
    %cst_118 = arith.constant dense<0.000000e+00> : vector<48x8xf32>
    %222 = tpu.matmul %219, %221, %cst_118 {dimension_numbers = #tpu.dot_dimension_numbers<[1], [0], [0], [1], [0, 0, 1, 1], [], []>} : vector<48x8xf32>, vector<8x8xf32>, vector<48x8xf32> -> vector<48x8xf32>
    %c16_i32_119 = arith.constant 16 : i32
    %223 = arith.subi %c16_i32_119, %0 : i32
    %224 = vector.broadcast %223 : i32 to vector<48x1xi32>
    %225 = arith.cmpi sge, %17, %224 : vector<48x1xi32>
    %c40_i32_120 = arith.constant 40 : i32
    %226 = arith.addi %223, %c40_i32_120 : i32
    %227 = vector.broadcast %226 : i32 to vector<48x1xi32>
    %228 = arith.cmpi slt, %17, %227 : vector<48x1xi32>
    %229 = arith.andi %225, %228 : vector<48x1xi1>
    %cst_121 = arith.constant 0.000000e+00 : f32
    %230 = vector.shape_cast %229 : vector<48x1xi1> to vector<48x1xi1>
    %231 = vector.broadcast %230 : vector<48x1xi1> to vector<48x8xi1>
    %232 = vector.broadcast %cst_121 : f32 to vector<48x8xf32>
    %233 = arith.select %231, %207, %232 : vector<48x8xi1>, vector<48x8xf32>
    %c10 = arith.constant 10 : index
    %c0_122 = arith.constant 0 : index
    %c0_123 = arith.constant 0 : index
    %234 = vector.load %arg7[%c10, %c0_122, %c0_123] : memref<21x8x8xf32, #tpu.memory_space<vmem>>, vector<1x8x8xf32>
    %235 = vector.shape_cast %234 : vector<1x8x8xf32> to vector<8x8xf32>
    %cst_124 = arith.constant dense<0.000000e+00> : vector<48x8xf32>
    %236 = tpu.matmul %233, %235, %cst_124 {dimension_numbers = #tpu.dot_dimension_numbers<[1], [0], [0], [1], [0, 0, 1, 1], [], []>} : vector<48x8xf32>, vector<8x8xf32>, vector<48x8xf32> -> vector<48x8xf32>
    %237 = arith.addf %222, %236 : vector<48x8xf32>
    %c46_i32_125 = arith.constant 46 : i32
    %238 = tpu.dynamic_rotate %207 by %c46_i32_125 dim 0 : vector<48x8xf32>, i32 -> vector<48x8xf32>
    %c14_i32_126 = arith.constant 14 : i32
    %239 = arith.subi %c14_i32_126, %0 : i32
    %240 = vector.broadcast %239 : i32 to vector<48x1xi32>
    %241 = arith.cmpi sge, %17, %240 : vector<48x1xi32>
    %c40_i32_127 = arith.constant 40 : i32
    %242 = arith.addi %239, %c40_i32_127 : i32
    %243 = vector.broadcast %242 : i32 to vector<48x1xi32>
    %244 = arith.cmpi slt, %17, %243 : vector<48x1xi32>
    %245 = arith.andi %241, %244 : vector<48x1xi1>
    %cst_128 = arith.constant 0.000000e+00 : f32
    %246 = vector.shape_cast %245 : vector<48x1xi1> to vector<48x1xi1>
    %247 = vector.broadcast %246 : vector<48x1xi1> to vector<48x8xi1>
    %248 = vector.broadcast %cst_128 : f32 to vector<48x8xf32>
    %249 = arith.select %247, %238, %248 : vector<48x8xi1>, vector<48x8xf32>
    %c11 = arith.constant 11 : index
    %c0_129 = arith.constant 0 : index
    %c0_130 = arith.constant 0 : index
    %250 = vector.load %arg7[%c11, %c0_129, %c0_130] : memref<21x8x8xf32, #tpu.memory_space<vmem>>, vector<1x8x8xf32>
    %251 = vector.shape_cast %250 : vector<1x8x8xf32> to vector<8x8xf32>
    %cst_131 = arith.constant dense<0.000000e+00> : vector<48x8xf32>
    %252 = tpu.matmul %249, %251, %cst_131 {dimension_numbers = #tpu.dot_dimension_numbers<[1], [0], [0], [1], [0, 0, 1, 1], [], []>} : vector<48x8xf32>, vector<8x8xf32>, vector<48x8xf32> -> vector<48x8xf32>
    %253 = arith.addf %237, %252 : vector<48x8xf32>
    %c3_132 = arith.constant 3 : index
    %c0_133 = arith.constant 0 : index
    %c0_134 = arith.constant 0 : index
    %254 = vector.load %arg8[%c3_132, %c0_133, %c0_134] : memref<7x1x8xf32, #tpu.memory_space<vmem>>, vector<1x1x8xf32>
    %255 = vector.shape_cast %254 : vector<1x1x8xf32> to vector<1x8xf32>
    %256 = vector.broadcast %255 : vector<1x8xf32> to vector<48x8xf32>
    %257 = arith.addf %253, %256 : vector<48x8xf32>
    %cst_135 = arith.constant 0.000000e+00 : f32
    %258 = vector.broadcast %cst_135 : f32 to vector<48x8xf32>
    %259 = arith.maximumf %257, %258 : vector<48x8xf32>
    %c3_136 = arith.constant 3 : index
    %c0_137 = arith.constant 0 : index
    %c0_138 = arith.constant 0 : index
    %260 = vector.load %arg9[%c3_136, %c0_137, %c0_138] : memref<7x1x8xf32, #tpu.memory_space<vmem>>, vector<1x1x8xf32>
    %261 = vector.shape_cast %260 : vector<1x1x8xf32> to vector<1x8xf32>
    %262 = vector.broadcast %261 : vector<1x8xf32> to vector<48x8xf32>
    %263 = arith.mulf %259, %262 : vector<48x8xf32>
    %c3_139 = arith.constant 3 : index
    %c0_140 = arith.constant 0 : index
    %c0_141 = arith.constant 0 : index
    %264 = vector.load %arg10[%c3_139, %c0_140, %c0_141] : memref<7x1x8xf32, #tpu.memory_space<vmem>>, vector<1x1x8xf32>
    %265 = vector.shape_cast %264 : vector<1x1x8xf32> to vector<1x8xf32>
    %266 = vector.broadcast %265 : vector<1x8xf32> to vector<48x8xf32>
    %267 = arith.addf %263, %266 : vector<48x8xf32>
    %c0_142 = arith.constant 0 : index
    %c24_143 = arith.constant 24 : index
    %268 = vector.load %arg17[%c0_142, %c24_143] : memref<48x64xf32, #tpu.memory_space<vmem>>, vector<48x8xf32>
    tpu.vector_store %arg17[%c0_142, %c24_143], %267 {strides = array<i32>} : memref<48x64xf32, #tpu.memory_space<vmem>>, vector<48x8xf32>,
    %c0_144 = arith.constant 0 : index
    %c32 = arith.constant 32 : index
    %269 = vector.load %arg17[%c0_144, %c32] : memref<48x64xf32, #tpu.memory_space<vmem>>, vector<48x8xf32>
    %270 = arith.addf %267, %269 : vector<48x8xf32>
    %c2_i32_145 = arith.constant 2 : i32
    %271 = tpu.dynamic_rotate %270 by %c2_i32_145 dim 0 : vector<48x8xf32>, i32 -> vector<48x8xf32>
    %c18_i32_146 = arith.constant 18 : i32
    %272 = arith.subi %c18_i32_146, %0 : i32
    %273 = vector.broadcast %272 : i32 to vector<48x1xi32>
    %274 = arith.cmpi sge, %17, %273 : vector<48x1xi32>
    %c40_i32_147 = arith.constant 40 : i32
    %275 = arith.addi %272, %c40_i32_147 : i32
    %276 = vector.broadcast %275 : i32 to vector<48x1xi32>
    %277 = arith.cmpi slt, %17, %276 : vector<48x1xi32>
    %278 = arith.andi %274, %277 : vector<48x1xi1>
    %cst_148 = arith.constant 0.000000e+00 : f32
    %279 = vector.shape_cast %278 : vector<48x1xi1> to vector<48x1xi1>
    %280 = vector.broadcast %279 : vector<48x1xi1> to vector<48x8xi1>
    %281 = vector.broadcast %cst_148 : f32 to vector<48x8xf32>
    %282 = arith.select %280, %271, %281 : vector<48x8xi1>, vector<48x8xf32>
    %c12 = arith.constant 12 : index
    %c0_149 = arith.constant 0 : index
    %c0_150 = arith.constant 0 : index
    %283 = vector.load %arg7[%c12, %c0_149, %c0_150] : memref<21x8x8xf32, #tpu.memory_space<vmem>>, vector<1x8x8xf32>
    %284 = vector.shape_cast %283 : vector<1x8x8xf32> to vector<8x8xf32>
    %cst_151 = arith.constant dense<0.000000e+00> : vector<48x8xf32>
    %285 = tpu.matmul %282, %284, %cst_151 {dimension_numbers = #tpu.dot_dimension_numbers<[1], [0], [0], [1], [0, 0, 1, 1], [], []>} : vector<48x8xf32>, vector<8x8xf32>, vector<48x8xf32> -> vector<48x8xf32>
    %c16_i32_152 = arith.constant 16 : i32
    %286 = arith.subi %c16_i32_152, %0 : i32
    %287 = vector.broadcast %286 : i32 to vector<48x1xi32>
    %288 = arith.cmpi sge, %17, %287 : vector<48x1xi32>
    %c40_i32_153 = arith.constant 40 : i32
    %289 = arith.addi %286, %c40_i32_153 : i32
    %290 = vector.broadcast %289 : i32 to vector<48x1xi32>
    %291 = arith.cmpi slt, %17, %290 : vector<48x1xi32>
    %292 = arith.andi %288, %291 : vector<48x1xi1>
    %cst_154 = arith.constant 0.000000e+00 : f32
    %293 = vector.shape_cast %292 : vector<48x1xi1> to vector<48x1xi1>
    %294 = vector.broadcast %293 : vector<48x1xi1> to vector<48x8xi1>
    %295 = vector.broadcast %cst_154 : f32 to vector<48x8xf32>
    %296 = arith.select %294, %270, %295 : vector<48x8xi1>, vector<48x8xf32>
    %c13 = arith.constant 13 : index
    %c0_155 = arith.constant 0 : index
    %c0_156 = arith.constant 0 : index
    %297 = vector.load %arg7[%c13, %c0_155, %c0_156] : memref<21x8x8xf32, #tpu.memory_space<vmem>>, vector<1x8x8xf32>
    %298 = vector.shape_cast %297 : vector<1x8x8xf32> to vector<8x8xf32>
    %cst_157 = arith.constant dense<0.000000e+00> : vector<48x8xf32>
    %299 = tpu.matmul %296, %298, %cst_157 {dimension_numbers = #tpu.dot_dimension_numbers<[1], [0], [0], [1], [0, 0, 1, 1], [], []>} : vector<48x8xf32>, vector<8x8xf32>, vector<48x8xf32> -> vector<48x8xf32>
    %300 = arith.addf %285, %299 : vector<48x8xf32>
    %c46_i32_158 = arith.constant 46 : i32
    %301 = tpu.dynamic_rotate %270 by %c46_i32_158 dim 0 : vector<48x8xf32>, i32 -> vector<48x8xf32>
    %c14_i32_159 = arith.constant 14 : i32
    %302 = arith.subi %c14_i32_159, %0 : i32
    %303 = vector.broadcast %302 : i32 to vector<48x1xi32>
    %304 = arith.cmpi sge, %17, %303 : vector<48x1xi32>
    %c40_i32_160 = arith.constant 40 : i32
    %305 = arith.addi %302, %c40_i32_160 : i32
    %306 = vector.broadcast %305 : i32 to vector<48x1xi32>
    %307 = arith.cmpi slt, %17, %306 : vector<48x1xi32>
    %308 = arith.andi %304, %307 : vector<48x1xi1>
    %cst_161 = arith.constant 0.000000e+00 : f32
    %309 = vector.shape_cast %308 : vector<48x1xi1> to vector<48x1xi1>
    %310 = vector.broadcast %309 : vector<48x1xi1> to vector<48x8xi1>
    %311 = vector.broadcast %cst_161 : f32 to vector<48x8xf32>
    %312 = arith.select %310, %301, %311 : vector<48x8xi1>, vector<48x8xf32>
    %c14 = arith.constant 14 : index
    %c0_162 = arith.constant 0 : index
    %c0_163 = arith.constant 0 : index
    %313 = vector.load %arg7[%c14, %c0_162, %c0_163] : memref<21x8x8xf32, #tpu.memory_space<vmem>>, vector<1x8x8xf32>
    %314 = vector.shape_cast %313 : vector<1x8x8xf32> to vector<8x8xf32>
    %cst_164 = arith.constant dense<0.000000e+00> : vector<48x8xf32>
    %315 = tpu.matmul %312, %314, %cst_164 {dimension_numbers = #tpu.dot_dimension_numbers<[1], [0], [0], [1], [0, 0, 1, 1], [], []>} : vector<48x8xf32>, vector<8x8xf32>, vector<48x8xf32> -> vector<48x8xf32>
    %316 = arith.addf %300, %315 : vector<48x8xf32>
    %c4_165 = arith.constant 4 : index
    %c0_166 = arith.constant 0 : index
    %c0_167 = arith.constant 0 : index
    %317 = vector.load %arg8[%c4_165, %c0_166, %c0_167] : memref<7x1x8xf32, #tpu.memory_space<vmem>>, vector<1x1x8xf32>
    %318 = vector.shape_cast %317 : vector<1x1x8xf32> to vector<1x8xf32>
    %319 = vector.broadcast %318 : vector<1x8xf32> to vector<48x8xf32>
    %320 = arith.addf %316, %319 : vector<48x8xf32>
    %cst_168 = arith.constant 0.000000e+00 : f32
    %321 = vector.broadcast %cst_168 : f32 to vector<48x8xf32>
    %322 = arith.maximumf %320, %321 : vector<48x8xf32>
    %c4_169 = arith.constant 4 : index
    %c0_170 = arith.constant 0 : index
    %c0_171 = arith.constant 0 : index
    %323 = vector.load %arg9[%c4_169, %c0_170, %c0_171] : memref<7x1x8xf32, #tpu.memory_space<vmem>>, vector<1x1x8xf32>
    %324 = vector.shape_cast %323 : vector<1x1x8xf32> to vector<1x8xf32>
    %325 = vector.broadcast %324 : vector<1x8xf32> to vector<48x8xf32>
    %326 = arith.mulf %322, %325 : vector<48x8xf32>
    %c4_172 = arith.constant 4 : index
    %c0_173 = arith.constant 0 : index
    %c0_174 = arith.constant 0 : index
    %327 = vector.load %arg10[%c4_172, %c0_173, %c0_174] : memref<7x1x8xf32, #tpu.memory_space<vmem>>, vector<1x1x8xf32>
    %328 = vector.shape_cast %327 : vector<1x1x8xf32> to vector<1x8xf32>
    %329 = vector.broadcast %328 : vector<1x8xf32> to vector<48x8xf32>
    %330 = arith.addf %326, %329 : vector<48x8xf32>
    %c0_175 = arith.constant 0 : index
    %c32_176 = arith.constant 32 : index
    %331 = vector.load %arg17[%c0_175, %c32_176] : memref<48x64xf32, #tpu.memory_space<vmem>>, vector<48x8xf32>
    tpu.vector_store %arg17[%c0_175, %c32_176], %330 {strides = array<i32>} : memref<48x64xf32, #tpu.memory_space<vmem>>, vector<48x8xf32>,
    %c0_177 = arith.constant 0 : index
    %c40 = arith.constant 40 : index
    %332 = vector.load %arg17[%c0_177, %c40] : memref<48x64xf32, #tpu.memory_space<vmem>>, vector<48x8xf32>
    %333 = arith.addf %330, %332 : vector<48x8xf32>
    %c2_i32_178 = arith.constant 2 : i32
    %334 = tpu.dynamic_rotate %333 by %c2_i32_178 dim 0 : vector<48x8xf32>, i32 -> vector<48x8xf32>
    %c18_i32_179 = arith.constant 18 : i32
    %335 = arith.subi %c18_i32_179, %0 : i32
    %336 = vector.broadcast %335 : i32 to vector<48x1xi32>
    %337 = arith.cmpi sge, %17, %336 : vector<48x1xi32>
    %c40_i32_180 = arith.constant 40 : i32
    %338 = arith.addi %335, %c40_i32_180 : i32
    %339 = vector.broadcast %338 : i32 to vector<48x1xi32>
    %340 = arith.cmpi slt, %17, %339 : vector<48x1xi32>
    %341 = arith.andi %337, %340 : vector<48x1xi1>
    %cst_181 = arith.constant 0.000000e+00 : f32
    %342 = vector.shape_cast %341 : vector<48x1xi1> to vector<48x1xi1>
    %343 = vector.broadcast %342 : vector<48x1xi1> to vector<48x8xi1>
    %344 = vector.broadcast %cst_181 : f32 to vector<48x8xf32>
    %345 = arith.select %343, %334, %344 : vector<48x8xi1>, vector<48x8xf32>
    %c15 = arith.constant 15 : index
    %c0_182 = arith.constant 0 : index
    %c0_183 = arith.constant 0 : index
    %346 = vector.load %arg7[%c15, %c0_182, %c0_183] : memref<21x8x8xf32, #tpu.memory_space<vmem>>, vector<1x8x8xf32>
    %347 = vector.shape_cast %346 : vector<1x8x8xf32> to vector<8x8xf32>
    %cst_184 = arith.constant dense<0.000000e+00> : vector<48x8xf32>
    %348 = tpu.matmul %345, %347, %cst_184 {dimension_numbers = #tpu.dot_dimension_numbers<[1], [0], [0], [1], [0, 0, 1, 1], [], []>} : vector<48x8xf32>, vector<8x8xf32>, vector<48x8xf32> -> vector<48x8xf32>
    %c16_i32_185 = arith.constant 16 : i32
    %349 = arith.subi %c16_i32_185, %0 : i32
    %350 = vector.broadcast %349 : i32 to vector<48x1xi32>
    %351 = arith.cmpi sge, %17, %350 : vector<48x1xi32>
    %c40_i32_186 = arith.constant 40 : i32
    %352 = arith.addi %349, %c40_i32_186 : i32
    %353 = vector.broadcast %352 : i32 to vector<48x1xi32>
    %354 = arith.cmpi slt, %17, %353 : vector<48x1xi32>
    %355 = arith.andi %351, %354 : vector<48x1xi1>
    %cst_187 = arith.constant 0.000000e+00 : f32
    %356 = vector.shape_cast %355 : vector<48x1xi1> to vector<48x1xi1>
    %357 = vector.broadcast %356 : vector<48x1xi1> to vector<48x8xi1>
    %358 = vector.broadcast %cst_187 : f32 to vector<48x8xf32>
    %359 = arith.select %357, %333, %358 : vector<48x8xi1>, vector<48x8xf32>
    %c16_188 = arith.constant 16 : index
    %c0_189 = arith.constant 0 : index
    %c0_190 = arith.constant 0 : index
    %360 = vector.load %arg7[%c16_188, %c0_189, %c0_190] : memref<21x8x8xf32, #tpu.memory_space<vmem>>, vector<1x8x8xf32>
    %361 = vector.shape_cast %360 : vector<1x8x8xf32> to vector<8x8xf32>
    %cst_191 = arith.constant dense<0.000000e+00> : vector<48x8xf32>
    %362 = tpu.matmul %359, %361, %cst_191 {dimension_numbers = #tpu.dot_dimension_numbers<[1], [0], [0], [1], [0, 0, 1, 1], [], []>} : vector<48x8xf32>, vector<8x8xf32>, vector<48x8xf32> -> vector<48x8xf32>
    %363 = arith.addf %348, %362 : vector<48x8xf32>
    %c46_i32_192 = arith.constant 46 : i32
    %364 = tpu.dynamic_rotate %333 by %c46_i32_192 dim 0 : vector<48x8xf32>, i32 -> vector<48x8xf32>
    %c14_i32_193 = arith.constant 14 : i32
    %365 = arith.subi %c14_i32_193, %0 : i32
    %366 = vector.broadcast %365 : i32 to vector<48x1xi32>
    %367 = arith.cmpi sge, %17, %366 : vector<48x1xi32>
    %c40_i32_194 = arith.constant 40 : i32
    %368 = arith.addi %365, %c40_i32_194 : i32
    %369 = vector.broadcast %368 : i32 to vector<48x1xi32>
    %370 = arith.cmpi slt, %17, %369 : vector<48x1xi32>
    %371 = arith.andi %367, %370 : vector<48x1xi1>
    %cst_195 = arith.constant 0.000000e+00 : f32
    %372 = vector.shape_cast %371 : vector<48x1xi1> to vector<48x1xi1>
    %373 = vector.broadcast %372 : vector<48x1xi1> to vector<48x8xi1>
    %374 = vector.broadcast %cst_195 : f32 to vector<48x8xf32>
    %375 = arith.select %373, %364, %374 : vector<48x8xi1>, vector<48x8xf32>
    %c17 = arith.constant 17 : index
    %c0_196 = arith.constant 0 : index
    %c0_197 = arith.constant 0 : index
    %376 = vector.load %arg7[%c17, %c0_196, %c0_197] : memref<21x8x8xf32, #tpu.memory_space<vmem>>, vector<1x8x8xf32>
    %377 = vector.shape_cast %376 : vector<1x8x8xf32> to vector<8x8xf32>
    %cst_198 = arith.constant dense<0.000000e+00> : vector<48x8xf32>
    %378 = tpu.matmul %375, %377, %cst_198 {dimension_numbers = #tpu.dot_dimension_numbers<[1], [0], [0], [1], [0, 0, 1, 1], [], []>} : vector<48x8xf32>, vector<8x8xf32>, vector<48x8xf32> -> vector<48x8xf32>
    %379 = arith.addf %363, %378 : vector<48x8xf32>
    %c5_199 = arith.constant 5 : index
    %c0_200 = arith.constant 0 : index
    %c0_201 = arith.constant 0 : index
    %380 = vector.load %arg8[%c5_199, %c0_200, %c0_201] : memref<7x1x8xf32, #tpu.memory_space<vmem>>, vector<1x1x8xf32>
    %381 = vector.shape_cast %380 : vector<1x1x8xf32> to vector<1x8xf32>
    %382 = vector.broadcast %381 : vector<1x8xf32> to vector<48x8xf32>
    %383 = arith.addf %379, %382 : vector<48x8xf32>
    %cst_202 = arith.constant 0.000000e+00 : f32
    %384 = vector.broadcast %cst_202 : f32 to vector<48x8xf32>
    %385 = arith.maximumf %383, %384 : vector<48x8xf32>
    %c5_203 = arith.constant 5 : index
    %c0_204 = arith.constant 0 : index
    %c0_205 = arith.constant 0 : index
    %386 = vector.load %arg9[%c5_203, %c0_204, %c0_205] : memref<7x1x8xf32, #tpu.memory_space<vmem>>, vector<1x1x8xf32>
    %387 = vector.shape_cast %386 : vector<1x1x8xf32> to vector<1x8xf32>
    %388 = vector.broadcast %387 : vector<1x8xf32> to vector<48x8xf32>
    %389 = arith.mulf %385, %388 : vector<48x8xf32>
    %c5_206 = arith.constant 5 : index
    %c0_207 = arith.constant 0 : index
    %c0_208 = arith.constant 0 : index
    %390 = vector.load %arg10[%c5_206, %c0_207, %c0_208] : memref<7x1x8xf32, #tpu.memory_space<vmem>>, vector<1x1x8xf32>
    %391 = vector.shape_cast %390 : vector<1x1x8xf32> to vector<1x8xf32>
    %392 = vector.broadcast %391 : vector<1x8xf32> to vector<48x8xf32>
    %393 = arith.addf %389, %392 : vector<48x8xf32>
    %c0_209 = arith.constant 0 : index
    %c40_210 = arith.constant 40 : index
    %394 = vector.load %arg17[%c0_209, %c40_210] : memref<48x64xf32, #tpu.memory_space<vmem>>, vector<48x8xf32>
    tpu.vector_store %arg17[%c0_209, %c40_210], %393 {strides = array<i32>} : memref<48x64xf32, #tpu.memory_space<vmem>>, vector<48x8xf32>,
    %c0_211 = arith.constant 0 : index
    %c48 = arith.constant 48 : index
    %395 = vector.load %arg17[%c0_211, %c48] : memref<48x64xf32, #tpu.memory_space<vmem>>, vector<48x8xf32>
    %396 = arith.addf %393, %395 : vector<48x8xf32>
    %c2_i32_212 = arith.constant 2 : i32
    %397 = tpu.dynamic_rotate %396 by %c2_i32_212 dim 0 : vector<48x8xf32>, i32 -> vector<48x8xf32>
    %c18_i32_213 = arith.constant 18 : i32
    %398 = arith.subi %c18_i32_213, %0 : i32
    %399 = vector.broadcast %398 : i32 to vector<48x1xi32>
    %400 = arith.cmpi sge, %17, %399 : vector<48x1xi32>
    %c40_i32_214 = arith.constant 40 : i32
    %401 = arith.addi %398, %c40_i32_214 : i32
    %402 = vector.broadcast %401 : i32 to vector<48x1xi32>
    %403 = arith.cmpi slt, %17, %402 : vector<48x1xi32>
    %404 = arith.andi %400, %403 : vector<48x1xi1>
    %cst_215 = arith.constant 0.000000e+00 : f32
    %405 = vector.shape_cast %404 : vector<48x1xi1> to vector<48x1xi1>
    %406 = vector.broadcast %405 : vector<48x1xi1> to vector<48x8xi1>
    %407 = vector.broadcast %cst_215 : f32 to vector<48x8xf32>
    %408 = arith.select %406, %397, %407 : vector<48x8xi1>, vector<48x8xf32>
    %c18 = arith.constant 18 : index
    %c0_216 = arith.constant 0 : index
    %c0_217 = arith.constant 0 : index
    %409 = vector.load %arg7[%c18, %c0_216, %c0_217] : memref<21x8x8xf32, #tpu.memory_space<vmem>>, vector<1x8x8xf32>
    %410 = vector.shape_cast %409 : vector<1x8x8xf32> to vector<8x8xf32>
    %cst_218 = arith.constant dense<0.000000e+00> : vector<48x8xf32>
    %411 = tpu.matmul %408, %410, %cst_218 {dimension_numbers = #tpu.dot_dimension_numbers<[1], [0], [0], [1], [0, 0, 1, 1], [], []>} : vector<48x8xf32>, vector<8x8xf32>, vector<48x8xf32> -> vector<48x8xf32>
    %c16_i32_219 = arith.constant 16 : i32
    %412 = arith.subi %c16_i32_219, %0 : i32
    %413 = vector.broadcast %412 : i32 to vector<48x1xi32>
    %414 = arith.cmpi sge, %17, %413 : vector<48x1xi32>
    %c40_i32_220 = arith.constant 40 : i32
    %415 = arith.addi %412, %c40_i32_220 : i32
    %416 = vector.broadcast %415 : i32 to vector<48x1xi32>
    %417 = arith.cmpi slt, %17, %416 : vector<48x1xi32>
    %418 = arith.andi %414, %417 : vector<48x1xi1>
    %cst_221 = arith.constant 0.000000e+00 : f32
    %419 = vector.shape_cast %418 : vector<48x1xi1> to vector<48x1xi1>
    %420 = vector.broadcast %419 : vector<48x1xi1> to vector<48x8xi1>
    %421 = vector.broadcast %cst_221 : f32 to vector<48x8xf32>
    %422 = arith.select %420, %396, %421 : vector<48x8xi1>, vector<48x8xf32>
    %c19 = arith.constant 19 : index
    %c0_222 = arith.constant 0 : index
    %c0_223 = arith.constant 0 : index
    %423 = vector.load %arg7[%c19, %c0_222, %c0_223] : memref<21x8x8xf32, #tpu.memory_space<vmem>>, vector<1x8x8xf32>
    %424 = vector.shape_cast %423 : vector<1x8x8xf32> to vector<8x8xf32>
    %cst_224 = arith.constant dense<0.000000e+00> : vector<48x8xf32>
    %425 = tpu.matmul %422, %424, %cst_224 {dimension_numbers = #tpu.dot_dimension_numbers<[1], [0], [0], [1], [0, 0, 1, 1], [], []>} : vector<48x8xf32>, vector<8x8xf32>, vector<48x8xf32> -> vector<48x8xf32>
    %426 = arith.addf %411, %425 : vector<48x8xf32>
    %c46_i32_225 = arith.constant 46 : i32
    %427 = tpu.dynamic_rotate %396 by %c46_i32_225 dim 0 : vector<48x8xf32>, i32 -> vector<48x8xf32>
    %c14_i32_226 = arith.constant 14 : i32
    %428 = arith.subi %c14_i32_226, %0 : i32
    %429 = vector.broadcast %428 : i32 to vector<48x1xi32>
    %430 = arith.cmpi sge, %17, %429 : vector<48x1xi32>
    %c40_i32_227 = arith.constant 40 : i32
    %431 = arith.addi %428, %c40_i32_227 : i32
    %432 = vector.broadcast %431 : i32 to vector<48x1xi32>
    %433 = arith.cmpi slt, %17, %432 : vector<48x1xi32>
    %434 = arith.andi %430, %433 : vector<48x1xi1>
    %cst_228 = arith.constant 0.000000e+00 : f32
    %435 = vector.shape_cast %434 : vector<48x1xi1> to vector<48x1xi1>
    %436 = vector.broadcast %435 : vector<48x1xi1> to vector<48x8xi1>
    %437 = vector.broadcast %cst_228 : f32 to vector<48x8xf32>
    %438 = arith.select %436, %427, %437 : vector<48x8xi1>, vector<48x8xf32>
    %c20 = arith.constant 20 : index
    %c0_229 = arith.constant 0 : index
    %c0_230 = arith.constant 0 : index
    %439 = vector.load %arg7[%c20, %c0_229, %c0_230] : memref<21x8x8xf32, #tpu.memory_space<vmem>>, vector<1x8x8xf32>
    %440 = vector.shape_cast %439 : vector<1x8x8xf32> to vector<8x8xf32>
    %cst_231 = arith.constant dense<0.000000e+00> : vector<48x8xf32>
    %441 = tpu.matmul %438, %440, %cst_231 {dimension_numbers = #tpu.dot_dimension_numbers<[1], [0], [0], [1], [0, 0, 1, 1], [], []>} : vector<48x8xf32>, vector<8x8xf32>, vector<48x8xf32> -> vector<48x8xf32>
    %442 = arith.addf %426, %441 : vector<48x8xf32>
    %c6_232 = arith.constant 6 : index
    %c0_233 = arith.constant 0 : index
    %c0_234 = arith.constant 0 : index
    %443 = vector.load %arg8[%c6_232, %c0_233, %c0_234] : memref<7x1x8xf32, #tpu.memory_space<vmem>>, vector<1x1x8xf32>
    %444 = vector.shape_cast %443 : vector<1x1x8xf32> to vector<1x8xf32>
    %445 = vector.broadcast %444 : vector<1x8xf32> to vector<48x8xf32>
    %446 = arith.addf %442, %445 : vector<48x8xf32>
    %cst_235 = arith.constant 0.000000e+00 : f32
    %447 = vector.broadcast %cst_235 : f32 to vector<48x8xf32>
    %448 = arith.maximumf %446, %447 : vector<48x8xf32>
    %c6_236 = arith.constant 6 : index
    %c0_237 = arith.constant 0 : index
    %c0_238 = arith.constant 0 : index
    %449 = vector.load %arg9[%c6_236, %c0_237, %c0_238] : memref<7x1x8xf32, #tpu.memory_space<vmem>>, vector<1x1x8xf32>
    %450 = vector.shape_cast %449 : vector<1x1x8xf32> to vector<1x8xf32>
    %451 = vector.broadcast %450 : vector<1x8xf32> to vector<48x8xf32>
    %452 = arith.mulf %448, %451 : vector<48x8xf32>
    %c6_239 = arith.constant 6 : index
    %c0_240 = arith.constant 0 : index
    %c0_241 = arith.constant 0 : index
    %453 = vector.load %arg10[%c6_239, %c0_240, %c0_241] : memref<7x1x8xf32, #tpu.memory_space<vmem>>, vector<1x1x8xf32>
    %454 = vector.shape_cast %453 : vector<1x1x8xf32> to vector<1x8xf32>
    %455 = vector.broadcast %454 : vector<1x8xf32> to vector<48x8xf32>
    %456 = arith.addf %452, %455 : vector<48x8xf32>
    %c0_242 = arith.constant 0 : index
    %c48_243 = arith.constant 48 : index
    %457 = vector.load %arg17[%c0_242, %c48_243] : memref<48x64xf32, #tpu.memory_space<vmem>>, vector<48x8xf32>
    tpu.vector_store %arg17[%c0_242, %c48_243], %456 {strides = array<i32>} : memref<48x64xf32, #tpu.memory_space<vmem>>, vector<48x8xf32>,
    %c16_244 = arith.constant 16 : index
    %c0_245 = arith.constant 0 : index
    %458 = vector.load %arg17[%c16_244, %c0_245] : memref<48x64xf32, #tpu.memory_space<vmem>>, vector<16x64xf32>
    %c0_246 = arith.constant 0 : index
    %c0_247 = arith.constant 0 : index
    %459 = vector.load %arg11[%c0_246, %c0_247] : memref<64x64xf32, #tpu.memory_space<vmem>>, vector<64x64xf32>
    %cst_248 = arith.constant dense<0.000000e+00> : vector<16x64xf32>
    %460 = tpu.matmul %458, %459, %cst_248 {dimension_numbers = #tpu.dot_dimension_numbers<[1], [0], [0], [1], [0, 0, 1, 1], [], []>} : vector<16x64xf32>, vector<64x64xf32>, vector<16x64xf32> -> vector<16x64xf32>
    %c0_249 = arith.constant 0 : index
    %c0_250 = arith.constant 0 : index
    %461 = vector.load %arg12[%c0_249, %c0_250] : memref<1x64xf32, #tpu.memory_space<vmem>>, vector<1x64xf32>
    %462 = vector.broadcast %461 : vector<1x64xf32> to vector<16x64xf32>
    %463 = arith.addf %460, %462 : vector<16x64xf32>
    %cst_251 = arith.constant 0.000000e+00 : f32
    %464 = vector.broadcast %cst_251 : f32 to vector<16x64xf32>
    %465 = arith.maximumf %463, %464 : vector<16x64xf32>
    %c0_252 = arith.constant 0 : index
    %c0_253 = arith.constant 0 : index
    %466 = vector.load %arg13[%c0_252, %c0_253] : memref<1x64xf32, #tpu.memory_space<vmem>>, vector<1x64xf32>
    %467 = vector.broadcast %466 : vector<1x64xf32> to vector<16x64xf32>
    %468 = arith.mulf %465, %467 : vector<16x64xf32>
    %c0_254 = arith.constant 0 : index
    %c0_255 = arith.constant 0 : index
    %469 = vector.load %arg14[%c0_254, %c0_255] : memref<1x64xf32, #tpu.memory_space<vmem>>, vector<1x64xf32>
    %470 = vector.broadcast %469 : vector<1x64xf32> to vector<16x64xf32>
    %471 = arith.addf %468, %470 : vector<16x64xf32>
    %c0_256 = arith.constant 0 : index
    %c0_257 = arith.constant 0 : index
    %c0_258 = arith.constant 0 : index
    %472 = vector.load %arg15[%c0_256, %c0_257, %c0_258] : memref<1x16x64xf32, #tpu.memory_space<vmem>>, vector<1x16x64xf32>
    %473 = vector.shape_cast %472 : vector<1x16x64xf32> to vector<16x64xf32>
    %474 = vector.shape_cast %471 : vector<16x64xf32> to vector<1x16x64xf32>
    tpu.vector_store %arg15[%c0_256, %c0_257, %c0_258], %474 {strides = array<i32>} : memref<1x16x64xf32, #tpu.memory_space<vmem>>, vector<1x16x64xf32>,
    %475 = tpu.iota {dimensions = array<i32: 0>} : vector<16x1xi32>
    %c40_i32_259 = arith.constant 40 : i32
    %476 = arith.subi %c40_i32_259, %0 : i32
    %477 = vector.broadcast %476 : i32 to vector<16x1xi32>
    %478 = arith.cmpi slt, %475, %477 : vector<16x1xi32>
    %cst_260 = arith.constant 0.000000e+00 : f32
    %479 = vector.shape_cast %478 : vector<16x1xi1> to vector<16x1xi1>
    %480 = vector.broadcast %479 : vector<16x1xi1> to vector<16x64xi1>
    %481 = vector.broadcast %cst_260 : f32 to vector<16x64xf32>
    %482 = arith.select %480, %471, %481 : vector<16x64xi1>, vector<16x64xf32>
    %cst_261 = arith.constant dense<0.000000e+00> : vector<64xf32>
    %483 = vector.multi_reduction <add>, %482, %cst_261 [0] : vector<16x64xf32> to vector<64xf32>
    %484 = vector.shape_cast %483 : vector<64xf32> to vector<1x64xf32>
    %c0_262 = arith.constant 0 : index
    %c0_263 = arith.constant 0 : index
    %c0_264 = arith.constant 0 : index
    %c0_265 = arith.constant 0 : index
    %485 = vector.load %arg16[%c0_262, %c0_263, %c0_264, %c0_265] : memref<1x1x1x64xf32, #tpu.memory_space<vmem>>, vector<1x1x1x64xf32>
    %486 = vector.shape_cast %485 : vector<1x1x1x64xf32> to vector<1x64xf32>
    %487 = vector.shape_cast %484 : vector<1x64xf32> to vector<1x1x1x64xf32>
    tpu.vector_store %arg16[%c0_262, %c0_263, %c0_264, %c0_265], %487 {strides = array<i32>} : memref<1x1x1x64xf32, #tpu.memory_space<vmem>>, vector<1x1x1x64xf32>,
    return
  }
  func.func @transform_0(%arg0: i32, %arg1: i32) -> (i32, i32, i32, i32) {
    %c0_i32 = arith.constant 0 : i32
    %c0_i32_0 = arith.constant 0 : i32
    %c0_i32_1 = arith.constant 0 : i32
    return %arg0, %arg1, %c0_i32, %c0_i32_0 : i32, i32, i32, i32
  }
  func.func @transform_1(%arg0: i32, %arg1: i32) -> (i32, i32) {
    %c0_i32 = arith.constant 0 : i32
    %c0_i32_0 = arith.constant 0 : i32
    %c0_i32_1 = arith.constant 0 : i32
    return %c0_i32, %c0_i32_0 : i32, i32
  }
  func.func @transform_2(%arg0: i32, %arg1: i32) -> (i32, i32) {
    %c0_i32 = arith.constant 0 : i32
    %c0_i32_0 = arith.constant 0 : i32
    %c0_i32_1 = arith.constant 0 : i32
    return %c0_i32, %c0_i32_0 : i32, i32
  }
  func.func @transform_3(%arg0: i32, %arg1: i32) -> (i32, i32) {
    %c0_i32 = arith.constant 0 : i32
    %c0_i32_0 = arith.constant 0 : i32
    %c0_i32_1 = arith.constant 0 : i32
    return %c0_i32, %c0_i32_0 : i32, i32
  }
  func.func @transform_4(%arg0: i32, %arg1: i32) -> (i32, i32) {
    %c0_i32 = arith.constant 0 : i32
    %c0_i32_0 = arith.constant 0 : i32
    %c0_i32_1 = arith.constant 0 : i32
    return %c0_i32, %c0_i32_0 : i32, i32
  }
  func.func @transform_5(%arg0: i32, %arg1: i32) -> (i32, i32, i32) {
    %c0_i32 = arith.constant 0 : i32
    %c0_i32_0 = arith.constant 0 : i32
    %c0_i32_1 = arith.constant 0 : i32
    %c0_i32_2 = arith.constant 0 : i32
    return %c0_i32, %c0_i32_0, %c0_i32_1 : i32, i32, i32
  }
  func.func @transform_6(%arg0: i32, %arg1: i32) -> (i32, i32, i32) {
    %c0_i32 = arith.constant 0 : i32
    %c0_i32_0 = arith.constant 0 : i32
    %c0_i32_1 = arith.constant 0 : i32
    %c0_i32_2 = arith.constant 0 : i32
    return %c0_i32, %c0_i32_0, %c0_i32_1 : i32, i32, i32
  }
  func.func @transform_7(%arg0: i32, %arg1: i32) -> (i32, i32, i32) {
    %c0_i32 = arith.constant 0 : i32
    %c0_i32_0 = arith.constant 0 : i32
    %c0_i32_1 = arith.constant 0 : i32
    %c0_i32_2 = arith.constant 0 : i32
    return %c0_i32, %c0_i32_0, %c0_i32_1 : i32, i32, i32
  }
  func.func @transform_8(%arg0: i32, %arg1: i32) -> (i32, i32, i32) {
    %c0_i32 = arith.constant 0 : i32
    %c0_i32_0 = arith.constant 0 : i32
    %c0_i32_1 = arith.constant 0 : i32
    %c0_i32_2 = arith.constant 0 : i32
    return %c0_i32, %c0_i32_0, %c0_i32_1 : i32, i32, i32
  }
  func.func @transform_9(%arg0: i32, %arg1: i32) -> (i32, i32) {
    %c0_i32 = arith.constant 0 : i32
    %c0_i32_0 = arith.constant 0 : i32
    %c0_i32_1 = arith.constant 0 : i32
    return %c0_i32, %c0_i32_0 : i32, i32
  }
  func.func @transform_10(%arg0: i32, %arg1: i32) -> (i32, i32) {
    %c0_i32 = arith.constant 0 : i32
    %c0_i32_0 = arith.constant 0 : i32
    %c0_i32_1 = arith.constant 0 : i32
    return %c0_i32, %c0_i32_0 : i32, i32
  }
  func.func @transform_11(%arg0: i32, %arg1: i32) -> (i32, i32) {
    %c0_i32 = arith.constant 0 : i32
    %c0_i32_0 = arith.constant 0 : i32
    %c0_i32_1 = arith.constant 0 : i32
    return %c0_i32, %c0_i32_0 : i32, i32
  }
  func.func @transform_12(%arg0: i32, %arg1: i32) -> (i32, i32) {
    %c0_i32 = arith.constant 0 : i32
    %c0_i32_0 = arith.constant 0 : i32
    %c0_i32_1 = arith.constant 0 : i32
    return %c0_i32, %c0_i32_0 : i32, i32
  }
  func.func @transform_13(%arg0: i32, %arg1: i32) -> (i32, i32, i32) {
    %c0_i32 = arith.constant 0 : i32
    %c0_i32_0 = arith.constant 0 : i32
    return %arg0, %arg1, %c0_i32 : i32, i32, i32
  }
  func.func @transform_14(%arg0: i32, %arg1: i32) -> (i32, i32, i32, i32) {
    %c0_i32 = arith.constant 0 : i32
    %c0_i32_0 = arith.constant 0 : i32
    %c0_i32_1 = arith.constant 0 : i32
    return %arg0, %arg1, %c0_i32, %c0_i32_0 : i32, i32, i32, i32
  }
}

</mosaic_0001>

<bundles_post_ra>
// kernel: tpu_custom_call.1
= control target key start
LH: loop header
LB: loop body
LE: loop exit
PB: predicated region body
PF: predicated region fallthrough
CT: control target
= control target key end

     0   :  { %s7009_s0 = inlined_call_operand.hbm [shape: f32[2,3,48,64], index: 0, kind: input, shape index: {}]   ;;  %s7010_s1 = inlined_call_operand.vmem [shape: f32[64,64], index: 1, kind: input, shape index: {}]   ;;  %s7011_s2 = inlined_call_operand.vmem [shape: f32[1,64], index: 2, kind: input, shape index: {}]   ;;  %s7012_s3 = inlined_call_operand.vmem [shape: f32[1,64], index: 3, kind: input, shape index: {}]   ;;  %s7013_s4 = inlined_call_operand.vmem [shape: f32[1,64], index: 4, kind: input, shape index: {}]   ;;  %s7014_s5 = inlined_call_operand.vmem [shape: f32[21,8,8], index: 5, kind: input, shape index: {}]   ;;  %s7015_s6 = inlined_call_operand.vmem [shape: f32[7,1,8], index: 6, kind: input, shape index: {}]   ;;  %s7016_s7 = inlined_call_operand.vmem [shape: f32[7,1,8], index: 7, kind: input, shape index: {}]   ;;  %s7017_s8 = inlined_call_operand.vmem [shape: f32[7,1,8], index: 8, kind: input, shape index: {}]   ;;  %s7018_s9 = inlined_call_operand.vmem [shape: f32[64,64], index: 9, kind: input, shape index: {}]   ;;  %s7019_s10 = inlined_call_operand.vmem [shape: f32[1,64], index: 10, kind: input, shape index: {}]   ;;  %s7020_s11 = inlined_call_operand.vmem [shape: f32[1,64], index: 11, kind: input, shape index: {}]   ;;  %s7021_s12 = inlined_call_operand.vmem [shape: f32[1,64], index: 12, kind: input, shape index: {}]   ;;  %s7022_s13 = inlined_call_operand.hbm [shape: f32[2,48,64], index: 13, kind: output, shape index: {0}]   ;;  %s7023_s14 = inlined_call_operand.hbm [shape: f32[2,3,1,64], index: 14, kind: output, shape index: {1}]  }
   0x1   :  { %7068 = sst [smem:[#allocation19_spill]] %s7009_s0 }
   0x2   :  { %7069 = sst [smem:[#allocation20_spill]] %s7010_s1 }
   0x3   :  { %7070 = sst [smem:[#allocation21_spill]] %s7011_s2 }
   0x4   :  { %7071 = sst [smem:[#allocation22_spill]] %s7019_s10 }
   0x5   :  { %7072 = sst [smem:[#allocation23_spill]] %s7020_s11 }
   0x6   :  { %7073 = sst [smem:[#allocation24_spill]] %s7021_s12 }
   0x7   :  { %7074 = sst [smem:[#allocation25_spill]] %s7022_s13 }
   0x8   :  { %7075 = sst [smem:[#allocation26_spill]] %s7023_s14 }
   0x9   :  { %20 = vsyncpa [#allocation4], 0 }
   0xa   :  { %22 = vsyncpa [#allocation4 + $0x1], 0 }
   0xb   :  { %23 = vsyncpa [#allocation5], 0 }
   0xc   :  { %25 = vsyncpa [#allocation5 + $0x1], 0 }
   0xd   :  { %26 = vsyncpa [#allocation8], 0 }
   0xe   :  { %28 = vsyncpa [#allocation8 + $0x1], 0  ;;  %s5730_s29 = smov 0   ;;  %s5732_s30 = smov 0  }
   0xf   :  { %s5734_s15 = smov 0   ;;  %s5736_s16 = smov 0  }
  0x10   :  { %s5738_s17 = smov 0   ;;  %s5740_s18 = smov 0  }
  0x11   :  { %s5742_s19 = smov 0   ;;  %s5744_s20 = smov 0  }
  0x12 LB: > { %7076 = sst [smem:[#allocation12_spill]] %s5607_s29  ;;  %s4596_s21 = sadd.s32 4294967295, %s5635_s20   ;;  %s5635_s20 = sphi %s5744_s20, %s34_s20   ;;  %s5631_s19 = sphi %s5742_s19, %s7384_s19   ;;  %s5627_s18 = sphi %s5740_s18, %s7378_s18   ;;  %s5623_s17 = sphi %s5738_s17, %s7383_s17   ;;  %s5619_s16 = sphi %s5736_s16, %s7377_s16   ;;  %s5615_s15 = sphi %s5734_s15, %s7382_s15   ;;  %s5611_s30 = sphi %s5732_s30, %s7381_s30   ;;  %s5607_s29 = sphi %s5730_s29, %s7380_s29  }
  0x13   : > { %7077 = sst [smem:[#allocation13_spill]] %s5623_s17  ;;  %s4597_s22 = sadd.s32 4294967294, %s5635_s20  }
  0x14   : > { %7078 = sst [smem:[#allocation14_spill]] %s5627_s18  ;;  %s43_s23 = sadd.s32 1, %s5627_s18 }
  0x15   : > { %s46_s24 = sadd.s32 1, %s5631_s19  ;;  %p44_p0 = scmp.ge.s32.totalorder %s43_s23, 3 }
  0x16   : > { %s55_s25 = sadd.s32 1, %s5615_s15  ;;  %p62_p1 = scmp.ne.s32.totalorder %s5615_s15, %s5611_s30 }
  0x17   : > { %p63_p2 = scmp.eq.s32.totalorder %s5635_s20, 0  ;;  %s7386_s23 = smov (%p44_p0, %s43_s23), 0 }
  0x18   : > { %7079 = sst [smem:[#allocation15_spill]] %s7386_s23  ;;  %s7388_s24 = smov (!%p44_p0, %s46_s24), %s5631_s19 }
  0x19   : > { %s51_s26 = ssub.s32 %s5627_s18, %s7386_s23  ;;  %p5783_p3 = por %p63_p2, %p62_p1 }
  0x1a   : > { %p48_p4 = scmp.ge.s32.totalorder %s7388_s24, 2  ;;  %p68_p5 = scmp.ne.s32.totalorder %s5611_s30, %s5607_s29 }
  0x1b   : > { %p69_p6 = scmp.eq.s32.totalorder %s4596_s21, 0  ;;  %p346_p7 = scmp.eq.s32.totalorder %s4596_s21, 5 }
  0x1c   : > { %s7390_s24 = smov (%p48_p4, %s7388_s24), 0  ;;  %p352_p10 = scmp.eq.s32.totalorder %s4597_s22, 5 }
  0x1d   : > { %7081 = sst [smem:[#allocation16_spill]] %s7390_s24  ;;  %p5791_p8 = por %p69_p6, %p68_p5 }
  0x1e   : > { %p5795_p9 = por %p346_p7, %p62_p1  ;;  %s50_s14 = ssub.s32 %s5631_s19, %s7390_s24 }
  0x1f   : > { %s52_s13 = sor.u32 %s51_s26, %s50_s14  ;;  %p5801_p12 = por %p352_p10, %p68_p5 }
  0x20   : > { %s7083_s23 = scalar_select %p5795_p9, 1, 0 }
  0x21   : > { %p53_p11 = scmp.eq.s32.totalorder %s52_s13, 0  ;;  %p5394_p13 = scmp.lt.s32.totalorder %s5635_s20, 6 }
  0x22   : > { %7084 = sst [smem:[#allocation17_spill]] %s7083_s23  ;;  %s436_s21 = sand.u32 1, %s5615_s15  }
  0x23   : > { %s7085_s29 = scalar_select %p5801_p12, 1, 0 }
  0x24   : > { %s5808_s12 = scalar_select %p53_p11, %s5615_s15, %s55_s25  }
  0x25   : > { %7086 = sst [smem:[#allocation18_spill]] %s7085_s29  ;;  %s5371_s11 = smul.u32 48, %s436_s21 }
  0x26   : > { %s5372_s10 = smul.u32 6, %s5627_s18  ;;  %p5813_p0 = pnand %p5394_p13, %p5783_p3 }
  0x27   : > { %s5373_s22 = smul.u32 18, %s5631_s19  ;;  %s440_s14 = scalar_lea.vmem [#allocation3], %s5371_s11 }
  0x28   : > { %s449_s13 = sshll.u32 %s440_s14, 4  ;;  %s7088_s0 = sld [smem:[#allocation19_spill]]  ;;  %s5818_s13 = int_to_ptr.vmem [resolvable:$true] %s449_s13 }
  0x29   : > { %s446_s26 = sadd.s32 %s5373_s22, %s5372_s10  ;;  %s5825_s27 = scalar_lea.sflag [#allocation4], %s436_s21 }
  0x2a   : > { %s4600_s24 = sshll.u32 %s446_s26, 7  ;;  %p5477_p2 = pneg %p5813_p0 }
  0x2e   : > { %s5823_s25 = scalar_lea.hbm %s7088_s0, %s4600_s24  ;;  %s5480_s29 = scalar_lea.hbm %s7088_s0, 4608 }
  0x2f   : > { %s5475_s18 = scalar_lea.hbm %s5823_s25, 768  ;;  %p5481_p5 = scmp.lt.u32.totalorder %s5823_s25, %s7088_s0 }
  0x30   : > { %p5476_p1 = scmp.ne.s32.totalorder %s5823_s25, %s5475_s18  ;;  %p5482_p6 = scmp.lt.u32.totalorder %s5480_s29, %s5475_s18 }
  0x31   : > { %p5484_p10 = scmp.lt.u32.totalorder %s5475_s18, %s5823_s25 }
  0x32   : > { %p5478_p3 = pnand %p5477_p2, %p5476_p1  ;;  %p5483_p7 = por %p5482_p6, %p5481_p5 }
  0x34   : > { %p5479_p4 = pneg %p5478_p3  ;;  %p5485_p11 = por %p5484_p10, %p5483_p7 }
  0x36   : > { %p5486_p13 = pnand %p5485_p11, %p5479_p4 }
  0x38   : > { %5489 = shalt.err (!%p5486_p13)
}
  0x39   : > { %s5490_s21 = scalar_lea.vmem %s5818_s13, 768  ;;  %s5637_s22 = smov [#allocation3]  }
  0x3a   : > { %p5491_p1 = scmp.ne.s32.totalorder %s5818_s13, %s5490_s21  ;;  %s5495_s14 = sshll.u32 %s5637_s22, 4  ;;  %s5496_s14 = int_to_ptr.vmem [resolvable:$false] %s5495_s14 }
  0x3b   : > { %s5497_s26 = scalar_lea.vmem %s5496_s14, 1536  ;;  %p5498_p9 = scmp.lt.s32.totalorder %s5818_s13, %s5496_s14 }
  0x3c   : > { %p5493_p3 = pnand %p5491_p1, %p5477_p2  ;;  %p5499_p5 = scmp.lt.s32.totalorder %s5497_s26, %s5490_s21 }
  0x3e   : > { %p5494_p12 = pneg %p5493_p3  ;;  %p5500_p6 = por %p5499_p5, %p5498_p9 }
  0x40   : > { %p5501_p7 = pnand %p5500_p6, %p5494_p12 }
  0x42   : > { %5504 = shalt.err (!%p5501_p7)
}
  0x43   : > { %s5638_s18 = smov 128   ;;  %s5639_s10 = smov 8  }
  0x44   : > { %5386 = dma.hbm_to_vmem [thread:$0]  (!%p5813_p0), %s5823_s25, 768, %s5818_s13, %s5825_s27, %s5638_s18, %s5638_s18, %s5639_s10  }
  0x45   : > { %p4601_p2 = scmp.ge.s32.totalorder %s5635_s20, 1  ;;  %p457_p4 = scmp.lt.s32.totalorder %s5635_s20, 7 }
  0x47   : > { %p458_p10 = pnand %p4601_p2, %p457_p4 }
  0x48   : > { %s5856_s11 = sand.u32 (!%p458_p10), 1, %s5611_s30  }
  0x49   : > { %461 = sbr.rel (%p458_p10) target bundleno = 3784 (0xec8), region = 72  ;;  %s464_s23 = scalar_lea.sflag (!%p458_p10), [#allocation4], %s5856_s11 }
  0x4a   : > { %s5374_s29 = smul.u32 (!%p458_p10), 48, %s5856_s11 }
  0x4c   : > { %s5860_s24 = scalar_lea.vmem (!%p458_p10), [#allocation3], %s5374_s29 }
  0x50   : > { %5594 = dma.done.wait (%p5791_p8), %s464_s23, 768  }
  0x51   : > { %5596 = vsyncadd (%p5791_p8), %s464_s23, 4294966528  ;;  %s7089_s1 = sld [smem:[#allocation20_spill]]  ;;  %vm7035_vm0 = vcmask 523264   ;;  %v518_v8 = vld [vmem:[%s5860_s24] sm:$0xff]  ;;  %v519_v13 = vld [vmem:[%s5860_s24 + $0x8] sm:$0xff]  ;;  %s7090_s2 = sld [smem:[#allocation21_spill]]  ;;  %v691_v24 = vlaneseq }
  0x52   : > { %4996 = vmatprep.mubr.msk.f32.mxu0 %vm7035_vm0, %v518_v8  ;;  %v520_v14 = vld [vmem:[%s5860_s24 + $0x10] sm:$0xff]  ;;  %v521_v15 = vld [vmem:[%s5860_s24 + $0x18] sm:$0xff]  ;;  %v522_v16 = vld [vmem:[%s5860_s24 + $0x20] sm:$0xff]  ;;  %s5918_s10 = sshll.u32 %s5619_s16, 4  ;;  %v7091_v59 = vmov 0  ;;  %vm7036_vm6 = vcmask 64512  }
  0x53   : > { %v523_v17 = vld [vmem:[%s5860_s24 + $0x28] sm:$0xff]  ;;  %v5908_v19 = vld [vmem:[%s7014_s5] sm:$0xff]  ;;  %v5923_v34 = vshrl.u32 %v691_v24, 7  ;;  %s758_s17 = ssub.s32 16, %s5918_s10  ;;  %s766_s13 = ssub.s32 56, %s5918_s10  ;;  %v7093_v62 = vmov 0 }
  0x54   : > { %v4613_v18 = vld [vmem:[%s7014_s5 + $0x8] sm:$0xff]  ;;  %v4611_v25 = vld [vmem:[%s7012_s3] ss:$0 sm:$0xff]  ;;  %v5927_v42 = vstv %s758_s17  ;;  %v5930_v46 = vstv %s766_s13  ;;  %s717_s25 = ssub.s32 18, %s5918_s10  ;;  %s725_s27 = ssub.s32 58, %s5918_s10 }
  0x55   : > { %5005 = vmatprep.subr.mxu1 %v4613_v18  ;;  %v4612_v28 = vld [vmem:[%s7013_s4] ss:$0 sm:$0xff]  ;;  %v5933_v47 = vadd.s32 8, %v5923_v34  ;;  %vm760_vm1 = vcmp.ge.s32.totalorder %v5923_v34, %v5927_v42  ;;  %vm768_vm2 = vcmp.lt.s32.totalorder %v5923_v34, %v5930_v46  ;;  %v5941_v54 = vadd.s32 16, %v5923_v34  ;;  %s1040_s14 = ssub.s32 14, %s5918_s10  ;;  %s1048_s26 = ssub.s32 54, %s5918_s10 }
  0x56   : > { %5006 = vmatpush3.msra.mxu1 %v4613_v18  ;;  %v5949_v56 = vadd.s32 24, %v5923_v34  ;;  %vm5952_vm5 = vmand %vm760_vm1, %vm768_vm2  ;;  %v5967_v63 = vadd.s32 32, %v5923_v34  ;;  %s5640_s22 = smov 120   ;;  %s7067_s13 = smov 8  }
  0x57   : > { %v524_v0 = vld [vmem:[%s7089_s1] sm:$0xff]  ;;  %v525_v1 = vld [vmem:[%s7089_s1 + $0x8] sm:$0xff]  ;;  %v526_v2 = vld [vmem:[%s7089_s1 + $0x10] sm:$0xff]  ;;  %5016 = vmatprep.subr.mxu1 %v5908_v19  ;;  %vm761_vm3 = vcmp.ge.s32.totalorder %v5933_v47, %v5927_v42  ;;  %vm769_vm4 = vcmp.lt.s32.totalorder %v5933_v47, %v5930_v46  ;;  %v7092_v59 = vsel %vm5952_vm5, 4294967295, %v7091_v59  ;;  %vm762_vm8 = vcmp.ge.s32.totalorder %v5941_v54, %v5927_v42  ;;  %s5644_s28 = smov 104   ;;  %s5646_s18 = smov 96  }
  0x58   : > { %v5255_v3 = vpack.c.bf16 %v525_v1, %v524_v0  ;;  %v527_v4 = vld [vmem:[%s7089_s1 + $0x18] sm:$0xff]  ;;  %v528_v6 = vld [vmem:[%s7089_s1 + $0x20] sm:$0xff]  ;;  %v529_v7 = vld [vmem:[%s7089_s1 + $0x28] sm:$0xff]  ;;  %vm770_vm9 = vcmp.lt.s32.totalorder %v5941_v54, %v5930_v46  ;;  %vm763_vm10 = vcmp.ge.s32.totalorder %v5949_v56, %v5927_v42  ;;  %vm771_vm11 = vcmp.lt.s32.totalorder %v5949_v56, %v5930_v46  ;;  %s5648_s23 = smov 88   ;;  %s5649_s24 = smov 40  }
  0x59   : > { %v5259_v5 = vpack.c.bf16 %v527_v4, %v526_v2  ;;  %v5263_v9 = vpack.c.bf16 %v529_v7, %v528_v6  ;;  %v530_v10 = vld [vmem:[%s7089_s1 + $0x30] sm:$0xff]  ;;  %v531_v11 = vld [vmem:[%s7089_s1 + $0x38] sm:$0xff]  ;;  %v4604_v20 = vld [vmem:[%s7090_s2] ss:$0 sm:$0xff]  ;;  %v5977_v1 = vadd.s32 40, %v5923_v34  ;;  %v7095_v4 = vmov 0 }
  0x5a   : > { %5256 = vmatprep.subr.bf16.mxu0 %v5255_v3  ;;  %v5267_v12 = vpack.c.bf16 %v531_v11, %v530_v10  ;;  %vm5958_vm7 = vmand %vm761_vm3, %vm769_vm4  ;;  %v7097_v7 = vmov 0  ;;  %vm764_vm14 = vcmp.ge.s32.totalorder %v5967_v63, %v5927_v42  ;;  %vm772_vm15 = vcmp.lt.s32.totalorder %v5967_v63, %v5930_v46  ;;  %s7359_s21 = sld [smem:[#allocation13_spill]]  ;;  %s4420_s29 = ssub.s32 40, %s5918_s10 }
  0x5b   : > { %5258 = vmatpush3.bf16.msra.mxu0 %v5255_v3  ;;  %v7094_v62 = vsel %vm5958_vm7, 4294967295, %v7093_v62  ;;  %vm5989_vm12 = vmand %vm762_vm8, %vm770_vm9  ;;  %vm765_vm1 = vcmp.ge.s32.totalorder %v5977_v1, %v5927_v42  ;;  %vm773_vm2 = vcmp.lt.s32.totalorder %v5977_v1, %v5930_v46  ;;  %v6016_v10 = vstv %s725_s27  ;;  %s5643_s27 = smov 16   ;;  %s7364_s1 = sld [smem:[#allocation24_spill]] }
  0x5c   : > { %5260 = vmatprep.subr.bf16.mxu0 %v5259_v5  ;;  %v7096_v4 = vsel %vm5989_vm12, 4294967295, %v7095_v4  ;;  %vm5999_vm13 = vmand %vm763_vm10, %vm771_vm11  ;;  %vm727_vm4 = vcmp.lt.s32.totalorder %v5923_v34, %v6016_v10  ;;  %vm7047_vm9 = vcmp.lt.s32.totalorder %v5923_v34, 2 }
  0x5d   : > { %v7098_v7 = vsel %vm5999_vm13, 4294967295, %v7097_v7  ;;  %vm6029_vm8 = vmand %vm764_vm14, %vm772_vm15  ;;  %vm728_vm15 = vcmp.lt.s32.totalorder %v5933_v47, %v6016_v10 }
  0x5e   : > { %vm6045_vm10 = vmand %vm765_vm1, %vm773_vm2  ;;  %vm729_vm2 = vcmp.lt.s32.totalorder %v5941_v54, %v6016_v10 }
  0x5f   : > { %5262 = vmatpush3.bf16.msra.mxu0 %v5259_v5  ;;  %v4626_v5 = vld [vmem:[%s7014_s5 + $0x10] sm:$0xff] }
  0x60   : > { %5264 = vmatprep.subr.bf16.mxu0 %v5263_v9 }
  0x63   : > { %5266 = vmatpush3.bf16.msra.mxu0 %v5263_v9  ;;  %v6014_v9 = vstv %s717_s25  ;;  %s5650_s25 = smov 80  }
  0x64   : > { %5268 = vmatprep.subr.bf16.mxu0 %v5267_v12  ;;  %vm719_vm3 = vcmp.ge.s32.totalorder %v5923_v34, %v6014_v9  ;;  %vm720_vm14 = vcmp.ge.s32.totalorder %v5933_v47, %v6014_v9  ;;  %vm721_vm1 = vcmp.ge.s32.totalorder %v5941_v54, %v6014_v9 }
  0x65   : > { %vm6052_vm11 = vmand %vm719_vm3, %vm727_vm4 }
  0x66   : > { %vm6079_vm3 = vmand %vm720_vm14, %vm728_vm15  ;;  %vm730_vm14 = vcmp.lt.s32.totalorder %v5949_v56, %v6016_v10  ;;  %vm723_vm15 = vcmp.ge.s32.totalorder %v5967_v63, %v6014_v9 }
  0x67   : > { %5270 = vmatpush3.bf16.msra.mxu0 %v5267_v12  ;;  %vm6089_vm4 = vmand %vm721_vm1, %vm729_vm2  ;;  %vm7109_vm1 = vcmask 64512  }
  0x6a   : > { %4997 = vmatmul.mubr.msk.f32.vlgmr.msra.gmra.mrb[0].mxu0 %vm7035_vm0, %v519_v13  ;;  %v7099_v13 = vmov 0 }
  0x6b   : > { %4999 = vmatprep.mubr.msk.f32.mxu0 %vm7035_vm0, %v520_v14  ;;  %v7100_v13 = vsel %vm6029_vm8, 4294967295, %v7099_v13 }
  0x6e   : > { %5000 = vmatmul.mubr.msk.f32.gmra.mrb[2].mxu0 %vm7035_vm0, %v521_v15 }
  0x6f   : > { %5002 = vmatprep.mubr.msk.f32.mxu0 %vm7035_vm0, %v522_v16 }
  0x72   : > { %5003 = vmatmul.mubr.msk.f32.gmra.mrb[4].mxu0 %vm7035_vm0, %v523_v17  ;;  %v7101_v17 = vmov 0 }
  0x73   : > { %v7102_v17 = vsel %vm6045_vm10, 4294967295, %v7101_v17 }
 0x13d   : > { %v4998_v21 = vpop.f32.mrb[0].mxu0 }
 0x13e   : > { %v630_v22 = vadd.f32 %v4998_v21, %v4604_v20  ;;  %v624_v23 = vpop.f32.mrb[1].mxu0 }
 0x13f   : > { %v625_v26 = vadd.f32 %v4604_v20, %v624_v23 }
 0x140   : > { %v654_v27 = vmax.f32 %v630_v22, 0.0 }
 0x141   : > { %v653_v29 = vmax.f32 %v625_v26, 0.0  ;;  %v5001_v30 = vpop.f32.mrb[2].mxu0 }
 0x142   : > { %v667_v31 = vmul.f32 %v4611_v25, %v654_v27  ;;  %v640_v32 = vadd.f32 %v5001_v30, %v4604_v20  ;;  %v634_v33 = vpop.f32.mrb[3].mxu0  ;;  %v7105_v27 = vmov 0  ;;  %v7107_v30 = vmov 0 }
 0x143   : > { %v666_v35 = vmul.f32 %v4611_v25, %v653_v29  ;;  %v635_v36 = vadd.f32 %v4604_v20, %v634_v33  ;;  %v7106_v27 = vsel %vm6079_vm3, 4294967295, %v7105_v27  ;;  %v7108_v30 = vsel %vm6089_vm4, 4294967295, %v7107_v30 }
 0x144   : > { %v680_v37 = vadd.f32 %v4612_v28, %v667_v31  ;;  %v656_v38 = vmax.f32 %v640_v32, 0.0  ;;  %v1041_v33 = vstv %s1040_s14  ;;  %s5642_s14 = smov 112  }
 0x145   : > { %v679_v39 = vadd.f32 %v4612_v28, %v666_v35  ;;  %v655_v40 = vmax.f32 %v635_v36, 0.0  ;;  %v5004_v41 = vpop.f32.mrb[4].mxu0  ;;  %v1049_v35 = vstv %s1048_s26  ;;  %s5647_s26 = smov 32  }
 0x146   : > { %686 = vst.msk [vmem:[#allocation2 + $0x8] sm:$0xff] %vm7035_vm0, %v680_v37  ;;  %v669_v43 = vmul.f32 %v4611_v25, %v656_v38  ;;  %v650_v44 = vadd.f32 %v5004_v41, %v4604_v20  ;;  %v644_v45 = vpop.f32.mrb[5].mxu0  ;;  %v7110_v38 = vmov 0  ;;  %v7113_v41 = vmov 0 }
 0x147   : > { %685 = vst.msk [vmem:[#allocation2] sm:$0xff] %vm7035_vm0, %v679_v39  ;;  %v668_v48 = vmul.f32 %v4611_v25, %v655_v40  ;;  %v645_v49 = vadd.f32 %v4604_v20, %v644_v45  ;;  %v7103_v20 = vmov 0 }
 0x148   : > { %v682_v50 = vadd.f32 %v4612_v28, %v669_v43  ;;  %v658_v51 = vmax.f32 %v650_v44, 0.0  ;;  %v7104_v20 = vsel %vm6052_vm11, 4294967295, %v7103_v20 }
 0x149   : > { %v681_v52 = vadd.f32 %v4612_v28, %v668_v48  ;;  %v657_v53 = vmax.f32 %v645_v49, 0.0  ;;  %v7117_v48 = vmov 0 }
 0x14a   : > { %688 = vst.msk [vmem:[#allocation2 + $0x18] sm:$0xff] %vm7035_vm0, %v682_v50  ;;  %v671_v55 = vmul.f32 %v4611_v25, %v658_v51  ;;  %v7121_v50 = vmov 0 }
 0x14b   : > { %687 = vst.msk [vmem:[#allocation2 + $0x10] sm:$0xff] %vm7035_vm0, %v681_v52  ;;  %v670_v57 = vmul.f32 %v4611_v25, %v657_v53 }
 0x14c   : > { %v684_v58 = vadd.f32 %v4612_v28, %v671_v55 }
 0x14d   : > { %v683_v60 = vadd.f32 %v4612_v28, %v670_v57  ;;  %v5956_v61 = vld [vmem:[#allocation2 + $0x8] sm:$0xff] }
 0x14e   : > { %690 = vst.msk [vmem:[#allocation2 + $0x28] sm:$0xff] %vm7035_vm0, %v684_v58  ;;  %v5970_v0 = vld [vmem:[#allocation2] sm:$0xff]  ;;  %v793_v3 = vsel %vm5958_vm7, %v5956_v61, 0.0  ;;  %v705_v15 = vrot.slane %v5956_v61, 6  ;;  %v1028_v42 = vrot.slane %v5956_v61, 2 }
 0x14f   : > { %689 = vst.msk [vmem:[#allocation2 + $0x20] sm:$0xff] %vm7035_vm0, %v683_v60  ;;  %v792_v2 = vsel %vm5952_vm5, %v5970_v0, 0.0  ;;  %v704_v14 = vrot.slane %v5970_v0, 6  ;;  %vm722_vm0 = vcmp.ge.s32.totalorder %v5949_v56, %v6014_v9  ;;  %v1027_v39 = vrot.slane %v5970_v0, 2 }
 0x150   : > { %5007 = vmatprep.mubr.msk.f32.mxu1 %vm7036_vm6, %v792_v2  ;;  %vm6109_vm2 = vmand %vm722_vm0, %vm730_vm14  ;;  %vm732_vm0 = vcmp.lt.s32.totalorder %v5977_v1, %v6016_v10  ;;  %v7128_v60 = vmov 0 }
 0x151   : > { %5008 = vmatmul.mubr.msk.f32.vlgmr.msra.gmra.mrb[0].mxu1 %vm7036_vm6, %v793_v3  ;;  %v5997_v6 = vld [vmem:[#allocation2 + $0x18] sm:$0xff]  ;;  %v715_v26 = vsel %vm7047_vm9, %v704_v14, %v705_v15  ;;  %v7111_v38 = vsel %vm6109_vm2, 4294967295, %v7110_v38 }
 0x152   : > { %5017 = vmatpush3.msra.mxu1 %v5908_v19  ;;  %v6008_v8 = vld [vmem:[#allocation2 + $0x10] sm:$0xff]  ;;  %v795_v12 = vsel %vm5999_vm13, %v5997_v6, 0.0  ;;  %v707_v28 = vrot.slane %v5997_v6, 6  ;;  %v752_v32 = vsel %vm6079_vm3, %v715_v26, 0.0  ;;  %vm7112_vm3 = vmmov %vm7109_vm1  ;;  %v1030_v51 = vrot.slane %v5997_v6, 2 }
 0x153   : > { %v794_v11 = vsel %vm5989_vm12, %v6008_v8, 0.0  ;;  %5027 = vmatprep.subr.mxu1 %v4626_v5  ;;  %v706_v21 = vrot.slane %v6008_v8, 6  ;;  %v1029_v44 = vrot.slane %v6008_v8, 2 }
 0x154   : > { %5010 = vmatprep.mubr.msk.f32.mxu1 %vm7036_vm6, %v794_v11  ;;  %v4637_v11 = vld [vmem:[%s7014_s5 + $0x20] sm:$0xff] }
 0x155   : > { %5011 = vmatmul.mubr.msk.f32.gmra.mrb[2].mxu1 %vm7036_vm6, %v795_v12  ;;  %v6037_v16 = vld [vmem:[#allocation2 + $0x28] sm:$0xff]  ;;  %v714_v29 = vsel %vm7047_vm9, %v705_v15, %v706_v21  ;;  %v713_v37 = vsel %vm7047_vm9, %v706_v21, %v707_v28  ;;  %5038 = vmatprep.subr.mxu0 %v4637_v11  ;;  %v4633_v12 = vld [vmem:[%s7015_s6] ss:$0 sm:$0xff] }
 0x156   : > { %v6049_v18 = vld [vmem:[#allocation2 + $0x20] sm:$0xff]  ;;  %v709_v19 = vrot.slane %v6037_v16, 6  ;;  %v797_v23 = vsel %vm6045_vm10, %v6037_v16, 0.0  ;;  %v753_v36 = vsel %vm6089_vm4, %v714_v29, 0.0  ;;  %vm1050_vm4 = vcmp.lt.s32.totalorder %v5923_v34, %v1049_v35  ;;  %5039 = vmatpush3.msra.mxu0 %v4637_v11 }
 0x157   : > { %v796_v22 = vsel %vm6029_vm8, %v6049_v18, 0.0  ;;  %v708_v31 = vrot.slane %v6049_v18, 6  ;;  %v754_v43 = vsel %vm6109_vm2, %v713_v37, 0.0  ;;  %vm7120_vm2 = vcmp.lt.s32.totalorder %v5923_v34, 6 }
 0x158   : > { %5013 = vmatprep.mubr.msk.f32.mxu1 %vm7036_vm6, %v796_v22  ;;  %v716_v24 = vsel %vm7047_vm9, %v709_v19, %v704_v14  ;;  %v1038_v49 = vsel %vm7120_vm2, %v1027_v39, %v1028_v42  ;;  %v1031_v58 = vrot.slane %v6049_v18, 2  ;;  %v1032_v61 = vrot.slane %v6037_v16, 2  ;;  %v4634_v18 = vld [vmem:[%s7016_s7] ss:$0 sm:$0xff] }
 0x159   : > { %5014 = vmatmul.mubr.msk.f32.gmra.mrb[4].mxu1 %vm7036_vm6, %v797_v23  ;;  %v751_v25 = vsel %vm6052_vm11, %v716_v24, 0.0  ;;  %v712_v40 = vsel %vm7047_vm9, %v707_v28, %v708_v31  ;;  %vm1042_vm11 = vcmp.ge.s32.totalorder %v5923_v34, %v1041_v33  ;;  %v711_v46 = vsel %vm7047_vm9, %v708_v31, %v709_v19  ;;  %v4635_v22 = vld [vmem:[%s7017_s8] ss:$0 sm:$0xff] }
 0x15a   : > { %5018 = vmatprep.mubr.msk.f32.mxu1 %vm7036_vm6, %v751_v25  ;;  %vm731_vm6 = vcmp.lt.s32.totalorder %v5967_v63, %v6016_v10  ;;  %vm6147_vm10 = vmand %vm1042_vm11, %vm1050_vm4  ;;  %vm1051_vm9 = vcmp.lt.s32.totalorder %v5933_v47, %v1049_v35  ;;  %v4305_v10 = vld [vmem:[%s7018_s9 + $0x18] sm:$0xff] }
 0x15b   : > { %v7122_v50 = vsel %vm6147_vm10, 4294967295, %v7121_v50  ;;  %v1074_v53 = vsel %vm6147_vm10, %v1038_v49, 0.0  ;;  %vm7123_vm11 = vmmov %vm7120_vm2  ;;  %vm1053_vm10 = vcmp.lt.s32.totalorder %v5949_v56, %v1049_v35 }
 0x15c   : > { %v1037_v55 = vsel %vm7123_vm11, %v1028_v42, %v1029_v44 }
 0x15d   : > { %5019 = vmatmul.mubr.msk.f32.vlgmr.msra.gmra.mrb[0].mxu1 %vm7109_vm1, %v752_v32  ;;  %vm6119_vm1 = vmand %vm723_vm15, %vm731_vm6 }
 0x15e   : > { %5028 = vmatpush3.msra.mxu1 %v4626_v5  ;;  %5021 = vmatprep.mubr.msk.f32.mxu1 %vm7112_vm3, %v753_v36  ;;  %v7114_v41 = vsel %vm6119_vm1, 4294967295, %v7113_v41  ;;  %vm7115_vm6 = vmmov %vm7112_vm3  ;;  %v755_v45 = vsel %vm6119_vm1, %v712_v40, 0.0  ;;  %vm7116_vm3 = vcmp.ge.s32.totalorder %v5977_v1, %v6014_v9  ;;  %v4302_v5 = vld [vmem:[%s7018_s9] sm:$0xff] }
 0x15f   : > { %vm6140_vm15 = vmand %vm7116_vm3, %vm732_vm0  ;;  %vm1044_vm0 = vcmp.ge.s32.totalorder %v5941_v54, %v1041_v33  ;;  %vm1052_vm3 = vcmp.lt.s32.totalorder %v5941_v54, %v1049_v35 }
 0x160   : > { %v7118_v48 = vsel %vm6140_vm15, 4294967295, %v7117_v48  ;;  %vm7119_vm14 = vmmov %vm7115_vm6  ;;  %v756_v52 = vsel %vm6140_vm15, %v711_v46, 0.0 }
 0x161   : > { %5022 = vmatmul.mubr.msk.f32.gmra.mrb[2].mxu1 %vm7115_vm6, %v754_v43  ;;  %vm1043_vm6 = vcmp.ge.s32.totalorder %v5933_v47, %v1041_v33  ;;  %vm7126_vm2 = vmmov %vm7119_vm14 }
 0x162   : > { %5024 = vmatprep.mubr.msk.f32.mxu1 %vm7119_vm14, %v755_v45  ;;  %vm6163_vm4 = vmand %vm1043_vm6, %vm1051_vm9  ;;  %vm1046_vm9 = vcmp.ge.s32.totalorder %v5967_v63, %v1041_v33  ;;  %vm1054_vm6 = vcmp.lt.s32.totalorder %v5967_v63, %v1049_v35  ;;  %v4304_v63 = vld [vmem:[%s7018_s9 + $0x10] sm:$0xff] }
 0x163   : > { %vm7127_vm1 = vmmov %vm7123_vm11  ;;  %v1075_v0 = vsel %vm6163_vm4, %v1037_v55, 0.0 }
 0x164   : > { %v1036_v54 = vsel %vm7127_vm1, %v1029_v44, %v1030_v51  ;;  %vm6171_vm15 = vmand %vm1044_vm0, %vm1052_vm3  ;;  %v1035_v3 = vsel %vm7127_vm1, %v1030_v51, %v1031_v58 }
 0x165   : > { %5025 = vmatmul.mubr.msk.f32.gmra.mrb[4].mxu1 %vm7119_vm14, %v756_v52  ;;  %v7129_v60 = vsel %vm6171_vm15, 4294967295, %v7128_v60  ;;  %vm1045_vm14 = vcmp.ge.s32.totalorder %v5949_v56, %v1041_v33  ;;  %vm7130_vm11 = vmmov %vm7126_vm2  ;;  %v1076_v2 = vsel %vm6171_vm15, %v1036_v54, 0.0  ;;  %vm1055_vm15 = vcmp.lt.s32.totalorder %v5977_v1, %v1049_v35  ;;  %v4636_v52 = vld [vmem:[%s7014_s5 + $0x18] sm:$0xff] }
 0x166   : > { %5029 = vmatprep.mubr.msk.f32.mxu1 %vm7126_vm2, %v1074_v53  ;;  %vm6187_vm0 = vmand %vm1045_vm14, %vm1053_vm10  ;;  %5049 = vmatprep.subr.mxu0 %v4636_v52 }
 0x167   : > { %vm7133_vm3 = vmmov %vm7126_vm2  ;;  %v1077_v6 = vsel %vm6187_vm0, %v1035_v3, 0.0 }
 0x168   : > { %vm7134_vm2 = vmmov %vm7127_vm1 }
 0x169   : > { %5030 = vmatmul.mubr.msk.f32.vlgmr.msra.gmra.mrb[0].mxu1 %vm7130_vm11, %v1075_v0  ;;  %v1034_v56 = vsel %vm7134_vm2, %v1031_v58, %v1032_v61  ;;  %vm6194_vm8 = vmand %vm1046_vm9, %vm1054_vm6  ;;  %vm1047_vm11 = vcmp.ge.s32.totalorder %v5977_v1, %v1041_v33 }
 0x16a   : > { %5032 = vmatprep.mubr.msk.f32.mxu1 %vm7133_vm3, %v1076_v2  ;;  %vm7137_vm10 = vmmov %vm7133_vm3  ;;  %v1078_v8 = vsel %vm6194_vm8, %v1034_v56, 0.0 }
 0x16b   : > { %vm7138_vm14 = vmmov %vm7127_vm1 }
 0x16c   : > { %v1039_v9 = vsel %vm7138_vm14, %v1032_v61, %v1027_v39  ;;  %vm6207_vm1 = vmand %vm1047_vm11, %vm1055_vm15 }
 0x16d   : > { %5033 = vmatmul.mubr.msk.f32.gmra.mrb[2].mxu1 %vm7137_vm10, %v1077_v6  ;;  %vm7141_vm9 = vmmov %vm7133_vm3  ;;  %v1079_v1 = vsel %vm6207_vm1, %v1039_v9, 0.0 }
 0x16e   : > { %5035 = vmatprep.mubr.msk.f32.mxu1 %vm7141_vm9, %v1078_v8  ;;  %vm7142_vm6 = vmmov %vm7133_vm3 }
 0x16f   : > { %vm7143_vm15 = vmmov %vm7133_vm3 }
 0x170   : > { %vm7144_vm2 = vmmov %vm7133_vm3 }
 0x171   : > { %5036 = vmatmul.mubr.msk.f32.gmra.mrb[4].mxu1 %vm7142_vm6, %v1079_v1  ;;  %vm7145_vm11 = vmmov %vm7144_vm2 }
 0x172   : > { %vm7146_vm10 = vmmov %vm7144_vm2 }
 0x173   : > { %vm7147_vm14 = vmmov %vm7144_vm2 }
 0x174   : > { %vm7148_vm9 = vmmov %vm7144_vm2 }
 0x175   : > { %vm7149_vm6 = vmmov %vm7144_vm2 }
 0x23c   : > { %v5031_v14 = vpop.f32.mrb[0].mxu1 }
 0x23d   : > { %v1209_v15 = vadd.f32 %v5031_v14, %v4633_v12  ;;  %v1166_v16 = vpop.f32.mrb[1].mxu1 }
 0x23e   : > { %v1208_v19 = vadd.f32 %v4633_v12, %v1166_v16 }
 0x23f   : > { %v1215_v21 = vmax.f32 %v1209_v15, 0.0 }
 0x240   : > { %v1214_v23 = vmax.f32 %v1208_v19, 0.0  ;;  %v5034_v24 = vpop.f32.mrb[2].mxu1 }
 0x241   : > { %v1228_v25 = vmul.f32 %v4634_v18, %v1215_v21  ;;  %v1211_v26 = vadd.f32 %v5034_v24, %v4633_v12  ;;  %v1176_v28 = vpop.f32.mrb[3].mxu1 }
 0x242   : > { %v1227_v29 = vmul.f32 %v4634_v18, %v1214_v23  ;;  %v1210_v31 = vadd.f32 %v4633_v12, %v1176_v28 }
 0x243   : > { %v1241_v32 = vadd.f32 %v4635_v22, %v1228_v25  ;;  %v1217_v33 = vmax.f32 %v1211_v26, 0.0 }
 0x244   : > { %v1240_v35 = vadd.f32 %v4635_v22, %v1227_v29  ;;  %v1216_v36 = vmax.f32 %v1210_v31, 0.0  ;;  %v5037_v37 = vpop.f32.mrb[4].mxu1 }
 0x245   : > { %1247 = vst.msk [vmem:[#allocation2 + $0x8] sm:$0xff] %vm7143_vm15, %v1241_v32  ;;  %v1230_v39 = vmul.f32 %v4634_v18, %v1217_v33  ;;  %v1213_v40 = vadd.f32 %v5037_v37, %v4633_v12  ;;  %v1186_v42 = vpop.f32.mrb[5].mxu1  ;;  %vm7150_vm15 = vmmov %vm7144_vm2 }
 0x246   : > { %1246 = vst.msk [vmem:[#allocation2] sm:$0xff] %vm7133_vm3, %v1240_v35  ;;  %v1229_v43 = vmul.f32 %v4634_v18, %v1216_v36  ;;  %v1212_v44 = vadd.f32 %v4633_v12, %v1186_v42  ;;  %vm7151_vm3 = vnez %v7100_v13 }
 0x247   : > { %v1243_v45 = vadd.f32 %v4635_v22, %v1230_v39  ;;  %v1219_v46 = vmax.f32 %v1213_v40, 0.0 }
 0x248   : > { %v1242_v49 = vadd.f32 %v4635_v22, %v1229_v43  ;;  %v1218_v51 = vmax.f32 %v1212_v44, 0.0 }
 0x249   : > { %1249 = vst.msk [vmem:[#allocation2 + $0x18] sm:$0xff] %vm7144_vm2, %v1243_v45  ;;  %v1232_v53 = vmul.f32 %v4634_v18, %v1219_v46 }
 0x24a   : > { %1248 = vst.msk [vmem:[#allocation2 + $0x10] sm:$0xff] %vm7145_vm11, %v1242_v49  ;;  %v1231_v55 = vmul.f32 %v4634_v18, %v1218_v51  ;;  %v4650_v18 = vld [vmem:[%s7014_s5 + $0x28] sm:$0xff]  ;;  %vm7152_vm11 = vmmov %vm7144_vm2 }
 0x24b   : > { %v1245_v58 = vadd.f32 %v4635_v22, %v1232_v53 }
 0x24c   : > { %v1244_v54 = vadd.f32 %v4635_v22, %v1231_v55  ;;  %v1253_v0 = vld [vmem:[#allocation2 + $0x8] sm:$0xff] }
 0x24d   : > { %1251 = vst.msk [vmem:[#allocation2 + $0x28] sm:$0xff] %vm7146_vm10, %v1245_v58  ;;  %v1252_v61 = vld [vmem:[#allocation2] sm:$0xff]  ;;  %vm7153_vm10 = vnez %v7102_v17 }
 0x24e   : > { %1250 = vst.msk [vmem:[#allocation2 + $0x20] sm:$0xff] %vm7147_vm14, %v1244_v54  ;;  %1264 = vrot.lane.b32.xlu0 %v1252_v61, %s5640_s22  ;;  %vm7154_vm14 = vmmov %vm7144_vm2 }
 0x250   : > { %v1255_v3 = vld [vmem:[#allocation2 + $0x18] sm:$0xff] }
 0x251   : > { %v1254_v2 = vld [vmem:[#allocation2 + $0x10] sm:$0xff] }
 0x252   : > { %1266 = vrot.lane.b32.xlu0 %v1253_v0, %s5640_s22  ;;  %1268 = vrot.lane.b32.xlu1 %v1254_v2, %s5640_s22 }
 0x254   : > { %v1257_v6 = vld [vmem:[#allocation2 + $0x28] sm:$0xff] }
 0x255   : > { %v1256_v56 = vld [vmem:[#allocation2 + $0x20] sm:$0xff] }
 0x256   : > { %1270 = vrot.lane.b32.xlu1 %v1255_v3, %s5640_s22  ;;  %1272 = vrot.lane.b32.xlu0 %v1256_v56, %s5640_s22 }
 0x25a   : > { %1274 = vrot.lane.b32.xlu1 %v1257_v6, %s5640_s22  ;;  %s5645_s22 = smov 24  }
 0x2c0   : > { %v1265_v8 = vpop.permute.xlu0 %1264 }
 0x2c1   : > { %v6236_v9 = vadd.f32 %v1265_v8, %v1240_v35 }
 0x2c3   : > { %v1308_v1 = vsel %vm5952_vm5, %v6236_v9, 0.0  ;;  %v1288_v33 = vrot.slane %v6236_v9, 6  ;;  %v1542_v53 = vrot.slane %v6236_v9, 2 }
 0x2c4   : > { %5040 = vmatprep.mubr.msk.f32.mxu0 %vm7148_vm9, %v1308_v1  ;;  %v1267_v11 = vpop.permute.xlu0 %1266  ;;  %v1269_v12 = vpop.permute.xlu1 %1268  ;;  %vm7155_vm9 = vcmp.lt.s32.totalorder %v5923_v34, 2 }
 0x2c5   : > { %v1283_v14 = vadd.f32 %v1267_v11, %v1241_v32  ;;  %v1284_v15 = vadd.f32 %v1269_v12, %v1242_v49 }
 0x2c7   : > { %v1309_v16 = vsel %vm5958_vm7, %v1283_v14, 0.0  ;;  %v1310_v22 = vsel %vm5989_vm12, %v1284_v15, 0.0  ;;  %v1289_v29 = vrot.slane %v1283_v14, 6  ;;  %v1290_v32 = vrot.slane %v1284_v15, 6 }
 0x2c8   : > { %5041 = vmatmul.mubr.msk.f32.vlgmr.msra.gmra.mrb[6].mxu0 %vm7149_vm6, %v1309_v16  ;;  %v1271_v19 = vpop.permute.xlu1 %1270  ;;  %v1273_v21 = vpop.permute.xlu0 %1272  ;;  %vm7156_vm6 = vmmov %vm7155_vm9  ;;  %v1543_v51 = vrot.slane %v1283_v14, 2 }
 0x2c9   : > { %5050 = vmatpush3.msra.mxu0 %v4636_v52  ;;  %v1285_v23 = vadd.f32 %v1271_v19, %v1243_v45  ;;  %v1286_v24 = vadd.f32 %v1273_v21, %v1244_v54  ;;  %5043 = vmatprep.mubr.msk.f32.mxu0 %vm7150_vm15, %v1310_v22  ;;  %v1298_v40 = vsel %vm7156_vm6, %v1288_v33, %v1289_v29  ;;  %v4658_v22 = vld [vmem:[%s7015_s6 + $0x1] ss:$0 sm:$0xff] }
 0x2ca   : > { %5060 = vmatprep.subr.mxu0 %v4650_v18  ;;  %vm7157_vm15 = vnez %v7104_v20 }
 0x2cb   : > { %v1311_v25 = vsel %vm5999_vm13, %v1285_v23, 0.0  ;;  %v1312_v28 = vsel %vm7151_vm3, %v1286_v24, 0.0  ;;  %v1291_v37 = vrot.slane %v1285_v23, 6  ;;  %v1292_v42 = vrot.slane %v1286_v24, 6  ;;  %vm7160_vm3 = vmmov %vm7152_vm11 }
 0x2cc   : > { %v1275_v26 = vpop.permute.xlu1 %1274  ;;  %5044 = vmatmul.mubr.msk.f32.gmra.mrb[8].mxu0 %vm7144_vm2, %v1311_v25  ;;  %vm7158_vm2 = vmmov %vm7156_vm6  ;;  %v1545_v0 = vrot.slane %v1285_v23, 2  ;;  %v1546_v56 = vrot.slane %v1286_v24, 2 }
 0x2cd   : > { %v1287_v31 = vadd.f32 %v1275_v26, %v1245_v58  ;;  %5046 = vmatprep.mubr.msk.f32.mxu0 %vm7152_vm11, %v1312_v28  ;;  %v1297_v44 = vsel %vm7158_vm2, %v1289_v29, %v1290_v32  ;;  %vm7163_vm6 = vmmov %vm7160_vm3  ;;  %v1544_v58 = vrot.slane %v1284_v15, 2  ;;  %v4660_v26 = vld [vmem:[%s7016_s7 + $0x1] ss:$0 sm:$0xff] }
 0x2cf   : > { %v1293_v35 = vrot.slane %v1287_v31, 6  ;;  %v1313_v36 = vsel %vm7153_vm10, %v1287_v31, 0.0  ;;  %vm7159_vm10 = vnez %v7106_v27  ;;  %v1547_v9 = vrot.slane %v1287_v31, 2 }
 0x2d0   : > { %5047 = vmatmul.mubr.msk.f32.gmra.mrb[10].mxu0 %vm7154_vm14, %v1313_v36  ;;  %v1301_v45 = vsel %vm7159_vm10, %v1298_v40, 0.0  ;;  %vm7161_vm14 = vnez %v7108_v30 }
 0x2d1   : > { %v1299_v39 = vsel %vm7155_vm9, %v1293_v35, %v1288_v33  ;;  %v1302_v46 = vsel %vm7161_vm14, %v1297_v44, 0.0  ;;  %vm7162_vm9 = vmmov %vm7158_vm2  ;;  %v4662_v33 = vld [vmem:[%s7017_s8 + $0x1] ss:$0 sm:$0xff] }
 0x2d2   : > { %v1300_v43 = vsel %vm7157_vm15, %v1299_v39, 0.0  ;;  %v1296_v49 = vsel %vm7162_vm9, %v1290_v32, %v1291_v37  ;;  %vm7164_vm15 = vmmov %vm7158_vm2  ;;  %vm7165_vm2 = vnez %v7111_v38  ;;  %v1294_v61 = vsel %vm7162_vm9, %v1292_v42, %v1293_v35 }
 0x2d3   : > { %5051 = vmatprep.mubr.msk.f32.mxu0 %vm7152_vm11, %v1300_v43  ;;  %v1295_v52 = vsel %vm7164_vm15, %v1291_v37, %v1292_v42  ;;  %v1303_v55 = vsel %vm7165_vm2, %v1296_v49, 0.0  ;;  %vm7166_vm11 = vnez %v7114_v41  ;;  %vm7167_vm14 = vmmov %vm7160_vm3  ;;  %vm7169_vm15 = vnez %v7118_v48 }
 0x2d4   : > { %5052 = vmatmul.mubr.msk.f32.vlgmr.msra.gmra.mrb[6].mxu0 %vm7160_vm3, %v1301_v45  ;;  %v1304_v54 = vsel %vm7166_vm11, %v1295_v52, 0.0  ;;  %v1305_v3 = vsel %vm7169_vm15, %v1294_v61, 0.0  ;;  %vm7170_vm2 = vmmov %vm7160_vm3  ;;  %vm7176_vm15 = vnez %v7129_v60 }
 0x2d5   : > { %5061 = vmatpush3.msra.mxu0 %v4650_v18  ;;  %5054 = vmatprep.mubr.msk.f32.mxu0 %vm7163_vm6, %v1302_v46  ;;  %vm7168_vm6 = vcmp.lt.s32.totalorder %v5923_v34, 6  ;;  %vm7173_vm9 = vmmov %vm7170_vm2 }
 0x2d6   : > { %v1552_v2 = vsel %vm7168_vm6, %v1542_v53, %v1543_v51  ;;  %vm7172_vm11 = vmmov %vm7168_vm6 }
 0x2d7   : > { %v1551_v8 = vsel %vm7172_vm11, %v1543_v51, %v1544_v58 }
 0x2d8   : > { %5055 = vmatmul.mubr.msk.f32.gmra.mrb[8].mxu0 %vm7160_vm3, %v1303_v55  ;;  %vm7171_vm3 = vnez %v7122_v50  ;;  %v1555_v11 = vsel %vm6163_vm4, %v1551_v8, 0.0 }
 0x2d9   : > { %5057 = vmatprep.mubr.msk.f32.mxu0 %vm7167_vm14, %v1304_v54  ;;  %v1554_v6 = vsel %vm7171_vm3, %v1552_v2, 0.0  ;;  %vm7174_vm14 = vmmov %vm7168_vm6 }
 0x2da   : > { %v1550_v1 = vsel %vm7174_vm14, %v1544_v58, %v1545_v0  ;;  %vm7175_vm6 = vmmov %vm7170_vm2 }
 0x2db   : > { %v1556_v12 = vsel %vm7176_vm15, %v1550_v1, 0.0  ;;  %vm7178_vm3 = vmmov %vm7175_vm6 }
 0x2dc   : > { %5058 = vmatmul.mubr.msk.f32.gmra.mrb[10].mxu0 %vm7170_vm2, %v1305_v3  ;;  %vm7177_vm2 = vmmov %vm7172_vm11  ;;  %v4664_v3 = vld [vmem:[%s7014_s5 + $0x38] sm:$0xff] }
 0x2dd   : > { %5062 = vmatprep.mubr.msk.f32.mxu0 %vm7173_vm9, %v1554_v6  ;;  %v1549_v14 = vsel %vm7177_vm2, %v1545_v0, %v1546_v56  ;;  %vm7179_vm11 = vmmov %vm7177_vm2  ;;  %5071 = vmatprep.subr.mxu1 %v4664_v3 }
 0x2de   : > { %v1548_v15 = vsel %vm7179_vm11, %v1546_v56, %v1547_v9  ;;  %v1557_v16 = vsel %vm6187_vm0, %v1549_v14, 0.0  ;;  %vm7180_vm9 = vmmov %vm7178_vm3  ;;  %5072 = vmatpush3.msra.mxu1 %v4664_v3 }
 0x2df   : > { %v1558_v18 = vsel %vm6194_vm8, %v1548_v15, 0.0  ;;  %vm7181_vm14 = vmmov %vm7177_vm2  ;;  %vm1753_vm2 = vcmask 130112  }
 0x2e0   : > { %5063 = vmatmul.mubr.msk.f32.vlgmr.msra.gmra.mrb[6].mxu0 %vm7175_vm6, %v1555_v11  ;;  %v1553_v19 = vsel %vm7181_vm14, %v1547_v9, %v1542_v53  ;;  %vm7182_vm6 = vmmov %vm7178_vm3  ;;  %v4663_v11 = vld [vmem:[%s7014_s5 + $0x30] sm:$0xff] }
 0x2e1   : > { %5065 = vmatprep.mubr.msk.f32.mxu0 %vm7178_vm3, %v1556_v12  ;;  %v1559_v21 = vsel %vm6207_vm1, %v1553_v19, 0.0  ;;  %5082 = vmatprep.subr.mxu1 %v4663_v11  ;;  %vm7183_vm11 = vmmov %vm7178_vm3 }
 0x2e2   : > { %vm7185_vm14 = vmmov %vm7178_vm3 }
 0x2e4   : > { %5066 = vmatmul.mubr.msk.f32.gmra.mrb[8].mxu0 %vm7180_vm9, %v1557_v16  ;;  %vm7184_vm9 = vmmov %vm7178_vm3 }
 0x2e5   : > { %5068 = vmatprep.mubr.msk.f32.mxu0 %vm7182_vm6, %v1558_v18  ;;  %vm7186_vm6 = vmmov %vm7178_vm3 }
 0x2e8   : > { %5069 = vmatmul.mubr.msk.f32.gmra.mrb[10].mxu0 %vm7178_vm3, %v1559_v21  ;;  %vm7187_vm3 = vnez %v7100_v13 }
 0x3b3   : > { %v5064_v23 = vpop.f32.mrb[6].mxu0 }
 0x3b4   : > { %v1690_v24 = vadd.f32 %v5064_v23, %v4658_v22  ;;  %v1646_v25 = vpop.f32.mrb[7].mxu0 }
 0x3b5   : > { %v1689_v28 = vadd.f32 %v4658_v22, %v1646_v25 }
 0x3b6   : > { %v1696_v29 = vmax.f32 %v1690_v24, 0.0 }
 0x3b7   : > { %v1695_v31 = vmax.f32 %v1689_v28, 0.0  ;;  %v5067_v32 = vpop.f32.mrb[8].mxu0 }
 0x3b8   : > { %v1710_v35 = vmul.f32 %v4660_v26, %v1696_v29  ;;  %v1692_v36 = vadd.f32 %v5067_v32, %v4658_v22  ;;  %v1656_v37 = vpop.f32.mrb[9].mxu0 }
 0x3b9   : > { %v1709_v39 = vmul.f32 %v4660_v26, %v1695_v31  ;;  %v1691_v40 = vadd.f32 %v4658_v22, %v1656_v37  ;;  %v4677_v37 = vld [vmem:[%s7014_s5 + $0x40] sm:$0xff] }
 0x3ba   : > { %v1698_v42 = vmax.f32 %v1692_v36, 0.0  ;;  %v1724_v43 = vadd.f32 %v4662_v33, %v1710_v35 }
 0x3bb   : > { %v1697_v44 = vmax.f32 %v1691_v40, 0.0  ;;  %v5070_v45 = vpop.f32.mrb[10].mxu0  ;;  %v1723_v46 = vadd.f32 %v4662_v33, %v1709_v39 }
 0x3bc   : > { %v1712_v49 = vmul.f32 %v4660_v26, %v1698_v42  ;;  %v1694_v51 = vadd.f32 %v5070_v45, %v4658_v22  ;;  %1737 = vrot.lane.b32.xlu1 %v1724_v43, %s7067_s13  ;;  %v1666_v52 = vpop.f32.mrb[11].mxu0 }
 0x3bd   : > { %v1711_v53 = vmul.f32 %v4660_v26, %v1697_v44  ;;  %v1693_v55 = vadd.f32 %v4658_v22, %v1666_v52  ;;  %1735 = vrot.lane.b32.xlu0 %v1723_v46, %s7067_s13 }
 0x3be   : > { %v1700_v58 = vmax.f32 %v1694_v51, 0.0  ;;  %v1726_v54 = vadd.f32 %v4662_v33, %v1712_v49 }
 0x3bf   : > { %v1699_v61 = vmax.f32 %v1693_v55, 0.0  ;;  %v1725_v0 = vadd.f32 %v4662_v33, %v1711_v53 }
 0x3c0   : > { %v1714_v2 = vmul.f32 %v4660_v26, %v1700_v58  ;;  %1741 = vrot.lane.b32.xlu1 %v1726_v54, %s7067_s13 }
 0x3c1   : > { %v1713_v56 = vmul.f32 %v4660_v26, %v1699_v61  ;;  %1739 = vrot.lane.b32.xlu0 %v1725_v0, %s7067_s13 }
 0x3c2   : > { %v1728_v6 = vadd.f32 %v4662_v33, %v1714_v2 }
 0x3c3   : > { %v1727_v8 = vadd.f32 %v4662_v33, %v1713_v56 }
 0x3c4   : > { %1745 = vrot.lane.b32.xlu1 %v1728_v6, %s7067_s13 }
 0x3c5   : > { %1743 = vrot.lane.b32.xlu0 %v1727_v8, %s7067_s13  ;;  %s7366_s13 = sld [smem:[#allocation25_spill]] }
 0x42e   : > { %v1738_v9 = vpop.permute.xlu1 %1737 }
 0x42f   : > { %1755 = vst.msk [vmem:[#allocation2 + $0x8] sm:$0xff] %vm1753_vm2, %v1738_v9  ;;  %v1736_v1 = vpop.permute.xlu0 %1735 }
 0x430   : > { %1754 = vst.msk [vmem:[#allocation2] sm:$0xff] %vm1753_vm2, %v1736_v1 }
 0x432   : > { %v1742_v12 = vpop.permute.xlu1 %1741 }
 0x433   : > { %1757 = vst.msk [vmem:[#allocation2 + $0x18] sm:$0xff] %vm1753_vm2, %v1742_v12  ;;  %v1740_v14 = vpop.permute.xlu0 %1739 }
 0x434   : > { %1756 = vst.msk [vmem:[#allocation2 + $0x10] sm:$0xff] %vm1753_vm2, %v1740_v14 }
 0x436   : > { %v1746_v15 = vpop.permute.xlu1 %1745  ;;  %v1761_v16 = vld [vmem:[#allocation2 + $0x8] sm:$0xff] }
 0x437   : > { %1759 = vst.msk [vmem:[#allocation2 + $0x28] sm:$0xff] %vm1753_vm2, %v1746_v15  ;;  %1774 = vrot.lane.b32.xlu1 %v1761_v16, %s5642_s14  ;;  %v1744_v18 = vpop.permute.xlu0 %1743  ;;  %v1760_v19 = vld [vmem:[#allocation2] sm:$0xff] }
 0x438   : > { %1758 = vst.msk [vmem:[#allocation2 + $0x20] sm:$0xff] %vm1753_vm2, %v1744_v18  ;;  %1772 = vrot.lane.b32.xlu0 %v1760_v19, %s5642_s14  ;;  %vm7188_vm2 = vmmov %vm7186_vm6 }
 0x43a   : > { %v1763_v21 = vld [vmem:[#allocation2 + $0x18] sm:$0xff] }
 0x43b   : > { %1778 = vrot.lane.b32.xlu1 %v1763_v21, %s5642_s14  ;;  %v1762_v22 = vld [vmem:[#allocation2 + $0x10] sm:$0xff] }
 0x43c   : > { %1776 = vrot.lane.b32.xlu0 %v1762_v22, %s5642_s14 }
 0x43e   : > { %v1765_v23 = vld [vmem:[#allocation2 + $0x28] sm:$0xff] }
 0x43f   : > { %1782 = vrot.lane.b32.xlu1 %v1765_v23, %s5642_s14  ;;  %v1764_v24 = vld [vmem:[#allocation2 + $0x20] sm:$0xff] }
 0x440   : > { %1780 = vrot.lane.b32.xlu0 %v1764_v24, %s5642_s14 }
 0x4a9   : > { %v1775_v25 = vpop.permute.xlu1 %1774 }
 0x4aa   : > { %v1791_v26 = vadd.f32 %v1775_v25, %v1724_v43  ;;  %v1773_v28 = vpop.permute.xlu0 %1772 }
 0x4ab   : > { %v6349_v29 = vadd.f32 %v1773_v28, %v1723_v46 }
 0x4ac   : > { %v1817_v33 = vsel %vm5958_vm7, %v1791_v26, 0.0  ;;  %v1797_v46 = vrot.slane %v1791_v26, 6  ;;  %v2051_v1 = vrot.slane %v1791_v26, 2 }
 0x4ad   : > { %v1779_v31 = vpop.permute.xlu1 %1778  ;;  %v1816_v32 = vsel %vm5952_vm5, %v6349_v29, 0.0  ;;  %v1796_v49 = vrot.slane %v6349_v29, 6 }
 0x4ae   : > { %v1793_v35 = vadd.f32 %v1779_v31, %v1726_v54  ;;  %5073 = vmatprep.mubr.msk.f32.mxu1 %vm7183_vm11, %v1816_v32  ;;  %v1777_v36 = vpop.permute.xlu0 %1776  ;;  %vm7189_vm11 = vnez %v7102_v17 }
 0x4af   : > { %v1792_v39 = vadd.f32 %v1777_v36, %v1725_v0  ;;  %5074 = vmatmul.mubr.msk.f32.vlgmr.msra.gmra.mrb[6].mxu1 %vm7184_vm9, %v1817_v33  ;;  %vm7190_vm9 = vcmp.lt.s32.totalorder %v5923_v34, 2 }
 0x4b0   : > { %5083 = vmatpush3.msra.mxu1 %v4663_v11  ;;  %v1819_v45 = vsel %vm5999_vm13, %v1793_v35, 0.0  ;;  %v1799_v61 = vrot.slane %v1793_v35, 6  ;;  %vm7192_vm13 = vnez %v7104_v20  ;;  %v2050_v11 = vrot.slane %v6349_v29, 2 }
 0x4b1   : > { %v1783_v40 = vpop.permute.xlu1 %1782  ;;  %v1818_v42 = vsel %vm5989_vm12, %v1792_v39, 0.0  ;;  %5093 = vmatprep.subr.mxu1 %v4677_v37  ;;  %v1798_v52 = vrot.slane %v1792_v39, 6  ;;  %vm7194_vm12 = vmmov %vm7188_vm2  ;;  %v2052_v15 = vrot.slane %v1792_v39, 2  ;;  %v2053_v19 = vrot.slane %v1793_v35, 2 }
 0x4b2   : > { %v1795_v43 = vadd.f32 %v1783_v40, %v1728_v6  ;;  %5076 = vmatprep.mubr.msk.f32.mxu1 %vm7185_vm14, %v1818_v42  ;;  %v1781_v44 = vpop.permute.xlu0 %1780  ;;  %vm7191_vm14 = vmmov %vm7188_vm2  ;;  %v4685_v40 = vld [vmem:[%s7015_s6 + $0x2] ss:$0 sm:$0xff] }
 0x4b3   : > { %v1794_v51 = vadd.f32 %v1781_v44, %v1727_v8  ;;  %5077 = vmatmul.mubr.msk.f32.gmra.mrb[8].mxu1 %vm7186_vm6, %v1819_v45  ;;  %vm7193_vm6 = vmmov %vm7190_vm9  ;;  %v4687_v45 = vld [vmem:[%s7016_s7 + $0x2] ss:$0 sm:$0xff] }
 0x4b4   : > { %v1801_v53 = vrot.slane %v1795_v43, 6  ;;  %v1821_v58 = vsel %vm7189_vm11, %v1795_v43, 0.0  ;;  %v1806_v2 = vsel %vm7193_vm6, %v1796_v49, %v1797_v46  ;;  %vm7196_vm11 = vmmov %vm7194_vm12  ;;  %v2055_v26 = vrot.slane %v1795_v43, 2 }
 0x4b5   : > { %v1820_v55 = vsel %vm7187_vm3, %v1794_v51, 0.0  ;;  %v1800_v3 = vrot.slane %v1794_v51, 6  ;;  %v1809_v6 = vsel %vm7159_vm10, %v1806_v2, 0.0  ;;  %v2054_v23 = vrot.slane %v1794_v51, 2 }
 0x4b6   : > { %5079 = vmatprep.mubr.msk.f32.mxu1 %vm7188_vm2, %v1820_v55  ;;  %v1807_v54 = vsel %vm7190_vm9, %v1801_v53, %v1796_v49  ;;  %vm7195_vm2 = vmmov %vm7193_vm6  ;;  %vm7197_vm9 = vnez %v7108_v30 }
 0x4b7   : > { %5080 = vmatmul.mubr.msk.f32.gmra.mrb[10].mxu1 %vm7191_vm14, %v1821_v58  ;;  %v1808_v0 = vsel %vm7192_vm13, %v1807_v54, 0.0  ;;  %v1805_v56 = vsel %vm7195_vm2, %v1797_v46, %v1798_v52  ;;  %vm7198_vm14 = vmmov %vm7195_vm2 }
 0x4b8   : > { %5084 = vmatprep.mubr.msk.f32.mxu1 %vm7194_vm12, %v1808_v0  ;;  %v1810_v8 = vsel %vm7197_vm9, %v1805_v56, 0.0  ;;  %v1804_v9 = vsel %vm7198_vm14, %v1798_v52, %v1799_v61  ;;  %vm7199_vm6 = vmmov %vm7196_vm11  ;;  %vm7203_vm9 = vnez %v7114_v41 }
 0x4b9   : > { %vm7200_vm12 = vmmov %vm7195_vm2  ;;  %vm7201_vm2 = vnez %v7111_v38 }
 0x4ba   : > { %v1803_v12 = vsel %vm7200_vm12, %v1799_v61, %v1800_v3  ;;  %v1811_v14 = vsel %vm7201_vm2, %v1804_v9, 0.0  ;;  %vm7204_vm14 = vmmov %vm7200_vm12  ;;  %vm7207_vm12 = vnez %v7118_v48 }
 0x4bb   : > { %5085 = vmatmul.mubr.msk.f32.vlgmr.msra.gmra.mrb[6].mxu1 %vm7196_vm11, %v1809_v6  ;;  %vm7202_vm11 = vmmov %vm7199_vm6  ;;  %v1812_v16 = vsel %vm7203_vm9, %v1803_v12, 0.0  ;;  %v1802_v18 = vsel %vm7204_vm14, %v1800_v3, %v1801_v53  ;;  %v4689_v53 = vld [vmem:[%s7017_s8 + $0x2] ss:$0 sm:$0xff] }
 0x4bc   : > { %5094 = vmatpush3.msra.mxu1 %v4677_v37  ;;  %5087 = vmatprep.mubr.msk.f32.mxu1 %vm7199_vm6, %v1810_v8  ;;  %vm7205_vm10 = vmmov %vm7199_vm6  ;;  %vm7206_vm6 = vcmp.lt.s32.totalorder %v5923_v34, 6  ;;  %v1813_v22 = vsel %vm7207_vm12, %v1802_v18, 0.0 }
 0x4bd   : > { %v2060_v21 = vsel %vm7206_vm6, %v2050_v11, %v2051_v1  ;;  %vm7208_vm2 = vmmov %vm7205_vm10 }
 0x4be   : > { %vm7210_vm9 = vmmov %vm7206_vm6 }
 0x4bf   : > { %5088 = vmatmul.mubr.msk.f32.gmra.mrb[8].mxu1 %vm7202_vm11, %v1811_v14  ;;  %vm7209_vm11 = vnez %v7122_v50  ;;  %v2059_v25 = vsel %vm7210_vm9, %v2051_v1, %v2052_v15  ;;  %vm7211_vm14 = vmmov %vm7208_vm2 }
 0x4c0   : > { %5090 = vmatprep.mubr.msk.f32.mxu1 %vm7205_vm10, %v1812_v16  ;;  %v2062_v24 = vsel %vm7209_vm11, %v2060_v21, 0.0  ;;  %vm7212_vm10 = vmmov %vm7206_vm6  ;;  %v2063_v29 = vsel %vm6163_vm4, %v2059_v25, 0.0 }
 0x4c1   : > { %v2058_v28 = vsel %vm7212_vm10, %v2052_v15, %v2053_v19  ;;  %vm7213_vm6 = vmmov %vm7208_vm2 }
 0x4c2   : > { %v2064_v31 = vsel %vm7176_vm15, %v2058_v28, 0.0  ;;  %vm7215_vm11 = vmmov %vm7213_vm6 }
 0x4c3   : > { %5091 = vmatmul.mubr.msk.f32.gmra.mrb[10].mxu1 %vm7208_vm2, %v1813_v22  ;;  %vm7214_vm2 = vmmov %vm7210_vm9  ;;  %v4691_v22 = vld [vmem:[%s7014_s5 + $0x50] sm:$0xff] }
 0x4c4   : > { %5095 = vmatprep.mubr.msk.f32.mxu1 %vm7211_vm14, %v2062_v24  ;;  %v2057_v32 = vsel %vm7214_vm2, %v2053_v19, %v2054_v23  ;;  %vm7216_vm9 = vmmov %vm7214_vm2  ;;  %5104 = vmatprep.subr.mxu0 %v4691_v22 }
 0x4c5   : > { %v2056_v33 = vsel %vm7216_vm9, %v2054_v23, %v2055_v26  ;;  %v2065_v35 = vsel %vm6187_vm0, %v2057_v32, 0.0  ;;  %vm7217_vm14 = vmmov %vm7213_vm6  ;;  %5105 = vmatpush3.msra.mxu0 %v4691_v22 }
 0x4c6   : > { %v2066_v36 = vsel %vm6194_vm8, %v2056_v33, 0.0  ;;  %vm7218_vm10 = vmmov %vm7214_vm2  ;;  %vm2261_vm2 = vcmask 195712  }
 0x4c7   : > { %5096 = vmatmul.mubr.msk.f32.vlgmr.msra.gmra.mrb[6].mxu1 %vm7213_vm6, %v2063_v29  ;;  %v2061_v37 = vsel %vm7218_vm10, %v2055_v26, %v2050_v11  ;;  %v4690_v29 = vld [vmem:[%s7014_s5 + $0x48] sm:$0xff]  ;;  %vm7220_vm9 = vmmov %vm7213_vm6  ;;  %vm7222_vm10 = vnez %v7096_v4 }
 0x4c8   : > { %5098 = vmatprep.mubr.msk.f32.mxu1 %vm7215_vm11, %v2064_v31  ;;  %v2067_v39 = vsel %vm6207_vm1, %v2061_v37, 0.0  ;;  %vm7219_vm11 = vmmov %vm7213_vm6  ;;  %5115 = vmatprep.subr.mxu0 %v4690_v29 }
 0x4cb   : > { %5099 = vmatmul.mubr.msk.f32.gmra.mrb[8].mxu1 %vm7217_vm14, %v2065_v35  ;;  %vm7221_vm14 = vmmov %vm7213_vm6 }
 0x4cc   : > { %5101 = vmatprep.mubr.msk.f32.mxu1 %vm7213_vm6, %v2066_v36 }
 0x4cf   : > { %5102 = vmatmul.mubr.msk.f32.gmra.mrb[10].mxu1 %vm7219_vm11, %v2067_v39  ;;  %vm7223_vm11 = vnez %v7098_v7 }
 0x59a   : > { %v5097_v42 = vpop.f32.mrb[6].mxu1 }
 0x59b   : > { %v2198_v43 = vadd.f32 %v5097_v42, %v4685_v40  ;;  %v2154_v44 = vpop.f32.mrb[7].mxu1 }
 0x59c   : > { %v2197_v46 = vadd.f32 %v4685_v40, %v2154_v44 }
 0x59d   : > { %v2204_v49 = vmax.f32 %v2198_v43, 0.0 }
 0x59e   : > { %v2203_v51 = vmax.f32 %v2197_v46, 0.0  ;;  %v5100_v52 = vpop.f32.mrb[8].mxu1 }
 0x59f   : > { %v2218_v55 = vmul.f32 %v4687_v45, %v2204_v49  ;;  %v2200_v58 = vadd.f32 %v5100_v52, %v4685_v40  ;;  %v2164_v54 = vpop.f32.mrb[9].mxu1 }
 0x5a0   : > { %v2217_v61 = vmul.f32 %v4687_v45, %v2203_v51  ;;  %v2199_v0 = vadd.f32 %v4685_v40, %v2164_v54  ;;  %v4704_v54 = vld [vmem:[%s7014_s5 + $0x58] sm:$0xff] }
 0x5a1   : > { %v2206_v2 = vmax.f32 %v2200_v58, 0.0  ;;  %v2232_v3 = vadd.f32 %v4689_v53, %v2218_v55 }
 0x5a2   : > { %v2205_v56 = vmax.f32 %v2199_v0, 0.0  ;;  %v5103_v6 = vpop.f32.mrb[10].mxu1  ;;  %v2231_v8 = vadd.f32 %v4689_v53, %v2217_v61 }
 0x5a3   : > { %v2220_v9 = vmul.f32 %v4687_v45, %v2206_v2  ;;  %v2202_v1 = vadd.f32 %v5103_v6, %v4685_v40  ;;  %2245 = vrot.lane.b32.xlu1 %v2232_v3, %s5643_s27  ;;  %v2174_v11 = vpop.f32.mrb[11].mxu1 }
 0x5a4   : > { %v2219_v12 = vmul.f32 %v4687_v45, %v2205_v56  ;;  %v2201_v14 = vadd.f32 %v4685_v40, %v2174_v11  ;;  %2243 = vrot.lane.b32.xlu0 %v2231_v8, %s5643_s27 }
 0x5a5   : > { %v2208_v15 = vmax.f32 %v2202_v1, 0.0  ;;  %v2234_v16 = vadd.f32 %v4689_v53, %v2220_v9 }
 0x5a6   : > { %v2207_v18 = vmax.f32 %v2201_v14, 0.0  ;;  %v2233_v19 = vadd.f32 %v4689_v53, %v2219_v12 }
 0x5a7   : > { %v2222_v21 = vmul.f32 %v4687_v45, %v2208_v15  ;;  %2249 = vrot.lane.b32.xlu1 %v2234_v16, %s5643_s27 }
 0x5a8   : > { %v2221_v23 = vmul.f32 %v4687_v45, %v2207_v18  ;;  %2247 = vrot.lane.b32.xlu0 %v2233_v19, %s5643_s27 }
 0x5a9   : > { %v2236_v24 = vadd.f32 %v4689_v53, %v2222_v21 }
 0x5aa   : > { %v2235_v25 = vadd.f32 %v4689_v53, %v2221_v23 }
 0x5ab   : > { %2253 = vrot.lane.b32.xlu1 %v2236_v24, %s5643_s27 }
 0x5ac   : > { %2251 = vrot.lane.b32.xlu0 %v2235_v25, %s5643_s27  ;;  %s5651_s27 = smov 48  }
 0x615   : > { %v2246_v26 = vpop.permute.xlu1 %2245 }
 0x616   : > { %2263 = vst.msk [vmem:[#allocation2 + $0x8] sm:$0xff] %vm2261_vm2, %v2246_v26  ;;  %v2244_v28 = vpop.permute.xlu0 %2243 }
 0x617   : > { %2262 = vst.msk [vmem:[#allocation2] sm:$0xff] %vm2261_vm2, %v2244_v28 }
 0x619   : > { %v2250_v31 = vpop.permute.xlu1 %2249 }
 0x61a   : > { %2265 = vst.msk [vmem:[#allocation2 + $0x18] sm:$0xff] %vm2261_vm2, %v2250_v31  ;;  %v2248_v32 = vpop.permute.xlu0 %2247 }
 0x61b   : > { %2264 = vst.msk [vmem:[#allocation2 + $0x10] sm:$0xff] %vm2261_vm2, %v2248_v32 }
 0x61d   : > { %v2254_v33 = vpop.permute.xlu1 %2253  ;;  %v2269_v35 = vld [vmem:[#allocation2 + $0x8] sm:$0xff] }
 0x61e   : > { %2267 = vst.msk [vmem:[#allocation2 + $0x28] sm:$0xff] %vm2261_vm2, %v2254_v33  ;;  %2282 = vrot.lane.b32.xlu1 %v2269_v35, %s5644_s28  ;;  %v2252_v36 = vpop.permute.xlu0 %2251  ;;  %v2268_v37 = vld [vmem:[#allocation2] sm:$0xff] }
 0x61f   : > { %2266 = vst.msk [vmem:[#allocation2 + $0x20] sm:$0xff] %vm2261_vm2, %v2252_v36  ;;  %2280 = vrot.lane.b32.xlu0 %v2268_v37, %s5644_s28  ;;  %vm7224_vm2 = vmmov %vm7213_vm6 }
 0x621   : > { %v2271_v39 = vld [vmem:[#allocation2 + $0x18] sm:$0xff] }
 0x622   : > { %2286 = vrot.lane.b32.xlu1 %v2271_v39, %s5644_s28  ;;  %v2270_v40 = vld [vmem:[#allocation2 + $0x10] sm:$0xff] }
 0x623   : > { %2284 = vrot.lane.b32.xlu0 %v2270_v40, %s5644_s28 }
 0x625   : > { %v2273_v42 = vld [vmem:[#allocation2 + $0x28] sm:$0xff] }
 0x626   : > { %2290 = vrot.lane.b32.xlu1 %v2273_v42, %s5644_s28  ;;  %v2272_v43 = vld [vmem:[#allocation2 + $0x20] sm:$0xff] }
 0x627   : > { %2288 = vrot.lane.b32.xlu0 %v2272_v43, %s5644_s28  ;;  %s5375_s28 = smul.u32 6, %s7359_s21 }
 0x690   : > { %v2283_v44 = vpop.permute.xlu1 %2282 }
 0x691   : > { %v2299_v45 = vadd.f32 %v2283_v44, %v2232_v3  ;;  %v2281_v46 = vpop.permute.xlu0 %2280 }
 0x692   : > { %v6456_v49 = vadd.f32 %v2281_v46, %v2231_v8 }
 0x693   : > { %v2325_v53 = vsel %vm5958_vm7, %v2299_v45, 0.0  ;;  %v2305_v8 = vrot.slane %v2299_v45, 6  ;;  %v2559_v28 = vrot.slane %v2299_v45, 2 }
 0x694   : > { %v2287_v51 = vpop.permute.xlu1 %2286  ;;  %v2324_v52 = vsel %vm5952_vm5, %v6456_v49, 0.0  ;;  %v2304_v9 = vrot.slane %v6456_v49, 6 }
 0x695   : > { %v2301_v55 = vadd.f32 %v2287_v51, %v2234_v16  ;;  %5106 = vmatprep.mubr.msk.f32.mxu0 %vm7220_vm9, %v2324_v52  ;;  %v2285_v58 = vpop.permute.xlu0 %2284  ;;  %vm7225_vm9 = vmmov %vm7224_vm2 }
 0x696   : > { %v2300_v61 = vadd.f32 %v2285_v58, %v2233_v19  ;;  %5107 = vmatmul.mubr.msk.f32.vlgmr.msra.gmra.mrb[12].mxu0 %vm7221_vm14, %v2325_v53  ;;  %vm7226_vm14 = vnez %v7102_v17 }
 0x697   : > { %5116 = vmatpush3.msra.mxu0 %v4690_v29  ;;  %v2327_v6 = vsel %vm7223_vm11, %v2301_v55, 0.0  ;;  %v2307_v18 = vrot.slane %v2301_v55, 6  ;;  %vm7228_vm11 = vmmov %vm7224_vm2  ;;  %v2558_v29 = vrot.slane %v6456_v49, 2  ;;  %v2561_v37 = vrot.slane %v2301_v55, 2 }
 0x698   : > { %v2291_v0 = vpop.permute.xlu1 %2290  ;;  %v2326_v2 = vsel %vm7222_vm10, %v2300_v61, 0.0  ;;  %5126 = vmatprep.subr.mxu0 %v4704_v54  ;;  %v2306_v11 = vrot.slane %v2300_v61, 6  ;;  %vm7230_vm10 = vmmov %vm7225_vm9  ;;  %v2560_v33 = vrot.slane %v2300_v61, 2 }
 0x699   : > { %v2303_v3 = vadd.f32 %v2291_v0, %v2236_v24  ;;  %5109 = vmatprep.mubr.msk.f32.mxu0 %vm7213_vm6, %v2326_v2  ;;  %v2289_v56 = vpop.permute.xlu0 %2288  ;;  %vm7227_vm6 = vcmp.lt.s32.totalorder %v5923_v34, 2  ;;  %v4712_v0 = vld [vmem:[%s7015_s6 + $0x3] ss:$0 sm:$0xff] }
 0x69a   : > { %v2302_v1 = vadd.f32 %v2289_v56, %v2235_v25  ;;  %5110 = vmatmul.mubr.msk.f32.gmra.mrb[14].mxu0 %vm7224_vm2, %v2327_v6  ;;  %vm7229_vm2 = vmmov %vm7227_vm6  ;;  %v4714_v6 = vld [vmem:[%s7016_s7 + $0x3] ss:$0 sm:$0xff] }
 0x69b   : > { %v2309_v12 = vrot.slane %v2303_v3, 6  ;;  %v2329_v15 = vsel %vm7226_vm14, %v2303_v3, 0.0  ;;  %v2314_v21 = vsel %vm7229_vm2, %v2304_v9, %v2305_v8  ;;  %vm7232_vm14 = vnez %v7106_v27 }
 0x69c   : > { %v2328_v14 = vsel %vm7187_vm3, %v2302_v1, 0.0  ;;  %v2308_v22 = vrot.slane %v2302_v1, 6  ;;  %v2317_v24 = vsel %vm7232_vm14, %v2314_v21, 0.0  ;;  %vm7233_vm3 = vmmov %vm7230_vm10  ;;  %v2562_v42 = vrot.slane %v2302_v1, 2 }
 0x69d   : > { %5112 = vmatprep.mubr.msk.f32.mxu0 %vm7225_vm9, %v2328_v14  ;;  %v2315_v16 = vsel %vm7227_vm6, %v2309_v12, %v2304_v9  ;;  %vm7231_vm9 = vmmov %vm7229_vm2  ;;  %vm7234_vm6 = vnez %v7108_v30  ;;  %v2563_v45 = vrot.slane %v2303_v3, 2 }
 0x69e   : > { %5113 = vmatmul.mubr.msk.f32.gmra.mrb[16].mxu0 %vm7228_vm11, %v2329_v15  ;;  %v2316_v19 = vsel %vm7192_vm13, %v2315_v16, 0.0  ;;  %v2313_v23 = vsel %vm7231_vm9, %v2305_v8, %v2306_v11  ;;  %vm7235_vm11 = vmmov %vm7229_vm2 }
 0x69f   : > { %5117 = vmatprep.mubr.msk.f32.mxu0 %vm7230_vm10, %v2316_v19  ;;  %v2318_v25 = vsel %vm7234_vm6, %v2313_v23, 0.0  ;;  %v2312_v26 = vsel %vm7235_vm11, %v2306_v11, %v2307_v18  ;;  %vm7236_vm2 = vmmov %vm7233_vm3  ;;  %vm7240_vm6 = vnez %v7114_v41 }
 0x6a0   : > { %vm7237_vm10 = vmmov %vm7231_vm9  ;;  %vm7238_vm9 = vnez %v7111_v38 }
 0x6a1   : > { %v2311_v31 = vsel %vm7237_vm10, %v2307_v18, %v2308_v22  ;;  %v2319_v32 = vsel %vm7238_vm9, %v2312_v26, 0.0  ;;  %vm7241_vm11 = vmmov %vm7237_vm10 }
 0x6a2   : > { %5118 = vmatmul.mubr.msk.f32.vlgmr.msra.gmra.mrb[12].mxu0 %vm7233_vm3, %v2317_v24  ;;  %vm7239_vm3 = vmmov %vm7236_vm2  ;;  %v2320_v35 = vsel %vm7240_vm6, %v2311_v31, 0.0  ;;  %v2310_v36 = vsel %vm7241_vm11, %v2308_v22, %v2309_v12  ;;  %v4716_v12 = vld [vmem:[%s7017_s8 + $0x3] ss:$0 sm:$0xff] }
 0x6a3   : > { %5127 = vmatpush3.msra.mxu0 %v4704_v54  ;;  %5120 = vmatprep.mubr.msk.f32.mxu0 %vm7236_vm2, %v2318_v25  ;;  %vm7242_vm14 = vmmov %vm7236_vm2  ;;  %vm7243_vm2 = vcmp.lt.s32.totalorder %v5923_v34, 6  ;;  %v2321_v40 = vsel %vm7207_vm12, %v2310_v36, 0.0 }
 0x6a4   : > { %v2568_v39 = vsel %vm7243_vm2, %v2558_v29, %v2559_v28  ;;  %vm7244_vm10 = vmmov %vm7239_vm3 }
 0x6a5   : > { %vm7246_vm6 = vmmov %vm7243_vm2 }
 0x6a6   : > { %5121 = vmatmul.mubr.msk.f32.gmra.mrb[14].mxu0 %vm7239_vm3, %v2319_v32  ;;  %vm7245_vm3 = vnez %v7122_v50  ;;  %v2567_v44 = vsel %vm7246_vm6, %v2559_v28, %v2560_v33  ;;  %vm7247_vm11 = vmmov %vm7244_vm10  ;;  %v2564_v53 = vsel %vm7246_vm6, %v2562_v42, %v2563_v45 }
 0x6a7   : > { %5123 = vmatprep.mubr.msk.f32.mxu0 %vm7242_vm14, %v2320_v35  ;;  %v2570_v43 = vsel %vm7245_vm3, %v2568_v39, 0.0  ;;  %vm7248_vm14 = vmmov %vm7243_vm2  ;;  %v2571_v49 = vsel %vm6163_vm4, %v2567_v44, 0.0  ;;  %v2574_v58 = vsel %vm6194_vm8, %v2564_v53, 0.0 }
 0x6a8   : > { %v2566_v46 = vsel %vm7248_vm14, %v2560_v33, %v2561_v37  ;;  %vm7249_vm2 = vmmov %vm7244_vm10 }
 0x6a9   : > { %v2572_v51 = vsel %vm7176_vm15, %v2566_v46, 0.0  ;;  %vm7251_vm3 = vmmov %vm7249_vm2 }
 0x6aa   : > { %5124 = vmatmul.mubr.msk.f32.gmra.mrb[16].mxu0 %vm7244_vm10, %v2321_v40  ;;  %vm7250_vm10 = vmmov %vm7246_vm6  ;;  %v4718_v40 = vld [vmem:[%s7014_s5 + $0x68] sm:$0xff] }
 0x6ab   : > { %5128 = vmatprep.mubr.msk.f32.mxu0 %vm7247_vm11, %v2570_v43  ;;  %v2565_v52 = vsel %vm7250_vm10, %v2561_v37, %v2562_v42  ;;  %vm7252_vm11 = vmmov %vm7249_vm2  ;;  %5137 = vmatprep.subr.mxu1 %v4718_v40  ;;  %vm2769_vm10 = vcmask 261312  }
 0x6ac   : > { %v2573_v55 = vsel %vm6187_vm0, %v2565_v52, 0.0  ;;  %vm7253_vm14 = vmmov %vm7246_vm6  ;;  %5138 = vmatpush3.msra.mxu1 %v4718_v40 }
 0x6ad   : > { %v2569_v54 = vsel %vm7253_vm14, %v2563_v45, %v2558_v29  ;;  %vm7255_vm6 = vmmov %vm7249_vm2  ;;  %vm7257_vm14 = vnez %v7096_v4 }
 0x6ae   : > { %5129 = vmatmul.mubr.msk.f32.vlgmr.msra.gmra.mrb[12].mxu0 %vm7249_vm2, %v2571_v49  ;;  %v2575_v61 = vsel %vm6207_vm1, %v2569_v54, 0.0  ;;  %v4717_v49 = vld [vmem:[%s7014_s5 + $0x60] sm:$0xff] }
 0x6af   : > { %5131 = vmatprep.mubr.msk.f32.mxu0 %vm7251_vm3, %v2572_v51  ;;  %vm7254_vm3 = vmmov %vm7249_vm2  ;;  %5148 = vmatprep.subr.mxu1 %v4717_v49 }
 0x6b2   : > { %5132 = vmatmul.mubr.msk.f32.gmra.mrb[14].mxu0 %vm7252_vm11, %v2573_v55  ;;  %vm7256_vm11 = vmmov %vm7249_vm2 }
 0x6b3   : > { %5134 = vmatprep.mubr.msk.f32.mxu0 %vm7249_vm2, %v2574_v58 }
 0x6b6   : > { %5135 = vmatmul.mubr.msk.f32.gmra.mrb[16].mxu0 %vm7254_vm3, %v2575_v61  ;;  %vm7258_vm3 = vnez %v7098_v7 }
 0x781   : > { %v5130_v2 = vpop.f32.mrb[12].mxu0 }
 0x782   : > { %v2706_v3 = vadd.f32 %v5130_v2, %v4712_v0  ;;  %v2662_v56 = vpop.f32.mrb[13].mxu0 }
 0x783   : > { %v2705_v8 = vadd.f32 %v4712_v0, %v2662_v56 }
 0x784   : > { %v2712_v9 = vmax.f32 %v2706_v3, 0.0 }
 0x785   : > { %v2711_v1 = vmax.f32 %v2705_v8, 0.0  ;;  %v5133_v11 = vpop.f32.mrb[14].mxu0 }
 0x786   : > { %v2726_v14 = vmul.f32 %v4714_v6, %v2712_v9  ;;  %v2708_v15 = vadd.f32 %v5133_v11, %v4712_v0  ;;  %v2672_v16 = vpop.f32.mrb[15].mxu0 }
 0x787   : > { %v2725_v18 = vmul.f32 %v4714_v6, %v2711_v1  ;;  %v2707_v19 = vadd.f32 %v4712_v0, %v2672_v16  ;;  %v4731_v16 = vld [vmem:[%s7014_s5 + $0x70] sm:$0xff] }
 0x788   : > { %v2714_v21 = vmax.f32 %v2708_v15, 0.0  ;;  %v2740_v22 = vadd.f32 %v4716_v12, %v2726_v14 }
 0x789   : > { %v2713_v23 = vmax.f32 %v2707_v19, 0.0  ;;  %v5136_v24 = vpop.f32.mrb[16].mxu0  ;;  %v2739_v25 = vadd.f32 %v4716_v12, %v2725_v18 }
 0x78a   : > { %v2728_v26 = vmul.f32 %v4714_v6, %v2714_v21  ;;  %v2710_v28 = vadd.f32 %v5136_v24, %v4712_v0  ;;  %2753 = vrot.lane.b32.xlu1 %v2740_v22, %s5645_s22  ;;  %v2682_v29 = vpop.f32.mrb[17].mxu0 }
 0x78b   : > { %v2727_v31 = vmul.f32 %v4714_v6, %v2713_v23  ;;  %v2709_v32 = vadd.f32 %v4712_v0, %v2682_v29  ;;  %2751 = vrot.lane.b32.xlu0 %v2739_v25, %s5645_s22 }
 0x78c   : > { %v2716_v33 = vmax.f32 %v2710_v28, 0.0  ;;  %v2742_v35 = vadd.f32 %v4716_v12, %v2728_v26 }
 0x78d   : > { %v2715_v36 = vmax.f32 %v2709_v32, 0.0  ;;  %v2741_v37 = vadd.f32 %v4716_v12, %v2727_v31 }
 0x78e   : > { %v2730_v39 = vmul.f32 %v4714_v6, %v2716_v33  ;;  %2757 = vrot.lane.b32.xlu1 %v2742_v35, %s5645_s22 }
 0x78f   : > { %v2729_v42 = vmul.f32 %v4714_v6, %v2715_v36  ;;  %2755 = vrot.lane.b32.xlu0 %v2741_v37, %s5645_s22 }
 0x790   : > { %v2744_v43 = vadd.f32 %v4716_v12, %v2730_v39 }
 0x791   : > { %v2743_v44 = vadd.f32 %v4716_v12, %v2729_v42 }
 0x792   : > { %2761 = vrot.lane.b32.xlu1 %v2744_v43, %s5645_s22 }
 0x793   : > { %2759 = vrot.lane.b32.xlu0 %v2743_v44, %s5645_s22 }
 0x7fc   : > { %v2754_v45 = vpop.permute.xlu1 %2753 }
 0x7fd   : > { %2771 = vst.msk [vmem:[#allocation2 + $0x8] sm:$0xff] %vm2769_vm10, %v2754_v45  ;;  %v2752_v46 = vpop.permute.xlu0 %2751 }
 0x7fe   : > { %2770 = vst.msk [vmem:[#allocation2] sm:$0xff] %vm2769_vm10, %v2752_v46 }
 0x800   : > { %v2758_v51 = vpop.permute.xlu1 %2757 }
 0x801   : > { %2773 = vst.msk [vmem:[#allocation2 + $0x18] sm:$0xff] %vm2769_vm10, %v2758_v51  ;;  %v2756_v52 = vpop.permute.xlu0 %2755 }
 0x802   : > { %2772 = vst.msk [vmem:[#allocation2 + $0x10] sm:$0xff] %vm2769_vm10, %v2756_v52 }
 0x804   : > { %v2762_v53 = vpop.permute.xlu1 %2761  ;;  %v2777_v55 = vld [vmem:[#allocation2 + $0x8] sm:$0xff] }
 0x805   : > { %2775 = vst.msk [vmem:[#allocation2 + $0x28] sm:$0xff] %vm2769_vm10, %v2762_v53  ;;  %2790 = vrot.lane.b32.xlu1 %v2777_v55, %s5646_s18  ;;  %v2760_v58 = vpop.permute.xlu0 %2759  ;;  %v2776_v54 = vld [vmem:[#allocation2] sm:$0xff] }
 0x806   : > { %2774 = vst.msk [vmem:[#allocation2 + $0x20] sm:$0xff] %vm2769_vm10, %v2760_v58  ;;  %2788 = vrot.lane.b32.xlu0 %v2776_v54, %s5646_s18  ;;  %vm7259_vm10 = vmmov %vm7249_vm2 }
 0x808   : > { %v2779_v61 = vld [vmem:[#allocation2 + $0x18] sm:$0xff] }
 0x809   : > { %2794 = vrot.lane.b32.xlu1 %v2779_v61, %s5646_s18  ;;  %v2778_v0 = vld [vmem:[#allocation2 + $0x10] sm:$0xff] }
 0x80a   : > { %2792 = vrot.lane.b32.xlu0 %v2778_v0, %s5646_s18 }
 0x80c   : > { %v2781_v2 = vld [vmem:[#allocation2 + $0x28] sm:$0xff] }
 0x80d   : > { %2798 = vrot.lane.b32.xlu1 %v2781_v2, %s5646_s18  ;;  %v2780_v3 = vld [vmem:[#allocation2 + $0x20] sm:$0xff] }
 0x80e   : > { %2796 = vrot.lane.b32.xlu0 %v2780_v3, %s5646_s18  ;;  %s4602_s18 = sshll.u32 %s5856_s11, 4 }
 0x80f   : > { %s509_s22 = scalar_lea.vmem [#allocation6], %s4602_s18 }
 0x810   : > { %s4461_s14 = sshll.u32 %s509_s22, 4  ;;  %s6913_s14 = int_to_ptr.vmem [resolvable:$true] %s4461_s14 }
 0x811   : > { %s5505_s18 = scalar_lea.vmem %s6913_s14, 256 }
 0x812   : > { %p5506_p8 = scmp.ne.s32.totalorder %s6913_s14, %s5505_s18 }
 0x877   : > { %v2791_v56 = vpop.permute.xlu1 %2790 }
 0x878   : > { %v2807_v6 = vadd.f32 %v2791_v56, %v2740_v22  ;;  %v2789_v8 = vpop.permute.xlu0 %2788 }
 0x879   : > { %v6563_v9 = vadd.f32 %v2789_v8, %v2739_v25 }
 0x87a   : > { %v2833_v12 = vsel %vm5958_vm7, %v2807_v6, 0.0  ;;  %v2813_v25 = vrot.slane %v2807_v6, 6  ;;  %v3067_v46 = vrot.slane %v2807_v6, 2 }
 0x87b   : > { %v2795_v1 = vpop.permute.xlu1 %2794  ;;  %v2832_v11 = vsel %vm5952_vm5, %v6563_v9, 0.0  ;;  %v2812_v26 = vrot.slane %v6563_v9, 6 }
 0x87c   : > { %v2809_v14 = vadd.f32 %v2795_v1, %v2742_v35  ;;  %5139 = vmatprep.mubr.msk.f32.mxu1 %vm7255_vm6, %v2832_v11  ;;  %v2793_v15 = vpop.permute.xlu0 %2792  ;;  %vm7260_vm6 = vnez %v7100_v13 }
 0x87d   : > { %v2808_v18 = vadd.f32 %v2793_v15, %v2741_v37  ;;  %5140 = vmatmul.mubr.msk.f32.vlgmr.msra.gmra.mrb[12].mxu1 %vm7256_vm11, %v2833_v12  ;;  %vm7261_vm11 = vmmov %vm7249_vm2 }
 0x87e   : > { %5149 = vmatpush3.msra.mxu1 %v4717_v49  ;;  %v2835_v24 = vsel %vm7258_vm3, %v2809_v14, 0.0  ;;  %v2815_v36 = vrot.slane %v2809_v14, 6  ;;  %vm7264_vm3 = vmmov %vm7259_vm10  ;;  %v3066_v49 = vrot.slane %v6563_v9, 2  ;;  %v3069_v54 = vrot.slane %v2809_v14, 2 }
 0x87f   : > { %v2799_v19 = vpop.permute.xlu1 %2798  ;;  %v2834_v21 = vsel %vm7257_vm14, %v2808_v18, 0.0  ;;  %5159 = vmatprep.subr.mxu1 %v4731_v16  ;;  %v2814_v29 = vrot.slane %v2808_v18, 6  ;;  %vm7262_vm14 = vnez %v7102_v17  ;;  %vm7266_vm7 = vmmov %vm7264_vm3  ;;  %v3068_v53 = vrot.slane %v2808_v18, 2 }
 0x880   : > { %v2811_v22 = vadd.f32 %v2799_v19, %v2744_v43  ;;  %5142 = vmatprep.mubr.msk.f32.mxu1 %vm7249_vm2, %v2834_v21  ;;  %v2797_v23 = vpop.permute.xlu0 %2796  ;;  %vm7263_vm2 = vcmp.lt.s32.totalorder %v5923_v34, 2  ;;  %v4739_v19 = vld [vmem:[%s7015_s6 + $0x4] ss:$0 sm:$0xff] }
 0x881   : > { %v2810_v28 = vadd.f32 %v2797_v23, %v2743_v44  ;;  %5143 = vmatmul.mubr.msk.f32.gmra.mrb[14].mxu1 %vm7259_vm10, %v2835_v24  ;;  %vm7265_vm10 = vmmov %vm7263_vm2  ;;  %v4741_v24 = vld [vmem:[%s7016_s7 + $0x4] ss:$0 sm:$0xff] }
 0x882   : > { %v2817_v31 = vrot.slane %v2811_v22, 6  ;;  %v2837_v33 = vsel %vm7262_vm14, %v2811_v22, 0.0  ;;  %v2822_v39 = vsel %vm7265_vm10, %v2812_v26, %v2813_v25  ;;  %vm7268_vm14 = vnez %v7106_v27 }
 0x883   : > { %v2836_v32 = vsel %vm7260_vm6, %v2810_v28, 0.0  ;;  %v2816_v40 = vrot.slane %v2810_v28, 6  ;;  %v2825_v43 = vsel %vm7268_vm14, %v2822_v39, 0.0  ;;  %vm7269_vm6 = vmmov %vm7264_vm3  ;;  %v3070_v2 = vrot.slane %v2810_v28, 2 }
 0x884   : > { %5145 = vmatprep.mubr.msk.f32.mxu1 %vm7261_vm11, %v2836_v32  ;;  %v2823_v35 = vsel %vm7263_vm2, %v2817_v31, %v2812_v26  ;;  %vm7267_vm11 = vmmov %vm7263_vm2  ;;  %vm7270_vm2 = vnez %v7108_v30  ;;  %v3071_v6 = vrot.slane %v2811_v22, 2 }
 0x885   : > { %5146 = vmatmul.mubr.msk.f32.gmra.mrb[16].mxu1 %vm7264_vm3, %v2837_v33  ;;  %v2824_v37 = vsel %vm7192_vm13, %v2823_v35, 0.0  ;;  %v2821_v42 = vsel %vm7267_vm11, %v2813_v25, %v2814_v29  ;;  %vm7271_vm3 = vmmov %vm7265_vm10  ;;  %vm7274_vm11 = vnez %v7114_v41 }
 0x886   : > { %5150 = vmatprep.mubr.msk.f32.mxu1 %vm7266_vm7, %v2824_v37  ;;  %v2826_v44 = vsel %vm7270_vm2, %v2821_v42, 0.0  ;;  %v2820_v45 = vsel %vm7271_vm3, %v2814_v29, %v2815_v36  ;;  %vm7272_vm10 = vmmov %vm7269_vm6  ;;  %v2818_v58 = vsel %vm7271_vm3, %v2816_v40, %v2817_v31  ;;  %v4743_v31 = vld [vmem:[%s7017_s8 + $0x4] ss:$0 sm:$0xff] }
 0x887   : > { %vm7273_vm7 = vmmov %vm7271_vm3  ;;  %v2827_v52 = vsel %vm7238_vm9, %v2820_v45, 0.0  ;;  %v2829_v0 = vsel %vm7207_vm12, %v2818_v58, 0.0 }
 0x888   : > { %v2819_v51 = vsel %vm7273_vm7, %v2815_v36, %v2816_v40  ;;  %vm7275_vm2 = vmmov %vm7269_vm6 }
 0x889   : > { %5151 = vmatmul.mubr.msk.f32.vlgmr.msra.gmra.mrb[12].mxu1 %vm7269_vm6, %v2825_v43  ;;  %v2828_v55 = vsel %vm7274_vm11, %v2819_v51, 0.0  ;;  %vm7277_vm7 = vmmov %vm7275_vm2 }
 0x88a   : > { %5160 = vmatpush3.msra.mxu1 %v4731_v16  ;;  %5153 = vmatprep.mubr.msk.f32.mxu1 %vm7272_vm10, %v2826_v44  ;;  %vm7276_vm10 = vcmp.lt.s32.totalorder %v5923_v34, 6  ;;  %vm7280_vm3 = vmmov %vm7275_vm2 }
 0x88b   : > { %v3076_v61 = vsel %vm7276_vm10, %v3066_v49, %v3067_v46  ;;  %vm7279_vm11 = vmmov %vm7276_vm10 }
 0x88c   : > { %v3075_v56 = vsel %vm7279_vm11, %v3067_v46, %v3068_v53 }
 0x88d   : > { %5154 = vmatmul.mubr.msk.f32.gmra.mrb[14].mxu1 %vm7269_vm6, %v2827_v52  ;;  %vm7278_vm6 = vnez %v7122_v50  ;;  %v3079_v9 = vsel %vm6163_vm4, %v3075_v56, 0.0 }
 0x88e   : > { %5156 = vmatprep.mubr.msk.f32.mxu1 %vm7275_vm2, %v2828_v55  ;;  %v3078_v3 = vsel %vm7278_vm6, %v3076_v61, 0.0  ;;  %vm7281_vm2 = vmmov %vm7276_vm10 }
 0x88f   : > { %v3074_v8 = vsel %vm7281_vm2, %v3068_v53, %v3069_v54  ;;  %vm7282_vm10 = vmmov %vm7280_vm3  ;;  %v3077_v16 = vsel %vm7281_vm2, %v3071_v6, %v3066_v49 }
 0x890   : > { %v3080_v1 = vsel %vm7176_vm15, %v3074_v8, 0.0  ;;  %vm7284_vm6 = vmmov %vm7280_vm3  ;;  %v3083_v18 = vsel %vm6207_vm1, %v3077_v16, 0.0 }
 0x891   : > { %5157 = vmatmul.mubr.msk.f32.gmra.mrb[16].mxu1 %vm7277_vm7, %v2829_v0  ;;  %vm7283_vm7 = vmmov %vm7281_vm2  ;;  %v4745_v0 = vld [vmem:[%s7014_s5 + $0x80] sm:$0xff] }
 0x892   : > { %5161 = vmatprep.mubr.msk.f32.mxu1 %vm7280_vm3, %v3078_v3  ;;  %v3073_v11 = vsel %vm7283_vm7, %v3069_v54, %v3070_v2  ;;  %vm7285_vm11 = vmmov %vm7281_vm2  ;;  %5170 = vmatprep.subr.mxu0 %v4745_v0  ;;  %vm3277_vm7 = vcmask 326912  }
 0x893   : > { %v3072_v12 = vsel %vm7285_vm11, %v3070_v2, %v3071_v6  ;;  %v3081_v14 = vsel %vm6187_vm0, %v3073_v11, 0.0  ;;  %5171 = vmatpush3.msra.mxu0 %v4745_v0  ;;  %vm7288_vm11 = vnez %v7094_v62  ;;  %vm7289_vm2 = vmmov %vm7280_vm3 }
 0x894   : > { %v3082_v15 = vsel %vm6194_vm8, %v3072_v12, 0.0 }
 0x895   : > { %5162 = vmatmul.mubr.msk.f32.vlgmr.msra.gmra.mrb[12].mxu1 %vm7282_vm10, %v3079_v9  ;;  %vm7286_vm10 = vmmov %vm7280_vm3  ;;  %v4744_v9 = vld [vmem:[%s7014_s5 + $0x78] sm:$0xff] }
 0x896   : > { %5164 = vmatprep.mubr.msk.f32.mxu1 %vm7284_vm6, %v3080_v1  ;;  %vm7287_vm6 = vmmov %vm7280_vm3  ;;  %5181 = vmatprep.subr.mxu0 %v4744_v9 }
 0x899   : > { %5165 = vmatmul.mubr.msk.f32.gmra.mrb[14].mxu1 %vm7280_vm3, %v3081_v14 }
 0x89a   : > { %5167 = vmatprep.mubr.msk.f32.mxu1 %vm7286_vm10, %v3082_v15  ;;  %vm7290_vm10 = vnez %v7096_v4 }
 0x89d   : > { %5168 = vmatmul.mubr.msk.f32.gmra.mrb[16].mxu1 %vm7287_vm6, %v3083_v18  ;;  %vm7291_vm6 = vmmov %vm7289_vm2 }
 0x968   : > { %v5163_v21 = vpop.f32.mrb[12].mxu1 }
 0x969   : > { %v3214_v22 = vadd.f32 %v5163_v21, %v4739_v19  ;;  %v3170_v23 = vpop.f32.mrb[13].mxu1 }
 0x96a   : > { %v3213_v25 = vadd.f32 %v4739_v19, %v3170_v23 }
 0x96b   : > { %v3220_v26 = vmax.f32 %v3214_v22, 0.0 }
 0x96c   : > { %v3219_v28 = vmax.f32 %v3213_v25, 0.0  ;;  %v5166_v29 = vpop.f32.mrb[14].mxu1 }
 0x96d   : > { %v3234_v32 = vmul.f32 %v4741_v24, %v3220_v26  ;;  %v3216_v33 = vadd.f32 %v5166_v29, %v4739_v19  ;;  %v3180_v35 = vpop.f32.mrb[15].mxu1 }
 0x96e   : > { %v3233_v36 = vmul.f32 %v4741_v24, %v3219_v28  ;;  %v3215_v37 = vadd.f32 %v4739_v19, %v3180_v35  ;;  %v4758_v35 = vld [vmem:[%s7014_s5 + $0x88] sm:$0xff] }
 0x96f   : > { %v3222_v39 = vmax.f32 %v3216_v33, 0.0  ;;  %v3248_v40 = vadd.f32 %v4743_v31, %v3234_v32 }
 0x970   : > { %v3221_v42 = vmax.f32 %v3215_v37, 0.0  ;;  %v5169_v43 = vpop.f32.mrb[16].mxu1  ;;  %v3247_v44 = vadd.f32 %v4743_v31, %v3233_v36 }
 0x971   : > { %v3236_v45 = vmul.f32 %v4741_v24, %v3222_v39  ;;  %v3218_v46 = vadd.f32 %v5169_v43, %v4739_v19  ;;  %3261 = vrot.lane.b32.xlu1 %v3248_v40, %s5647_s26  ;;  %v3190_v49 = vpop.f32.mrb[17].mxu1 }
 0x972   : > { %v3235_v51 = vmul.f32 %v4741_v24, %v3221_v42  ;;  %v3217_v52 = vadd.f32 %v4739_v19, %v3190_v49  ;;  %3259 = vrot.lane.b32.xlu0 %v3247_v44, %s5647_s26 }
 0x973   : > { %v3224_v53 = vmax.f32 %v3218_v46, 0.0  ;;  %v3250_v55 = vadd.f32 %v4743_v31, %v3236_v45 }
 0x974   : > { %v3223_v58 = vmax.f32 %v3217_v52, 0.0  ;;  %v3249_v54 = vadd.f32 %v4743_v31, %v3235_v51 }
 0x975   : > { %v3238_v61 = vmul.f32 %v4741_v24, %v3224_v53  ;;  %3265 = vrot.lane.b32.xlu1 %v3250_v55, %s5647_s26 }
 0x976   : > { %v3237_v2 = vmul.f32 %v4741_v24, %v3223_v58  ;;  %3263 = vrot.lane.b32.xlu0 %v3249_v54, %s5647_s26 }
 0x977   : > { %v3252_v3 = vadd.f32 %v4743_v31, %v3238_v61 }
 0x978   : > { %v3251_v56 = vadd.f32 %v4743_v31, %v3237_v2 }
 0x979   : > { %3269 = vrot.lane.b32.xlu1 %v3252_v3, %s5647_s26 }
 0x97a   : > { %3267 = vrot.lane.b32.xlu0 %v3251_v56, %s5647_s26  ;;  %s7362_s26 = sld [smem:[#allocation22_spill]] }
 0x9e3   : > { %v3262_v6 = vpop.permute.xlu1 %3261 }
 0x9e4   : > { %3279 = vst.msk [vmem:[#allocation2 + $0x8] sm:$0xff] %vm3277_vm7, %v3262_v6  ;;  %v3260_v8 = vpop.permute.xlu0 %3259 }
 0x9e5   : > { %3278 = vst.msk [vmem:[#allocation2] sm:$0xff] %vm3277_vm7, %v3260_v8 }
 0x9e7   : > { %v3266_v1 = vpop.permute.xlu1 %3265 }
 0x9e8   : > { %3281 = vst.msk [vmem:[#allocation2 + $0x18] sm:$0xff] %vm3277_vm7, %v3266_v1  ;;  %v3264_v11 = vpop.permute.xlu0 %3263 }
 0x9e9   : > { %3280 = vst.msk [vmem:[#allocation2 + $0x10] sm:$0xff] %vm3277_vm7, %v3264_v11 }
 0x9eb   : > { %v3270_v12 = vpop.permute.xlu1 %3269  ;;  %v3285_v14 = vld [vmem:[#allocation2 + $0x8] sm:$0xff] }
 0x9ec   : > { %3283 = vst.msk [vmem:[#allocation2 + $0x28] sm:$0xff] %vm3277_vm7, %v3270_v12  ;;  %3298 = vrot.lane.b32.xlu1 %v3285_v14, %s5648_s23  ;;  %v3268_v15 = vpop.permute.xlu0 %3267  ;;  %v3284_v16 = vld [vmem:[#allocation2] sm:$0xff] }
 0x9ed   : > { %3282 = vst.msk [vmem:[#allocation2 + $0x20] sm:$0xff] %vm3277_vm7, %v3268_v15  ;;  %3296 = vrot.lane.b32.xlu0 %v3284_v16, %s5648_s23  ;;  %vm7292_vm7 = vnez %v7098_v7 }
 0x9ef   : > { %v3287_v18 = vld [vmem:[#allocation2 + $0x18] sm:$0xff] }
 0x9f0   : > { %3302 = vrot.lane.b32.xlu1 %v3287_v18, %s5648_s23  ;;  %v3286_v19 = vld [vmem:[#allocation2 + $0x10] sm:$0xff] }
 0x9f1   : > { %3300 = vrot.lane.b32.xlu0 %v3286_v19, %s5648_s23 }
 0x9f3   : > { %v3289_v21 = vld [vmem:[#allocation2 + $0x28] sm:$0xff] }
 0x9f4   : > { %3306 = vrot.lane.b32.xlu1 %v3289_v21, %s5648_s23  ;;  %v3288_v22 = vld [vmem:[#allocation2 + $0x20] sm:$0xff] }
 0x9f5   : > { %3304 = vrot.lane.b32.xlu0 %v3288_v22, %s5648_s23 }
 0xa5e   : > { %v3299_v23 = vpop.permute.xlu1 %3298 }
 0xa5f   : > { %v3315_v24 = vadd.f32 %v3299_v23, %v3248_v40  ;;  %v3297_v25 = vpop.permute.xlu0 %3296 }
 0xa60   : > { %v6670_v26 = vadd.f32 %v3297_v25, %v3247_v44 }
 0xa61   : > { %v3341_v31 = vsel %vm7288_vm11, %v3315_v24, 0.0  ;;  %v3321_v44 = vrot.slane %v3315_v24, 6  ;;  %vm7296_vm11 = vnez %v7102_v17  ;;  %v3575_v8 = vrot.slane %v3315_v24, 2 }
 0xa62   : > { %v3303_v28 = vpop.permute.xlu1 %3302  ;;  %v3340_v29 = vsel %vm5952_vm5, %v6670_v26, 0.0  ;;  %v3320_v45 = vrot.slane %v6670_v26, 6 }
 0xa63   : > { %v3317_v32 = vadd.f32 %v3303_v28, %v3250_v55  ;;  %5172 = vmatprep.mubr.msk.f32.mxu0 %vm7280_vm3, %v3340_v29  ;;  %v3301_v33 = vpop.permute.xlu0 %3300  ;;  %vm7293_vm3 = vmmov %vm7289_vm2 }
 0xa64   : > { %v3316_v36 = vadd.f32 %v3301_v33, %v3249_v54  ;;  %5173 = vmatmul.mubr.msk.f32.vlgmr.msra.gmra.mrb[18].mxu0 %vm7289_vm2, %v3341_v31  ;;  %vm7294_vm2 = vnez %v7100_v13 }
 0xa65   : > { %5182 = vmatpush3.msra.mxu0 %v4744_v9  ;;  %v3343_v43 = vsel %vm7292_vm7, %v3317_v32, 0.0  ;;  %v3323_v58 = vrot.slane %v3317_v32, 6  ;;  %vm7298_vm7 = vmmov %vm7293_vm3  ;;  %v3574_v9 = vrot.slane %v6670_v26, 2  ;;  %v3577_v16 = vrot.slane %v3317_v32, 2 }
 0xa66   : > { %v3307_v37 = vpop.permute.xlu1 %3306  ;;  %v3342_v39 = vsel %vm7290_vm10, %v3316_v36, 0.0  ;;  %5192 = vmatprep.subr.mxu0 %v4758_v35  ;;  %v3322_v49 = vrot.slane %v3316_v36, 6  ;;  %vm7295_vm10 = vmmov %vm7293_vm3  ;;  %v3576_v12 = vrot.slane %v3316_v36, 2 }
 0xa67   : > { %v3319_v40 = vadd.f32 %v3307_v37, %v3252_v3  ;;  %5175 = vmatprep.mubr.msk.f32.mxu0 %vm7291_vm6, %v3342_v39  ;;  %v3305_v42 = vpop.permute.xlu0 %3304  ;;  %vm7297_vm6 = vcmp.lt.s32.totalorder %v5923_v34, 2  ;;  %vm7300_vm5 = vmmov %vm7298_vm7  ;;  %v4766_v37 = vld [vmem:[%s7015_s6 + $0x5] ss:$0 sm:$0xff] }
 0xa68   : > { %v3318_v46 = vadd.f32 %v3305_v42, %v3251_v56  ;;  %5176 = vmatmul.mubr.msk.f32.gmra.mrb[20].mxu0 %vm7293_vm3, %v3343_v43  ;;  %vm7299_vm3 = vmmov %vm7297_vm6  ;;  %v4768_v43 = vld [vmem:[%s7016_s7 + $0x5] ss:$0 sm:$0xff] }
 0xa69   : > { %v3325_v51 = vrot.slane %v3319_v40, 6  ;;  %v3345_v53 = vsel %vm7296_vm11, %v3319_v40, 0.0  ;;  %v3330_v61 = vsel %vm7299_vm3, %v3320_v45, %v3321_v44  ;;  %vm7302_vm11 = vmmov %vm7300_vm5  ;;  %v3579_v24 = vrot.slane %v3319_v40, 2 }
 0xa6a   : > { %v3344_v52 = vsel %vm7294_vm2, %v3318_v46, 0.0  ;;  %v3324_v0 = vrot.slane %v3318_v46, 6  ;;  %v3333_v3 = vsel %vm7268_vm14, %v3330_v61, 0.0  ;;  %v3578_v21 = vrot.slane %v3318_v46, 2 }
 0xa6b   : > { %5178 = vmatprep.mubr.msk.f32.mxu0 %vm7295_vm10, %v3344_v52  ;;  %v3331_v55 = vsel %vm7297_vm6, %v3325_v51, %v3320_v45  ;;  %vm7301_vm10 = vmmov %vm7299_vm3  ;;  %vm7303_vm6 = vnez %v7108_v30 }
 0xa6c   : > { %5179 = vmatmul.mubr.msk.f32.gmra.mrb[22].mxu0 %vm7298_vm7, %v3345_v53  ;;  %v3332_v54 = vsel %vm7192_vm13, %v3331_v55, 0.0  ;;  %v3329_v2 = vsel %vm7301_vm10, %v3321_v44, %v3322_v49  ;;  %vm7304_vm7 = vmmov %vm7299_vm3  ;;  %vm7308_vm10 = vnez %v7114_v41 }
 0xa6d   : > { %5183 = vmatprep.mubr.msk.f32.mxu0 %vm7300_vm5, %v3332_v54  ;;  %v3334_v56 = vsel %vm7303_vm6, %v3329_v2, 0.0  ;;  %v3328_v6 = vsel %vm7304_vm7, %v3322_v49, %v3323_v58  ;;  %vm7305_vm3 = vmmov %vm7300_vm5 }
 0xa6e   : > { %vm7306_vm5 = vmmov %vm7304_vm7  ;;  %v3335_v11 = vsel %vm7238_vm9, %v3328_v6, 0.0 }
 0xa6f   : > { %v3327_v1 = vsel %vm7306_vm5, %v3323_v58, %v3324_v0  ;;  %vm7309_vm7 = vmmov %vm7306_vm5 }
 0xa70   : > { %5184 = vmatmul.mubr.msk.f32.vlgmr.msra.gmra.mrb[18].mxu0 %vm7302_vm11, %v3333_v3  ;;  %vm7307_vm11 = vmmov %vm7305_vm3  ;;  %v3336_v14 = vsel %vm7308_vm10, %v3327_v1, 0.0  ;;  %v3326_v15 = vsel %vm7309_vm7, %v3324_v0, %v3325_v51  ;;  %v4770_v51 = vld [vmem:[%s7017_s8 + $0x5] ss:$0 sm:$0xff] }
 0xa71   : > { %5193 = vmatpush3.msra.mxu0 %v4758_v35  ;;  %5186 = vmatprep.mubr.msk.f32.mxu0 %vm7305_vm3, %v3334_v56  ;;  %vm7310_vm6 = vmmov %vm7305_vm3  ;;  %vm7311_vm3 = vcmp.lt.s32.totalorder %v5923_v34, 6  ;;  %v3337_v19 = vsel %vm7207_vm12, %v3326_v15, 0.0 }
 0xa72   : > { %v3584_v18 = vsel %vm7311_vm3, %v3574_v9, %v3575_v8  ;;  %vm7312_vm5 = vmmov %vm7310_vm6 }
 0xa73   : > { %vm7314_vm10 = vmmov %vm7311_vm3 }
 0xa74   : > { %5187 = vmatmul.mubr.msk.f32.gmra.mrb[20].mxu0 %vm7307_vm11, %v3335_v11  ;;  %vm7313_vm11 = vnez %v7122_v50  ;;  %v3583_v23 = vsel %vm7314_vm10, %v3575_v8, %v3576_v12  ;;  %vm7315_vm7 = vmmov %vm7312_vm5 }
 0xa75   : > { %5189 = vmatprep.mubr.msk.f32.mxu0 %vm7310_vm6, %v3336_v14  ;;  %v3586_v22 = vsel %vm7313_vm11, %v3584_v18, 0.0  ;;  %vm7316_vm6 = vmmov %vm7311_vm3  ;;  %v3587_v26 = vsel %vm6163_vm4, %v3583_v23, 0.0 }
 0xa76   : > { %v3582_v25 = vsel %vm7316_vm6, %v3576_v12, %v3577_v16  ;;  %vm7317_vm3 = vmmov %vm7312_vm5 }
 0xa77   : > { %v3588_v28 = vsel %vm7176_vm15, %v3582_v25, 0.0  ;;  %vm7319_vm11 = vmmov %vm7317_vm3 }
 0xa78   : > { %5190 = vmatmul.mubr.msk.f32.gmra.mrb[22].mxu0 %vm7312_vm5, %v3337_v19  ;;  %vm7318_vm5 = vmmov %vm7316_vm6  ;;  %v4772_v19 = vld [vmem:[%s7014_s5 + $0x98] sm:$0xff] }
 0xa79   : > { %5194 = vmatprep.mubr.msk.f32.mxu0 %vm7315_vm7, %v3586_v22  ;;  %v3581_v29 = vsel %vm7318_vm5, %v3577_v16, %v3578_v21  ;;  %vm7320_vm10 = vmmov %vm7318_vm5  ;;  %5203 = vmatprep.subr.mxu1 %v4772_v19 }
 0xa7a   : > { %v3580_v31 = vsel %vm7320_vm10, %v3578_v21, %v3579_v24  ;;  %v3589_v32 = vsel %vm6187_vm0, %v3581_v29, 0.0  ;;  %vm7321_vm7 = vmmov %vm7317_vm3  ;;  %5204 = vmatpush3.msra.mxu1 %v4772_v19  ;;  %vm7324_vm10 = vnez %v7092_v59 }
 0xa7b   : > { %v3590_v33 = vsel %vm6194_vm8, %v3580_v31, 0.0  ;;  %vm7322_vm6 = vmmov %vm7318_vm5  ;;  %vm3785_vm5 = vcmask 392512  }
 0xa7c   : > { %5195 = vmatmul.mubr.msk.f32.vlgmr.msra.gmra.mrb[18].mxu0 %vm7317_vm3, %v3587_v26  ;;  %v3585_v35 = vsel %vm7322_vm6, %v3579_v24, %v3574_v9  ;;  %v4771_v26 = vld [vmem:[%s7014_s5 + $0x90] sm:$0xff]  ;;  %vm7326_vm6 = vmmov %vm7317_vm3 }
 0xa7d   : > { %5197 = vmatprep.mubr.msk.f32.mxu0 %vm7319_vm11, %v3588_v28  ;;  %v3591_v36 = vsel %vm6207_vm1, %v3585_v35, 0.0  ;;  %vm7323_vm11 = vmmov %vm7317_vm3  ;;  %5214 = vmatprep.subr.mxu1 %v4771_v26 }
 0xa80   : > { %5198 = vmatmul.mubr.msk.f32.gmra.mrb[20].mxu0 %vm7321_vm7, %v3589_v32  ;;  %vm7325_vm7 = vnez %v7094_v62 }
 0xa81   : > { %5200 = vmatprep.mubr.msk.f32.mxu0 %vm7317_vm3, %v3590_v33 }
 0xa84   : > { %5201 = vmatmul.mubr.msk.f32.gmra.mrb[22].mxu0 %vm7323_vm11, %v3591_v36  ;;  %vm7327_vm11 = vnez %v7096_v4 }
 0xb4f   : > { %v5196_v39 = vpop.f32.mrb[18].mxu0 }
 0xb50   : > { %v3722_v40 = vadd.f32 %v5196_v39, %v4766_v37  ;;  %v3678_v42 = vpop.f32.mrb[19].mxu0 }
 0xb51   : > { %v3721_v44 = vadd.f32 %v4766_v37, %v3678_v42 }
 0xb52   : > { %v3728_v45 = vmax.f32 %v3722_v40, 0.0 }
 0xb53   : > { %v3727_v46 = vmax.f32 %v3721_v44, 0.0  ;;  %v5199_v49 = vpop.f32.mrb[20].mxu0 }
 0xb54   : > { %v3742_v52 = vmul.f32 %v4768_v43, %v3728_v45  ;;  %v3724_v53 = vadd.f32 %v5199_v49, %v4766_v37  ;;  %v3688_v55 = vpop.f32.mrb[21].mxu0 }
 0xb55   : > { %v3741_v58 = vmul.f32 %v4768_v43, %v3727_v46  ;;  %v3723_v54 = vadd.f32 %v4766_v37, %v3688_v55  ;;  %v4785_v55 = vld [vmem:[%s7014_s5 + $0xa0] sm:$0xff] }
 0xb56   : > { %v3730_v61 = vmax.f32 %v3724_v53, 0.0  ;;  %v3756_v0 = vadd.f32 %v4770_v51, %v3742_v52 }
 0xb57   : > { %v3729_v2 = vmax.f32 %v3723_v54, 0.0  ;;  %v5202_v3 = vpop.f32.mrb[22].mxu0  ;;  %v3755_v56 = vadd.f32 %v4770_v51, %v3741_v58 }
 0xb58   : > { %v3744_v6 = vmul.f32 %v4768_v43, %v3730_v61  ;;  %v3726_v8 = vadd.f32 %v5202_v3, %v4766_v37  ;;  %3769 = vrot.lane.b32.xlu1 %v3756_v0, %s5649_s24  ;;  %v3698_v9 = vpop.f32.mrb[23].mxu0 }
 0xb59   : > { %v3743_v1 = vmul.f32 %v4768_v43, %v3729_v2  ;;  %v3725_v11 = vadd.f32 %v4766_v37, %v3698_v9  ;;  %3767 = vrot.lane.b32.xlu0 %v3755_v56, %s5649_s24 }
 0xb5a   : > { %v3732_v12 = vmax.f32 %v3726_v8, 0.0  ;;  %v3758_v14 = vadd.f32 %v4770_v51, %v3744_v6 }
 0xb5b   : > { %v3731_v15 = vmax.f32 %v3725_v11, 0.0  ;;  %v3757_v16 = vadd.f32 %v4770_v51, %v3743_v1 }
 0xb5c   : > { %v3746_v18 = vmul.f32 %v4768_v43, %v3732_v12  ;;  %3773 = vrot.lane.b32.xlu1 %v3758_v14, %s5649_s24 }
 0xb5d   : > { %v3745_v21 = vmul.f32 %v4768_v43, %v3731_v15  ;;  %3771 = vrot.lane.b32.xlu0 %v3757_v16, %s5649_s24 }
 0xb5e   : > { %v3760_v22 = vadd.f32 %v4770_v51, %v3746_v18 }
 0xb5f   : > { %v3759_v23 = vadd.f32 %v4770_v51, %v3745_v21 }
 0xb60   : > { %3777 = vrot.lane.b32.xlu1 %v3760_v22, %s5649_s24 }
 0xb61   : > { %3775 = vrot.lane.b32.xlu0 %v3759_v23, %s5649_s24  ;;  %s4804_s24 = sshll.u32 %s5619_s16, 1 }
 0xbca   : > { %v3770_v24 = vpop.permute.xlu1 %3769 }
 0xbcb   : > { %3787 = vst.msk [vmem:[#allocation2 + $0x8] sm:$0xff] %vm3785_vm5, %v3770_v24  ;;  %v3768_v25 = vpop.permute.xlu0 %3767 }
 0xbcc   : > { %3786 = vst.msk [vmem:[#allocation2] sm:$0xff] %vm3785_vm5, %v3768_v25 }
 0xbce   : > { %v3774_v28 = vpop.permute.xlu1 %3773 }
 0xbcf   : > { %3789 = vst.msk [vmem:[#allocation2 + $0x18] sm:$0xff] %vm3785_vm5, %v3774_v28  ;;  %v3772_v29 = vpop.permute.xlu0 %3771 }
 0xbd0   : > { %3788 = vst.msk [vmem:[#allocation2 + $0x10] sm:$0xff] %vm3785_vm5, %v3772_v29 }
 0xbd2   : > { %v3778_v31 = vpop.permute.xlu1 %3777  ;;  %v3793_v32 = vld [vmem:[#allocation2 + $0x8] sm:$0xff] }
 0xbd3   : > { %3791 = vst.msk [vmem:[#allocation2 + $0x28] sm:$0xff] %vm3785_vm5, %v3778_v31  ;;  %3806 = vrot.lane.b32.xlu1 %v3793_v32, %s5650_s25  ;;  %v3776_v33 = vpop.permute.xlu0 %3775  ;;  %v3792_v35 = vld [vmem:[#allocation2] sm:$0xff] }
 0xbd4   : > { %3790 = vst.msk [vmem:[#allocation2 + $0x20] sm:$0xff] %vm3785_vm5, %v3776_v33  ;;  %3804 = vrot.lane.b32.xlu0 %v3792_v35, %s5650_s25  ;;  %vm7328_vm5 = vmmov %vm7317_vm3 }
 0xbd6   : > { %v3795_v36 = vld [vmem:[#allocation2 + $0x18] sm:$0xff] }
 0xbd7   : > { %3810 = vrot.lane.b32.xlu1 %v3795_v36, %s5650_s25  ;;  %v3794_v37 = vld [vmem:[#allocation2 + $0x10] sm:$0xff]  ;;  %v4303_v36 = vld [vmem:[%s7018_s9 + $0x8] sm:$0xff] }
 0xbd8   : > { %3808 = vrot.lane.b32.xlu0 %v3794_v37, %s5650_s25  ;;  %v5271_v37 = vpack.c.bf16 %v4303_v36, %v4302_v5 }
 0xbda   : > { %v3797_v39 = vld [vmem:[#allocation2 + $0x28] sm:$0xff]  ;;  %5272 = vmatprep.subr.bf16.mxu0 %v5271_v37 }
 0xbdb   : > { %3814 = vrot.lane.b32.xlu1 %v3797_v39, %s5650_s25  ;;  %v3796_v40 = vld [vmem:[#allocation2 + $0x20] sm:$0xff]  ;;  %v5275_v39 = vpack.c.bf16 %v4305_v10, %v4304_v63  ;;  %5274 = vmatpush3.bf16.msra.mxu0 %v5271_v37 }
 0xbdc   : > { %3812 = vrot.lane.b32.xlu0 %v3796_v40, %s5650_s25  ;;  %s7363_s25 = sld [smem:[#allocation23_spill]] }
 0xbdd   : > { %5276 = vmatprep.subr.bf16.mxu0 %v5275_v39 }
 0xbdf   : > { %5278 = vmatpush3.bf16.msra.mxu0 %v5275_v39 }
 0xc45   : > { %v3807_v42 = vpop.permute.xlu1 %3806 }
 0xc46   : > { %v3823_v43 = vadd.f32 %v3807_v42, %v3756_v0  ;;  %v3805_v44 = vpop.permute.xlu0 %3804  ;;  %v4793_v42 = vld [vmem:[%s7015_s6 + $0x6] ss:$0 sm:$0xff] }
 0xc47   : > { %v6777_v45 = vadd.f32 %v3805_v44, %v3755_v56  ;;  %v4306_v44 = vld [vmem:[%s7018_s9 + $0x20] sm:$0xff] }
 0xc48   : > { %v3849_v51 = vsel %vm7325_vm7, %v3823_v43, 0.0  ;;  %v3829_v2 = vrot.slane %v3823_v43, 6  ;;  %vm7330_vm7 = vmmov %vm7317_vm3 }
 0xc49   : > { %v3811_v46 = vpop.permute.xlu1 %3810  ;;  %v3848_v49 = vsel %vm7324_vm10, %v6777_v45, 0.0  ;;  %vm7329_vm10 = vnez %v7098_v7  ;;  %v3828_v3 = vrot.slane %v6777_v45, 6  ;;  %v4082_v18 = vrot.slane %v6777_v45, 2  ;;  %v4307_v45 = vld [vmem:[%s7018_s9 + $0x28] sm:$0xff] }
 0xc4a   : > { %v3825_v52 = vadd.f32 %v3811_v46, %v3758_v14  ;;  %5205 = vmatprep.mubr.msk.f32.mxu1 %vm7326_vm6, %v3848_v49  ;;  %v3809_v53 = vpop.permute.xlu0 %3808  ;;  %vm7331_vm6 = vmmov %vm7317_vm3  ;;  %v5279_v46 = vpack.c.bf16 %v4307_v45, %v4306_v44 }
 0xc4b   : > { %v3824_v58 = vadd.f32 %v3809_v53, %v3757_v16  ;;  %5206 = vmatmul.mubr.msk.f32.vlgmr.msra.gmra.mrb[18].mxu1 %vm7317_vm3, %v3849_v51  ;;  %vm7332_vm3 = vnez %v7102_v17  ;;  %v4083_v16 = vrot.slane %v3823_v43, 2 }
 0xc4c   : > { %5215 = vmatpush3.msra.mxu1 %v4771_v26  ;;  %v3851_v0 = vsel %vm7329_vm10, %v3825_v52, 0.0  ;;  %v3831_v1 = vrot.slane %v3825_v52, 6  ;;  %5280 = vmatprep.subr.bf16.mxu0 %v5279_v46 }
 0xc4d   : > { %v3815_v54 = vpop.permute.xlu1 %3814  ;;  %v3850_v59 = vsel %vm7327_vm11, %v3824_v58, 0.0  ;;  %5225 = vmatprep.subr.mxu1 %v4785_v55  ;;  %v3830_v6 = vrot.slane %v3824_v58, 6  ;;  %vm7333_vm11 = vcmp.lt.s32.totalorder %v5923_v34, 2  ;;  %v4084_v21 = vrot.slane %v3824_v58, 2  ;;  %5282 = vmatpush3.bf16.msra.mxu0 %v5279_v46  ;;  %v4308_v58 = vld [vmem:[%s7018_s9 + $0x30] sm:$0xff] }
 0xc4e   : > { %v3827_v61 = vadd.f32 %v3815_v54, %v3760_v22  ;;  %5208 = vmatprep.mubr.msk.f32.mxu1 %vm7328_vm5, %v3850_v59  ;;  %v3813_v62 = vpop.permute.xlu0 %3812  ;;  %vm7334_vm10 = vmmov %vm7333_vm11  ;;  %v4309_v54 = vld [vmem:[%s7018_s9 + $0x38] sm:$0xff] }
 0xc4f   : > { %v3826_v56 = vadd.f32 %v3813_v62, %v3759_v23  ;;  %5209 = vmatmul.mubr.msk.f32.gmra.mrb[20].mxu1 %vm7330_vm7, %v3851_v0  ;;  %v3838_v12 = vsel %vm7334_vm10, %v3828_v3, %v3829_v2  ;;  %vm7335_vm7 = vmmov %vm7328_vm5  ;;  %v4085_v23 = vrot.slane %v3825_v52, 2 }
 0xc50   : > { %v3833_v8 = vrot.slane %v3827_v61, 6  ;;  %v3853_v9 = vsel %vm7332_vm3, %v3827_v61, 0.0  ;;  %v3841_v17 = vsel %vm7268_vm14, %v3838_v12, 0.0  ;;  %vm7338_vm3 = vnez %v7108_v30 }
 0xc51   : > { %v3852_v4 = vsel %vm7294_vm2, %v3826_v56, 0.0  ;;  %v3832_v14 = vrot.slane %v3826_v56, 6  ;;  %vm7336_vm2 = vmmov %vm7334_vm10  ;;  %vm7343_vm10 = vnez %v7114_v41  ;;  %v4086_v38 = vrot.slane %v3826_v56, 2 }
 0xc52   : > { %5211 = vmatprep.mubr.msk.f32.mxu1 %vm7331_vm6, %v3852_v4  ;;  %v3839_v7 = vsel %vm7333_vm11, %v3833_v8, %v3828_v3  ;;  %v3837_v13 = vsel %vm7336_vm2, %v3829_v2, %v3830_v6  ;;  %vm7337_vm6 = vmmov %vm7328_vm5  ;;  %v4087_v28 = vrot.slane %v3827_v61, 2  ;;  %v5283_v61 = vpack.c.bf16 %v4309_v54, %v4308_v58  ;;  %v4795_v2 = vld [vmem:[%s7016_s7 + $0x6] ss:$0 sm:$0xff] }
 0xc53   : > { %5212 = vmatmul.mubr.msk.f32.gmra.mrb[22].mxu1 %vm7328_vm5, %v3853_v9  ;;  %v3840_v11 = vsel %vm7192_vm13, %v3839_v7, 0.0  ;;  %v3842_v15 = vsel %vm7338_vm3, %v3837_v13, 0.0  ;;  %vm7339_vm11 = vmmov %vm7336_vm2  ;;  %vm7348_vm3 = vnez %v7122_v50 }
 0xc54   : > { %5216 = vmatprep.mubr.msk.f32.mxu1 %vm7335_vm7, %v3840_v11  ;;  %v3836_v20 = vsel %vm7339_vm11, %v3830_v6, %v3831_v1  ;;  %vm7340_vm13 = vmmov %vm7328_vm5  ;;  %5284 = vmatprep.subr.bf16.mxu0 %v5283_v61  ;;  %v4797_v11 = vld [vmem:[%s7017_s8 + $0x6] ss:$0 sm:$0xff] }
 0xc55   : > { %vm7341_vm5 = vmmov %vm7336_vm2  ;;  %v3843_v27 = vsel %vm7238_vm9, %v3836_v20, 0.0  ;;  %5286 = vmatpush3.bf16.msra.mxu0 %v5283_v61 }
 0xc56   : > { %v3835_v19 = vsel %vm7341_vm5, %v3831_v1, %v3832_v14  ;;  %vm7342_vm14 = vmmov %vm7337_vm6 }
 0xc57   : > { %5217 = vmatmul.mubr.msk.f32.vlgmr.msra.gmra.mrb[18].mxu1 %vm7337_vm6, %v3841_v17  ;;  %v3844_v30 = vsel %vm7343_vm10, %v3835_v19, 0.0  ;;  %vm7344_vm7 = vmmov %vm7336_vm2 }
 0xc58   : > { %5226 = vmatpush3.msra.mxu1 %v4785_v55  ;;  %5219 = vmatprep.mubr.msk.f32.mxu1 %vm7340_vm13, %v3842_v15  ;;  %v3834_v22 = vsel %vm7344_vm7, %v3832_v14, %v3833_v8  ;;  %vm7345_vm2 = vmmov %vm7337_vm6  ;;  %vm7346_vm6 = vcmp.lt.s32.totalorder %v5923_v34, 6 }
 0xc59   : > { %v4092_v24 = vsel %vm7346_vm6, %v4082_v18, %v4083_v16  ;;  %v3845_v25 = vsel %vm7207_vm12, %v3834_v22, 0.0  ;;  %vm7347_vm9 = vmmov %vm7345_vm2 }
 0xc5a   : > { %v4094_v26 = vsel %vm7348_vm3, %v4092_v24, 0.0  ;;  %vm7349_vm11 = vmmov %vm7346_vm6 }
 0xc5b   : > { %5220 = vmatmul.mubr.msk.f32.gmra.mrb[20].mxu1 %vm7342_vm14, %v3843_v27  ;;  %v4091_v41 = vsel %vm7349_vm11, %v4083_v16, %v4084_v21  ;;  %vm7350_vm13 = vmmov %vm7345_vm2 }
 0xc5c   : > { %5222 = vmatprep.mubr.msk.f32.mxu1 %vm7345_vm2, %v3844_v30  ;;  %vm7351_vm5 = vmmov %vm7346_vm6  ;;  %v4095_v31 = vsel %vm6163_vm4, %v4091_v41, 0.0 }
 0xc5d   : > { %v4090_v29 = vsel %vm7351_vm5, %v4084_v21, %v4085_v23  ;;  %vm7352_vm14 = vmmov %vm7345_vm2 }
 0xc5e   : > { %v4096_v48 = vsel %vm7176_vm15, %v4090_v29, 0.0  ;;  %vm7353_vm12 = vmmov %vm7351_vm5  ;;  %v4798_v29 = vld [vmem:[%s7362_s26] ss:$0 sm:$0xff]  ;;  %s7365_s26 = sld [smem:[#allocation17_spill]] }
 0xc5f   : > { %5223 = vmatmul.mubr.msk.f32.gmra.mrb[22].mxu1 %vm7347_vm9, %v3845_v25  ;;  %v4089_v50 = vsel %vm7353_vm12, %v4085_v23, %v4086_v38  ;;  %vm7354_vm10 = vmmov %vm7345_vm2 }
 0xc60   : > { %5227 = vmatprep.mubr.msk.f32.mxu1 %vm7350_vm13, %v4094_v26  ;;  %vm7355_vm7 = vmmov %vm7351_vm5  ;;  %v4097_v33 = vsel %vm6187_vm0, %v4089_v50, 0.0  ;;  %vm7360_vm0 = vcmask 523264  }
 0xc61   : > { %v4088_v32 = vsel %vm7355_vm7, %v4086_v38, %v4087_v28  ;;  %vm7356_vm4 = vmmov %vm7351_vm5 }
 0xc62   : > { %v4098_v57 = vsel %vm6194_vm8, %v4088_v32, 0.0  ;;  %v4093_v60 = vsel %vm7356_vm4, %v4087_v28, %v4082_v18  ;;  %vm7357_vm15 = vmmov %vm7345_vm2  ;;  %vm4293_vm8 = vcmask 458112   ;;  %v4801_v32 = vld [vmem:[%s7363_s25] ss:$0 sm:$0xff] }
 0xc63   : > { %5228 = vmatmul.mubr.msk.f32.vlgmr.msra.gmra.mrb[18].mxu1 %vm7352_vm14, %v4095_v31  ;;  %v4099_v35 = vsel %vm6207_vm1, %v4093_v60, 0.0  ;;  %vm7358_vm6 = vmmov %vm7345_vm2  ;;  %v4421_v60 = vstv %s4420_s29  ;;  %s5652_s29 = smov [#allocation6]  }
 0xc64   : > { %5230 = vmatprep.mubr.msk.f32.mxu1 %vm7354_vm10, %v4096_v48  ;;  %vm7361_vm1 = vmmov %vm7360_vm0  ;;  %vm4423_vm9 = vcmp.lt.s32.totalorder %v5933_v47, %v4421_v60  ;;  %vm4422_vm3 = vcmp.lt.s32.totalorder %v5923_v34, %v4421_v60  ;;  %p7371_p9 = scmp.ne.s32.totalorder %s7365_s26, 0  ;;  %s5509_s23 = sshll.u32 %s5652_s29, 4  ;;  %s5510_s23 = int_to_ptr.vmem [resolvable:$false] %s5509_s23 }
 0xc65   : > { %vm7367_vm11 = vmmov %vm7360_vm0  ;;  %s5511_s17 = scalar_lea.vmem %s5510_s23, 512  ;;  %p5512_p11 = scmp.lt.s32.totalorder %s6913_s14, %s5510_s23 }
 0xc66   : > { %vm7368_vm13 = vmmov %vm7360_vm0  ;;  %p5507_p12 = pnand %p5506_p8, %p7371_p9  ;;  %p5513_p13 = scmp.lt.s32.totalorder %s5511_s17, %s5505_s18 }
 0xc67   : > { %5231 = vmatmul.mubr.msk.f32.gmra.mrb[20].mxu1 %vm7345_vm2, %v4097_v33  ;;  %vm7369_vm5 = vmmov %vm7360_vm0 }
 0xc68   : > { %5233 = vmatprep.mubr.msk.f32.mxu1 %vm7357_vm15, %v4098_v57  ;;  %vm7370_vm14 = vmmov %vm7360_vm0  ;;  %p5508_p0 = pneg %p5507_p12  ;;  %p5514_p1 = por %p5513_p13, %p5512_p11 }
 0xc6a   : > { %p5515_p3 = pnand %p5514_p1, %p5508_p0 }
 0xc6b   : > { %5234 = vmatmul.mubr.msk.f32.gmra.mrb[22].mxu1 %vm7358_vm6, %v4099_v35  ;;  %v4802_v35 = vld [vmem:[%s7364_s1] ss:$0 sm:$0xff] }
 0xd36   : > { %v5229_v40 = vpop.f32.mrb[18].mxu1 }
 0xd37   : > { %v4186_v43 = vpop.f32.mrb[19].mxu1  ;;  %v4230_v49 = vadd.f32 %v5229_v40, %v4793_v42 }
 0xd38   : > { %v4229_v51 = vadd.f32 %v4793_v42, %v4186_v43 }
 0xd39   : > { %v4236_v62 = vmax.f32 %v4230_v49, 0.0 }
 0xd3a   : > { %v5232_v52 = vpop.f32.mrb[20].mxu1  ;;  %v4235_v3 = vmax.f32 %v4229_v51, 0.0 }
 0xd3b   : > { %v4232_v53 = vadd.f32 %v5232_v52, %v4793_v42  ;;  %v4196_v55 = vpop.f32.mrb[21].mxu1  ;;  %v4250_v12 = vmul.f32 %v4795_v2, %v4236_v62 }
 0xd3c   : > { %v4231_v59 = vadd.f32 %v4793_v42, %v4196_v55  ;;  %v4249_v17 = vmul.f32 %v4795_v2, %v4235_v3 }
 0xd3d   : > { %v4238_v0 = vmax.f32 %v4232_v53, 0.0  ;;  %v4264_v18 = vadd.f32 %v4797_v11, %v4250_v12 }
 0xd3e   : > { %v4237_v56 = vmax.f32 %v4231_v59, 0.0  ;;  %v5235_v6 = vpop.f32.mrb[22].mxu1  ;;  %v4263_v27 = vadd.f32 %v4797_v11, %v4249_v17 }
 0xd3f   : > { %v4252_v8 = vmul.f32 %v4795_v2, %v4238_v0  ;;  %v4234_v4 = vadd.f32 %v5235_v6, %v4793_v42  ;;  %v4206_v9 = vpop.f32.mrb[23].mxu1 }
 0xd40   : > { %v4251_v7 = vmul.f32 %v4795_v2, %v4237_v56  ;;  %v4233_v1 = vadd.f32 %v4793_v42, %v4206_v9 }
 0xd41   : > { %v4240_v14 = vmax.f32 %v4234_v4, 0.0  ;;  %v4266_v13 = vadd.f32 %v4797_v11, %v4252_v8 }
 0xd42   : > { %v4239_v15 = vmax.f32 %v4233_v1, 0.0  ;;  %v4265_v20 = vadd.f32 %v4797_v11, %v4251_v7 }
 0xd43   : > { %4281 = vrot.lane.b32.xlu1 %v4266_v13, %s5651_s27  ;;  %v4254_v16 = vmul.f32 %v4795_v2, %v4240_v14 }
 0xd44   : > { %4279 = vrot.lane.b32.xlu0 %v4265_v20, %s5651_s27  ;;  %v4253_v19 = vmul.f32 %v4795_v2, %v4239_v15 }
 0xd45   : > { %v4268_v21 = vadd.f32 %v4797_v11, %v4254_v16 }
 0xd46   : > { %v4267_v30 = vadd.f32 %v4797_v11, %v4253_v19 }
 0xd47   : > { %4277 = vrot.lane.b32.xlu1 %v4264_v18, %s5651_s27 }
 0xd48   : > { %4275 = vrot.lane.b32.xlu0 %v4263_v27, %s5651_s27 }
 0xd4b   : > { %4285 = vrot.lane.b32.xlu1 %v4268_v21, %s5651_s27 }
 0xd4c   : > { %4283 = vrot.lane.b32.xlu0 %v4267_v30, %s5651_s27  ;;  %s4458_s27 = sadd.s32 %s5375_s28, %s4804_s24  ;;  %s4442_s24 = scalar_lea.sflag [#allocation5], %s5856_s11 }
 0xd4d   : > { %s4805_s10 = sshll.u32 %s4458_s27, 7 }
 0xd4e   : > { %s6918_s28 = scalar_lea.hbm %s7366_s13, %s4805_s10 }
 0xdb5   : > { %v4282_v22 = vpop.permute.xlu1 %4281 }
 0xdb6   : > { %4297 = vst.msk [vmem:[#allocation2 + $0x18] sm:$0xff] %vm4293_vm8, %v4282_v22  ;;  %v4280_v23 = vpop.permute.xlu0 %4279 }
 0xdb7   : > { %4296 = vst.msk [vmem:[#allocation2 + $0x10] sm:$0xff] %vm4293_vm8, %v4280_v23 }
 0xdb9   : > { %v4278_v24 = vpop.permute.xlu1 %4277 }
 0xdba   : > { %4295 = vst.msk [vmem:[#allocation2 + $0x8] sm:$0xff] %vm4293_vm8, %v4278_v24  ;;  %v4276_v25 = vpop.permute.xlu0 %4275 }
 0xdbb   : > { %4294 = vst.msk [vmem:[#allocation2] sm:$0xff] %vm4293_vm8, %v4276_v25 }
 0xdbd   : > { %v4286_v38 = vpop.permute.xlu1 %4285  ;;  %v4301_v28 = vld [vmem:[#allocation2 + $0x18] sm:$0xff] }
 0xdbe   : > { %4299 = vst.msk [vmem:[#allocation2 + $0x28] sm:$0xff] %vm4293_vm8, %v4286_v38  ;;  %v4284_v26 = vpop.permute.xlu0 %4283  ;;  %v4300_v41 = vld [vmem:[#allocation2 + $0x10] sm:$0xff] }
 0xdbf   : > { %4298 = vst.msk [vmem:[#allocation2 + $0x20] sm:$0xff] %vm4293_vm8, %v4284_v26  ;;  %5252 = vmatprep.mubr.msk.f32.mxu0 %vm7360_vm0, %v4300_v41 }
 0xdc0   : > { %5253 = vmatmul.mubr.msk.f32.vlgmr.msra.gmra.mrb[24].mxu0 %vm7361_vm1, %v4301_v28 }
 0xe93   : > { %v5254_v31 = vpop.f32.mrb[24].mxu0 }
 0xe94   : > { %v4395_v48 = vadd.f32 %v5254_v31, %v4798_v29  ;;  %v4389_v50 = vpop.f32.mrb[25].mxu0 }
 0xe95   : > { %v4390_v33 = vadd.f32 %v4798_v29, %v4389_v50 }
 0xe96   : > { %v4399_v57 = vmax.f32 %v4395_v48, 0.0 }
 0xe97   : > { %v4398_v5 = vmax.f32 %v4390_v33, 0.0 }
 0xe98   : > { %v4408_v36 = vmul.f32 %v4801_v32, %v4399_v57 }
 0xe99   : > { %v4407_v63 = vmul.f32 %v4801_v32, %v4398_v5 }
 0xe9a   : > { %v4417_v37 = vadd.f32 %v4802_v35, %v4408_v36 }
 0xe9b   : > { %v4416_v10 = vadd.f32 %v4802_v35, %v4407_v63 }
 0xe9c   : > { %4419 = vst.msk [vmem:[%s509_s22 + $0x8] sm:$0xff] %vm7367_vm11, %v4417_v37  ;;  %v4429_v39 = vsel %vm4423_vm9, %v4417_v37, 0.0 }
 0xe9d   : > { %v4431_v47 = vsel %vm7368_vm13, %v4429_v39, 0.0  ;;  %4418 = vst.msk [vmem:[%s509_s22] sm:$0xff] %vm7369_vm5, %v4416_v10  ;;  %v4428_v40 = vsel %vm4422_vm3, %v4416_v10, 0.0 }
 0xe9e   : > { %v4430_v34 = vsel %vm7370_vm14, %v4428_v40, 0.0 }
 0xe9f   : > { %5518 = shalt.err (!%p5515_p3)
}
 0xea0   : > { %s5519_s25 = scalar_lea.hbm %s6918_s28, 256  ;;  %s5523_s10 = scalar_lea.hbm %s7366_s13, 1536 }
 0xea1   : > { %p5520_p5 = scmp.ne.s32.totalorder %s6918_s28, %s5519_s25  ;;  %p5524_p2 = scmp.lt.u32.totalorder %s6918_s28, %s7366_s13 }
 0xea2   : > { %p5525_p4 = scmp.lt.u32.totalorder %s5523_s10, %s5519_s25  ;;  %p5527_p8 = scmp.lt.u32.totalorder %s5519_s25, %s6918_s28 }
 0xea3   : > { %p5521_p6 = pnand %p5520_p5, %p7371_p9 }
 0xea4   : > { %p5526_p10 = por %p5525_p4, %p5524_p2 }
 0xea5   : > { %p5522_p7 = pneg %p5521_p6 }
 0xea6   : > { %p5528_p12 = por %p5527_p8, %p5526_p10 }
 0xea8   : > { %p5529_p0 = pnand %p5528_p12, %p5522_p7 }
 0xeaa   : > { %5532 = shalt.err (!%p5529_p0)
}
 0xeab   : > { %s5653_s18 = smov 128   ;;  %s7372_s29 = smov 8   ;;  %v4432_v42 = vadd.f32 %v4431_v47, %v4430_v34  ;;  %vm4439_vm12 = vcmask 516096  }
 0xeac   : > { %5379 = dma.vmem_to_hbm [thread:$0]  (%p7371_p9), %s6913_s14, 256, %s6918_s28, %s4442_s24, %s5653_s18, %s5653_s18, %s7372_s29  }
 0xead   : > { %v4433_v43 = vrot.slane %v4432_v42, 4  ;;  %s5376_s23 = smul.u32 3, %s7359_s21  ;;  %s515_s27 = scalar_lea.vmem [#allocation7], %s5856_s11 }
 0xeae   : > { %s4479_s22 = sshll.u32 %s515_s27, 4  ;;  %s7373_s1 = sld [smem:[#allocation26_spill]]  ;;  %s6957_s22 = int_to_ptr.vmem [resolvable:$true] %s4479_s22 }
 0xeaf   : > { %v4434_v44 = vadd.f32 %v4433_v43, %v4432_v42  ;;  %s4475_s17 = sadd.s32 %s5619_s16, %s5376_s23  ;;  %s4447_s21 = scalar_lea.sflag [#allocation8], %s5856_s11 }
 0xeb0   : > { %s4806_s25 = sshll.u32 %s4475_s17, 4  ;;  %s5533_s16 = scalar_lea.vmem %s6957_s22, 16 }
 0xeb1   : > { %v4435_v45 = vrot.slane %v4434_v44, 2  ;;  %p5534_p11 = scmp.ne.s32.totalorder %s6957_s22, %s5533_s16  ;;  %s5654_s14 = smov [#allocation7]  }
 0xeb2   : > { %s5537_s28 = sshll.u32 %s5654_s14, 4  ;;  %s5538_s28 = int_to_ptr.vmem [resolvable:$false] %s5537_s28 }
 0xeb3   : > { %v4436_v46 = vadd.f32 %v4435_v45, %v4434_v44  ;;  %p5535_p13 = pnand %p5534_p11, %p7371_p9  ;;  %s5539_s24 = scalar_lea.vmem %s5538_s28, 32 }
 0xeb4   : > { %s6955_s2 = scalar_lea.hbm %s7373_s1, %s4806_s25  ;;  %p5540_p3 = scmp.lt.s32.totalorder %s6957_s22, %s5538_s28 }
 0xeb5   : > { %v4437_v49 = vrot.slane %v4436_v46, 1  ;;  %p5536_p1 = pneg %p5535_p13  ;;  %p5541_p5 = scmp.lt.s32.totalorder %s5539_s24, %s5533_s16 }
 0xeb7   : > { %v4438_v51 = vadd.f32 %v4437_v49, %v4436_v46  ;;  %p5542_p6 = por %p5541_p5, %p5540_p3 }
 0xeb9   : > { %4440 = vst.msk [vmem:[%s515_s27] sm:$0x1] %vm4439_vm12, %v4438_v51  ;;  %p5543_p7 = pnand %p5542_p6, %p5536_p1 }
 0xebb   : > { %5546 = shalt.err (!%p5543_p7)
}
 0xebc   : > { %s5547_s11 = scalar_lea.hbm %s6955_s2, 16  ;;  %s5551_s23 = scalar_lea.hbm %s7373_s1, 96 }
 0xebd   : > { %p5548_p2 = scmp.ne.s32.totalorder %s6955_s2, %s5547_s11  ;;  %p5552_p8 = scmp.lt.u32.totalorder %s6955_s2, %s7373_s1 }
 0xebe   : > { %p5553_p12 = scmp.lt.u32.totalorder %s5551_s23, %s5547_s11  ;;  %p5555_p11 = scmp.lt.u32.totalorder %s5547_s11, %s6955_s2 }
 0xebf   : > { %p5549_p4 = pnand %p5548_p2, %p7371_p9 }
 0xec0   : > { %p5554_p0 = por %p5553_p12, %p5552_p8 }
 0xec1   : > { %p5550_p10 = pneg %p5549_p4 }
 0xec2   : > { %p5556_p13 = por %p5555_p11, %p5554_p0 }
 0xec4   : > { %p5557_p1 = pnand %p5556_p13, %p5550_p10 }
 0xec6   : > { %5560 = shalt.err (!%p5557_p1)
}
 0xec7   : > { %5380 = dma.vmem_to_hbm [thread:$0]  (%p7371_p9), %s6957_s22, 16, %s6955_s2, %s4447_s21  }
 0xec8 PF: > { %s7374_s27 = sld [smem:[#allocation12_spill]]  ;;  %s7375_s10 = sld [smem:[#allocation18_spill]] }
 0xec9   : > { %p5395_p3 = scmp.ge.s32.totalorder %s5635_s20, 2 }
 0xece   : > { %s4491_s0 = sand.u32 1, %s7374_s27   ;;  %p7376_p5 = scmp.ne.s32.totalorder %s7375_s10, 0 }
 0xecf   : > { %s4492_s16 = scalar_lea.sflag [#allocation5], %s4491_s0 }
 0xed0   : > { %p5388_p6 = pnand %p5395_p3, %p7376_p5 }
 0xed2   : > { %5598 = dma.done.wait (!%p5388_p6), %s4492_s16, 256  }
 0xed3   : > { %5600 = vsyncadd (!%p5388_p6), %s4492_s16, 4294967040  ;;  %s4501_s14 = scalar_lea.sflag [#allocation8], %s4491_s0 }
 0xed4   : > { %5602 = dma.done.wait (!%p5388_p6), %s4501_s14, 16  }
 0xed5   : > { %5604 = vsyncadd (!%p5388_p6), %s4501_s14, 4294967280  ;;  %s34_s20 = sadd.s32 1, %s5635_s20   ;;  %s7377_s16 = sld [smem:[#allocation14_spill]] }
 0xed6   : > { %p31_p7 = scmp.ge.s32.totalorder %s34_s20, 8   ;;  %s7378_s18 = sld [smem:[#allocation15_spill]] }
 0xed7   : > { %s7379_s2 = sld [smem:[#allocation16_spill]]  ;;  %s7380_s29 = smov %s5611_s30 }
 0xed8   : > { %s7381_s30 = smov %s5615_s15  ;;  %s7382_s15 = smov %s5808_s12 }
 0xed9   : > { %s7383_s17 = smov %s5631_s19  ;;  %33 = sbr.rel (!%p31_p7) target bundleno = 18 (0x12), region = 172 }
 0xedd   : > { %s7384_s19 = smov %s7379_s2 }
 0xee0   :  { %4505 = vsyncpa [#allocation4], 1 }
 0xee1   :  { %4507 = vsyncpa [#allocation4 + $0x1], 1 }
 0xee2   :  { %4508 = vsyncpa [#allocation5], 1 }
 0xee3   :  { %4510 = vsyncpa [#allocation5 + $0x1], 1 }
 0xee4   :  { %4511 = vsyncpa [#allocation8], 1 }
 0xee5   :  { %4513 = vsyncpa [#allocation8 + $0x1], 1 }

// kernel: tpu_custom_call.1
= control target key start
LH: loop header
LB: loop body
LE: loop exit
PB: predicated region body
PF: predicated region fallthrough
CT: control target
= control target key end

     0   :  { %s7009_s0 = inlined_call_operand.hbm [shape: f32[2,3,48,64], index: 0, kind: input, shape index: {}]   ;;  %s7010_s1 = inlined_call_operand.vmem [shape: f32[64,64], index: 1, kind: input, shape index: {}]   ;;  %s7011_s2 = inlined_call_operand.vmem [shape: f32[1,64], index: 2, kind: input, shape index: {}]   ;;  %s7012_s3 = inlined_call_operand.vmem [shape: f32[1,64], index: 3, kind: input, shape index: {}]   ;;  %s7013_s4 = inlined_call_operand.vmem [shape: f32[1,64], index: 4, kind: input, shape index: {}]   ;;  %s7014_s5 = inlined_call_operand.vmem [shape: f32[21,8,8], index: 5, kind: input, shape index: {}]   ;;  %s7015_s6 = inlined_call_operand.vmem [shape: f32[7,1,8], index: 6, kind: input, shape index: {}]   ;;  %s7016_s7 = inlined_call_operand.vmem [shape: f32[7,1,8], index: 7, kind: input, shape index: {}]   ;;  %s7017_s8 = inlined_call_operand.vmem [shape: f32[7,1,8], index: 8, kind: input, shape index: {}]   ;;  %s7018_s9 = inlined_call_operand.vmem [shape: f32[64,64], index: 9, kind: input, shape index: {}]   ;;  %s7019_s10 = inlined_call_operand.vmem [shape: f32[1,64], index: 10, kind: input, shape index: {}]   ;;  %s7020_s11 = inlined_call_operand.vmem [shape: f32[1,64], index: 11, kind: input, shape index: {}]   ;;  %s7021_s12 = inlined_call_operand.vmem [shape: f32[1,64], index: 12, kind: input, shape index: {}]   ;;  %s7022_s13 = inlined_call_operand.hbm [shape: f32[2,48,64], index: 13, kind: output, shape index: {0}]   ;;  %s7023_s14 = inlined_call_operand.hbm [shape: f32[2,3,1,64], index: 14, kind: output, shape index: {1}]  }
   0x1   :  { %7068 = sst [smem:[#allocation19_spill]] %s7009_s0 }
   0x2   :  { %7069 = sst [smem:[#allocation20_spill]] %s7010_s1 }
   0x3   :  { %7070 = sst [smem:[#allocation21_spill]] %s7011_s2 }
   0x4   :  { %7071 = sst [smem:[#allocation22_spill]] %s7019_s10 }
   0x5   :  { %7072 = sst [smem:[#allocation23_spill]] %s7020_s11 }
   0x6   :  { %7073 = sst [smem:[#allocation24_spill]] %s7021_s12 }
   0x7   :  { %7074 = sst [smem:[#allocation25_spill]] %s7022_s13 }
   0x8   :  { %7075 = sst [smem:[#allocation26_spill]] %s7023_s14 }
   0x9   :  { %20 = vsyncpa [#allocation4], 0 }
   0xa   :  { %22 = vsyncpa [#allocation4 + $0x1], 0 }
   0xb   :  { %23 = vsyncpa [#allocation5], 0 }
   0xc   :  { %25 = vsyncpa [#allocation5 + $0x1], 0 }
   0xd   :  { %26 = vsyncpa [#allocation8], 0 }
   0xe   :  { %28 = vsyncpa [#allocation8 + $0x1], 0  ;;  %s5730_s29 = smov 0   ;;  %s5732_s30 = smov 0  }
   0xf   :  { %s5734_s15 = smov 0   ;;  %s5736_s16 = smov 0  }
  0x10   :  { %s5738_s17 = smov 0   ;;  %s5740_s18 = smov 0  }
  0x11   :  { %s5742_s19 = smov 0   ;;  %s5744_s20 = smov 0  }
  0x12 LB: > { %7076 = sst [smem:[#allocation12_spill]] %s5607_s29  ;;  %s4596_s21 = sadd.s32 4294967295, %s5635_s20   ;;  %s5635_s20 = sphi %s5744_s20, %s34_s20   ;;  %s5631_s19 = sphi %s5742_s19, %s7384_s19   ;;  %s5627_s18 = sphi %s5740_s18, %s7378_s18   ;;  %s5623_s17 = sphi %s5738_s17, %s7383_s17   ;;  %s5619_s16 = sphi %s5736_s16, %s7377_s16   ;;  %s5615_s15 = sphi %s5734_s15, %s7382_s15   ;;  %s5611_s30 = sphi %s5732_s30, %s7381_s30   ;;  %s5607_s29 = sphi %s5730_s29, %s7380_s29  }
  0x13   : > { %7077 = sst [smem:[#allocation13_spill]] %s5623_s17  ;;  %s4597_s22 = sadd.s32 4294967294, %s5635_s20  }
  0x14   : > { %7078 = sst [smem:[#allocation14_spill]] %s5627_s18  ;;  %s43_s23 = sadd.s32 1, %s5627_s18 }
  0x15   : > { %s46_s24 = sadd.s32 1, %s5631_s19  ;;  %p44_p0 = scmp.ge.s32.totalorder %s43_s23, 3 }
  0x16   : > { %s55_s25 = sadd.s32 1, %s5615_s15  ;;  %p62_p1 = scmp.ne.s32.totalorder %s5615_s15, %s5611_s30 }
  0x17   : > { %p63_p2 = scmp.eq.s32.totalorder %s5635_s20, 0  ;;  %s7386_s23 = smov (%p44_p0, %s43_s23), 0 }
  0x18   : > { %7079 = sst [smem:[#allocation15_spill]] %s7386_s23  ;;  %s7388_s24 = smov (!%p44_p0, %s46_s24), %s5631_s19 }
  0x19   : > { %s51_s26 = ssub.s32 %s5627_s18, %s7386_s23  ;;  %p5783_p3 = por %p63_p2, %p62_p1 }
  0x1a   : > { %p48_p4 = scmp.ge.s32.totalorder %s7388_s24, 2  ;;  %p68_p5 = scmp.ne.s32.totalorder %s5611_s30, %s5607_s29 }
  0x1b   : > { %p69_p6 = scmp.eq.s32.totalorder %s4596_s21, 0  ;;  %p346_p7 = scmp.eq.s32.totalorder %s4596_s21, 5 }
  0x1c   : > { %s7390_s24 = smov (%p48_p4, %s7388_s24), 0  ;;  %p352_p10 = scmp.eq.s32.totalorder %s4597_s22, 5 }
  0x1d   : > { %7081 = sst [smem:[#allocation16_spill]] %s7390_s24  ;;  %p5791_p8 = por %p69_p6, %p68_p5 }
  0x1e   : > { %p5795_p9 = por %p346_p7, %p62_p1  ;;  %s50_s14 = ssub.s32 %s5631_s19, %s7390_s24 }
  0x1f   : > { %s52_s13 = sor.u32 %s51_s26, %s50_s14  ;;  %p5801_p12 = por %p352_p10, %p68_p5 }
  0x20   : > { %s7083_s23 = scalar_select %p5795_p9, 1, 0 }
  0x21   : > { %p53_p11 = scmp.eq.s32.totalorder %s52_s13, 0  ;;  %p5394_p13 = scmp.lt.s32.totalorder %s5635_s20, 6 }
  0x22   : > { %7084 = sst [smem:[#allocation17_spill]] %s7083_s23  ;;  %s436_s21 = sand.u32 1, %s5615_s15  }
  0x23   : > { %s7085_s29 = scalar_select %p5801_p12, 1, 0 }
  0x24   : > { %s5808_s12 = scalar_select %p53_p11, %s5615_s15, %s55_s25  }
  0x25   : > { %7086 = sst [smem:[#allocation18_spill]] %s7085_s29  ;;  %s5371_s11 = smul.u32 48, %s436_s21 }
  0x26   : > { %s5372_s10 = smul.u32 6, %s5627_s18  ;;  %p5813_p0 = pnand %p5394_p13, %p5783_p3 }
  0x27   : > { %s5373_s22 = smul.u32 18, %s5631_s19  ;;  %s440_s14 = scalar_lea.vmem [#allocation3], %s5371_s11 }
  0x28   : > { %s449_s13 = sshll.u32 %s440_s14, 4  ;;  %s7088_s0 = sld [smem:[#allocation19_spill]]  ;;  %s5818_s13 = int_to_ptr.vmem [resolvable:$true] %s449_s13 }
  0x29   : > { %s446_s26 = sadd.s32 %s5373_s22, %s5372_s10  ;;  %s5825_s27 = scalar_lea.sflag [#allocation4], %s436_s21 }
  0x2a   : > { %s4600_s24 = sshll.u32 %s446_s26, 7  ;;  %p5477_p2 = pneg %p5813_p0 }
  0x2e   : > { %s5823_s25 = scalar_lea.hbm %s7088_s0, %s4600_s24  ;;  %s5480_s29 = scalar_lea.hbm %s7088_s0, 4608 }
  0x2f   : > { %s5475_s18 = scalar_lea.hbm %s5823_s25, 768  ;;  %p5481_p5 = scmp.lt.u32.totalorder %s5823_s25, %s7088_s0 }
  0x30   : > { %p5476_p1 = scmp.ne.s32.totalorder %s5823_s25, %s5475_s18  ;;  %p5482_p6 = scmp.lt.u32.totalorder %s5480_s29, %s5475_s18 }
  0x31   : > { %p5484_p10 = scmp.lt.u32.totalorder %s5475_s18, %s5823_s25 }
  0x32   : > { %p5478_p3 = pnand %p5477_p2, %p5476_p1  ;;  %p5483_p7 = por %p5482_p6, %p5481_p5 }
  0x34   : > { %p5479_p4 = pneg %p5478_p3  ;;  %p5485_p11 = por %p5484_p10, %p5483_p7 }
  0x36   : > { %p5486_p13 = pnand %p5485_p11, %p5479_p4 }
  0x38   : > { %5489 = shalt.err (!%p5486_p13)
}
  0x39   : > { %s5490_s21 = scalar_lea.vmem %s5818_s13, 768  ;;  %s5637_s22 = smov [#allocation3]  }
  0x3a   : > { %p5491_p1 = scmp.ne.s32.totalorder %s5818_s13, %s5490_s21  ;;  %s5495_s14 = sshll.u32 %s5637_s22, 4  ;;  %s5496_s14 = int_to_ptr.vmem [resolvable:$false] %s5495_s14 }
  0x3b   : > { %s5497_s26 = scalar_lea.vmem %s5496_s14, 1536  ;;  %p5498_p9 = scmp.lt.s32.totalorder %s5818_s13, %s5496_s14 }
  0x3c   : > { %p5493_p3 = pnand %p5491_p1, %p5477_p2  ;;  %p5499_p5 = scmp.lt.s32.totalorder %s5497_s26, %s5490_s21 }
  0x3e   : > { %p5494_p12 = pneg %p5493_p3  ;;  %p5500_p6 = por %p5499_p5, %p5498_p9 }
  0x40   : > { %p5501_p7 = pnand %p5500_p6, %p5494_p12 }
  0x42   : > { %5504 = shalt.err (!%p5501_p7)
}
  0x43   : > { %s5638_s18 = smov 128   ;;  %s5639_s10 = smov 8  }
  0x44   : > { %5386 = dma.hbm_to_vmem [thread:$0]  (!%p5813_p0), %s5823_s25, 768, %s5818_s13, %s5825_s27, %s5638_s18, %s5638_s18, %s5639_s10  }
  0x45   : > { %p4601_p2 = scmp.ge.s32.totalorder %s5635_s20, 1  ;;  %p457_p4 = scmp.lt.s32.totalorder %s5635_s20, 7 }
  0x47   : > { %p458_p10 = pnand %p4601_p2, %p457_p4 }
  0x48   : > { %s5856_s11 = sand.u32 (!%p458_p10), 1, %s5611_s30  }
  0x49   : > { %461 = sbr.rel (%p458_p10) target bundleno = 3784 (0xec8), region = 72  ;;  %s464_s23 = scalar_lea.sflag (!%p458_p10), [#allocation4], %s5856_s11 }
  0x4a   : > { %s5374_s29 = smul.u32 (!%p458_p10), 48, %s5856_s11 }
  0x4c   : > { %s5860_s24 = scalar_lea.vmem (!%p458_p10), [#allocation3], %s5374_s29 }
  0x50   : > { %5594 = dma.done.wait (%p5791_p8), %s464_s23, 768  }
  0x51   : > { %5596 = vsyncadd (%p5791_p8), %s464_s23, 4294966528  ;;  %s7089_s1 = sld [smem:[#allocation20_spill]]  ;;  %vm7035_vm0 = vcmask 523264   ;;  %v518_v8 = vld [vmem:[%s5860_s24] sm:$0xff]  ;;  %v519_v13 = vld [vmem:[%s5860_s24 + $0x8] sm:$0xff]  ;;  %s7090_s2 = sld [smem:[#allocation21_spill]]  ;;  %v691_v24 = vlaneseq }
  0x52   : > { %4996 = vmatprep.mubr.msk.f32.mxu0 %vm7035_vm0, %v518_v8  ;;  %v520_v14 = vld [vmem:[%s5860_s24 + $0x10] sm:$0xff]  ;;  %v521_v15 = vld [vmem:[%s5860_s24 + $0x18] sm:$0xff]  ;;  %v522_v16 = vld [vmem:[%s5860_s24 + $0x20] sm:$0xff]  ;;  %s5918_s10 = sshll.u32 %s5619_s16, 4  ;;  %v7091_v59 = vmov 0  ;;  %vm7036_vm6 = vcmask 64512  }
  0x53   : > { %v523_v17 = vld [vmem:[%s5860_s24 + $0x28] sm:$0xff]  ;;  %v5908_v19 = vld [vmem:[%s7014_s5] sm:$0xff]  ;;  %v5923_v34 = vshrl.u32 %v691_v24, 7  ;;  %s758_s17 = ssub.s32 16, %s5918_s10  ;;  %s766_s13 = ssub.s32 56, %s5918_s10  ;;  %v7093_v62 = vmov 0 }
  0x54   : > { %v4613_v18 = vld [vmem:[%s7014_s5 + $0x8] sm:$0xff]  ;;  %v4611_v25 = vld [vmem:[%s7012_s3] ss:$0 sm:$0xff]  ;;  %v5927_v42 = vstv %s758_s17  ;;  %v5930_v46 = vstv %s766_s13  ;;  %s717_s25 = ssub.s32 18, %s5918_s10  ;;  %s725_s27 = ssub.s32 58, %s5918_s10 }
  0x55   : > { %5005 = vmatprep.subr.mxu1 %v4613_v18  ;;  %v4612_v28 = vld [vmem:[%s7013_s4] ss:$0 sm:$0xff]  ;;  %v5933_v47 = vadd.s32 8, %v5923_v34  ;;  %vm760_vm1 = vcmp.ge.s32.totalorder %v5923_v34, %v5927_v42  ;;  %vm768_vm2 = vcmp.lt.s32.totalorder %v5923_v34, %v5930_v46  ;;  %v5941_v54 = vadd.s32 16, %v5923_v34  ;;  %s1040_s14 = ssub.s32 14, %s5918_s10  ;;  %s1048_s26 = ssub.s32 54, %s5918_s10 }
  0x56   : > { %5006 = vmatpush3.msra.mxu1 %v4613_v18  ;;  %v5949_v56 = vadd.s32 24, %v5923_v34  ;;  %vm5952_vm5 = vmand %vm760_vm1, %vm768_vm2  ;;  %v5967_v63 = vadd.s32 32, %v5923_v34  ;;  %s5640_s22 = smov 120   ;;  %s7067_s13 = smov 8  }
  0x57   : > { %v524_v0 = vld [vmem:[%s7089_s1] sm:$0xff]  ;;  %v525_v1 = vld [vmem:[%s7089_s1 + $0x8] sm:$0xff]  ;;  %v526_v2 = vld [vmem:[%s7089_s1 + $0x10] sm:$0xff]  ;;  %5016 = vmatprep.subr.mxu1 %v5908_v19  ;;  %vm761_vm3 = vcmp.ge.s32.totalorder %v5933_v47, %v5927_v42  ;;  %vm769_vm4 = vcmp.lt.s32.totalorder %v5933_v47, %v5930_v46  ;;  %v7092_v59 = vsel %vm5952_vm5, 4294967295, %v7091_v59  ;;  %vm762_vm8 = vcmp.ge.s32.totalorder %v5941_v54, %v5927_v42  ;;  %s5644_s28 = smov 104   ;;  %s5646_s18 = smov 96  }
  0x58   : > { %v5255_v3 = vpack.c.bf16 %v525_v1, %v524_v0  ;;  %v527_v4 = vld [vmem:[%s7089_s1 + $0x18] sm:$0xff]  ;;  %v528_v6 = vld [vmem:[%s7089_s1 + $0x20] sm:$0xff]  ;;  %v529_v7 = vld [vmem:[%s7089_s1 + $0x28] sm:$0xff]  ;;  %vm770_vm9 = vcmp.lt.s32.totalorder %v5941_v54, %v5930_v46  ;;  %vm763_vm10 = vcmp.ge.s32.totalorder %v5949_v56, %v5927_v42  ;;  %vm771_vm11 = vcmp.lt.s32.totalorder %v5949_v56, %v5930_v46  ;;  %s5648_s23 = smov 88   ;;  %s5649_s24 = smov 40  }
  0x59   : > { %v5259_v5 = vpack.c.bf16 %v527_v4, %v526_v2  ;;  %v5263_v9 = vpack.c.bf16 %v529_v7, %v528_v6  ;;  %v530_v10 = vld [vmem:[%s7089_s1 + $0x30] sm:$0xff]  ;;  %v531_v11 = vld [vmem:[%s7089_s1 + $0x38] sm:$0xff]  ;;  %v4604_v20 = vld [vmem:[%s7090_s2] ss:$0 sm:$0xff]  ;;  %v5977_v1 = vadd.s32 40, %v5923_v34  ;;  %v7095_v4 = vmov 0 }
  0x5a   : > { %5256 = vmatprep.subr.bf16.mxu0 %v5255_v3  ;;  %v5267_v12 = vpack.c.bf16 %v531_v11, %v530_v10  ;;  %vm5958_vm7 = vmand %vm761_vm3, %vm769_vm4  ;;  %v7097_v7 = vmov 0  ;;  %vm764_vm14 = vcmp.ge.s32.totalorder %v5967_v63, %v5927_v42  ;;  %vm772_vm15 = vcmp.lt.s32.totalorder %v5967_v63, %v5930_v46  ;;  %s7359_s21 = sld [smem:[#allocation13_spill]]  ;;  %s4420_s29 = ssub.s32 40, %s5918_s10 }
  0x5b   : > { %5258 = vmatpush3.bf16.msra.mxu0 %v5255_v3  ;;  %v7094_v62 = vsel %vm5958_vm7, 4294967295, %v7093_v62  ;;  %vm5989_vm12 = vmand %vm762_vm8, %vm770_vm9  ;;  %vm765_vm1 = vcmp.ge.s32.totalorder %v5977_v1, %v5927_v42  ;;  %vm773_vm2 = vcmp.lt.s32.totalorder %v5977_v1, %v5930_v46  ;;  %v6016_v10 = vstv %s725_s27  ;;  %s5643_s27 = smov 16   ;;  %s7364_s1 = sld [smem:[#allocation24_spill]] }
  0x5c   : > { %5260 = vmatprep.subr.bf16.mxu0 %v5259_v5  ;;  %v7096_v4 = vsel %vm5989_vm12, 4294967295, %v7095_v4  ;;  %vm5999_vm13 = vmand %vm763_vm10, %vm771_vm11  ;;  %vm727_vm4 = vcmp.lt.s32.totalorder %v5923_v34, %v6016_v10  ;;  %vm7047_vm9 = vcmp.lt.s32.totalorder %v5923_v34, 2 }
  0x5d   : > { %v7098_v7 = vsel %vm5999_vm13, 4294967295, %v7097_v7  ;;  %vm6029_vm8 = vmand %vm764_vm14, %vm772_vm15  ;;  %vm728_vm15 = vcmp.lt.s32.totalorder %v5933_v47, %v6016_v10 }
  0x5e   : > { %vm6045_vm10 = vmand %vm765_vm1, %vm773_vm2  ;;  %vm729_vm2 = vcmp.lt.s32.totalorder %v5941_v54, %v6016_v10 }
  0x5f   : > { %5262 = vmatpush3.bf16.msra.mxu0 %v5259_v5  ;;  %v4626_v5 = vld [vmem:[%s7014_s5 + $0x10] sm:$0xff] }
  0x60   : > { %5264 = vmatprep.subr.bf16.mxu0 %v5263_v9 }
  0x63   : > { %5266 = vmatpush3.bf16.msra.mxu0 %v5263_v9  ;;  %v6014_v9 = vstv %s717_s25  ;;  %s5650_s25 = smov 80  }
  0x64   : > { %5268 = vmatprep.subr.bf16.mxu0 %v5267_v12  ;;  %vm719_vm3 = vcmp.ge.s32.totalorder %v5923_v34, %v6014_v9  ;;  %vm720_vm14 = vcmp.ge.s32.totalorder %v5933_v47, %v6014_v9  ;;  %vm721_vm1 = vcmp.ge.s32.totalorder %v5941_v54, %v6014_v9 }
  0x65   : > { %vm6052_vm11 = vmand %vm719_vm3, %vm727_vm4 }
  0x66   : > { %vm6079_vm3 = vmand %vm720_vm14, %vm728_vm15  ;;  %vm730_vm14 = vcmp.lt.s32.totalorder %v5949_v56, %v6016_v10  ;;  %vm723_vm15 = vcmp.ge.s32.totalorder %v5967_v63, %v6014_v9 }
  0x67   : > { %5270 = vmatpush3.bf16.msra.mxu0 %v5267_v12  ;;  %vm6089_vm4 = vmand %vm721_vm1, %vm729_vm2  ;;  %vm7109_vm1 = vcmask 64512  }
  0x6a   : > { %4997 = vmatmul.mubr.msk.f32.vlgmr.msra.gmra.mrb[0].mxu0 %vm7035_vm0, %v519_v13  ;;  %v7099_v13 = vmov 0 }
  0x6b   : > { %4999 = vmatprep.mubr.msk.f32.mxu0 %vm7035_vm0, %v520_v14  ;;  %v7100_v13 = vsel %vm6029_vm8, 4294967295, %v7099_v13 }
  0x6e   : > { %5000 = vmatmul.mubr.msk.f32.gmra.mrb[2].mxu0 %vm7035_vm0, %v521_v15 }
  0x6f   : > { %5002 = vmatprep.mubr.msk.f32.mxu0 %vm7035_vm0, %v522_v16 }
  0x72   : > { %5003 = vmatmul.mubr.msk.f32.gmra.mrb[4].mxu0 %vm7035_vm0, %v523_v17  ;;  %v7101_v17 = vmov 0 }
  0x73   : > { %v7102_v17 = vsel %vm6045_vm10, 4294967295, %v7101_v17 }
 0x13d   : > { %v4998_v21 = vpop.f32.mrb[0].mxu0 }
 0x13e   : > { %v630_v22 = vadd.f32 %v4998_v21, %v4604_v20  ;;  %v624_v23 = vpop.f32.mrb[1].mxu0 }
 0x13f   : > { %v625_v26 = vadd.f32 %v4604_v20, %v624_v23 }
 0x140   : > { %v654_v27 = vmax.f32 %v630_v22, 0.0 }
 0x141   : > { %v653_v29 = vmax.f32 %v625_v26, 0.0  ;;  %v5001_v30 = vpop.f32.mrb[2].mxu0 }
 0x142   : > { %v667_v31 = vmul.f32 %v4611_v25, %v654_v27  ;;  %v640_v32 = vadd.f32 %v5001_v30, %v4604_v20  ;;  %v634_v33 = vpop.f32.mrb[3].mxu0  ;;  %v7105_v27 = vmov 0  ;;  %v7107_v30 = vmov 0 }
 0x143   : > { %v666_v35 = vmul.f32 %v4611_v25, %v653_v29  ;;  %v635_v36 = vadd.f32 %v4604_v20, %v634_v33  ;;  %v7106_v27 = vsel %vm6079_vm3, 4294967295, %v7105_v27  ;;  %v7108_v30 = vsel %vm6089_vm4, 4294967295, %v7107_v30 }
 0x144   : > { %v680_v37 = vadd.f32 %v4612_v28, %v667_v31  ;;  %v656_v38 = vmax.f32 %v640_v32, 0.0  ;;  %v1041_v33 = vstv %s1040_s14  ;;  %s5642_s14 = smov 112  }
 0x145   : > { %v679_v39 = vadd.f32 %v4612_v28, %v666_v35  ;;  %v655_v40 = vmax.f32 %v635_v36, 0.0  ;;  %v5004_v41 = vpop.f32.mrb[4].mxu0  ;;  %v1049_v35 = vstv %s1048_s26  ;;  %s5647_s26 = smov 32  }
 0x146   : > { %686 = vst.msk [vmem:[#allocation2 + $0x8] sm:$0xff] %vm7035_vm0, %v680_v37  ;;  %v669_v43 = vmul.f32 %v4611_v25, %v656_v38  ;;  %v650_v44 = vadd.f32 %v5004_v41, %v4604_v20  ;;  %v644_v45 = vpop.f32.mrb[5].mxu0  ;;  %v7110_v38 = vmov 0  ;;  %v7113_v41 = vmov 0 }
 0x147   : > { %685 = vst.msk [vmem:[#allocation2] sm:$0xff] %vm7035_vm0, %v679_v39  ;;  %v668_v48 = vmul.f32 %v4611_v25, %v655_v40  ;;  %v645_v49 = vadd.f32 %v4604_v20, %v644_v45  ;;  %v7103_v20 = vmov 0 }
 0x148   : > { %v682_v50 = vadd.f32 %v4612_v28, %v669_v43  ;;  %v658_v51 = vmax.f32 %v650_v44, 0.0  ;;  %v7104_v20 = vsel %vm6052_vm11, 4294967295, %v7103_v20 }
 0x149   : > { %v681_v52 = vadd.f32 %v4612_v28, %v668_v48  ;;  %v657_v53 = vmax.f32 %v645_v49, 0.0  ;;  %v7117_v48 = vmov 0 }
 0x14a   : > { %688 = vst.msk [vmem:[#allocation2 + $0x18] sm:$0xff] %vm7035_vm0, %v682_v50  ;;  %v671_v55 = vmul.f32 %v4611_v25, %v658_v51  ;;  %v7121_v50 = vmov 0 }
 0x14b   : > { %687 = vst.msk [vmem:[#allocation2 + $0x10] sm:$0xff] %vm7035_vm0, %v681_v52  ;;  %v670_v57 = vmul.f32 %v4611_v25, %v657_v53 }
 0x14c   : > { %v684_v58 = vadd.f32 %v4612_v28, %v671_v55 }
 0x14d   : > { %v683_v60 = vadd.f32 %v4612_v28, %v670_v57  ;;  %v5956_v61 = vld [vmem:[#allocation2 + $0x8] sm:$0xff] }
 0x14e   : > { %690 = vst.msk [vmem:[#allocation2 + $0x28] sm:$0xff] %vm7035_vm0, %v684_v58  ;;  %v5970_v0 = vld [vmem:[#allocation2] sm:$0xff]  ;;  %v793_v3 = vsel %vm5958_vm7, %v5956_v61, 0.0  ;;  %v705_v15 = vrot.slane %v5956_v61, 6  ;;  %v1028_v42 = vrot.slane %v5956_v61, 2 }
 0x14f   : > { %689 = vst.msk [vmem:[#allocation2 + $0x20] sm:$0xff] %vm7035_vm0, %v683_v60  ;;  %v792_v2 = vsel %vm5952_vm5, %v5970_v0, 0.0  ;;  %v704_v14 = vrot.slane %v5970_v0, 6  ;;  %vm722_vm0 = vcmp.ge.s32.totalorder %v5949_v56, %v6014_v9  ;;  %v1027_v39 = vrot.slane %v5970_v0, 2 }
 0x150   : > { %5007 = vmatprep.mubr.msk.f32.mxu1 %vm7036_vm6, %v792_v2  ;;  %vm6109_vm2 = vmand %vm722_vm0, %vm730_vm14  ;;  %vm732_vm0 = vcmp.lt.s32.totalorder %v5977_v1, %v6016_v10  ;;  %v7128_v60 = vmov 0 }
 0x151   : > { %5008 = vmatmul.mubr.msk.f32.vlgmr.msra.gmra.mrb[0].mxu1 %vm7036_vm6, %v793_v3  ;;  %v5997_v6 = vld [vmem:[#allocation2 + $0x18] sm:$0xff]  ;;  %v715_v26 = vsel %vm7047_vm9, %v704_v14, %v705_v15  ;;  %v7111_v38 = vsel %vm6109_vm2, 4294967295, %v7110_v38 }
 0x152   : > { %5017 = vmatpush3.msra.mxu1 %v5908_v19  ;;  %v6008_v8 = vld [vmem:[#allocation2 + $0x10] sm:$0xff]  ;;  %v795_v12 = vsel %vm5999_vm13, %v5997_v6, 0.0  ;;  %v707_v28 = vrot.slane %v5997_v6, 6  ;;  %v752_v32 = vsel %vm6079_vm3, %v715_v26, 0.0  ;;  %vm7112_vm3 = vmmov %vm7109_vm1  ;;  %v1030_v51 = vrot.slane %v5997_v6, 2 }
 0x153   : > { %v794_v11 = vsel %vm5989_vm12, %v6008_v8, 0.0  ;;  %5027 = vmatprep.subr.mxu1 %v4626_v5  ;;  %v706_v21 = vrot.slane %v6008_v8, 6  ;;  %v1029_v44 = vrot.slane %v6008_v8, 2 }
 0x154   : > { %5010 = vmatprep.mubr.msk.f32.mxu1 %vm7036_vm6, %v794_v11  ;;  %v4637_v11 = vld [vmem:[%s7014_s5 + $0x20] sm:$0xff] }
 0x155   : > { %5011 = vmatmul.mubr.msk.f32.gmra.mrb[2].mxu1 %vm7036_vm6, %v795_v12  ;;  %v6037_v16 = vld [vmem:[#allocation2 + $0x28] sm:$0xff]  ;;  %v714_v29 = vsel %vm7047_vm9, %v705_v15, %v706_v21  ;;  %v713_v37 = vsel %vm7047_vm9, %v706_v21, %v707_v28  ;;  %5038 = vmatprep.subr.mxu0 %v4637_v11  ;;  %v4633_v12 = vld [vmem:[%s7015_s6] ss:$0 sm:$0xff] }
 0x156   : > { %v6049_v18 = vld [vmem:[#allocation2 + $0x20] sm:$0xff]  ;;  %v709_v19 = vrot.slane %v6037_v16, 6  ;;  %v797_v23 = vsel %vm6045_vm10, %v6037_v16, 0.0  ;;  %v753_v36 = vsel %vm6089_vm4, %v714_v29, 0.0  ;;  %vm1050_vm4 = vcmp.lt.s32.totalorder %v5923_v34, %v1049_v35  ;;  %5039 = vmatpush3.msra.mxu0 %v4637_v11 }
 0x157   : > { %v796_v22 = vsel %vm6029_vm8, %v6049_v18, 0.0  ;;  %v708_v31 = vrot.slane %v6049_v18, 6  ;;  %v754_v43 = vsel %vm6109_vm2, %v713_v37, 0.0  ;;  %vm7120_vm2 = vcmp.lt.s32.totalorder %v5923_v34, 6 }
 0x158   : > { %5013 = vmatprep.mubr.msk.f32.mxu1 %vm7036_vm6, %v796_v22  ;;  %v716_v24 = vsel %vm7047_vm9, %v709_v19, %v704_v14  ;;  %v1038_v49 = vsel %vm7120_vm2, %v1027_v39, %v1028_v42  ;;  %v1031_v58 = vrot.slane %v6049_v18, 2  ;;  %v1032_v61 = vrot.slane %v6037_v16, 2  ;;  %v4634_v18 = vld [vmem:[%s7016_s7] ss:$0 sm:$0xff] }
 0x159   : > { %5014 = vmatmul.mubr.msk.f32.gmra.mrb[4].mxu1 %vm7036_vm6, %v797_v23  ;;  %v751_v25 = vsel %vm6052_vm11, %v716_v24, 0.0  ;;  %v712_v40 = vsel %vm7047_vm9, %v707_v28, %v708_v31  ;;  %vm1042_vm11 = vcmp.ge.s32.totalorder %v5923_v34, %v1041_v33  ;;  %v711_v46 = vsel %vm7047_vm9, %v708_v31, %v709_v19  ;;  %v4635_v22 = vld [vmem:[%s7017_s8] ss:$0 sm:$0xff] }
 0x15a   : > { %5018 = vmatprep.mubr.msk.f32.mxu1 %vm7036_vm6, %v751_v25  ;;  %vm731_vm6 = vcmp.lt.s32.totalorder %v5967_v63, %v6016_v10  ;;  %vm6147_vm10 = vmand %vm1042_vm11, %vm1050_vm4  ;;  %vm1051_vm9 = vcmp.lt.s32.totalorder %v5933_v47, %v1049_v35  ;;  %v4305_v10 = vld [vmem:[%s7018_s9 + $0x18] sm:$0xff] }
 0x15b   : > { %v7122_v50 = vsel %vm6147_vm10, 4294967295, %v7121_v50  ;;  %v1074_v53 = vsel %vm6147_vm10, %v1038_v49, 0.0  ;;  %vm7123_vm11 = vmmov %vm7120_vm2  ;;  %vm1053_vm10 = vcmp.lt.s32.totalorder %v5949_v56, %v1049_v35 }
 0x15c   : > { %v1037_v55 = vsel %vm7123_vm11, %v1028_v42, %v1029_v44 }
 0x15d   : > { %5019 = vmatmul.mubr.msk.f32.vlgmr.msra.gmra.mrb[0].mxu1 %vm7109_vm1, %v752_v32  ;;  %vm6119_vm1 = vmand %vm723_vm15, %vm731_vm6 }
 0x15e   : > { %5028 = vmatpush3.msra.mxu1 %v4626_v5  ;;  %5021 = vmatprep.mubr.msk.f32.mxu1 %vm7112_vm3, %v753_v36  ;;  %v7114_v41 = vsel %vm6119_vm1, 4294967295, %v7113_v41  ;;  %vm7115_vm6 = vmmov %vm7112_vm3  ;;  %v755_v45 = vsel %vm6119_vm1, %v712_v40, 0.0  ;;  %vm7116_vm3 = vcmp.ge.s32.totalorder %v5977_v1, %v6014_v9  ;;  %v4302_v5 = vld [vmem:[%s7018_s9] sm:$0xff] }
 0x15f   : > { %vm6140_vm15 = vmand %vm7116_vm3, %vm732_vm0  ;;  %vm1044_vm0 = vcmp.ge.s32.totalorder %v5941_v54, %v1041_v33  ;;  %vm1052_vm3 = vcmp.lt.s32.totalorder %v5941_v54, %v1049_v35 }
 0x160   : > { %v7118_v48 = vsel %vm6140_vm15, 4294967295, %v7117_v48  ;;  %vm7119_vm14 = vmmov %vm7115_vm6  ;;  %v756_v52 = vsel %vm6140_vm15, %v711_v46, 0.0 }
 0x161   : > { %5022 = vmatmul.mubr.msk.f32.gmra.mrb[2].mxu1 %vm7115_vm6, %v754_v43  ;;  %vm1043_vm6 = vcmp.ge.s32.totalorder %v5933_v47, %v1041_v33  ;;  %vm7126_vm2 = vmmov %vm7119_vm14 }
 0x162   : > { %5024 = vmatprep.mubr.msk.f32.mxu1 %vm7119_vm14, %v755_v45  ;;  %vm6163_vm4 = vmand %vm1043_vm6, %vm1051_vm9  ;;  %vm1046_vm9 = vcmp.ge.s32.totalorder %v5967_v63, %v1041_v33  ;;  %vm1054_vm6 = vcmp.lt.s32.totalorder %v5967_v63, %v1049_v35  ;;  %v4304_v63 = vld [vmem:[%s7018_s9 + $0x10] sm:$0xff] }
 0x163   : > { %vm7127_vm1 = vmmov %vm7123_vm11  ;;  %v1075_v0 = vsel %vm6163_vm4, %v1037_v55, 0.0 }
 0x164   : > { %v1036_v54 = vsel %vm7127_vm1, %v1029_v44, %v1030_v51  ;;  %vm6171_vm15 = vmand %vm1044_vm0, %vm1052_vm3  ;;  %v1035_v3 = vsel %vm7127_vm1, %v1030_v51, %v1031_v58 }
 0x165   : > { %5025 = vmatmul.mubr.msk.f32.gmra.mrb[4].mxu1 %vm7119_vm14, %v756_v52  ;;  %v7129_v60 = vsel %vm6171_vm15, 4294967295, %v7128_v60  ;;  %vm1045_vm14 = vcmp.ge.s32.totalorder %v5949_v56, %v1041_v33  ;;  %vm7130_vm11 = vmmov %vm7126_vm2  ;;  %v1076_v2 = vsel %vm6171_vm15, %v1036_v54, 0.0  ;;  %vm1055_vm15 = vcmp.lt.s32.totalorder %v5977_v1, %v1049_v35  ;;  %v4636_v52 = vld [vmem:[%s7014_s5 + $0x18] sm:$0xff] }
 0x166   : > { %5029 = vmatprep.mubr.msk.f32.mxu1 %vm7126_vm2, %v1074_v53  ;;  %vm6187_vm0 = vmand %vm1045_vm14, %vm1053_vm10  ;;  %5049 = vmatprep.subr.mxu0 %v4636_v52 }
 0x167   : > { %vm7133_vm3 = vmmov %vm7126_vm2  ;;  %v1077_v6 = vsel %vm6187_vm0, %v1035_v3, 0.0 }
 0x168   : > { %vm7134_vm2 = vmmov %vm7127_vm1 }
 0x169   : > { %5030 = vmatmul.mubr.msk.f32.vlgmr.msra.gmra.mrb[0].mxu1 %vm7130_vm11, %v1075_v0  ;;  %v1034_v56 = vsel %vm7134_vm2, %v1031_v58, %v1032_v61  ;;  %vm6194_vm8 = vmand %vm1046_vm9, %vm1054_vm6  ;;  %vm1047_vm11 = vcmp.ge.s32.totalorder %v5977_v1, %v1041_v33 }
 0x16a   : > { %5032 = vmatprep.mubr.msk.f32.mxu1 %vm7133_vm3, %v1076_v2  ;;  %vm7137_vm10 = vmmov %vm7133_vm3  ;;  %v1078_v8 = vsel %vm6194_vm8, %v1034_v56, 0.0 }
 0x16b   : > { %vm7138_vm14 = vmmov %vm7127_vm1 }
 0x16c   : > { %v1039_v9 = vsel %vm7138_vm14, %v1032_v61, %v1027_v39  ;;  %vm6207_vm1 = vmand %vm1047_vm11, %vm1055_vm15 }
 0x16d   : > { %5033 = vmatmul.mubr.msk.f32.gmra.mrb[2].mxu1 %vm7137_vm10, %v1077_v6  ;;  %vm7141_vm9 = vmmov %vm7133_vm3  ;;  %v1079_v1 = vsel %vm6207_vm1, %v1039_v9, 0.0 }
 0x16e   : > { %5035 = vmatprep.mubr.msk.f32.mxu1 %vm7141_vm9, %v1078_v8  ;;  %vm7142_vm6 = vmmov %vm7133_vm3 }
 0x16f   : > { %vm7143_vm15 = vmmov %vm7133_vm3 }
 0x170   : > { %vm7144_vm2 = vmmov %vm7133_vm3 }
 0x171   : > { %5036 = vmatmul.mubr.msk.f32.gmra.mrb[4].mxu1 %vm7142_vm6, %v1079_v1  ;;  %vm7145_vm11 = vmmov %vm7144_vm2 }
 0x172   : > { %vm7146_vm10 = vmmov %vm7144_vm2 }
 0x173   : > { %vm7147_vm14 = vmmov %vm7144_vm2 }
 0x174   : > { %vm7148_vm9 = vmmov %vm7144_vm2 }
 0x175   : > { %vm7149_vm6 = vmmov %vm7144_vm2 }
 0x23c   : > { %v5031_v14 = vpop.f32.mrb[0].mxu1 }
 0x23d   : > { %v1209_v15 = vadd.f32 %v5031_v14, %v4633_v12  ;;  %v1166_v16 = vpop.f32.mrb[1].mxu1 }
 0x23e   : > { %v1208_v19 = vadd.f32 %v4633_v12, %v1166_v16 }
 0x23f   : > { %v1215_v21 = vmax.f32 %v1209_v15, 0.0 }
 0x240   : > { %v1214_v23 = vmax.f32 %v1208_v19, 0.0  ;;  %v5034_v24 = vpop.f32.mrb[2].mxu1 }
 0x241   : > { %v1228_v25 = vmul.f32 %v4634_v18, %v1215_v21  ;;  %v1211_v26 = vadd.f32 %v5034_v24, %v4633_v12  ;;  %v1176_v28 = vpop.f32.mrb[3].mxu1 }
 0x242   : > { %v1227_v29 = vmul.f32 %v4634_v18, %v1214_v23  ;;  %v1210_v31 = vadd.f32 %v4633_v12, %v1176_v28 }
 0x243   : > { %v1241_v32 = vadd.f32 %v4635_v22, %v1228_v25  ;;  %v1217_v33 = vmax.f32 %v1211_v26, 0.0 }
 0x244   : > { %v1240_v35 = vadd.f32 %v4635_v22, %v1227_v29  ;;  %v1216_v36 = vmax.f32 %v1210_v31, 0.0  ;;  %v5037_v37 = vpop.f32.mrb[4].mxu1 }
 0x245   : > { %1247 = vst.msk [vmem:[#allocation2 + $0x8] sm:$0xff] %vm7143_vm15, %v1241_v32  ;;  %v1230_v39 = vmul.f32 %v4634_v18, %v1217_v33  ;;  %v1213_v40 = vadd.f32 %v5037_v37, %v4633_v12  ;;  %v1186_v42 = vpop.f32.mrb[5].mxu1  ;;  %vm7150_vm15 = vmmov %vm7144_vm2 }
 0x246   : > { %1246 = vst.msk [vmem:[#allocation2] sm:$0xff] %vm7133_vm3, %v1240_v35  ;;  %v1229_v43 = vmul.f32 %v4634_v18, %v1216_v36  ;;  %v1212_v44 = vadd.f32 %v4633_v12, %v1186_v42  ;;  %vm7151_vm3 = vnez %v7100_v13 }
 0x247   : > { %v1243_v45 = vadd.f32 %v4635_v22, %v1230_v39  ;;  %v1219_v46 = vmax.f32 %v1213_v40, 0.0 }
 0x248   : > { %v1242_v49 = vadd.f32 %v4635_v22, %v1229_v43  ;;  %v1218_v51 = vmax.f32 %v1212_v44, 0.0 }
 0x249   : > { %1249 = vst.msk [vmem:[#allocation2 + $0x18] sm:$0xff] %vm7144_vm2, %v1243_v45  ;;  %v1232_v53 = vmul.f32 %v4634_v18, %v1219_v46 }
 0x24a   : > { %1248 = vst.msk [vmem:[#allocation2 + $0x10] sm:$0xff] %vm7145_vm11, %v1242_v49  ;;  %v1231_v55 = vmul.f32 %v4634_v18, %v1218_v51  ;;  %v4650_v18 = vld [vmem:[%s7014_s5 + $0x28] sm:$0xff]  ;;  %vm7152_vm11 = vmmov %vm7144_vm2 }
 0x24b   : > { %v1245_v58 = vadd.f32 %v4635_v22, %v1232_v53 }
 0x24c   : > { %v1244_v54 = vadd.f32 %v4635_v22, %v1231_v55  ;;  %v1253_v0 = vld [vmem:[#allocation2 + $0x8] sm:$0xff] }
 0x24d   : > { %1251 = vst.msk [vmem:[#allocation2 + $0x28] sm:$0xff] %vm7146_vm10, %v1245_v58  ;;  %v1252_v61 = vld [vmem:[#allocation2] sm:$0xff]  ;;  %vm7153_vm10 = vnez %v7102_v17 }
 0x24e   : > { %1250 = vst.msk [vmem:[#allocation2 + $0x20] sm:$0xff] %vm7147_vm14, %v1244_v54  ;;  %1264 = vrot.lane.b32.xlu0 %v1252_v61, %s5640_s22  ;;  %vm7154_vm14 = vmmov %vm7144_vm2 }
 0x250   : > { %v1255_v3 = vld [vmem:[#allocation2 + $0x18] sm:$0xff] }
 0x251   : > { %v1254_v2 = vld [vmem:[#allocation2 + $0x10] sm:$0xff] }
 0x252   : > { %1266 = vrot.lane.b32.xlu0 %v1253_v0, %s5640_s22  ;;  %1268 = vrot.lane.b32.xlu1 %v1254_v2, %s5640_s22 }
 0x254   : > { %v1257_v6 = vld [vmem:[#allocation2 + $0x28] sm:$0xff] }
 0x255   : > { %v1256_v56 = vld [vmem:[#allocation2 + $0x20] sm:$0xff] }
 0x256   : > { %1270 = vrot.lane.b32.xlu1 %v1255_v3, %s5640_s22  ;;  %1272 = vrot.lane.b32.xlu0 %v1256_v56, %s5640_s22 }
 0x25a   : > { %1274 = vrot.lane.b32.xlu1 %v1257_v6, %s5640_s22  ;;  %s5645_s22 = smov 24  }
 0x2c0   : > { %v1265_v8 = vpop.permute.xlu0 %1264 }
 0x2c1   : > { %v6236_v9 = vadd.f32 %v1265_v8, %v1240_v35 }
 0x2c3   : > { %v1308_v1 = vsel %vm5952_vm5, %v6236_v9, 0.0  ;;  %v1288_v33 = vrot.slane %v6236_v9, 6  ;;  %v1542_v53 = vrot.slane %v6236_v9, 2 }
 0x2c4   : > { %5040 = vmatprep.mubr.msk.f32.mxu0 %vm7148_vm9, %v1308_v1  ;;  %v1267_v11 = vpop.permute.xlu0 %1266  ;;  %v1269_v12 = vpop.permute.xlu1 %1268  ;;  %vm7155_vm9 = vcmp.lt.s32.totalorder %v5923_v34, 2 }
 0x2c5   : > { %v1283_v14 = vadd.f32 %v1267_v11, %v1241_v32  ;;  %v1284_v15 = vadd.f32 %v1269_v12, %v1242_v49 }
 0x2c7   : > { %v1309_v16 = vsel %vm5958_vm7, %v1283_v14, 0.0  ;;  %v1310_v22 = vsel %vm5989_vm12, %v1284_v15, 0.0  ;;  %v1289_v29 = vrot.slane %v1283_v14, 6  ;;  %v1290_v32 = vrot.slane %v1284_v15, 6 }
 0x2c8   : > { %5041 = vmatmul.mubr.msk.f32.vlgmr.msra.gmra.mrb[6].mxu0 %vm7149_vm6, %v1309_v16  ;;  %v1271_v19 = vpop.permute.xlu1 %1270  ;;  %v1273_v21 = vpop.permute.xlu0 %1272  ;;  %vm7156_vm6 = vmmov %vm7155_vm9  ;;  %v1543_v51 = vrot.slane %v1283_v14, 2 }
 0x2c9   : > { %5050 = vmatpush3.msra.mxu0 %v4636_v52  ;;  %v1285_v23 = vadd.f32 %v1271_v19, %v1243_v45  ;;  %v1286_v24 = vadd.f32 %v1273_v21, %v1244_v54  ;;  %5043 = vmatprep.mubr.msk.f32.mxu0 %vm7150_vm15, %v1310_v22  ;;  %v1298_v40 = vsel %vm7156_vm6, %v1288_v33, %v1289_v29  ;;  %v4658_v22 = vld [vmem:[%s7015_s6 + $0x1] ss:$0 sm:$0xff] }
 0x2ca   : > { %5060 = vmatprep.subr.mxu0 %v4650_v18  ;;  %vm7157_vm15 = vnez %v7104_v20 }
 0x2cb   : > { %v1311_v25 = vsel %vm5999_vm13, %v1285_v23, 0.0  ;;  %v1312_v28 = vsel %vm7151_vm3, %v1286_v24, 0.0  ;;  %v1291_v37 = vrot.slane %v1285_v23, 6  ;;  %v1292_v42 = vrot.slane %v1286_v24, 6  ;;  %vm7160_vm3 = vmmov %vm7152_vm11 }
 0x2cc   : > { %v1275_v26 = vpop.permute.xlu1 %1274  ;;  %5044 = vmatmul.mubr.msk.f32.gmra.mrb[8].mxu0 %vm7144_vm2, %v1311_v25  ;;  %vm7158_vm2 = vmmov %vm7156_vm6  ;;  %v1545_v0 = vrot.slane %v1285_v23, 2  ;;  %v1546_v56 = vrot.slane %v1286_v24, 2 }
 0x2cd   : > { %v1287_v31 = vadd.f32 %v1275_v26, %v1245_v58  ;;  %5046 = vmatprep.mubr.msk.f32.mxu0 %vm7152_vm11, %v1312_v28  ;;  %v1297_v44 = vsel %vm7158_vm2, %v1289_v29, %v1290_v32  ;;  %vm7163_vm6 = vmmov %vm7160_vm3  ;;  %v1544_v58 = vrot.slane %v1284_v15, 2  ;;  %v4660_v26 = vld [vmem:[%s7016_s7 + $0x1] ss:$0 sm:$0xff] }
 0x2cf   : > { %v1293_v35 = vrot.slane %v1287_v31, 6  ;;  %v1313_v36 = vsel %vm7153_vm10, %v1287_v31, 0.0  ;;  %vm7159_vm10 = vnez %v7106_v27  ;;  %v1547_v9 = vrot.slane %v1287_v31, 2 }
 0x2d0   : > { %5047 = vmatmul.mubr.msk.f32.gmra.mrb[10].mxu0 %vm7154_vm14, %v1313_v36  ;;  %v1301_v45 = vsel %vm7159_vm10, %v1298_v40, 0.0  ;;  %vm7161_vm14 = vnez %v7108_v30 }
 0x2d1   : > { %v1299_v39 = vsel %vm7155_vm9, %v1293_v35, %v1288_v33  ;;  %v1302_v46 = vsel %vm7161_vm14, %v1297_v44, 0.0  ;;  %vm7162_vm9 = vmmov %vm7158_vm2  ;;  %v4662_v33 = vld [vmem:[%s7017_s8 + $0x1] ss:$0 sm:$0xff] }
 0x2d2   : > { %v1300_v43 = vsel %vm7157_vm15, %v1299_v39, 0.0  ;;  %v1296_v49 = vsel %vm7162_vm9, %v1290_v32, %v1291_v37  ;;  %vm7164_vm15 = vmmov %vm7158_vm2  ;;  %vm7165_vm2 = vnez %v7111_v38  ;;  %v1294_v61 = vsel %vm7162_vm9, %v1292_v42, %v1293_v35 }
 0x2d3   : > { %5051 = vmatprep.mubr.msk.f32.mxu0 %vm7152_vm11, %v1300_v43  ;;  %v1295_v52 = vsel %vm7164_vm15, %v1291_v37, %v1292_v42  ;;  %v1303_v55 = vsel %vm7165_vm2, %v1296_v49, 0.0  ;;  %vm7166_vm11 = vnez %v7114_v41  ;;  %vm7167_vm14 = vmmov %vm7160_vm3  ;;  %vm7169_vm15 = vnez %v7118_v48 }
 0x2d4   : > { %5052 = vmatmul.mubr.msk.f32.vlgmr.msra.gmra.mrb[6].mxu0 %vm7160_vm3, %v1301_v45  ;;  %v1304_v54 = vsel %vm7166_vm11, %v1295_v52, 0.0  ;;  %v1305_v3 = vsel %vm7169_vm15, %v1294_v61, 0.0  ;;  %vm7170_vm2 = vmmov %vm7160_vm3  ;;  %vm7176_vm15 = vnez %v7129_v60 }
 0x2d5   : > { %5061 = vmatpush3.msra.mxu0 %v4650_v18  ;;  %5054 = vmatprep.mubr.msk.f32.mxu0 %vm7163_vm6, %v1302_v46  ;;  %vm7168_vm6 = vcmp.lt.s32.totalorder %v5923_v34, 6  ;;  %vm7173_vm9 = vmmov %vm7170_vm2 }
 0x2d6   : > { %v1552_v2 = vsel %vm7168_vm6, %v1542_v53, %v1543_v51  ;;  %vm7172_vm11 = vmmov %vm7168_vm6 }
 0x2d7   : > { %v1551_v8 = vsel %vm7172_vm11, %v1543_v51, %v1544_v58 }
 0x2d8   : > { %5055 = vmatmul.mubr.msk.f32.gmra.mrb[8].mxu0 %vm7160_vm3, %v1303_v55  ;;  %vm7171_vm3 = vnez %v7122_v50  ;;  %v1555_v11 = vsel %vm6163_vm4, %v1551_v8, 0.0 }
 0x2d9   : > { %5057 = vmatprep.mubr.msk.f32.mxu0 %vm7167_vm14, %v1304_v54  ;;  %v1554_v6 = vsel %vm7171_vm3, %v1552_v2, 0.0  ;;  %vm7174_vm14 = vmmov %vm7168_vm6 }
 0x2da   : > { %v1550_v1 = vsel %vm7174_vm14, %v1544_v58, %v1545_v0  ;;  %vm7175_vm6 = vmmov %vm7170_vm2 }
 0x2db   : > { %v1556_v12 = vsel %vm7176_vm15, %v1550_v1, 0.0  ;;  %vm7178_vm3 = vmmov %vm7175_vm6 }
 0x2dc   : > { %5058 = vmatmul.mubr.msk.f32.gmra.mrb[10].mxu0 %vm7170_vm2, %v1305_v3  ;;  %vm7177_vm2 = vmmov %vm7172_vm11  ;;  %v4664_v3 = vld [vmem:[%s7014_s5 + $0x38] sm:$0xff] }
 0x2dd   : > { %5062 = vmatprep.mubr.msk.f32.mxu0 %vm7173_vm9, %v1554_v6  ;;  %v1549_v14 = vsel %vm7177_vm2, %v1545_v0, %v1546_v56  ;;  %vm7179_vm11 = vmmov %vm7177_vm2  ;;  %5071 = vmatprep.subr.mxu1 %v4664_v3 }
 0x2de   : > { %v1548_v15 = vsel %vm7179_vm11, %v1546_v56, %v1547_v9  ;;  %v1557_v16 = vsel %vm6187_vm0, %v1549_v14, 0.0  ;;  %vm7180_vm9 = vmmov %vm7178_vm3  ;;  %5072 = vmatpush3.msra.mxu1 %v4664_v3 }
 0x2df   : > { %v1558_v18 = vsel %vm6194_vm8, %v1548_v15, 0.0  ;;  %vm7181_vm14 = vmmov %vm7177_vm2  ;;  %vm1753_vm2 = vcmask 130112  }
 0x2e0   : > { %5063 = vmatmul.mubr.msk.f32.vlgmr.msra.gmra.mrb[6].mxu0 %vm7175_vm6, %v1555_v11  ;;  %v1553_v19 = vsel %vm7181_vm14, %v1547_v9, %v1542_v53  ;;  %vm7182_vm6 = vmmov %vm7178_vm3  ;;  %v4663_v11 = vld [vmem:[%s7014_s5 + $0x30] sm:$0xff] }
 0x2e1   : > { %5065 = vmatprep.mubr.msk.f32.mxu0 %vm7178_vm3, %v1556_v12  ;;  %v1559_v21 = vsel %vm6207_vm1, %v1553_v19, 0.0  ;;  %5082 = vmatprep.subr.mxu1 %v4663_v11  ;;  %vm7183_vm11 = vmmov %vm7178_vm3 }
 0x2e2   : > { %vm7185_vm14 = vmmov %vm7178_vm3 }
 0x2e4   : > { %5066 = vmatmul.mubr.msk.f32.gmra.mrb[8].mxu0 %vm7180_vm9, %v1557_v16  ;;  %vm7184_vm9 = vmmov %vm7178_vm3 }
 0x2e5   : > { %5068 = vmatprep.mubr.msk.f32.mxu0 %vm7182_vm6, %v1558_v18  ;;  %vm7186_vm6 = vmmov %vm7178_vm3 }
 0x2e8   : > { %5069 = vmatmul.mubr.msk.f32.gmra.mrb[10].mxu0 %vm7178_vm3, %v1559_v21  ;;  %vm7187_vm3 = vnez %v7100_v13 }
 0x3b3   : > { %v5064_v23 = vpop.f32.mrb[6].mxu0 }
 0x3b4   : > { %v1690_v24 = vadd.f32 %v5064_v23, %v4658_v22  ;;  %v1646_v25 = vpop.f32.mrb[7].mxu0 }
 0x3b5   : > { %v1689_v28 = vadd.f32 %v4658_v22, %v1646_v25 }
 0x3b6   : > { %v1696_v29 = vmax.f32 %v1690_v24, 0.0 }
 0x3b7   : > { %v1695_v31 = vmax.f32 %v1689_v28, 0.0  ;;  %v5067_v32 = vpop.f32.mrb[8].mxu0 }
 0x3b8   : > { %v1710_v35 = vmul.f32 %v4660_v26, %v1696_v29  ;;  %v1692_v36 = vadd.f32 %v5067_v32, %v4658_v22  ;;  %v1656_v37 = vpop.f32.mrb[9].mxu0 }
 0x3b9   : > { %v1709_v39 = vmul.f32 %v4660_v26, %v1695_v31  ;;  %v1691_v40 = vadd.f32 %v4658_v22, %v1656_v37  ;;  %v4677_v37 = vld [vmem:[%s7014_s5 + $0x40] sm:$0xff] }
 0x3ba   : > { %v1698_v42 = vmax.f32 %v1692_v36, 0.0  ;;  %v1724_v43 = vadd.f32 %v4662_v33, %v1710_v35 }
 0x3bb   : > { %v1697_v44 = vmax.f32 %v1691_v40, 0.0  ;;  %v5070_v45 = vpop.f32.mrb[10].mxu0  ;;  %v1723_v46 = vadd.f32 %v4662_v33, %v1709_v39 }
 0x3bc   : > { %v1712_v49 = vmul.f32 %v4660_v26, %v1698_v42  ;;  %v1694_v51 = vadd.f32 %v5070_v45, %v4658_v22  ;;  %1737 = vrot.lane.b32.xlu1 %v1724_v43, %s7067_s13  ;;  %v1666_v52 = vpop.f32.mrb[11].mxu0 }
 0x3bd   : > { %v1711_v53 = vmul.f32 %v4660_v26, %v1697_v44  ;;  %v1693_v55 = vadd.f32 %v4658_v22, %v1666_v52  ;;  %1735 = vrot.lane.b32.xlu0 %v1723_v46, %s7067_s13 }
 0x3be   : > { %v1700_v58 = vmax.f32 %v1694_v51, 0.0  ;;  %v1726_v54 = vadd.f32 %v4662_v33, %v1712_v49 }
 0x3bf   : > { %v1699_v61 = vmax.f32 %v1693_v55, 0.0  ;;  %v1725_v0 = vadd.f32 %v4662_v33, %v1711_v53 }
 0x3c0   : > { %v1714_v2 = vmul.f32 %v4660_v26, %v1700_v58  ;;  %1741 = vrot.lane.b32.xlu1 %v1726_v54, %s7067_s13 }
 0x3c1   : > { %v1713_v56 = vmul.f32 %v4660_v26, %v1699_v61  ;;  %1739 = vrot.lane.b32.xlu0 %v1725_v0, %s7067_s13 }
 0x3c2   : > { %v1728_v6 = vadd.f32 %v4662_v33, %v1714_v2 }
 0x3c3   : > { %v1727_v8 = vadd.f32 %v4662_v33, %v1713_v56 }
 0x3c4   : > { %1745 = vrot.lane.b32.xlu1 %v1728_v6, %s7067_s13 }
 0x3c5   : > { %1743 = vrot.lane.b32.xlu0 %v1727_v8, %s7067_s13  ;;  %s7366_s13 = sld [smem:[#allocation25_spill]] }
 0x42e   : > { %v1738_v9 = vpop.permute.xlu1 %1737 }
 0x42f   : > { %1755 = vst.msk [vmem:[#allocation2 + $0x8] sm:$0xff] %vm1753_vm2, %v1738_v9  ;;  %v1736_v1 = vpop.permute.xlu0 %1735 }
 0x430   : > { %1754 = vst.msk [vmem:[#allocation2] sm:$0xff] %vm1753_vm2, %v1736_v1 }
 0x432   : > { %v1742_v12 = vpop.permute.xlu1 %1741 }
 0x433   : > { %1757 = vst.msk [vmem:[#allocation2 + $0x18] sm:$0xff] %vm1753_vm2, %v1742_v12  ;;  %v1740_v14 = vpop.permute.xlu0 %1739 }
 0x434   : > { %1756 = vst.msk [vmem:[#allocation2 + $0x10] sm:$0xff] %vm1753_vm2, %v1740_v14 }
 0x436   : > { %v1746_v15 = vpop.permute.xlu1 %1745  ;;  %v1761_v16 = vld [vmem:[#allocation2 + $0x8] sm:$0xff] }
 0x437   : > { %1759 = vst.msk [vmem:[#allocation2 + $0x28] sm:$0xff] %vm1753_vm2, %v1746_v15  ;;  %1774 = vrot.lane.b32.xlu1 %v1761_v16, %s5642_s14  ;;  %v1744_v18 = vpop.permute.xlu0 %1743  ;;  %v1760_v19 = vld [vmem:[#allocation2] sm:$0xff] }
 0x438   : > { %1758 = vst.msk [vmem:[#allocation2 + $0x20] sm:$0xff] %vm1753_vm2, %v1744_v18  ;;  %1772 = vrot.lane.b32.xlu0 %v1760_v19, %s5642_s14  ;;  %vm7188_vm2 = vmmov %vm7186_vm6 }
 0x43a   : > { %v1763_v21 = vld [vmem:[#allocation2 + $0x18] sm:$0xff] }
 0x43b   : > { %1778 = vrot.lane.b32.xlu1 %v1763_v21, %s5642_s14  ;;  %v1762_v22 = vld [vmem:[#allocation2 + $0x10] sm:$0xff] }
 0x43c   : > { %1776 = vrot.lane.b32.xlu0 %v1762_v22, %s5642_s14 }
 0x43e   : > { %v1765_v23 = vld [vmem:[#allocation2 + $0x28] sm:$0xff] }
 0x43f   : > { %1782 = vrot.lane.b32.xlu1 %v1765_v23, %s5642_s14  ;;  %v1764_v24 = vld [vmem:[#allocation2 + $0x20] sm:$0xff] }
 0x440   : > { %1780 = vrot.lane.b32.xlu0 %v1764_v24, %s5642_s14 }
 0x4a9   : > { %v1775_v25 = vpop.permute.xlu1 %1774 }
 0x4aa   : > { %v1791_v26 = vadd.f32 %v1775_v25, %v1724_v43  ;;  %v1773_v28 = vpop.permute.xlu0 %1772 }
 0x4ab   : > { %v6349_v29 = vadd.f32 %v1773_v28, %v1723_v46 }
 0x4ac   : > { %v1817_v33 = vsel %vm5958_vm7, %v1791_v26, 0.0  ;;  %v1797_v46 = vrot.slane %v1791_v26, 6  ;;  %v2051_v1 = vrot.slane %v1791_v26, 2 }
 0x4ad   : > { %v1779_v31 = vpop.permute.xlu1 %1778  ;;  %v1816_v32 = vsel %vm5952_vm5, %v6349_v29, 0.0  ;;  %v1796_v49 = vrot.slane %v6349_v29, 6 }
 0x4ae   : > { %v1793_v35 = vadd.f32 %v1779_v31, %v1726_v54  ;;  %5073 = vmatprep.mubr.msk.f32.mxu1 %vm7183_vm11, %v1816_v32  ;;  %v1777_v36 = vpop.permute.xlu0 %1776  ;;  %vm7189_vm11 = vnez %v7102_v17 }
 0x4af   : > { %v1792_v39 = vadd.f32 %v1777_v36, %v1725_v0  ;;  %5074 = vmatmul.mubr.msk.f32.vlgmr.msra.gmra.mrb[6].mxu1 %vm7184_vm9, %v1817_v33  ;;  %vm7190_vm9 = vcmp.lt.s32.totalorder %v5923_v34, 2 }
 0x4b0   : > { %5083 = vmatpush3.msra.mxu1 %v4663_v11  ;;  %v1819_v45 = vsel %vm5999_vm13, %v1793_v35, 0.0  ;;  %v1799_v61 = vrot.slane %v1793_v35, 6  ;;  %vm7192_vm13 = vnez %v7104_v20  ;;  %v2050_v11 = vrot.slane %v6349_v29, 2 }
 0x4b1   : > { %v1783_v40 = vpop.permute.xlu1 %1782  ;;  %v1818_v42 = vsel %vm5989_vm12, %v1792_v39, 0.0  ;;  %5093 = vmatprep.subr.mxu1 %v4677_v37  ;;  %v1798_v52 = vrot.slane %v1792_v39, 6  ;;  %vm7194_vm12 = vmmov %vm7188_vm2  ;;  %v2052_v15 = vrot.slane %v1792_v39, 2  ;;  %v2053_v19 = vrot.slane %v1793_v35, 2 }
 0x4b2   : > { %v1795_v43 = vadd.f32 %v1783_v40, %v1728_v6  ;;  %5076 = vmatprep.mubr.msk.f32.mxu1 %vm7185_vm14, %v1818_v42  ;;  %v1781_v44 = vpop.permute.xlu0 %1780  ;;  %vm7191_vm14 = vmmov %vm7188_vm2  ;;  %v4685_v40 = vld [vmem:[%s7015_s6 + $0x2] ss:$0 sm:$0xff] }
 0x4b3   : > { %v1794_v51 = vadd.f32 %v1781_v44, %v1727_v8  ;;  %5077 = vmatmul.mubr.msk.f32.gmra.mrb[8].mxu1 %vm7186_vm6, %v1819_v45  ;;  %vm7193_vm6 = vmmov %vm7190_vm9  ;;  %v4687_v45 = vld [vmem:[%s7016_s7 + $0x2] ss:$0 sm:$0xff] }
 0x4b4   : > { %v1801_v53 = vrot.slane %v1795_v43, 6  ;;  %v1821_v58 = vsel %vm7189_vm11, %v1795_v43, 0.0  ;;  %v1806_v2 = vsel %vm7193_vm6, %v1796_v49, %v1797_v46  ;;  %vm7196_vm11 = vmmov %vm7194_vm12  ;;  %v2055_v26 = vrot.slane %v1795_v43, 2 }
 0x4b5   : > { %v1820_v55 = vsel %vm7187_vm3, %v1794_v51, 0.0  ;;  %v1800_v3 = vrot.slane %v1794_v51, 6  ;;  %v1809_v6 = vsel %vm7159_vm10, %v1806_v2, 0.0  ;;  %v2054_v23 = vrot.slane %v1794_v51, 2 }
 0x4b6   : > { %5079 = vmatprep.mubr.msk.f32.mxu1 %vm7188_vm2, %v1820_v55  ;;  %v1807_v54 = vsel %vm7190_vm9, %v1801_v53, %v1796_v49  ;;  %vm7195_vm2 = vmmov %vm7193_vm6  ;;  %vm7197_vm9 = vnez %v7108_v30 }
 0x4b7   : > { %5080 = vmatmul.mubr.msk.f32.gmra.mrb[10].mxu1 %vm7191_vm14, %v1821_v58  ;;  %v1808_v0 = vsel %vm7192_vm13, %v1807_v54, 0.0  ;;  %v1805_v56 = vsel %vm7195_vm2, %v1797_v46, %v1798_v52  ;;  %vm7198_vm14 = vmmov %vm7195_vm2 }
 0x4b8   : > { %5084 = vmatprep.mubr.msk.f32.mxu1 %vm7194_vm12, %v1808_v0  ;;  %v1810_v8 = vsel %vm7197_vm9, %v1805_v56, 0.0  ;;  %v1804_v9 = vsel %vm7198_vm14, %v1798_v52, %v1799_v61  ;;  %vm7199_vm6 = vmmov %vm7196_vm11  ;;  %vm7203_vm9 = vnez %v7114_v41 }
 0x4b9   : > { %vm7200_vm12 = vmmov %vm7195_vm2  ;;  %vm7201_vm2 = vnez %v7111_v38 }
 0x4ba   : > { %v1803_v12 = vsel %vm7200_vm12, %v1799_v61, %v1800_v3  ;;  %v1811_v14 = vsel %vm7201_vm2, %v1804_v9, 0.0  ;;  %vm7204_vm14 = vmmov %vm7200_vm12  ;;  %vm7207_vm12 = vnez %v7118_v48 }
 0x4bb   : > { %5085 = vmatmul.mubr.msk.f32.vlgmr.msra.gmra.mrb[6].mxu1 %vm7196_vm11, %v1809_v6  ;;  %vm7202_vm11 = vmmov %vm7199_vm6  ;;  %v1812_v16 = vsel %vm7203_vm9, %v1803_v12, 0.0  ;;  %v1802_v18 = vsel %vm7204_vm14, %v1800_v3, %v1801_v53  ;;  %v4689_v53 = vld [vmem:[%s7017_s8 + $0x2] ss:$0 sm:$0xff] }
 0x4bc   : > { %5094 = vmatpush3.msra.mxu1 %v4677_v37  ;;  %5087 = vmatprep.mubr.msk.f32.mxu1 %vm7199_vm6, %v1810_v8  ;;  %vm7205_vm10 = vmmov %vm7199_vm6  ;;  %vm7206_vm6 = vcmp.lt.s32.totalorder %v5923_v34, 6  ;;  %v1813_v22 = vsel %vm7207_vm12, %v1802_v18, 0.0 }
 0x4bd   : > { %v2060_v21 = vsel %vm7206_vm6, %v2050_v11, %v2051_v1  ;;  %vm7208_vm2 = vmmov %vm7205_vm10 }
 0x4be   : > { %vm7210_vm9 = vmmov %vm7206_vm6 }
 0x4bf   : > { %5088 = vmatmul.mubr.msk.f32.gmra.mrb[8].mxu1 %vm7202_vm11, %v1811_v14  ;;  %vm7209_vm11 = vnez %v7122_v50  ;;  %v2059_v25 = vsel %vm7210_vm9, %v2051_v1, %v2052_v15  ;;  %vm7211_vm14 = vmmov %vm7208_vm2 }
 0x4c0   : > { %5090 = vmatprep.mubr.msk.f32.mxu1 %vm7205_vm10, %v1812_v16  ;;  %v2062_v24 = vsel %vm7209_vm11, %v2060_v21, 0.0  ;;  %vm7212_vm10 = vmmov %vm7206_vm6  ;;  %v2063_v29 = vsel %vm6163_vm4, %v2059_v25, 0.0 }
 0x4c1   : > { %v2058_v28 = vsel %vm7212_vm10, %v2052_v15, %v2053_v19  ;;  %vm7213_vm6 = vmmov %vm7208_vm2 }
 0x4c2   : > { %v2064_v31 = vsel %vm7176_vm15, %v2058_v28, 0.0  ;;  %vm7215_vm11 = vmmov %vm7213_vm6 }
 0x4c3   : > { %5091 = vmatmul.mubr.msk.f32.gmra.mrb[10].mxu1 %vm7208_vm2, %v1813_v22  ;;  %vm7214_vm2 = vmmov %vm7210_vm9  ;;  %v4691_v22 = vld [vmem:[%s7014_s5 + $0x50] sm:$0xff] }
 0x4c4   : > { %5095 = vmatprep.mubr.msk.f32.mxu1 %vm7211_vm14, %v2062_v24  ;;  %v2057_v32 = vsel %vm7214_vm2, %v2053_v19, %v2054_v23  ;;  %vm7216_vm9 = vmmov %vm7214_vm2  ;;  %5104 = vmatprep.subr.mxu0 %v4691_v22 }
 0x4c5   : > { %v2056_v33 = vsel %vm7216_vm9, %v2054_v23, %v2055_v26  ;;  %v2065_v35 = vsel %vm6187_vm0, %v2057_v32, 0.0  ;;  %vm7217_vm14 = vmmov %vm7213_vm6  ;;  %5105 = vmatpush3.msra.mxu0 %v4691_v22 }
 0x4c6   : > { %v2066_v36 = vsel %vm6194_vm8, %v2056_v33, 0.0  ;;  %vm7218_vm10 = vmmov %vm7214_vm2  ;;  %vm2261_vm2 = vcmask 195712  }
 0x4c7   : > { %5096 = vmatmul.mubr.msk.f32.vlgmr.msra.gmra.mrb[6].mxu1 %vm7213_vm6, %v2063_v29  ;;  %v2061_v37 = vsel %vm7218_vm10, %v2055_v26, %v2050_v11  ;;  %v4690_v29 = vld [vmem:[%s7014_s5 + $0x48] sm:$0xff]  ;;  %vm7220_vm9 = vmmov %vm7213_vm6  ;;  %vm7222_vm10 = vnez %v7096_v4 }
 0x4c8   : > { %5098 = vmatprep.mubr.msk.f32.mxu1 %vm7215_vm11, %v2064_v31  ;;  %v2067_v39 = vsel %vm6207_vm1, %v2061_v37, 0.0  ;;  %vm7219_vm11 = vmmov %vm7213_vm6  ;;  %5115 = vmatprep.subr.mxu0 %v4690_v29 }
 0x4cb   : > { %5099 = vmatmul.mubr.msk.f32.gmra.mrb[8].mxu1 %vm7217_vm14, %v2065_v35  ;;  %vm7221_vm14 = vmmov %vm7213_vm6 }
 0x4cc   : > { %5101 = vmatprep.mubr.msk.f32.mxu1 %vm7213_vm6, %v2066_v36 }
 0x4cf   : > { %5102 = vmatmul.mubr.msk.f32.gmra.mrb[10].mxu1 %vm7219_vm11, %v2067_v39  ;;  %vm7223_vm11 = vnez %v7098_v7 }
 0x59a   : > { %v5097_v42 = vpop.f32.mrb[6].mxu1 }
 0x59b   : > { %v2198_v43 = vadd.f32 %v5097_v42, %v4685_v40  ;;  %v2154_v44 = vpop.f32.mrb[7].mxu1 }
 0x59c   : > { %v2197_v46 = vadd.f32 %v4685_v40, %v2154_v44 }
 0x59d   : > { %v2204_v49 = vmax.f32 %v2198_v43, 0.0 }
 0x59e   : > { %v2203_v51 = vmax.f32 %v2197_v46, 0.0  ;;  %v5100_v52 = vpop.f32.mrb[8].mxu1 }
 0x59f   : > { %v2218_v55 = vmul.f32 %v4687_v45, %v2204_v49  ;;  %v2200_v58 = vadd.f32 %v5100_v52, %v4685_v40  ;;  %v2164_v54 = vpop.f32.mrb[9].mxu1 }
 0x5a0   : > { %v2217_v61 = vmul.f32 %v4687_v45, %v2203_v51  ;;  %v2199_v0 = vadd.f32 %v4685_v40, %v2164_v54  ;;  %v4704_v54 = vld [vmem:[%s7014_s5 + $0x58] sm:$0xff] }
 0x5a1   : > { %v2206_v2 = vmax.f32 %v2200_v58, 0.0  ;;  %v2232_v3 = vadd.f32 %v4689_v53, %v2218_v55 }
 0x5a2   : > { %v2205_v56 = vmax.f32 %v2199_v0, 0.0  ;;  %v5103_v6 = vpop.f32.mrb[10].mxu1  ;;  %v2231_v8 = vadd.f32 %v4689_v53, %v2217_v61 }
 0x5a3   : > { %v2220_v9 = vmul.f32 %v4687_v45, %v2206_v2  ;;  %v2202_v1 = vadd.f32 %v5103_v6, %v4685_v40  ;;  %2245 = vrot.lane.b32.xlu1 %v2232_v3, %s5643_s27  ;;  %v2174_v11 = vpop.f32.mrb[11].mxu1 }
 0x5a4   : > { %v2219_v12 = vmul.f32 %v4687_v45, %v2205_v56  ;;  %v2201_v14 = vadd.f32 %v4685_v40, %v2174_v11  ;;  %2243 = vrot.lane.b32.xlu0 %v2231_v8, %s5643_s27 }
 0x5a5   : > { %v2208_v15 = vmax.f32 %v2202_v1, 0.0  ;;  %v2234_v16 = vadd.f32 %v4689_v53, %v2220_v9 }
 0x5a6   : > { %v2207_v18 = vmax.f32 %v2201_v14, 0.0  ;;  %v2233_v19 = vadd.f32 %v4689_v53, %v2219_v12 }
 0x5a7   : > { %v2222_v21 = vmul.f32 %v4687_v45, %v2208_v15  ;;  %2249 = vrot.lane.b32.xlu1 %v2234_v16, %s5643_s27 }
 0x5a8   : > { %v2221_v23 = vmul.f32 %v4687_v45, %v2207_v18  ;;  %2247 = vrot.lane.b32.xlu0 %v2233_v19, %s5643_s27 }
 0x5a9   : > { %v2236_v24 = vadd.f32 %v4689_v53, %v2222_v21 }
 0x5aa   : > { %v2235_v25 = vadd.f32 %v4689_v53, %v2221_v23 }
 0x5ab   : > { %2253 = vrot.lane.b32.xlu1 %v2236_v24, %s5643_s27 }
 0x5ac   : > { %2251 = vrot.lane.b32.xlu0 %v2235_v25, %s5643_s27  ;;  %s5651_s27 = smov 48  }
 0x615   : > { %v2246_v26 = vpop.permute.xlu1 %2245 }
 0x616   : > { %2263 = vst.msk [vmem:[#allocation2 + $0x8] sm:$0xff] %vm2261_vm2, %v2246_v26  ;;  %v2244_v28 = vpop.permute.xlu0 %2243 }
 0x617   : > { %2262 = vst.msk [vmem:[#allocation2] sm:$0xff] %vm2261_vm2, %v2244_v28 }
 0x619   : > { %v2250_v31 = vpop.permute.xlu1 %2249 }
 0x61a   : > { %2265 = vst.msk [vmem:[#allocation2 + $0x18] sm:$0xff] %vm2261_vm2, %v2250_v31  ;;  %v2248_v32 = vpop.permute.xlu0 %2247 }
 0x61b   : > { %2264 = vst.msk [vmem:[#allocation2 + $0x10] sm:$0xff] %vm2261_vm2, %v2248_v32 }
 0x61d   : > { %v2254_v33 = vpop.permute.xlu1 %2253  ;;  %v2269_v35 = vld [vmem:[#allocation2 + $0x8] sm:$0xff] }
 0x61e   : > { %2267 = vst.msk [vmem:[#allocation2 + $0x28] sm:$0xff] %vm2261_vm2, %v2254_v33  ;;  %2282 = vrot.lane.b32.xlu1 %v2269_v35, %s5644_s28  ;;  %v2252_v36 = vpop.permute.xlu0 %2251  ;;  %v2268_v37 = vld [vmem:[#allocation2] sm:$0xff] }
 0x61f   : > { %2266 = vst.msk [vmem:[#allocation2 + $0x20] sm:$0xff] %vm2261_vm2, %v2252_v36  ;;  %2280 = vrot.lane.b32.xlu0 %v2268_v37, %s5644_s28  ;;  %vm7224_vm2 = vmmov %vm7213_vm6 }
 0x621   : > { %v2271_v39 = vld [vmem:[#allocation2 + $0x18] sm:$0xff] }
 0x622   : > { %2286 = vrot.lane.b32.xlu1 %v2271_v39, %s5644_s28  ;;  %v2270_v40 = vld [vmem:[#allocation2 + $0x10] sm:$0xff] }
 0x623   : > { %2284 = vrot.lane.b32.xlu0 %v2270_v40, %s5644_s28 }
 0x625   : > { %v2273_v42 = vld [vmem:[#allocation2 + $0x28] sm:$0xff] }
 0x626   : > { %2290 = vrot.lane.b32.xlu1 %v2273_v42, %s5644_s28  ;;  %v2272_v43 = vld [vmem:[#allocation2 + $0x20] sm:$0xff] }
 0x627   : > { %2288 = vrot.lane.b32.xlu0 %v2272_v43, %s5644_s28  ;;  %s5375_s28 = smul.u32 6, %s7359_s21 }
 0x690   : > { %v2283_v44 = vpop.permute.xlu1 %2282 }
 0x691   : > { %v2299_v45 = vadd.f32 %v2283_v44, %v2232_v3  ;;  %v2281_v46 = vpop.permute.xlu0 %2280 }
 0x692   : > { %v6456_v49 = vadd.f32 %v2281_v46, %v2231_v8 }
 0x693   : > { %v2325_v53 = vsel %vm5958_vm7, %v2299_v45, 0.0  ;;  %v2305_v8 = vrot.slane %v2299_v45, 6  ;;  %v2559_v28 = vrot.slane %v2299_v45, 2 }
 0x694   : > { %v2287_v51 = vpop.permute.xlu1 %2286  ;;  %v2324_v52 = vsel %vm5952_vm5, %v6456_v49, 0.0  ;;  %v2304_v9 = vrot.slane %v6456_v49, 6 }
 0x695   : > { %v2301_v55 = vadd.f32 %v2287_v51, %v2234_v16  ;;  %5106 = vmatprep.mubr.msk.f32.mxu0 %vm7220_vm9, %v2324_v52  ;;  %v2285_v58 = vpop.permute.xlu0 %2284  ;;  %vm7225_vm9 = vmmov %vm7224_vm2 }
 0x696   : > { %v2300_v61 = vadd.f32 %v2285_v58, %v2233_v19  ;;  %5107 = vmatmul.mubr.msk.f32.vlgmr.msra.gmra.mrb[12].mxu0 %vm7221_vm14, %v2325_v53  ;;  %vm7226_vm14 = vnez %v7102_v17 }
 0x697   : > { %5116 = vmatpush3.msra.mxu0 %v4690_v29  ;;  %v2327_v6 = vsel %vm7223_vm11, %v2301_v55, 0.0  ;;  %v2307_v18 = vrot.slane %v2301_v55, 6  ;;  %vm7228_vm11 = vmmov %vm7224_vm2  ;;  %v2558_v29 = vrot.slane %v6456_v49, 2  ;;  %v2561_v37 = vrot.slane %v2301_v55, 2 }
 0x698   : > { %v2291_v0 = vpop.permute.xlu1 %2290  ;;  %v2326_v2 = vsel %vm7222_vm10, %v2300_v61, 0.0  ;;  %5126 = vmatprep.subr.mxu0 %v4704_v54  ;;  %v2306_v11 = vrot.slane %v2300_v61, 6  ;;  %vm7230_vm10 = vmmov %vm7225_vm9  ;;  %v2560_v33 = vrot.slane %v2300_v61, 2 }
 0x699   : > { %v2303_v3 = vadd.f32 %v2291_v0, %v2236_v24  ;;  %5109 = vmatprep.mubr.msk.f32.mxu0 %vm7213_vm6, %v2326_v2  ;;  %v2289_v56 = vpop.permute.xlu0 %2288  ;;  %vm7227_vm6 = vcmp.lt.s32.totalorder %v5923_v34, 2  ;;  %v4712_v0 = vld [vmem:[%s7015_s6 + $0x3] ss:$0 sm:$0xff] }
 0x69a   : > { %v2302_v1 = vadd.f32 %v2289_v56, %v2235_v25  ;;  %5110 = vmatmul.mubr.msk.f32.gmra.mrb[14].mxu0 %vm7224_vm2, %v2327_v6  ;;  %vm7229_vm2 = vmmov %vm7227_vm6  ;;  %v4714_v6 = vld [vmem:[%s7016_s7 + $0x3] ss:$0 sm:$0xff] }
 0x69b   : > { %v2309_v12 = vrot.slane %v2303_v3, 6  ;;  %v2329_v15 = vsel %vm7226_vm14, %v2303_v3, 0.0  ;;  %v2314_v21 = vsel %vm7229_vm2, %v2304_v9, %v2305_v8  ;;  %vm7232_vm14 = vnez %v7106_v27 }
 0x69c   : > { %v2328_v14 = vsel %vm7187_vm3, %v2302_v1, 0.0  ;;  %v2308_v22 = vrot.slane %v2302_v1, 6  ;;  %v2317_v24 = vsel %vm7232_vm14, %v2314_v21, 0.0  ;;  %vm7233_vm3 = vmmov %vm7230_vm10  ;;  %v2562_v42 = vrot.slane %v2302_v1, 2 }
 0x69d   : > { %5112 = vmatprep.mubr.msk.f32.mxu0 %vm7225_vm9, %v2328_v14  ;;  %v2315_v16 = vsel %vm7227_vm6, %v2309_v12, %v2304_v9  ;;  %vm7231_vm9 = vmmov %vm7229_vm2  ;;  %vm7234_vm6 = vnez %v7108_v30  ;;  %v2563_v45 = vrot.slane %v2303_v3, 2 }
 0x69e   : > { %5113 = vmatmul.mubr.msk.f32.gmra.mrb[16].mxu0 %vm7228_vm11, %v2329_v15  ;;  %v2316_v19 = vsel %vm7192_vm13, %v2315_v16, 0.0  ;;  %v2313_v23 = vsel %vm7231_vm9, %v2305_v8, %v2306_v11  ;;  %vm7235_vm11 = vmmov %vm7229_vm2 }
 0x69f   : > { %5117 = vmatprep.mubr.msk.f32.mxu0 %vm7230_vm10, %v2316_v19  ;;  %v2318_v25 = vsel %vm7234_vm6, %v2313_v23, 0.0  ;;  %v2312_v26 = vsel %vm7235_vm11, %v2306_v11, %v2307_v18  ;;  %vm7236_vm2 = vmmov %vm7233_vm3  ;;  %vm7240_vm6 = vnez %v7114_v41 }
 0x6a0   : > { %vm7237_vm10 = vmmov %vm7231_vm9  ;;  %vm7238_vm9 = vnez %v7111_v38 }
 0x6a1   : > { %v2311_v31 = vsel %vm7237_vm10, %v2307_v18, %v2308_v22  ;;  %v2319_v32 = vsel %vm7238_vm9, %v2312_v26, 0.0  ;;  %vm7241_vm11 = vmmov %vm7237_vm10 }
 0x6a2   : > { %5118 = vmatmul.mubr.msk.f32.vlgmr.msra.gmra.mrb[12].mxu0 %vm7233_vm3, %v2317_v24  ;;  %vm7239_vm3 = vmmov %vm7236_vm2  ;;  %v2320_v35 = vsel %vm7240_vm6, %v2311_v31, 0.0  ;;  %v2310_v36 = vsel %vm7241_vm11, %v2308_v22, %v2309_v12  ;;  %v4716_v12 = vld [vmem:[%s7017_s8 + $0x3] ss:$0 sm:$0xff] }
 0x6a3   : > { %5127 = vmatpush3.msra.mxu0 %v4704_v54  ;;  %5120 = vmatprep.mubr.msk.f32.mxu0 %vm7236_vm2, %v2318_v25  ;;  %vm7242_vm14 = vmmov %vm7236_vm2  ;;  %vm7243_vm2 = vcmp.lt.s32.totalorder %v5923_v34, 6  ;;  %v2321_v40 = vsel %vm7207_vm12, %v2310_v36, 0.0 }
 0x6a4   : > { %v2568_v39 = vsel %vm7243_vm2, %v2558_v29, %v2559_v28  ;;  %vm7244_vm10 = vmmov %vm7239_vm3 }
 0x6a5   : > { %vm7246_vm6 = vmmov %vm7243_vm2 }
 0x6a6   : > { %5121 = vmatmul.mubr.msk.f32.gmra.mrb[14].mxu0 %vm7239_vm3, %v2319_v32  ;;  %vm7245_vm3 = vnez %v7122_v50  ;;  %v2567_v44 = vsel %vm7246_vm6, %v2559_v28, %v2560_v33  ;;  %vm7247_vm11 = vmmov %vm7244_vm10  ;;  %v2564_v53 = vsel %vm7246_vm6, %v2562_v42, %v2563_v45 }
 0x6a7   : > { %5123 = vmatprep.mubr.msk.f32.mxu0 %vm7242_vm14, %v2320_v35  ;;  %v2570_v43 = vsel %vm7245_vm3, %v2568_v39, 0.0  ;;  %vm7248_vm14 = vmmov %vm7243_vm2  ;;  %v2571_v49 = vsel %vm6163_vm4, %v2567_v44, 0.0  ;;  %v2574_v58 = vsel %vm6194_vm8, %v2564_v53, 0.0 }
 0x6a8   : > { %v2566_v46 = vsel %vm7248_vm14, %v2560_v33, %v2561_v37  ;;  %vm7249_vm2 = vmmov %vm7244_vm10 }
 0x6a9   : > { %v2572_v51 = vsel %vm7176_vm15, %v2566_v46, 0.0  ;;  %vm7251_vm3 = vmmov %vm7249_vm2 }
 0x6aa   : > { %5124 = vmatmul.mubr.msk.f32.gmra.mrb[16].mxu0 %vm7244_vm10, %v2321_v40  ;;  %vm7250_vm10 = vmmov %vm7246_vm6  ;;  %v4718_v40 = vld [vmem:[%s7014_s5 + $0x68] sm:$0xff] }
 0x6ab   : > { %5128 = vmatprep.mubr.msk.f32.mxu0 %vm7247_vm11, %v2570_v43  ;;  %v2565_v52 = vsel %vm7250_vm10, %v2561_v37, %v2562_v42  ;;  %vm7252_vm11 = vmmov %vm7249_vm2  ;;  %5137 = vmatprep.subr.mxu1 %v4718_v40  ;;  %vm2769_vm10 = vcmask 261312  }
 0x6ac   : > { %v2573_v55 = vsel %vm6187_vm0, %v2565_v52, 0.0  ;;  %vm7253_vm14 = vmmov %vm7246_vm6  ;;  %5138 = vmatpush3.msra.mxu1 %v4718_v40 }
 0x6ad   : > { %v2569_v54 = vsel %vm7253_vm14, %v2563_v45, %v2558_v29  ;;  %vm7255_vm6 = vmmov %vm7249_vm2  ;;  %vm7257_vm14 = vnez %v7096_v4 }
 0x6ae   : > { %5129 = vmatmul.mubr.msk.f32.vlgmr.msra.gmra.mrb[12].mxu0 %vm7249_vm2, %v2571_v49  ;;  %v2575_v61 = vsel %vm6207_vm1, %v2569_v54, 0.0  ;;  %v4717_v49 = vld [vmem:[%s7014_s5 + $0x60] sm:$0xff] }
 0x6af   : > { %5131 = vmatprep.mubr.msk.f32.mxu0 %vm7251_vm3, %v2572_v51  ;;  %vm7254_vm3 = vmmov %vm7249_vm2  ;;  %5148 = vmatprep.subr.mxu1 %v4717_v49 }
 0x6b2   : > { %5132 = vmatmul.mubr.msk.f32.gmra.mrb[14].mxu0 %vm7252_vm11, %v2573_v55  ;;  %vm7256_vm11 = vmmov %vm7249_vm2 }
 0x6b3   : > { %5134 = vmatprep.mubr.msk.f32.mxu0 %vm7249_vm2, %v2574_v58 }
 0x6b6   : > { %5135 = vmatmul.mubr.msk.f32.gmra.mrb[16].mxu0 %vm7254_vm3, %v2575_v61  ;;  %vm7258_vm3 = vnez %v7098_v7 }
 0x781   : > { %v5130_v2 = vpop.f32.mrb[12].mxu0 }
 0x782   : > { %v2706_v3 = vadd.f32 %v5130_v2, %v4712_v0  ;;  %v2662_v56 = vpop.f32.mrb[13].mxu0 }
 0x783   : > { %v2705_v8 = vadd.f32 %v4712_v0, %v2662_v56 }
 0x784   : > { %v2712_v9 = vmax.f32 %v2706_v3, 0.0 }
 0x785   : > { %v2711_v1 = vmax.f32 %v2705_v8, 0.0  ;;  %v5133_v11 = vpop.f32.mrb[14].mxu0 }
 0x786   : > { %v2726_v14 = vmul.f32 %v4714_v6, %v2712_v9  ;;  %v2708_v15 = vadd.f32 %v5133_v11, %v4712_v0  ;;  %v2672_v16 = vpop.f32.mrb[15].mxu0 }
 0x787   : > { %v2725_v18 = vmul.f32 %v4714_v6, %v2711_v1  ;;  %v2707_v19 = vadd.f32 %v4712_v0, %v2672_v16  ;;  %v4731_v16 = vld [vmem:[%s7014_s5 + $0x70] sm:$0xff] }
 0x788   : > { %v2714_v21 = vmax.f32 %v2708_v15, 0.0  ;;  %v2740_v22 = vadd.f32 %v4716_v12, %v2726_v14 }
 0x789   : > { %v2713_v23 = vmax.f32 %v2707_v19, 0.0  ;;  %v5136_v24 = vpop.f32.mrb[16].mxu0  ;;  %v2739_v25 = vadd.f32 %v4716_v12, %v2725_v18 }
 0x78a   : > { %v2728_v26 = vmul.f32 %v4714_v6, %v2714_v21  ;;  %v2710_v28 = vadd.f32 %v5136_v24, %v4712_v0  ;;  %2753 = vrot.lane.b32.xlu1 %v2740_v22, %s5645_s22  ;;  %v2682_v29 = vpop.f32.mrb[17].mxu0 }
 0x78b   : > { %v2727_v31 = vmul.f32 %v4714_v6, %v2713_v23  ;;  %v2709_v32 = vadd.f32 %v4712_v0, %v2682_v29  ;;  %2751 = vrot.lane.b32.xlu0 %v2739_v25, %s5645_s22 }
 0x78c   : > { %v2716_v33 = vmax.f32 %v2710_v28, 0.0  ;;  %v2742_v35 = vadd.f32 %v4716_v12, %v2728_v26 }
 0x78d   : > { %v2715_v36 = vmax.f32 %v2709_v32, 0.0  ;;  %v2741_v37 = vadd.f32 %v4716_v12, %v2727_v31 }
 0x78e   : > { %v2730_v39 = vmul.f32 %v4714_v6, %v2716_v33  ;;  %2757 = vrot.lane.b32.xlu1 %v2742_v35, %s5645_s22 }
 0x78f   : > { %v2729_v42 = vmul.f32 %v4714_v6, %v2715_v36  ;;  %2755 = vrot.lane.b32.xlu0 %v2741_v37, %s5645_s22 }
 0x790   : > { %v2744_v43 = vadd.f32 %v4716_v12, %v2730_v39 }
 0x791   : > { %v2743_v44 = vadd.f32 %v4716_v12, %v2729_v42 }
 0x792   : > { %2761 = vrot.lane.b32.xlu1 %v2744_v43, %s5645_s22 }
 0x793   : > { %2759 = vrot.lane.b32.xlu0 %v2743_v44, %s5645_s22 }
 0x7fc   : > { %v2754_v45 = vpop.permute.xlu1 %2753 }
 0x7fd   : > { %2771 = vst.msk [vmem:[#allocation2 + $0x8] sm:$0xff] %vm2769_vm10, %v2754_v45  ;;  %v2752_v46 = vpop.permute.xlu0 %2751 }
 0x7fe   : > { %2770 = vst.msk [vmem:[#allocation2] sm:$0xff] %vm2769_vm10, %v2752_v46 }
 0x800   : > { %v2758_v51 = vpop.permute.xlu1 %2757 }
 0x801   : > { %2773 = vst.msk [vmem:[#allocation2 + $0x18] sm:$0xff] %vm2769_vm10, %v2758_v51  ;;  %v2756_v52 = vpop.permute.xlu0 %2755 }
 0x802   : > { %2772 = vst.msk [vmem:[#allocation2 + $0x10] sm:$0xff] %vm2769_vm10, %v2756_v52 }
 0x804   : > { %v2762_v53 = vpop.permute.xlu1 %2761  ;;  %v2777_v55 = vld [vmem:[#allocation2 + $0x8] sm:$0xff] }
 0x805   : > { %2775 = vst.msk [vmem:[#allocation2 + $0x28] sm:$0xff] %vm2769_vm10, %v2762_v53  ;;  %2790 = vrot.lane.b32.xlu1 %v2777_v55, %s5646_s18  ;;  %v2760_v58 = vpop.permute.xlu0 %2759  ;;  %v2776_v54 = vld [vmem:[#allocation2] sm:$0xff] }
 0x806   : > { %2774 = vst.msk [vmem:[#allocation2 + $0x20] sm:$0xff] %vm2769_vm10, %v2760_v58  ;;  %2788 = vrot.lane.b32.xlu0 %v2776_v54, %s5646_s18  ;;  %vm7259_vm10 = vmmov %vm7249_vm2 }
 0x808   : > { %v2779_v61 = vld [vmem:[#allocation2 + $0x18] sm:$0xff] }
 0x809   : > { %2794 = vrot.lane.b32.xlu1 %v2779_v61, %s5646_s18  ;;  %v2778_v0 = vld [vmem:[#allocation2 + $0x10] sm:$0xff] }
 0x80a   : > { %2792 = vrot.lane.b32.xlu0 %v2778_v0, %s5646_s18 }
 0x80c   : > { %v2781_v2 = vld [vmem:[#allocation2 + $0x28] sm:$0xff] }
 0x80d   : > { %2798 = vrot.lane.b32.xlu1 %v2781_v2, %s5646_s18  ;;  %v2780_v3 = vld [vmem:[#allocation2 + $0x20] sm:$0xff] }
 0x80e   : > { %2796 = vrot.lane.b32.xlu0 %v2780_v3, %s5646_s18  ;;  %s4602_s18 = sshll.u32 %s5856_s11, 4 }
 0x80f   : > { %s509_s22 = scalar_lea.vmem [#allocation6], %s4602_s18 }
 0x810   : > { %s4461_s14 = sshll.u32 %s509_s22, 4  ;;  %s6913_s14 = int_to_ptr.vmem [resolvable:$true] %s4461_s14 }
 0x811   : > { %s5505_s18 = scalar_lea.vmem %s6913_s14, 256 }
 0x812   : > { %p5506_p8 = scmp.ne.s32.totalorder %s6913_s14, %s5505_s18 }
 0x877   : > { %v2791_v56 = vpop.permute.xlu1 %2790 }
 0x878   : > { %v2807_v6 = vadd.f32 %v2791_v56, %v2740_v22  ;;  %v2789_v8 = vpop.permute.xlu0 %2788 }
 0x879   : > { %v6563_v9 = vadd.f32 %v2789_v8, %v2739_v25 }
 0x87a   : > { %v2833_v12 = vsel %vm5958_vm7, %v2807_v6, 0.0  ;;  %v2813_v25 = vrot.slane %v2807_v6, 6  ;;  %v3067_v46 = vrot.slane %v2807_v6, 2 }
 0x87b   : > { %v2795_v1 = vpop.permute.xlu1 %2794  ;;  %v2832_v11 = vsel %vm5952_vm5, %v6563_v9, 0.0  ;;  %v2812_v26 = vrot.slane %v6563_v9, 6 }
 0x87c   : > { %v2809_v14 = vadd.f32 %v2795_v1, %v2742_v35  ;;  %5139 = vmatprep.mubr.msk.f32.mxu1 %vm7255_vm6, %v2832_v11  ;;  %v2793_v15 = vpop.permute.xlu0 %2792  ;;  %vm7260_vm6 = vnez %v7100_v13 }
 0x87d   : > { %v2808_v18 = vadd.f32 %v2793_v15, %v2741_v37  ;;  %5140 = vmatmul.mubr.msk.f32.vlgmr.msra.gmra.mrb[12].mxu1 %vm7256_vm11, %v2833_v12  ;;  %vm7261_vm11 = vmmov %vm7249_vm2 }
 0x87e   : > { %5149 = vmatpush3.msra.mxu1 %v4717_v49  ;;  %v2835_v24 = vsel %vm7258_vm3, %v2809_v14, 0.0  ;;  %v2815_v36 = vrot.slane %v2809_v14, 6  ;;  %vm7264_vm3 = vmmov %vm7259_vm10  ;;  %v3066_v49 = vrot.slane %v6563_v9, 2  ;;  %v3069_v54 = vrot.slane %v2809_v14, 2 }
 0x87f   : > { %v2799_v19 = vpop.permute.xlu1 %2798  ;;  %v2834_v21 = vsel %vm7257_vm14, %v2808_v18, 0.0  ;;  %5159 = vmatprep.subr.mxu1 %v4731_v16  ;;  %v2814_v29 = vrot.slane %v2808_v18, 6  ;;  %vm7262_vm14 = vnez %v7102_v17  ;;  %vm7266_vm7 = vmmov %vm7264_vm3  ;;  %v3068_v53 = vrot.slane %v2808_v18, 2 }
 0x880   : > { %v2811_v22 = vadd.f32 %v2799_v19, %v2744_v43  ;;  %5142 = vmatprep.mubr.msk.f32.mxu1 %vm7249_vm2, %v2834_v21  ;;  %v2797_v23 = vpop.permute.xlu0 %2796  ;;  %vm7263_vm2 = vcmp.lt.s32.totalorder %v5923_v34, 2  ;;  %v4739_v19 = vld [vmem:[%s7015_s6 + $0x4] ss:$0 sm:$0xff] }
 0x881   : > { %v2810_v28 = vadd.f32 %v2797_v23, %v2743_v44  ;;  %5143 = vmatmul.mubr.msk.f32.gmra.mrb[14].mxu1 %vm7259_vm10, %v2835_v24  ;;  %vm7265_vm10 = vmmov %vm7263_vm2  ;;  %v4741_v24 = vld [vmem:[%s7016_s7 + $0x4] ss:$0 sm:$0xff] }
 0x882   : > { %v2817_v31 = vrot.slane %v2811_v22, 6  ;;  %v2837_v33 = vsel %vm7262_vm14, %v2811_v22, 0.0  ;;  %v2822_v39 = vsel %vm7265_vm10, %v2812_v26, %v2813_v25  ;;  %vm7268_vm14 = vnez %v7106_v27 }
 0x883   : > { %v2836_v32 = vsel %vm7260_vm6, %v2810_v28, 0.0  ;;  %v2816_v40 = vrot.slane %v2810_v28, 6  ;;  %v2825_v43 = vsel %vm7268_vm14, %v2822_v39, 0.0  ;;  %vm7269_vm6 = vmmov %vm7264_vm3  ;;  %v3070_v2 = vrot.slane %v2810_v28, 2 }
 0x884   : > { %5145 = vmatprep.mubr.msk.f32.mxu1 %vm7261_vm11, %v2836_v32  ;;  %v2823_v35 = vsel %vm7263_vm2, %v2817_v31, %v2812_v26  ;;  %vm7267_vm11 = vmmov %vm7263_vm2  ;;  %vm7270_vm2 = vnez %v7108_v30  ;;  %v3071_v6 = vrot.slane %v2811_v22, 2 }
 0x885   : > { %5146 = vmatmul.mubr.msk.f32.gmra.mrb[16].mxu1 %vm7264_vm3, %v2837_v33  ;;  %v2824_v37 = vsel %vm7192_vm13, %v2823_v35, 0.0  ;;  %v2821_v42 = vsel %vm7267_vm11, %v2813_v25, %v2814_v29  ;;  %vm7271_vm3 = vmmov %vm7265_vm10  ;;  %vm7274_vm11 = vnez %v7114_v41 }
 0x886   : > { %5150 = vmatprep.mubr.msk.f32.mxu1 %vm7266_vm7, %v2824_v37  ;;  %v2826_v44 = vsel %vm7270_vm2, %v2821_v42, 0.0  ;;  %v2820_v45 = vsel %vm7271_vm3, %v2814_v29, %v2815_v36  ;;  %vm7272_vm10 = vmmov %vm7269_vm6  ;;  %v2818_v58 = vsel %vm7271_vm3, %v2816_v40, %v2817_v31  ;;  %v4743_v31 = vld [vmem:[%s7017_s8 + $0x4] ss:$0 sm:$0xff] }
 0x887   : > { %vm7273_vm7 = vmmov %vm7271_vm3  ;;  %v2827_v52 = vsel %vm7238_vm9, %v2820_v45, 0.0  ;;  %v2829_v0 = vsel %vm7207_vm12, %v2818_v58, 0.0 }
 0x888   : > { %v2819_v51 = vsel %vm7273_vm7, %v2815_v36, %v2816_v40  ;;  %vm7275_vm2 = vmmov %vm7269_vm6 }
 0x889   : > { %5151 = vmatmul.mubr.msk.f32.vlgmr.msra.gmra.mrb[12].mxu1 %vm7269_vm6, %v2825_v43  ;;  %v2828_v55 = vsel %vm7274_vm11, %v2819_v51, 0.0  ;;  %vm7277_vm7 = vmmov %vm7275_vm2 }
 0x88a   : > { %5160 = vmatpush3.msra.mxu1 %v4731_v16  ;;  %5153 = vmatprep.mubr.msk.f32.mxu1 %vm7272_vm10, %v2826_v44  ;;  %vm7276_vm10 = vcmp.lt.s32.totalorder %v5923_v34, 6  ;;  %vm7280_vm3 = vmmov %vm7275_vm2 }
 0x88b   : > { %v3076_v61 = vsel %vm7276_vm10, %v3066_v49, %v3067_v46  ;;  %vm7279_vm11 = vmmov %vm7276_vm10 }
 0x88c   : > { %v3075_v56 = vsel %vm7279_vm11, %v3067_v46, %v3068_v53 }
 0x88d   : > { %5154 = vmatmul.mubr.msk.f32.gmra.mrb[14].mxu1 %vm7269_vm6, %v2827_v52  ;;  %vm7278_vm6 = vnez %v7122_v50  ;;  %v3079_v9 = vsel %vm6163_vm4, %v3075_v56, 0.0 }
 0x88e   : > { %5156 = vmatprep.mubr.msk.f32.mxu1 %vm7275_vm2, %v2828_v55  ;;  %v3078_v3 = vsel %vm7278_vm6, %v3076_v61, 0.0  ;;  %vm7281_vm2 = vmmov %vm7276_vm10 }
 0x88f   : > { %v3074_v8 = vsel %vm7281_vm2, %v3068_v53, %v3069_v54  ;;  %vm7282_vm10 = vmmov %vm7280_vm3  ;;  %v3077_v16 = vsel %vm7281_vm2, %v3071_v6, %v3066_v49 }
 0x890   : > { %v3080_v1 = vsel %vm7176_vm15, %v3074_v8, 0.0  ;;  %vm7284_vm6 = vmmov %vm7280_vm3  ;;  %v3083_v18 = vsel %vm6207_vm1, %v3077_v16, 0.0 }
 0x891   : > { %5157 = vmatmul.mubr.msk.f32.gmra.mrb[16].mxu1 %vm7277_vm7, %v2829_v0  ;;  %vm7283_vm7 = vmmov %vm7281_vm2  ;;  %v4745_v0 = vld [vmem:[%s7014_s5 + $0x80] sm:$0xff] }
 0x892   : > { %5161 = vmatprep.mubr.msk.f32.mxu1 %vm7280_vm3, %v3078_v3  ;;  %v3073_v11 = vsel %vm7283_vm7, %v3069_v54, %v3070_v2  ;;  %vm7285_vm11 = vmmov %vm7281_vm2  ;;  %5170 = vmatprep.subr.mxu0 %v4745_v0  ;;  %vm3277_vm7 = vcmask 326912  }
 0x893   : > { %v3072_v12 = vsel %vm7285_vm11, %v3070_v2, %v3071_v6  ;;  %v3081_v14 = vsel %vm6187_vm0, %v3073_v11, 0.0  ;;  %5171 = vmatpush3.msra.mxu0 %v4745_v0  ;;  %vm7288_vm11 = vnez %v7094_v62  ;;  %vm7289_vm2 = vmmov %vm7280_vm3 }
 0x894   : > { %v3082_v15 = vsel %vm6194_vm8, %v3072_v12, 0.0 }
 0x895   : > { %5162 = vmatmul.mubr.msk.f32.vlgmr.msra.gmra.mrb[12].mxu1 %vm7282_vm10, %v3079_v9  ;;  %vm7286_vm10 = vmmov %vm7280_vm3  ;;  %v4744_v9 = vld [vmem:[%s7014_s5 + $0x78] sm:$0xff] }
 0x896   : > { %5164 = vmatprep.mubr.msk.f32.mxu1 %vm7284_vm6, %v3080_v1  ;;  %vm7287_vm6 = vmmov %vm7280_vm3  ;;  %5181 = vmatprep.subr.mxu0 %v4744_v9 }
 0x899   : > { %5165 = vmatmul.mubr.msk.f32.gmra.mrb[14].mxu1 %vm7280_vm3, %v3081_v14 }
 0x89a   : > { %5167 = vmatprep.mubr.msk.f32.mxu1 %vm7286_vm10, %v3082_v15  ;;  %vm7290_vm10 = vnez %v7096_v4 }
 0x89d   : > { %5168 = vmatmul.mubr.msk.f32.gmra.mrb[16].mxu1 %vm7287_vm6, %v3083_v18  ;;  %vm7291_vm6 = vmmov %vm7289_vm2 }
 0x968   : > { %v5163_v21 = vpop.f32.mrb[12].mxu1 }
 0x969   : > { %v3214_v22 = vadd.f32 %v5163_v21, %v4739_v19  ;;  %v3170_v23 = vpop.f32.mrb[13].mxu1 }
 0x96a   : > { %v3213_v25 = vadd.f32 %v4739_v19, %v3170_v23 }
 0x96b   : > { %v3220_v26 = vmax.f32 %v3214_v22, 0.0 }
 0x96c   : > { %v3219_v28 = vmax.f32 %v3213_v25, 0.0  ;;  %v5166_v29 = vpop.f32.mrb[14].mxu1 }
 0x96d   : > { %v3234_v32 = vmul.f32 %v4741_v24, %v3220_v26  ;;  %v3216_v33 = vadd.f32 %v5166_v29, %v4739_v19  ;;  %v3180_v35 = vpop.f32.mrb[15].mxu1 }
 0x96e   : > { %v3233_v36 = vmul.f32 %v4741_v24, %v3219_v28  ;;  %v3215_v37 = vadd.f32 %v4739_v19, %v3180_v35  ;;  %v4758_v35 = vld [vmem:[%s7014_s5 + $0x88] sm:$0xff] }
 0x96f   : > { %v3222_v39 = vmax.f32 %v3216_v33, 0.0  ;;  %v3248_v40 = vadd.f32 %v4743_v31, %v3234_v32 }
 0x970   : > { %v3221_v42 = vmax.f32 %v3215_v37, 0.0  ;;  %v5169_v43 = vpop.f32.mrb[16].mxu1  ;;  %v3247_v44 = vadd.f32 %v4743_v31, %v3233_v36 }
 0x971   : > { %v3236_v45 = vmul.f32 %v4741_v24, %v3222_v39  ;;  %v3218_v46 = vadd.f32 %v5169_v43, %v4739_v19  ;;  %3261 = vrot.lane.b32.xlu1 %v3248_v40, %s5647_s26  ;;  %v3190_v49 = vpop.f32.mrb[17].mxu1 }
 0x972   : > { %v3235_v51 = vmul.f32 %v4741_v24, %v3221_v42  ;;  %v3217_v52 = vadd.f32 %v4739_v19, %v3190_v49  ;;  %3259 = vrot.lane.b32.xlu0 %v3247_v44, %s5647_s26 }
 0x973   : > { %v3224_v53 = vmax.f32 %v3218_v46, 0.0  ;;  %v3250_v55 = vadd.f32 %v4743_v31, %v3236_v45 }
 0x974   : > { %v3223_v58 = vmax.f32 %v3217_v52, 0.0  ;;  %v3249_v54 = vadd.f32 %v4743_v31, %v3235_v51 }
 0x975   : > { %v3238_v61 = vmul.f32 %v4741_v24, %v3224_v53  ;;  %3265 = vrot.lane.b32.xlu1 %v3250_v55, %s5647_s26 }
 0x976   : > { %v3237_v2 = vmul.f32 %v4741_v24, %v3223_v58  ;;  %3263 = vrot.lane.b32.xlu0 %v3249_v54, %s5647_s26 }
 0x977   : > { %v3252_v3 = vadd.f32 %v4743_v31, %v3238_v61 }
 0x978   : > { %v3251_v56 = vadd.f32 %v4743_v31, %v3237_v2 }
 0x979   : > { %3269 = vrot.lane.b32.xlu1 %v3252_v3, %s5647_s26 }
 0x97a   : > { %3267 = vrot.lane.b32.xlu0 %v3251_v56, %s5647_s26  ;;  %s7362_s26 = sld [smem:[#allocation22_spill]] }
 0x9e3   : > { %v3262_v6 = vpop.permute.xlu1 %3261 }
 0x9e4   : > { %3279 = vst.msk [vmem:[#allocation2 + $0x8] sm:$0xff] %vm3277_vm7, %v3262_v6  ;;  %v3260_v8 = vpop.permute.xlu0 %3259 }
 0x9e5   : > { %3278 = vst.msk [vmem:[#allocation2] sm:$0xff] %vm3277_vm7, %v3260_v8 }
 0x9e7   : > { %v3266_v1 = vpop.permute.xlu1 %3265 }
 0x9e8   : > { %3281 = vst.msk [vmem:[#allocation2 + $0x18] sm:$0xff] %vm3277_vm7, %v3266_v1  ;;  %v3264_v11 = vpop.permute.xlu0 %3263 }
 0x9e9   : > { %3280 = vst.msk [vmem:[#allocation2 + $0x10] sm:$0xff] %vm3277_vm7, %v3264_v11 }
 0x9eb   : > { %v3270_v12 = vpop.permute.xlu1 %3269  ;;  %v3285_v14 = vld [vmem:[#allocation2 + $0x8] sm:$0xff] }
 0x9ec   : > { %3283 = vst.msk [vmem:[#allocation2 + $0x28] sm:$0xff] %vm3277_vm7, %v3270_v12  ;;  %3298 = vrot.lane.b32.xlu1 %v3285_v14, %s5648_s23  ;;  %v3268_v15 = vpop.permute.xlu0 %3267  ;;  %v3284_v16 = vld [vmem:[#allocation2] sm:$0xff] }
 0x9ed   : > { %3282 = vst.msk [vmem:[#allocation2 + $0x20] sm:$0xff] %vm3277_vm7, %v3268_v15  ;;  %3296 = vrot.lane.b32.xlu0 %v3284_v16, %s5648_s23  ;;  %vm7292_vm7 = vnez %v7098_v7 }
 0x9ef   : > { %v3287_v18 = vld [vmem:[#allocation2 + $0x18] sm:$0xff] }
 0x9f0   : > { %3302 = vrot.lane.b32.xlu1 %v3287_v18, %s5648_s23  ;;  %v3286_v19 = vld [vmem:[#allocation2 + $0x10] sm:$0xff] }
 0x9f1   : > { %3300 = vrot.lane.b32.xlu0 %v3286_v19, %s5648_s23 }
 0x9f3   : > { %v3289_v21 = vld [vmem:[#allocation2 + $0x28] sm:$0xff] }
 0x9f4   : > { %3306 = vrot.lane.b32.xlu1 %v3289_v21, %s5648_s23  ;;  %v3288_v22 = vld [vmem:[#allocation2 + $0x20] sm:$0xff] }
 0x9f5   : > { %3304 = vrot.lane.b32.xlu0 %v3288_v22, %s5648_s23 }
 0xa5e   : > { %v3299_v23 = vpop.permute.xlu1 %3298 }
 0xa5f   : > { %v3315_v24 = vadd.f32 %v3299_v23, %v3248_v40  ;;  %v3297_v25 = vpop.permute.xlu0 %3296 }
 0xa60   : > { %v6670_v26 = vadd.f32 %v3297_v25, %v3247_v44 }
 0xa61   : > { %v3341_v31 = vsel %vm7288_vm11, %v3315_v24, 0.0  ;;  %v3321_v44 = vrot.slane %v3315_v24, 6  ;;  %vm7296_vm11 = vnez %v7102_v17  ;;  %v3575_v8 = vrot.slane %v3315_v24, 2 }
 0xa62   : > { %v3303_v28 = vpop.permute.xlu1 %3302  ;;  %v3340_v29 = vsel %vm5952_vm5, %v6670_v26, 0.0  ;;  %v3320_v45 = vrot.slane %v6670_v26, 6 }
 0xa63   : > { %v3317_v32 = vadd.f32 %v3303_v28, %v3250_v55  ;;  %5172 = vmatprep.mubr.msk.f32.mxu0 %vm7280_vm3, %v3340_v29  ;;  %v3301_v33 = vpop.permute.xlu0 %3300  ;;  %vm7293_vm3 = vmmov %vm7289_vm2 }
 0xa64   : > { %v3316_v36 = vadd.f32 %v3301_v33, %v3249_v54  ;;  %5173 = vmatmul.mubr.msk.f32.vlgmr.msra.gmra.mrb[18].mxu0 %vm7289_vm2, %v3341_v31  ;;  %vm7294_vm2 = vnez %v7100_v13 }
 0xa65   : > { %5182 = vmatpush3.msra.mxu0 %v4744_v9  ;;  %v3343_v43 = vsel %vm7292_vm7, %v3317_v32, 0.0  ;;  %v3323_v58 = vrot.slane %v3317_v32, 6  ;;  %vm7298_vm7 = vmmov %vm7293_vm3  ;;  %v3574_v9 = vrot.slane %v6670_v26, 2  ;;  %v3577_v16 = vrot.slane %v3317_v32, 2 }
 0xa66   : > { %v3307_v37 = vpop.permute.xlu1 %3306  ;;  %v3342_v39 = vsel %vm7290_vm10, %v3316_v36, 0.0  ;;  %5192 = vmatprep.subr.mxu0 %v4758_v35  ;;  %v3322_v49 = vrot.slane %v3316_v36, 6  ;;  %vm7295_vm10 = vmmov %vm7293_vm3  ;;  %v3576_v12 = vrot.slane %v3316_v36, 2 }
 0xa67   : > { %v3319_v40 = vadd.f32 %v3307_v37, %v3252_v3  ;;  %5175 = vmatprep.mubr.msk.f32.mxu0 %vm7291_vm6, %v3342_v39  ;;  %v3305_v42 = vpop.permute.xlu0 %3304  ;;  %vm7297_vm6 = vcmp.lt.s32.totalorder %v5923_v34, 2  ;;  %vm7300_vm5 = vmmov %vm7298_vm7  ;;  %v4766_v37 = vld [vmem:[%s7015_s6 + $0x5] ss:$0 sm:$0xff] }
 0xa68   : > { %v3318_v46 = vadd.f32 %v3305_v42, %v3251_v56  ;;  %5176 = vmatmul.mubr.msk.f32.gmra.mrb[20].mxu0 %vm7293_vm3, %v3343_v43  ;;  %vm7299_vm3 = vmmov %vm7297_vm6  ;;  %v4768_v43 = vld [vmem:[%s7016_s7 + $0x5] ss:$0 sm:$0xff] }
 0xa69   : > { %v3325_v51 = vrot.slane %v3319_v40, 6  ;;  %v3345_v53 = vsel %vm7296_vm11, %v3319_v40, 0.0  ;;  %v3330_v61 = vsel %vm7299_vm3, %v3320_v45, %v3321_v44  ;;  %vm7302_vm11 = vmmov %vm7300_vm5  ;;  %v3579_v24 = vrot.slane %v3319_v40, 2 }
 0xa6a   : > { %v3344_v52 = vsel %vm7294_vm2, %v3318_v46, 0.0  ;;  %v3324_v0 = vrot.slane %v3318_v46, 6  ;;  %v3333_v3 = vsel %vm7268_vm14, %v3330_v61, 0.0  ;;  %v3578_v21 = vrot.slane %v3318_v46, 2 }
 0xa6b   : > { %5178 = vmatprep.mubr.msk.f32.mxu0 %vm7295_vm10, %v3344_v52  ;;  %v3331_v55 = vsel %vm7297_vm6, %v3325_v51, %v3320_v45  ;;  %vm7301_vm10 = vmmov %vm7299_vm3  ;;  %vm7303_vm6 = vnez %v7108_v30 }
 0xa6c   : > { %5179 = vmatmul.mubr.msk.f32.gmra.mrb[22].mxu0 %vm7298_vm7, %v3345_v53  ;;  %v3332_v54 = vsel %vm7192_vm13, %v3331_v55, 0.0  ;;  %v3329_v2 = vsel %vm7301_vm10, %v3321_v44, %v3322_v49  ;;  %vm7304_vm7 = vmmov %vm7299_vm3  ;;  %vm7308_vm10 = vnez %v7114_v41 }
 0xa6d   : > { %5183 = vmatprep.mubr.msk.f32.mxu0 %vm7300_vm5, %v3332_v54  ;;  %v3334_v56 = vsel %vm7303_vm6, %v3329_v2, 0.0  ;;  %v3328_v6 = vsel %vm7304_vm7, %v3322_v49, %v3323_v58  ;;  %vm7305_vm3 = vmmov %vm7300_vm5 }
 0xa6e   : > { %vm7306_vm5 = vmmov %vm7304_vm7  ;;  %v3335_v11 = vsel %vm7238_vm9, %v3328_v6, 0.0 }
 0xa6f   : > { %v3327_v1 = vsel %vm7306_vm5, %v3323_v58, %v3324_v0  ;;  %vm7309_vm7 = vmmov %vm7306_vm5 }
 0xa70   : > { %5184 = vmatmul.mubr.msk.f32.vlgmr.msra.gmra.mrb[18].mxu0 %vm7302_vm11, %v3333_v3  ;;  %vm7307_vm11 = vmmov %vm7305_vm3  ;;  %v3336_v14 = vsel %vm7308_vm10, %v3327_v1, 0.0  ;;  %v3326_v15 = vsel %vm7309_vm7, %v3324_v0, %v3325_v51  ;;  %v4770_v51 = vld [vmem:[%s7017_s8 + $0x5] ss:$0 sm:$0xff] }
 0xa71   : > { %5193 = vmatpush3.msra.mxu0 %v4758_v35  ;;  %5186 = vmatprep.mubr.msk.f32.mxu0 %vm7305_vm3, %v3334_v56  ;;  %vm7310_vm6 = vmmov %vm7305_vm3  ;;  %vm7311_vm3 = vcmp.lt.s32.totalorder %v5923_v34, 6  ;;  %v3337_v19 = vsel %vm7207_vm12, %v3326_v15, 0.0 }
 0xa72   : > { %v3584_v18 = vsel %vm7311_vm3, %v3574_v9, %v3575_v8  ;;  %vm7312_vm5 = vmmov %vm7310_vm6 }
 0xa73   : > { %vm7314_vm10 = vmmov %vm7311_vm3 }
 0xa74   : > { %5187 = vmatmul.mubr.msk.f32.gmra.mrb[20].mxu0 %vm7307_vm11, %v3335_v11  ;;  %vm7313_vm11 = vnez %v7122_v50  ;;  %v3583_v23 = vsel %vm7314_vm10, %v3575_v8, %v3576_v12  ;;  %vm7315_vm7 = vmmov %vm7312_vm5 }
 0xa75   : > { %5189 = vmatprep.mubr.msk.f32.mxu0 %vm7310_vm6, %v3336_v14  ;;  %v3586_v22 = vsel %vm7313_vm11, %v3584_v18, 0.0  ;;  %vm7316_vm6 = vmmov %vm7311_vm3  ;;  %v3587_v26 = vsel %vm6163_vm4, %v3583_v23, 0.0 }
 0xa76   : > { %v3582_v25 = vsel %vm7316_vm6, %v3576_v12, %v3577_v16  ;;  %vm7317_vm3 = vmmov %vm7312_vm5 }
 0xa77   : > { %v3588_v28 = vsel %vm7176_vm15, %v3582_v25, 0.0  ;;  %vm7319_vm11 = vmmov %vm7317_vm3 }
 0xa78   : > { %5190 = vmatmul.mubr.msk.f32.gmra.mrb[22].mxu0 %vm7312_vm5, %v3337_v19  ;;  %vm7318_vm5 = vmmov %vm7316_vm6  ;;  %v4772_v19 = vld [vmem:[%s7014_s5 + $0x98] sm:$0xff] }
 0xa79   : > { %5194 = vmatprep.mubr.msk.f32.mxu0 %vm7315_vm7, %v3586_v22  ;;  %v3581_v29 = vsel %vm7318_vm5, %v3577_v16, %v3578_v21  ;;  %vm7320_vm10 = vmmov %vm7318_vm5  ;;  %5203 = vmatprep.subr.mxu1 %v4772_v19 }
 0xa7a   : > { %v3580_v31 = vsel %vm7320_vm10, %v3578_v21, %v3579_v24  ;;  %v3589_v32 = vsel %vm6187_vm0, %v3581_v29, 0.0  ;;  %vm7321_vm7 = vmmov %vm7317_vm3  ;;  %5204 = vmatpush3.msra.mxu1 %v4772_v19  ;;  %vm7324_vm10 = vnez %v7092_v59 }
 0xa7b   : > { %v3590_v33 = vsel %vm6194_vm8, %v3580_v31, 0.0  ;;  %vm7322_vm6 = vmmov %vm7318_vm5  ;;  %vm3785_vm5 = vcmask 392512  }
 0xa7c   : > { %5195 = vmatmul.mubr.msk.f32.vlgmr.msra.gmra.mrb[18].mxu0 %vm7317_vm3, %v3587_v26  ;;  %v3585_v35 = vsel %vm7322_vm6, %v3579_v24, %v3574_v9  ;;  %v4771_v26 = vld [vmem:[%s7014_s5 + $0x90] sm:$0xff]  ;;  %vm7326_vm6 = vmmov %vm7317_vm3 }
 0xa7d   : > { %5197 = vmatprep.mubr.msk.f32.mxu0 %vm7319_vm11, %v3588_v28  ;;  %v3591_v36 = vsel %vm6207_vm1, %v3585_v35, 0.0  ;;  %vm7323_vm11 = vmmov %vm7317_vm3  ;;  %5214 = vmatprep.subr.mxu1 %v4771_v26 }
 0xa80   : > { %5198 = vmatmul.mubr.msk.f32.gmra.mrb[20].mxu0 %vm7321_vm7, %v3589_v32  ;;  %vm7325_vm7 = vnez %v7094_v62 }
 0xa81   : > { %5200 = vmatprep.mubr.msk.f32.mxu0 %vm7317_vm3, %v3590_v33 }
 0xa84   : > { %5201 = vmatmul.mubr.msk.f32.gmra.mrb[22].mxu0 %vm7323_vm11, %v3591_v36  ;;  %vm7327_vm11 = vnez %v7096_v4 }
 0xb4f   : > { %v5196_v39 = vpop.f32.mrb[18].mxu0 }
 0xb50   : > { %v3722_v40 = vadd.f32 %v5196_v39, %v4766_v37  ;;  %v3678_v42 = vpop.f32.mrb[19].mxu0 }
 0xb51   : > { %v3721_v44 = vadd.f32 %v4766_v37, %v3678_v42 }
 0xb52   : > { %v3728_v45 = vmax.f32 %v3722_v40, 0.0 }
 0xb53   : > { %v3727_v46 = vmax.f32 %v3721_v44, 0.0  ;;  %v5199_v49 = vpop.f32.mrb[20].mxu0 }
 0xb54   : > { %v3742_v52 = vmul.f32 %v4768_v43, %v3728_v45  ;;  %v3724_v53 = vadd.f32 %v5199_v49, %v4766_v37  ;;  %v3688_v55 = vpop.f32.mrb[21].mxu0 }
 0xb55   : > { %v3741_v58 = vmul.f32 %v4768_v43, %v3727_v46  ;;  %v3723_v54 = vadd.f32 %v4766_v37, %v3688_v55  ;;  %v4785_v55 = vld [vmem:[%s7014_s5 + $0xa0] sm:$0xff] }
 0xb56   : > { %v3730_v61 = vmax.f32 %v3724_v53, 0.0  ;;  %v3756_v0 = vadd.f32 %v4770_v51, %v3742_v52 }
 0xb57   : > { %v3729_v2 = vmax.f32 %v3723_v54, 0.0  ;;  %v5202_v3 = vpop.f32.mrb[22].mxu0  ;;  %v3755_v56 = vadd.f32 %v4770_v51, %v3741_v58 }
 0xb58   : > { %v3744_v6 = vmul.f32 %v4768_v43, %v3730_v61  ;;  %v3726_v8 = vadd.f32 %v5202_v3, %v4766_v37  ;;  %3769 = vrot.lane.b32.xlu1 %v3756_v0, %s5649_s24  ;;  %v3698_v9 = vpop.f32.mrb[23].mxu0 }
 0xb59   : > { %v3743_v1 = vmul.f32 %v4768_v43, %v3729_v2  ;;  %v3725_v11 = vadd.f32 %v4766_v37, %v3698_v9  ;;  %3767 = vrot.lane.b32.xlu0 %v3755_v56, %s5649_s24 }
 0xb5a   : > { %v3732_v12 = vmax.f32 %v3726_v8, 0.0  ;;  %v3758_v14 = vadd.f32 %v4770_v51, %v3744_v6 }
 0xb5b   : > { %v3731_v15 = vmax.f32 %v3725_v11, 0.0  ;;  %v3757_v16 = vadd.f32 %v4770_v51, %v3743_v1 }
 0xb5c   : > { %v3746_v18 = vmul.f32 %v4768_v43, %v3732_v12  ;;  %3773 = vrot.lane.b32.xlu1 %v3758_v14, %s5649_s24 }
 0xb5d   : > { %v3745_v21 = vmul.f32 %v4768_v43, %v3731_v15  ;;  %3771 = vrot.lane.b32.xlu0 %v3757_v16, %s5649_s24 }
 0xb5e   : > { %v3760_v22 = vadd.f32 %v4770_v51, %v3746_v18 }
 0xb5f   : > { %v3759_v23 = vadd.f32 %v4770_v51, %v3745_v21 }
 0xb60   : > { %3777 = vrot.lane.b32.xlu1 %v3760_v22, %s5649_s24 }
 0xb61   : > { %3775 = vrot.lane.b32.xlu0 %v3759_v23, %s5649_s24  ;;  %s4804_s24 = sshll.u32 %s5619_s16, 1 }
 0xbca   : > { %v3770_v24 = vpop.permute.xlu1 %3769 }
 0xbcb   : > { %3787 = vst.msk [vmem:[#allocation2 + $0x8] sm:$0xff] %vm3785_vm5, %v3770_v24  ;;  %v3768_v25 = vpop.permute.xlu0 %3767 }
 0xbcc   : > { %3786 = vst.msk [vmem:[#allocation2] sm:$0xff] %vm3785_vm5, %v3768_v25 }
 0xbce   : > { %v3774_v28 = vpop.permute.xlu1 %3773 }
 0xbcf   : > { %3789 = vst.msk [vmem:[#allocation2 + $0x18] sm:$0xff] %vm3785_vm5, %v3774_v28  ;;  %v3772_v29 = vpop.permute.xlu0 %3771 }
 0xbd0   : > { %3788 = vst.msk [vmem:[#allocation2 + $0x10] sm:$0xff] %vm3785_vm5, %v3772_v29 }
 0xbd2   : > { %v3778_v31 = vpop.permute.xlu1 %3777  ;;  %v3793_v32 = vld [vmem:[#allocation2 + $0x8] sm:$0xff] }
 0xbd3   : > { %3791 = vst.msk [vmem:[#allocation2 + $0x28] sm:$0xff] %vm3785_vm5, %v3778_v31  ;;  %3806 = vrot.lane.b32.xlu1 %v3793_v32, %s5650_s25  ;;  %v3776_v33 = vpop.permute.xlu0 %3775  ;;  %v3792_v35 = vld [vmem:[#allocation2] sm:$0xff] }
 0xbd4   : > { %3790 = vst.msk [vmem:[#allocation2 + $0x20] sm:$0xff] %vm3785_vm5, %v3776_v33  ;;  %3804 = vrot.lane.b32.xlu0 %v3792_v35, %s5650_s25  ;;  %vm7328_vm5 = vmmov %vm7317_vm3 }
 0xbd6   : > { %v3795_v36 = vld [vmem:[#allocation2 + $0x18] sm:$0xff] }
 0xbd7   : > { %3810 = vrot.lane.b32.xlu1 %v3795_v36, %s5650_s25  ;;  %v3794_v37 = vld [vmem:[#allocation2 + $0x10] sm:$0xff]  ;;  %v4303_v36 = vld [vmem:[%s7018_s9 + $0x8] sm:$0xff] }
 0xbd8   : > { %3808 = vrot.lane.b32.xlu0 %v3794_v37, %s5650_s25  ;;  %v5271_v37 = vpack.c.bf16 %v4303_v36, %v4302_v5 }
 0xbda   : > { %v3797_v39 = vld [vmem:[#allocation2 + $0x28] sm:$0xff]  ;;  %5272 = vmatprep.subr.bf16.mxu0 %v5271_v37 }
 0xbdb   : > { %3814 = vrot.lane.b32.xlu1 %v3797_v39, %s5650_s25  ;;  %v3796_v40 = vld [vmem:[#allocation2 + $0x20] sm:$0xff]  ;;  %v5275_v39 = vpack.c.bf16 %v4305_v10, %v4304_v63  ;;  %5274 = vmatpush3.bf16.msra.mxu0 %v5271_v37 }
 0xbdc   : > { %3812 = vrot.lane.b32.xlu0 %v3796_v40, %s5650_s25  ;;  %s7363_s25 = sld [smem:[#allocation23_spill]] }
 0xbdd   : > { %5276 = vmatprep.subr.bf16.mxu0 %v5275_v39 }
 0xbdf   : > { %5278 = vmatpush3.bf16.msra.mxu0 %v5275_v39 }
 0xc45   : > { %v3807_v42 = vpop.permute.xlu1 %3806 }
 0xc46   : > { %v3823_v43 = vadd.f32 %v3807_v42, %v3756_v0  ;;  %v3805_v44 = vpop.permute.xlu0 %3804  ;;  %v4793_v42 = vld [vmem:[%s7015_s6 + $0x6] ss:$0 sm:$0xff] }
 0xc47   : > { %v6777_v45 = vadd.f32 %v3805_v44, %v3755_v56  ;;  %v4306_v44 = vld [vmem:[%s7018_s9 + $0x20] sm:$0xff] }
 0xc48   : > { %v3849_v51 = vsel %vm7325_vm7, %v3823_v43, 0.0  ;;  %v3829_v2 = vrot.slane %v3823_v43, 6  ;;  %vm7330_vm7 = vmmov %vm7317_vm3 }
 0xc49   : > { %v3811_v46 = vpop.permute.xlu1 %3810  ;;  %v3848_v49 = vsel %vm7324_vm10, %v6777_v45, 0.0  ;;  %vm7329_vm10 = vnez %v7098_v7  ;;  %v3828_v3 = vrot.slane %v6777_v45, 6  ;;  %v4082_v18 = vrot.slane %v6777_v45, 2  ;;  %v4307_v45 = vld [vmem:[%s7018_s9 + $0x28] sm:$0xff] }
 0xc4a   : > { %v3825_v52 = vadd.f32 %v3811_v46, %v3758_v14  ;;  %5205 = vmatprep.mubr.msk.f32.mxu1 %vm7326_vm6, %v3848_v49  ;;  %v3809_v53 = vpop.permute.xlu0 %3808  ;;  %vm7331_vm6 = vmmov %vm7317_vm3  ;;  %v5279_v46 = vpack.c.bf16 %v4307_v45, %v4306_v44 }
 0xc4b   : > { %v3824_v58 = vadd.f32 %v3809_v53, %v3757_v16  ;;  %5206 = vmatmul.mubr.msk.f32.vlgmr.msra.gmra.mrb[18].mxu1 %vm7317_vm3, %v3849_v51  ;;  %vm7332_vm3 = vnez %v7102_v17  ;;  %v4083_v16 = vrot.slane %v3823_v43, 2 }
 0xc4c   : > { %5215 = vmatpush3.msra.mxu1 %v4771_v26  ;;  %v3851_v0 = vsel %vm7329_vm10, %v3825_v52, 0.0  ;;  %v3831_v1 = vrot.slane %v3825_v52, 6  ;;  %5280 = vmatprep.subr.bf16.mxu0 %v5279_v46 }
 0xc4d   : > { %v3815_v54 = vpop.permute.xlu1 %3814  ;;  %v3850_v59 = vsel %vm7327_vm11, %v3824_v58, 0.0  ;;  %5225 = vmatprep.subr.mxu1 %v4785_v55  ;;  %v3830_v6 = vrot.slane %v3824_v58, 6  ;;  %vm7333_vm11 = vcmp.lt.s32.totalorder %v5923_v34, 2  ;;  %v4084_v21 = vrot.slane %v3824_v58, 2  ;;  %5282 = vmatpush3.bf16.msra.mxu0 %v5279_v46  ;;  %v4308_v58 = vld [vmem:[%s7018_s9 + $0x30] sm:$0xff] }
 0xc4e   : > { %v3827_v61 = vadd.f32 %v3815_v54, %v3760_v22  ;;  %5208 = vmatprep.mubr.msk.f32.mxu1 %vm7328_vm5, %v3850_v59  ;;  %v3813_v62 = vpop.permute.xlu0 %3812  ;;  %vm7334_vm10 = vmmov %vm7333_vm11  ;;  %v4309_v54 = vld [vmem:[%s7018_s9 + $0x38] sm:$0xff] }
 0xc4f   : > { %v3826_v56 = vadd.f32 %v3813_v62, %v3759_v23  ;;  %5209 = vmatmul.mubr.msk.f32.gmra.mrb[20].mxu1 %vm7330_vm7, %v3851_v0  ;;  %v3838_v12 = vsel %vm7334_vm10, %v3828_v3, %v3829_v2  ;;  %vm7335_vm7 = vmmov %vm7328_vm5  ;;  %v4085_v23 = vrot.slane %v3825_v52, 2 }
 0xc50   : > { %v3833_v8 = vrot.slane %v3827_v61, 6  ;;  %v3853_v9 = vsel %vm7332_vm3, %v3827_v61, 0.0  ;;  %v3841_v17 = vsel %vm7268_vm14, %v3838_v12, 0.0  ;;  %vm7338_vm3 = vnez %v7108_v30 }
 0xc51   : > { %v3852_v4 = vsel %vm7294_vm2, %v3826_v56, 0.0  ;;  %v3832_v14 = vrot.slane %v3826_v56, 6  ;;  %vm7336_vm2 = vmmov %vm7334_vm10  ;;  %vm7343_vm10 = vnez %v7114_v41  ;;  %v4086_v38 = vrot.slane %v3826_v56, 2 }
 0xc52   : > { %5211 = vmatprep.mubr.msk.f32.mxu1 %vm7331_vm6, %v3852_v4  ;;  %v3839_v7 = vsel %vm7333_vm11, %v3833_v8, %v3828_v3  ;;  %v3837_v13 = vsel %vm7336_vm2, %v3829_v2, %v3830_v6  ;;  %vm7337_vm6 = vmmov %vm7328_vm5  ;;  %v4087_v28 = vrot.slane %v3827_v61, 2  ;;  %v5283_v61 = vpack.c.bf16 %v4309_v54, %v4308_v58  ;;  %v4795_v2 = vld [vmem:[%s7016_s7 + $0x6] ss:$0 sm:$0xff] }
 0xc53   : > { %5212 = vmatmul.mubr.msk.f32.gmra.mrb[22].mxu1 %vm7328_vm5, %v3853_v9  ;;  %v3840_v11 = vsel %vm7192_vm13, %v3839_v7, 0.0  ;;  %v3842_v15 = vsel %vm7338_vm3, %v3837_v13, 0.0  ;;  %vm7339_vm11 = vmmov %vm7336_vm2  ;;  %vm7348_vm3 = vnez %v7122_v50 }
 0xc54   : > { %5216 = vmatprep.mubr.msk.f32.mxu1 %vm7335_vm7, %v3840_v11  ;;  %v3836_v20 = vsel %vm7339_vm11, %v3830_v6, %v3831_v1  ;;  %vm7340_vm13 = vmmov %vm7328_vm5  ;;  %5284 = vmatprep.subr.bf16.mxu0 %v5283_v61  ;;  %v4797_v11 = vld [vmem:[%s7017_s8 + $0x6] ss:$0 sm:$0xff] }
 0xc55   : > { %vm7341_vm5 = vmmov %vm7336_vm2  ;;  %v3843_v27 = vsel %vm7238_vm9, %v3836_v20, 0.0  ;;  %5286 = vmatpush3.bf16.msra.mxu0 %v5283_v61 }
 0xc56   : > { %v3835_v19 = vsel %vm7341_vm5, %v3831_v1, %v3832_v14  ;;  %vm7342_vm14 = vmmov %vm7337_vm6 }
 0xc57   : > { %5217 = vmatmul.mubr.msk.f32.vlgmr.msra.gmra.mrb[18].mxu1 %vm7337_vm6, %v3841_v17  ;;  %v3844_v30 = vsel %vm7343_vm10, %v3835_v19, 0.0  ;;  %vm7344_vm7 = vmmov %vm7336_vm2 }
 0xc58   : > { %5226 = vmatpush3.msra.mxu1 %v4785_v55  ;;  %5219 = vmatprep.mubr.msk.f32.mxu1 %vm7340_vm13, %v3842_v15  ;;  %v3834_v22 = vsel %vm7344_vm7, %v3832_v14, %v3833_v8  ;;  %vm7345_vm2 = vmmov %vm7337_vm6  ;;  %vm7346_vm6 = vcmp.lt.s32.totalorder %v5923_v34, 6 }
 0xc59   : > { %v4092_v24 = vsel %vm7346_vm6, %v4082_v18, %v4083_v16  ;;  %v3845_v25 = vsel %vm7207_vm12, %v3834_v22, 0.0  ;;  %vm7347_vm9 = vmmov %vm7345_vm2 }
 0xc5a   : > { %v4094_v26 = vsel %vm7348_vm3, %v4092_v24, 0.0  ;;  %vm7349_vm11 = vmmov %vm7346_vm6 }
 0xc5b   : > { %5220 = vmatmul.mubr.msk.f32.gmra.mrb[20].mxu1 %vm7342_vm14, %v3843_v27  ;;  %v4091_v41 = vsel %vm7349_vm11, %v4083_v16, %v4084_v21  ;;  %vm7350_vm13 = vmmov %vm7345_vm2 }
 0xc5c   : > { %5222 = vmatprep.mubr.msk.f32.mxu1 %vm7345_vm2, %v3844_v30  ;;  %vm7351_vm5 = vmmov %vm7346_vm6  ;;  %v4095_v31 = vsel %vm6163_vm4, %v4091_v41, 0.0 }
 0xc5d   : > { %v4090_v29 = vsel %vm7351_vm5, %v4084_v21, %v4085_v23  ;;  %vm7352_vm14 = vmmov %vm7345_vm2 }
 0xc5e   : > { %v4096_v48 = vsel %vm7176_vm15, %v4090_v29, 0.0  ;;  %vm7353_vm12 = vmmov %vm7351_vm5  ;;  %v4798_v29 = vld [vmem:[%s7362_s26] ss:$0 sm:$0xff]  ;;  %s7365_s26 = sld [smem:[#allocation17_spill]] }
 0xc5f   : > { %5223 = vmatmul.mubr.msk.f32.gmra.mrb[22].mxu1 %vm7347_vm9, %v3845_v25  ;;  %v4089_v50 = vsel %vm7353_vm12, %v4085_v23, %v4086_v38  ;;  %vm7354_vm10 = vmmov %vm7345_vm2 }
 0xc60   : > { %5227 = vmatprep.mubr.msk.f32.mxu1 %vm7350_vm13, %v4094_v26  ;;  %vm7355_vm7 = vmmov %vm7351_vm5  ;;  %v4097_v33 = vsel %vm6187_vm0, %v4089_v50, 0.0  ;;  %vm7360_vm0 = vcmask 523264  }
 0xc61   : > { %v4088_v32 = vsel %vm7355_vm7, %v4086_v38, %v4087_v28  ;;  %vm7356_vm4 = vmmov %vm7351_vm5 }
 0xc62   : > { %v4098_v57 = vsel %vm6194_vm8, %v4088_v32, 0.0  ;;  %v4093_v60 = vsel %vm7356_vm4, %v4087_v28, %v4082_v18  ;;  %vm7357_vm15 = vmmov %vm7345_vm2  ;;  %vm4293_vm8 = vcmask 458112   ;;  %v4801_v32 = vld [vmem:[%s7363_s25] ss:$0 sm:$0xff] }
 0xc63   : > { %5228 = vmatmul.mubr.msk.f32.vlgmr.msra.gmra.mrb[18].mxu1 %vm7352_vm14, %v4095_v31  ;;  %v4099_v35 = vsel %vm6207_vm1, %v4093_v60, 0.0  ;;  %vm7358_vm6 = vmmov %vm7345_vm2  ;;  %v4421_v60 = vstv %s4420_s29  ;;  %s5652_s29 = smov [#allocation6]  }
 0xc64   : > { %5230 = vmatprep.mubr.msk.f32.mxu1 %vm7354_vm10, %v4096_v48  ;;  %vm7361_vm1 = vmmov %vm7360_vm0  ;;  %vm4423_vm9 = vcmp.lt.s32.totalorder %v5933_v47, %v4421_v60  ;;  %vm4422_vm3 = vcmp.lt.s32.totalorder %v5923_v34, %v4421_v60  ;;  %p7371_p9 = scmp.ne.s32.totalorder %s7365_s26, 0  ;;  %s5509_s23 = sshll.u32 %s5652_s29, 4  ;;  %s5510_s23 = int_to_ptr.vmem [resolvable:$false] %s5509_s23 }
 0xc65   : > { %vm7367_vm11 = vmmov %vm7360_vm0  ;;  %s5511_s17 = scalar_lea.vmem %s5510_s23, 512  ;;  %p5512_p11 = scmp.lt.s32.totalorder %s6913_s14, %s5510_s23 }
 0xc66   : > { %vm7368_vm13 = vmmov %vm7360_vm0  ;;  %p5507_p12 = pnand %p5506_p8, %p7371_p9  ;;  %p5513_p13 = scmp.lt.s32.totalorder %s5511_s17, %s5505_s18 }
 0xc67   : > { %5231 = vmatmul.mubr.msk.f32.gmra.mrb[20].mxu1 %vm7345_vm2, %v4097_v33  ;;  %vm7369_vm5 = vmmov %vm7360_vm0 }
 0xc68   : > { %5233 = vmatprep.mubr.msk.f32.mxu1 %vm7357_vm15, %v4098_v57  ;;  %vm7370_vm14 = vmmov %vm7360_vm0  ;;  %p5508_p0 = pneg %p5507_p12  ;;  %p5514_p1 = por %p5513_p13, %p5512_p11 }
 0xc6a   : > { %p5515_p3 = pnand %p5514_p1, %p5508_p0 }
 0xc6b   : > { %5234 = vmatmul.mubr.msk.f32.gmra.mrb[22].mxu1 %vm7358_vm6, %v4099_v35  ;;  %v4802_v35 = vld [vmem:[%s7364_s1] ss:$0 sm:$0xff] }
 0xd36   : > { %v5229_v40 = vpop.f32.mrb[18].mxu1 }
 0xd37   : > { %v4186_v43 = vpop.f32.mrb[19].mxu1  ;;  %v4230_v49 = vadd.f32 %v5229_v40, %v4793_v42 }
 0xd38   : > { %v4229_v51 = vadd.f32 %v4793_v42, %v4186_v43 }
 0xd39   : > { %v4236_v62 = vmax.f32 %v4230_v49, 0.0 }
 0xd3a   : > { %v5232_v52 = vpop.f32.mrb[20].mxu1  ;;  %v4235_v3 = vmax.f32 %v4229_v51, 0.0 }
 0xd3b   : > { %v4232_v53 = vadd.f32 %v5232_v52, %v4793_v42  ;;  %v4196_v55 = vpop.f32.mrb[21].mxu1  ;;  %v4250_v12 = vmul.f32 %v4795_v2, %v4236_v62 }
 0xd3c   : > { %v4231_v59 = vadd.f32 %v4793_v42, %v4196_v55  ;;  %v4249_v17 = vmul.f32 %v4795_v2, %v4235_v3 }
 0xd3d   : > { %v4238_v0 = vmax.f32 %v4232_v53, 0.0  ;;  %v4264_v18 = vadd.f32 %v4797_v11, %v4250_v12 }
 0xd3e   : > { %v4237_v56 = vmax.f32 %v4231_v59, 0.0  ;;  %v5235_v6 = vpop.f32.mrb[22].mxu1  ;;  %v4263_v27 = vadd.f32 %v4797_v11, %v4249_v17 }
 0xd3f   : > { %v4252_v8 = vmul.f32 %v4795_v2, %v4238_v0  ;;  %v4234_v4 = vadd.f32 %v5235_v6, %v4793_v42  ;;  %v4206_v9 = vpop.f32.mrb[23].mxu1 }
 0xd40   : > { %v4251_v7 = vmul.f32 %v4795_v2, %v4237_v56  ;;  %v4233_v1 = vadd.f32 %v4793_v42, %v4206_v9 }
 0xd41   : > { %v4240_v14 = vmax.f32 %v4234_v4, 0.0  ;;  %v4266_v13 = vadd.f32 %v4797_v11, %v4252_v8 }
 0xd42   : > { %v4239_v15 = vmax.f32 %v4233_v1, 0.0  ;;  %v4265_v20 = vadd.f32 %v4797_v11, %v4251_v7 }
 0xd43   : > { %4281 = vrot.lane.b32.xlu1 %v4266_v13, %s5651_s27  ;;  %v4254_v16 = vmul.f32 %v4795_v2, %v4240_v14 }
 0xd44   : > { %4279 = vrot.lane.b32.xlu0 %v4265_v20, %s5651_s27  ;;  %v4253_v19 = vmul.f32 %v4795_v2, %v4239_v15 }
 0xd45   : > { %v4268_v21 = vadd.f32 %v4797_v11, %v4254_v16 }
 0xd46   : > { %v4267_v30 = vadd.f32 %v4797_v11, %v4253_v19 }
 0xd47   : > { %4277 = vrot.lane.b32.xlu1 %v4264_v18, %s5651_s27 }
 0xd48   : > { %4275 = vrot.lane.b32.xlu0 %v4263_v27, %s5651_s27 }
 0xd4b   : > { %4285 = vrot.lane.b32.xlu1 %v4268_v21, %s5651_s27 }
 0xd4c   : > { %4283 = vrot.lane.b32.xlu0 %v4267_v30, %s5651_s27  ;;  %s4458_s27 = sadd.s32 %s5375_s28, %s4804_s24  ;;  %s4442_s24 = scalar_lea.sflag [#allocation5], %s5856_s11 }
 0xd4d   : > { %s4805_s10 = sshll.u32 %s4458_s27, 7 }
 0xd4e   : > { %s6918_s28 = scalar_lea.hbm %s7366_s13, %s4805_s10 }
 0xdb5   : > { %v4282_v22 = vpop.permute.xlu1 %4281 }
 0xdb6   : > { %4297 = vst.msk [vmem:[#allocation2 + $0x18] sm:$0xff] %vm4293_vm8, %v4282_v22  ;;  %v4280_v23 = vpop.permute.xlu0 %4279 }
 0xdb7   : > { %4296 = vst.msk [vmem:[#allocation2 + $0x10] sm:$0xff] %vm4293_vm8, %v4280_v23 }
 0xdb9   : > { %v4278_v24 = vpop.permute.xlu1 %4277 }
 0xdba   : > { %4295 = vst.msk [vmem:[#allocation2 + $0x8] sm:$0xff] %vm4293_vm8, %v4278_v24  ;;  %v4276_v25 = vpop.permute.xlu0 %4275 }
 0xdbb   : > { %4294 = vst.msk [vmem:[#allocation2] sm:$0xff] %vm4293_vm8, %v4276_v25 }
 0xdbd   : > { %v4286_v38 = vpop.permute.xlu1 %4285  ;;  %v4301_v28 = vld [vmem:[#allocation2 + $0x18] sm:$0xff] }
 0xdbe   : > { %4299 = vst.msk [vmem:[#allocation2 + $0x28] sm:$0xff] %vm4293_vm8, %v4286_v38  ;;  %v4284_v26 = vpop.permute.xlu0 %4283  ;;  %v4300_v41 = vld [vmem:[#allocation2 + $0x10] sm:$0xff] }
 0xdbf   : > { %4298 = vst.msk [vmem:[#allocation2 + $0x20] sm:$0xff] %vm4293_vm8, %v4284_v26  ;;  %5252 = vmatprep.mubr.msk.f32.mxu0 %vm7360_vm0, %v4300_v41 }
 0xdc0   : > { %5253 = vmatmul.mubr.msk.f32.vlgmr.msra.gmra.mrb[24].mxu0 %vm7361_vm1, %v4301_v28 }
 0xe93   : > { %v5254_v31 = vpop.f32.mrb[24].mxu0 }
 0xe94   : > { %v4395_v48 = vadd.f32 %v5254_v31, %v4798_v29  ;;  %v4389_v50 = vpop.f32.mrb[25].mxu0 }
 0xe95   : > { %v4390_v33 = vadd.f32 %v4798_v29, %v4389_v50 }
 0xe96   : > { %v4399_v57 = vmax.f32 %v4395_v48, 0.0 }
 0xe97   : > { %v4398_v5 = vmax.f32 %v4390_v33, 0.0 }
 0xe98   : > { %v4408_v36 = vmul.f32 %v4801_v32, %v4399_v57 }
 0xe99   : > { %v4407_v63 = vmul.f32 %v4801_v32, %v4398_v5 }
 0xe9a   : > { %v4417_v37 = vadd.f32 %v4802_v35, %v4408_v36 }
 0xe9b   : > { %v4416_v10 = vadd.f32 %v4802_v35, %v4407_v63 }
 0xe9c   : > { %4419 = vst.msk [vmem:[%s509_s22 + $0x8] sm:$0xff] %vm7367_vm11, %v4417_v37  ;;  %v4429_v39 = vsel %vm4423_vm9, %v4417_v37, 0.0 }
 0xe9d   : > { %v4431_v47 = vsel %vm7368_vm13, %v4429_v39, 0.0  ;;  %4418 = vst.msk [vmem:[%s509_s22] sm:$0xff] %vm7369_vm5, %v4416_v10  ;;  %v4428_v40 = vsel %vm4422_vm3, %v4416_v10, 0.0 }
 0xe9e   : > { %v4430_v34 = vsel %vm7370_vm14, %v4428_v40, 0.0 }
 0xe9f   : > { %5518 = shalt.err (!%p5515_p3)
}
 0xea0   : > { %s5519_s25 = scalar_lea.hbm %s6918_s28, 256  ;;  %s5523_s10 = scalar_lea.hbm %s7366_s13, 1536 }
 0xea1   : > { %p5520_p5 = scmp.ne.s32.totalorder %s6918_s28, %s5519_s25  ;;  %p5524_p2 = scmp.lt.u32.totalorder %s6918_s28, %s7366_s13 }
 0xea2   : > { %p5525_p4 = scmp.lt.u32.totalorder %s5523_s10, %s5519_s25  ;;  %p5527_p8 = scmp.lt.u32.totalorder %s5519_s25, %s6918_s28 }
 0xea3   : > { %p5521_p6 = pnand %p5520_p5, %p7371_p9 }
 0xea4   : > { %p5526_p10 = por %p5525_p4, %p5524_p2 }
 0xea5   : > { %p5522_p7 = pneg %p5521_p6 }
 0xea6   : > { %p5528_p12 = por %p5527_p8, %p5526_p10 }
 0xea8   : > { %p5529_p0 = pnand %p5528_p12, %p5522_p7 }
 0xeaa   : > { %5532 = shalt.err (!%p5529_p0)
}
 0xeab   : > { %s5653_s18 = smov 128   ;;  %s7372_s29 = smov 8   ;;  %v4432_v42 = vadd.f32 %v4431_v47, %v4430_v34  ;;  %vm4439_vm12 = vcmask 516096  }
 0xeac   : > { %5379 = dma.vmem_to_hbm [thread:$0]  (%p7371_p9), %s6913_s14, 256, %s6918_s28, %s4442_s24, %s5653_s18, %s5653_s18, %s7372_s29  }
 0xead   : > { %v4433_v43 = vrot.slane %v4432_v42, 4  ;;  %s5376_s23 = smul.u32 3, %s7359_s21  ;;  %s515_s27 = scalar_lea.vmem [#allocation7], %s5856_s11 }
 0xeae   : > { %s4479_s22 = sshll.u32 %s515_s27, 4  ;;  %s7373_s1 = sld [smem:[#allocation26_spill]]  ;;  %s6957_s22 = int_to_ptr.vmem [resolvable:$true] %s4479_s22 }
 0xeaf   : > { %v4434_v44 = vadd.f32 %v4433_v43, %v4432_v42  ;;  %s4475_s17 = sadd.s32 %s5619_s16, %s5376_s23  ;;  %s4447_s21 = scalar_lea.sflag [#allocation8], %s5856_s11 }
 0xeb0   : > { %s4806_s25 = sshll.u32 %s4475_s17, 4  ;;  %s5533_s16 = scalar_lea.vmem %s6957_s22, 16 }
 0xeb1   : > { %v4435_v45 = vrot.slane %v4434_v44, 2  ;;  %p5534_p11 = scmp.ne.s32.totalorder %s6957_s22, %s5533_s16  ;;  %s5654_s14 = smov [#allocation7]  }
 0xeb2   : > { %s5537_s28 = sshll.u32 %s5654_s14, 4  ;;  %s5538_s28 = int_to_ptr.vmem [resolvable:$false] %s5537_s28 }
 0xeb3   : > { %v4436_v46 = vadd.f32 %v4435_v45, %v4434_v44  ;;  %p5535_p13 = pnand %p5534_p11, %p7371_p9  ;;  %s5539_s24 = scalar_lea.vmem %s5538_s28, 32 }
 0xeb4   : > { %s6955_s2 = scalar_lea.hbm %s7373_s1, %s4806_s25  ;;  %p5540_p3 = scmp.lt.s32.totalorder %s6957_s22, %s5538_s28 }
 0xeb5   : > { %v4437_v49 = vrot.slane %v4436_v46, 1  ;;  %p5536_p1 = pneg %p5535_p13  ;;  %p5541_p5 = scmp.lt.s32.totalorder %s5539_s24, %s5533_s16 }
 0xeb7   : > { %v4438_v51 = vadd.f32 %v4437_v49, %v4436_v46  ;;  %p5542_p6 = por %p5541_p5, %p5540_p3 }
 0xeb9   : > { %4440 = vst.msk [vmem:[%s515_s27] sm:$0x1] %vm4439_vm12, %v4438_v51  ;;  %p5543_p7 = pnand %p5542_p6, %p5536_p1 }
 0xebb   : > { %5546 = shalt.err (!%p5543_p7)
}
 0xebc   : > { %s5547_s11 = scalar_lea.hbm %s6955_s2, 16  ;;  %s5551_s23 = scalar_lea.hbm %s7373_s1, 96 }
 0xebd   : > { %p5548_p2 = scmp.ne.s32.totalorder %s6955_s2, %s5547_s11  ;;  %p5552_p8 = scmp.lt.u32.totalorder %s6955_s2, %s7373_s1 }
 0xebe   : > { %p5553_p12 = scmp.lt.u32.totalorder %s5551_s23, %s5547_s11  ;;  %p5555_p11 = scmp.lt.u32.totalorder %s5547_s11, %s6955_s2 }
 0xebf   : > { %p5549_p4 = pnand %p5548_p2, %p7371_p9 }
 0xec0   : > { %p5554_p0 = por %p5553_p12, %p5552_p8 }
 0xec1   : > { %p5550_p10 = pneg %p5549_p4 }
 0xec2   : > { %p5556_p13 = por %p5555_p11, %p5554_p0 }
 0xec4   : > { %p5557_p1 = pnand %p5556_p13, %p5550_p10 }
 0xec6   : > { %5560 = shalt.err (!%p5557_p1)
}
 0xec7   : > { %5380 = dma.vmem_to_hbm [thread:$0]  (%p7371_p9), %s6957_s22, 16, %s6955_s2, %s4447_s21  }
 0xec8 PF: > { %s7374_s27 = sld [smem:[#allocation12_spill]]  ;;  %s7375_s10 = sld [smem:[#allocation18_spill]] }
 0xec9   : > { %p5395_p3 = scmp.ge.s32.totalorder %s5635_s20, 2 }
 0xece   : > { %s4491_s0 = sand.u32 1, %s7374_s27   ;;  %p7376_p5 = scmp.ne.s32.totalorder %s7375_s10, 0 }
 0xecf   : > { %s4492_s16 = scalar_lea.sflag [#allocation5], %s4491_s0 }
 0xed0   : > { %p5388_p6 = pnand %p5395_p3, %p7376_p5 }
 0xed2   : > { %5598 = dma.done.wait (!%p5388_p6), %s4492_s16, 256  }
 0xed3   : > { %5600 = vsyncadd (!%p5388_p6), %s4492_s16, 4294967040  ;;  %s4501_s14 = scalar_lea.sflag [#allocation8], %s4491_s0 }
 0xed4   : > { %5602 = dma.done.wait (!%p5388_p6), %s4501_s14, 16  }
 0xed5   : > { %5604 = vsyncadd (!%p5388_p6), %s4501_s14, 4294967280  ;;  %s34_s20 = sadd.s32 1, %s5635_s20   ;;  %s7377_s16 = sld [smem:[#allocation14_spill]] }
 0xed6   : > { %p31_p7 = scmp.ge.s32.totalorder %s34_s20, 8   ;;  %s7378_s18 = sld [smem:[#allocation15_spill]] }
 0xed7   : > { %s7379_s2 = sld [smem:[#allocation16_spill]]  ;;  %s7380_s29 = smov %s5611_s30 }
 0xed8   : > { %s7381_s30 = smov %s5615_s15  ;;  %s7382_s15 = smov %s5808_s12 }
 0xed9   : > { %s7383_s17 = smov %s5631_s19  ;;  %33 = sbr.rel (!%p31_p7) target bundleno = 18 (0x12), region = 172 }
 0xedd   : > { %s7384_s19 = smov %s7379_s2 }
 0xee0   :  { %4505 = vsyncpa [#allocation4], 1 }
 0xee1   :  { %4507 = vsyncpa [#allocation4 + $0x1], 1 }
 0xee2   :  { %4508 = vsyncpa [#allocation5], 1 }
 0xee3   :  { %4510 = vsyncpa [#allocation5 + $0x1], 1 }
 0xee4   :  { %4511 = vsyncpa [#allocation8], 1 }
 0xee5   :  { %4513 = vsyncpa [#allocation8 + $0x1], 1 }

</bundles_post_ra>
